<compile_context>
chip_gen: v7x
topology: tpu7x:2x2x1
jax: 0.10.0
libtpu: 0.0.40
codegen_flags: <defaults>
</compile_context>

<pallas_src>
import jax
import jax.numpy as jnp
from jax import lax
from jax.experimental import pallas as pl
from jax.experimental.pallas import tpu as pltpu


# ----------------------------- Pallas kernel --------------------------------

def make_efm_kernel(H, W, C):
    # NOTE: only Python scalars are closed over (no jnp arrays) — closing over
    # concrete jax arrays makes pallas_call reject the kernel.
    H2 = H // 2
    NEG = -1e30   # -inf stand-in for max-pool boundary fill
    POS = 1e30    # +inf stand-in for min-pool boundary fill

    def erf_approx(z):
        # Abramowitz & Stegun 7.1.26, |err| < 1.5e-7 (matches exact-erf GELU in f32).
        s = jnp.where(z >= 0.0, 1.0, -1.0)
        a = jnp.abs(z)
        t = 1.0 / (1.0 + 0.3275911 * a)
        poly = t * (0.254829592 + t * (-0.284496736 + t * (
            1.421413741 + t * (-1.453152027 + t * 1.061405429))))
        return s * (1.0 - poly * jnp.exp(-a * a))

    def gelu(x):
        return 0.5 * x * (1.0 + erf_approx(x * 0.7071067811865476))

    def softmax_c(x):  # softmax over the channel (last / lane) axis == nn.Softmax2d
        m = jnp.max(x, axis=-1, keepdims=True)
        e = jnp.exp(x - m)
        return e / jnp.sum(e, axis=-1, keepdims=True)     # exact divide (accuracy)

    def kernel(x1_ref, x2_ref, x3_ref, prm_ref, w1t_ref, out_ref):
        # column-index constant used to mask the roll wrap-around
        wi = lax.broadcasted_iota(jnp.int32, (H, W, C), 1)

        def shift_w(x, s, fill):
            # result[:, w, :] = x[:, w+s, :] for valid w+s, else `fill`.
            # pltpu.roll is an XLU sublane rotation (no misaligned slice copies).
            if s == 0:
                return x
            if s > 0:
                return jnp.where(wi < W - s, pltpu.roll(x, W - s, 1), fill)
            k = -s
            return jnp.where(wi >= k, pltpu.roll(x, k, 1), fill)

        def shift_h(x, s, fill):
            # result[h] = x[h+s] with `fill` rows outside; leading-dim shifts are
            # plain tile re-indexing (no relayout).
            if s == 0:
                return x
            pad = jnp.full((abs(s), W, C), fill, jnp.float32)
            if s > 0:
                return jnp.concatenate([x[s:], pad], axis=0)
            return jnp.concatenate([pad, x[:s]], axis=0)

        def edge7(s):
            # 7x7 / stride 1 / pad 3 morphological gradient (dilate - erode):
            # separable symmetric trees (window 3, then offsets +-2) computing the
            # running max AND min in one fused pass.  The two level-1 W rolls are
            # shared between the max and the min trees.
            l1 = pltpu.roll(s, W - 1, 1)          # s[:, w+1]
            r1 = pltpu.roll(s, 1, 1)              # s[:, w-1]
            lv = wi < (W - 1)
            rv = wi >= 1
            mx = jnp.maximum(s, jnp.maximum(jnp.where(lv, l1, NEG),
                                            jnp.where(rv, r1, NEG)))
            mn = jnp.minimum(s, jnp.minimum(jnp.where(lv, l1, POS),
                                            jnp.where(rv, r1, POS)))
            # W level 2 (offsets +-2)
            mx = jnp.maximum(mx, jnp.maximum(shift_w(mx, 2, NEG),
                                             shift_w(mx, -2, NEG)))
            mn = jnp.minimum(mn, jnp.minimum(shift_w(mn, 2, POS),
                                             shift_w(mn, -2, POS)))
            # H level 1 (+-1) and level 2 (+-2): leading-dim shifts, ~free
            mx = jnp.maximum(mx, jnp.maximum(shift_h(mx, 1, NEG),
                                             shift_h(mx, -1, NEG)))
            mn = jnp.minimum(mn, jnp.minimum(shift_h(mn, 1, POS),
                                             shift_h(mn, -1, POS)))
            mx = jnp.maximum(mx, jnp.maximum(shift_h(mx, 2, NEG),
                                             shift_h(mx, -2, NEG)))
            mn = jnp.minimum(mn, jnp.minimum(shift_h(mn, 2, POS),
                                             shift_h(mn, -2, POS)))
            return mx - mn

        prm = prm_ref[...]        # (12, C): 9 depthwise taps, BN scale, BN shift, 1x1 bias
        w1t = w1t_ref[...]        # (2C, C): [w_for_edge(x2) ; w_for_edge(x1)]^T

        # ---------------- x2 path (computed and consumed first) -------------
        # nearest-2x row upsample in-kernel (x2 arrives at half height, already
        # width-upsampled by the wrapper -> 2x less x2 HBM traffic than before).
        # TODO(synk): also fold the width 2x repeat into the kernel (needs a
        # sublane interleave) so x2 is DMA'd at 1/4 size.
        x2h = x2_ref[...]                                               # (H/2, W, C)
        x2u = jnp.broadcast_to(x2h[:, None, :, :], (H2, 2, W, C)).reshape(H, W, C)

        # depthwise 3x3 conv (padding=1, no bias) as 9 shifted FMAs, zero fill;
        # the two W rolls are shared across the three H taps of each column.
        conv = jnp.zeros((H, W, C), jnp.float32)
        for dx in range(3):
            xs = shift_w(x2u, dx - 1, 0.0)
            for dy in range(3):
                tap = prm[3 * dy + dx: 3 * dy + dx + 1, :]              # (1, C)
                conv = conv + tap * shift_h(xs, dy - 1, 0.0)

        # BatchNorm (inference: fused scale/shift) + GELU, softmax, edge
        x2a = gelu(conv * prm[9:10, :] + prm[10:11, :])
        edge2 = edge7(softmax_c(x2a))

        # 1x1 conv (edge2 half) on the MXU; (H,W,C)->(H*W,C) is layout-preserving
        # because W % 8 == 0 (asserted in the wrapper).
        acc = jnp.dot(edge2.reshape(H * W, C), w1t[:C, :],
                      preferred_element_type=jnp.float32)

        # ---------------- x1 path -------------------------------------------
        edge1 = edge7(softmax_c(x1_ref[...]))
        acc = acc + jnp.dot(edge1.reshape(H * W, C), w1t[C:, :],
                            preferred_element_type=jnp.float32)

        # bias + residual
        out_ref[...] = x3_ref[...] + acc + prm[11:12, :]

    return kernel


# ------------------------------- wrapper -------------------------------------

def efm_forward(x1, x2, x3, params):
    """EFM forward.  x1:(N,C,H,W)  x2:(N,C,H/2,W/2)  x3:(N,C,H,W)  -> (N,C,H,W)."""
    N, C, H, W = x1.shape
    assert x2.shape == (N, C, H // 2, W // 2)
    assert x3.shape == (N, C, H, W)
    assert params['dw_w'].shape[:2] == (C, 1), "depthwise path assumes in_dim == out_dim"
    # TODO(synk): general grouped conv (in_dim = g*out_dim, g > 1) not implemented.
    assert W % 8 == 0 and H % 2 == 0, "layout-preserving (H,W,C)->(H*W,C) reshape needs W % 8 == 0"
    eps = 1e-5

    # ---- glue: NCHW -> NHWC (channels on lanes).  x2 is width-upsampled here
    # and height-upsampled inside the kernel.
    to_nhwc = lambda a: jnp.transpose(a, (0, 2, 3, 1)).astype(jnp.float32)
    x1n = to_nhwc(x1)
    x2n = to_nhwc(jnp.repeat(x2, 2, axis=3))               # (N, H/2, W, C)
    x3n = to_nhwc(x3).reshape(N, H * W, C)                 # 2D view for the residual add

    # ---- glue: parameter prep (merged into one (12, C) array) ----
    wdw9 = jnp.transpose(params['dw_w'][:, 0, :, :].reshape(C, 9), (1, 0))   # (9, C)
    scale = params['bn_gamma'] / jnp.sqrt(params['bn_var'] + eps)
    shift = params['bn_beta'] - params['bn_mean'] * scale
    prm = jnp.concatenate([wdw9, scale.reshape(1, C), shift.reshape(1, C),
                           params['b1'].reshape(1, C)], axis=0)              # (12, C)
    w1t = jnp.transpose(params['w1'][:, :, 0, 0])                            # (2C, C)

    # generation-aware VMEM request (v7x only has 64 MiB per TensorCore)
    try:
        vmem_cap = pltpu.get_tpu_info().vmem_capacity_bytes
    except Exception:
        vmem_cap = 64 * 1024 * 1024
    vmem_limit = min(int(vmem_cap * 0.8), 100 * 1024 * 1024)

    # TODO(synk): for large H*W*C add an H-tiled grid axis with a 3-row pooling
    # halo (and 1-row conv halo) so blocks keep fitting in VMEM on v7x.
    # TODO(synk): for tiny C (<< 128) a lane-dense layout (H*W or W*C on lanes)
    # would use the VPU/store bandwidth far better than channels-on-lanes.
    kernel = make_efm_kernel(H, W, C)
    out2d = pl.pallas_call(
        kernel,
        out_shape=jax.ShapeDtypeStruct((N, H * W, C), jnp.float32),
        grid=(N,),
        in_specs=[
            pl.BlockSpec((None, H, W, C), lambda n: (n, 0, 0, 0)),       # x1
            pl.BlockSpec((None, H // 2, W, C), lambda n: (n, 0, 0, 0)),  # x2 (half height)
            pl.BlockSpec((None, H * W, C), lambda n: (n, 0, 0)),         # x3 (flattened)
            pl.BlockSpec((12, C), lambda n: (0, 0)),                     # taps + BN + bias
            pl.BlockSpec((2 * C, C), lambda n: (0, 0)),                  # 1x1 weight^T
        ],
        out_specs=pl.BlockSpec((None, H * W, C), lambda n: (n, 0, 0)),
        compiler_params=pltpu.CompilerParams(
            dimension_semantics=("parallel",),     # N >= 2 keeps both v7x TCs busy
            vmem_limit_bytes=vmem_limit,
        ),
    )(x1n, x2n, x3n, prm, w1t)

    return jnp.transpose(out2d.reshape(N, H, W, C), (0, 3, 1, 2))


# ------------------------- pure-JAX reference (NCHW) --------------------------

def efm_reference(x1, x2, x3, p):
    C = x1.shape[1]
    eps = 1e-5
    x2u = jnp.repeat(jnp.repeat(x2, 2, axis=2), 2, axis=3)
    conv = lax.conv_general_dilated(
        x2u, p['dw_w'], (1, 1), ((1, 1), (1, 1)),
        dimension_numbers=('NCHW', 'OIHW', 'NCHW'),
        feature_group_count=C, precision=lax.Precision.HIGHEST)
    bcast = lambda v: v[None, :, None, None]
    bn = (conv - bcast(p['bn_mean'])) / jnp.sqrt(bcast(p['bn_var']) + eps) \
         * bcast(p['bn_gamma']) + bcast(p['bn_beta'])
    x2a = jax.nn.gelu(bn, approximate=False)

    sm = lambda x: jax.nn.softmax(x, axis=1)
    mp = lambda x: lax.reduce_window(x, -jnp.inf, lax.max, (1, 1, 7, 7), (1, 1, 1, 1),
                                     ((0, 0), (0, 0), (3, 3), (3, 3)))
    x1_edge = mp(sm(x1)) - (-mp(-sm(x1)))
    x2_edge = mp(sm(x2a)) - (-mp(-sm(x2a)))
    cat = jnp.concatenate([x2_edge, x1_edge], axis=1)
    new_edge = jnp.einsum('nkhw,ok->nohw', cat, p['w1'][:, :, 0, 0],
                          precision=lax.Precision.HIGHEST) + bcast(p['b1'])
    return x3 + new_edge


# ---------------------------------- main --------------------------------------

if __name__ == "__main__":
    key = jax.random.PRNGKey(0)
    ks = jax.random.split(key, 10)
    N, C, H, W = 2, 4, 16, 16          # in_dim = out_dim = 4

    x1 = jax.random.normal(ks[0], (N, C, H, W), jnp.float32)
    x2 = jax.random.normal(ks[1], (N, C, H // 2, W // 2), jnp.float32)
    x3 = jax.random.normal(ks[2], (N, C, H, W), jnp.float32)

    params = {
        'dw_w':     0.2 * jax.random.normal(ks[3], (C, 1, 3, 3), jnp.float32),
        'bn_gamma': 1.0 + 0.1 * jax.random.normal(ks[4], (C,), jnp.float32),
        'bn_beta':  0.1 * jax.random.normal(ks[5], (C,), jnp.float32),
        'bn_mean':  0.1 * jax.random.normal(ks[6], (C,), jnp.float32),
        'bn_var':   0.5 + jnp.abs(jax.random.normal(ks[7], (C,), jnp.float32)),
        'w1':       0.2 * jax.random.normal(ks[8], (C, 2 * C, 1, 1), jnp.float32),
        'b1':       0.1 * jax.random.normal(ks[9], (C,), jnp.float32),
    }

    out = efm_forward(x1, x2, x3, params)
    out = jax.block_until_ready(out)

    ref = efm_reference(x1, x2, x3, params)
    err = float(jnp.max(jnp.abs(out - ref)))
    assert err < 2e-3, f"max abs error vs reference: {err}"
    print("KERNEL_OK")
</pallas_src>

<mosaic_0001>
module attributes {stable_mosaic.version = 11 : i64} {
  func.func @kernel(%arg0: i32, %arg1: memref<1x16x16x4xf32, #tpu.memory_space<vmem>>, %arg2: memref<1x8x16x4xf32, #tpu.memory_space<vmem>>, %arg3: memref<1x256x4xf32, #tpu.memory_space<vmem>>, %arg4: memref<12x4xf32, #tpu.memory_space<vmem>>, %arg5: memref<8x4xf32, #tpu.memory_space<vmem>>, %arg6: memref<1x256x4xf32, #tpu.memory_space<vmem>>) attributes {dimension_semantics = [#tpu.dimension_semantics<parallel>], iteration_bounds = array<i64: 2>, scalar_prefetch = 0 : i64, scratch_operands = 0 : i64, tpu.core_type = #tpu.core_type<tc>, window_params = [{transform_indices = @transform_0, window_bounds = array<i64: 1, 16, 16, 4>}, {transform_indices = @transform_1, window_bounds = array<i64: 1, 8, 16, 4>}, {transform_indices = @transform_2, window_bounds = array<i64: 1, 256, 4>}, {pipeline_mode = #tpu.pipeline_mode<synchronous>, transform_indices = @transform_3, window_bounds = array<i64: 12, 4>}, {pipeline_mode = #tpu.pipeline_mode<synchronous>, transform_indices = @transform_4, window_bounds = array<i64: 8, 4>}, {transform_indices = @transform_5, window_bounds = array<i64: 1, 256, 4>}]} {
    %0 = tpu.iota {dimensions = array<i32: 1>} : vector<16x16x4xi32>
    %c0 = arith.constant 0 : index
    %c0_0 = arith.constant 0 : index
    %1 = vector.load %arg4[%c0, %c0_0] : memref<12x4xf32, #tpu.memory_space<vmem>>, vector<12x4xf32>
    %c0_1 = arith.constant 0 : index
    %c0_2 = arith.constant 0 : index
    %2 = vector.load %arg5[%c0_1, %c0_2] : memref<8x4xf32, #tpu.memory_space<vmem>>, vector<8x4xf32>
    %c0_3 = arith.constant 0 : index
    %c0_4 = arith.constant 0 : index
    %c0_5 = arith.constant 0 : index
    %c0_6 = arith.constant 0 : index
    %3 = vector.load %arg2[%c0_3, %c0_4, %c0_5, %c0_6] : memref<1x8x16x4xf32, #tpu.memory_space<vmem>>, vector<1x8x16x4xf32>
    %4 = vector.shape_cast %3 : vector<1x8x16x4xf32> to vector<8x16x4xf32>
    %5 = vector.shape_cast %4 : vector<8x16x4xf32> to vector<8x1x16x4xf32>
    %6 = vector.shape_cast %5 : vector<8x1x16x4xf32> to vector<8x1x16x4xf32>
    %7 = vector.broadcast %6 : vector<8x1x16x4xf32> to vector<8x2x16x4xf32>
    %8 = vector.shape_cast %7 : vector<8x2x16x4xf32> to vector<16x16x4xf32>
    %cst = arith.constant 0.000000e+00 : f32
    %9 = vector.broadcast %cst : f32 to vector<16x16x4xf32>
    %c1_i32 = arith.constant 1 : i32
    %10 = vector.broadcast %c1_i32 : i32 to vector<16x16x4xi32>
    %11 = arith.cmpi sge, %0, %10 : vector<16x16x4xi32>
    %c1_i32_7 = arith.constant 1 : i32
    %12 = tpu.dynamic_rotate %8 by %c1_i32_7 dim 1 : vector<16x16x4xf32>, i32 -> vector<16x16x4xf32>
    %cst_8 = arith.constant 0.000000e+00 : f32
    %13 = vector.broadcast %cst_8 : f32 to vector<16x16x4xf32>
    %14 = arith.select %11, %12, %13 : vector<16x16x4xi1>, vector<16x16x4xf32>
    %15 = vector.extract_strided_slice %1 {offsets = [0, 0], sizes = [1, 4], strides = [1, 1]} : vector<12x4xf32> to vector<1x4xf32>
    %cst_9 = arith.constant 0.000000e+00 : f32
    %16 = vector.broadcast %cst_9 : f32 to vector<1x16x4xf32>
    %17 = vector.extract_strided_slice %14 {offsets = [0, 0, 0], sizes = [15, 16, 4], strides = [1, 1, 1]} : vector<16x16x4xf32> to vector<15x16x4xf32>
    %18 = tpu.concatenate %16, %17 in 0 : vector<1x16x4xf32>, vector<15x16x4xf32> -> vector<16x16x4xf32>
    %19 = vector.shape_cast %15 : vector<1x4xf32> to vector<1x1x4xf32>
    %20 = vector.broadcast %19 : vector<1x1x4xf32> to vector<16x16x4xf32>
    %21 = arith.mulf %20, %18 : vector<16x16x4xf32>
    %22 = arith.addf %9, %21 : vector<16x16x4xf32>
    %23 = vector.extract_strided_slice %1 {offsets = [3, 0], sizes = [1, 4], strides = [1, 1]} : vector<12x4xf32> to vector<1x4xf32>
    %24 = vector.shape_cast %23 : vector<1x4xf32> to vector<1x1x4xf32>
    %25 = vector.broadcast %24 : vector<1x1x4xf32> to vector<16x16x4xf32>
    %26 = arith.mulf %25, %14 : vector<16x16x4xf32>
    %27 = arith.addf %22, %26 : vector<16x16x4xf32>
    %28 = vector.extract_strided_slice %1 {offsets = [6, 0], sizes = [1, 4], strides = [1, 1]} : vector<12x4xf32> to vector<1x4xf32>
    %cst_10 = arith.constant 0.000000e+00 : f32
    %29 = vector.broadcast %cst_10 : f32 to vector<1x16x4xf32>
    %30 = vector.extract_strided_slice %14 {offsets = [1, 0, 0], sizes = [15, 16, 4], strides = [1, 1, 1]} : vector<16x16x4xf32> to vector<15x16x4xf32>
    %31 = tpu.concatenate %30, %29 in 0 : vector<15x16x4xf32>, vector<1x16x4xf32> -> vector<16x16x4xf32>
    %32 = vector.shape_cast %28 : vector<1x4xf32> to vector<1x1x4xf32>
    %33 = vector.broadcast %32 : vector<1x1x4xf32> to vector<16x16x4xf32>
    %34 = arith.mulf %33, %31 : vector<16x16x4xf32>
    %35 = arith.addf %27, %34 : vector<16x16x4xf32>
    %36 = vector.extract_strided_slice %1 {offsets = [1, 0], sizes = [1, 4], strides = [1, 1]} : vector<12x4xf32> to vector<1x4xf32>
    %cst_11 = arith.constant 0.000000e+00 : f32
    %37 = vector.broadcast %cst_11 : f32 to vector<1x16x4xf32>
    %38 = vector.extract_strided_slice %8 {offsets = [0, 0, 0], sizes = [15, 16, 4], strides = [1, 1, 1]} : vector<16x16x4xf32> to vector<15x16x4xf32>
    %39 = tpu.concatenate %37, %38 in 0 : vector<1x16x4xf32>, vector<15x16x4xf32> -> vector<16x16x4xf32>
    %40 = vector.shape_cast %36 : vector<1x4xf32> to vector<1x1x4xf32>
    %41 = vector.broadcast %40 : vector<1x1x4xf32> to vector<16x16x4xf32>
    %42 = arith.mulf %41, %39 : vector<16x16x4xf32>
    %43 = arith.addf %35, %42 : vector<16x16x4xf32>
    %44 = vector.extract_strided_slice %1 {offsets = [4, 0], sizes = [1, 4], strides = [1, 1]} : vector<12x4xf32> to vector<1x4xf32>
    %45 = vector.shape_cast %44 : vector<1x4xf32> to vector<1x1x4xf32>
    %46 = vector.broadcast %45 : vector<1x1x4xf32> to vector<16x16x4xf32>
    %47 = arith.mulf %46, %8 : vector<16x16x4xf32>
    %48 = arith.addf %43, %47 : vector<16x16x4xf32>
    %49 = vector.extract_strided_slice %1 {offsets = [7, 0], sizes = [1, 4], strides = [1, 1]} : vector<12x4xf32> to vector<1x4xf32>
    %cst_12 = arith.constant 0.000000e+00 : f32
    %50 = vector.broadcast %cst_12 : f32 to vector<1x16x4xf32>
    %51 = vector.extract_strided_slice %8 {offsets = [1, 0, 0], sizes = [15, 16, 4], strides = [1, 1, 1]} : vector<16x16x4xf32> to vector<15x16x4xf32>
    %52 = tpu.concatenate %51, %50 in 0 : vector<15x16x4xf32>, vector<1x16x4xf32> -> vector<16x16x4xf32>
    %53 = vector.shape_cast %49 : vector<1x4xf32> to vector<1x1x4xf32>
    %54 = vector.broadcast %53 : vector<1x1x4xf32> to vector<16x16x4xf32>
    %55 = arith.mulf %54, %52 : vector<16x16x4xf32>
    %56 = arith.addf %48, %55 : vector<16x16x4xf32>
    %c15_i32 = arith.constant 15 : i32
    %57 = vector.broadcast %c15_i32 : i32 to vector<16x16x4xi32>
    %58 = arith.cmpi slt, %0, %57 : vector<16x16x4xi32>
    %c15_i32_13 = arith.constant 15 : i32
    %59 = tpu.dynamic_rotate %8 by %c15_i32_13 dim 1 : vector<16x16x4xf32>, i32 -> vector<16x16x4xf32>
    %cst_14 = arith.constant 0.000000e+00 : f32
    %60 = vector.broadcast %cst_14 : f32 to vector<16x16x4xf32>
    %61 = arith.select %58, %59, %60 : vector<16x16x4xi1>, vector<16x16x4xf32>
    %62 = vector.extract_strided_slice %1 {offsets = [2, 0], sizes = [1, 4], strides = [1, 1]} : vector<12x4xf32> to vector<1x4xf32>
    %cst_15 = arith.constant 0.000000e+00 : f32
    %63 = vector.broadcast %cst_15 : f32 to vector<1x16x4xf32>
    %64 = vector.extract_strided_slice %61 {offsets = [0, 0, 0], sizes = [15, 16, 4], strides = [1, 1, 1]} : vector<16x16x4xf32> to vector<15x16x4xf32>
    %65 = tpu.concatenate %63, %64 in 0 : vector<1x16x4xf32>, vector<15x16x4xf32> -> vector<16x16x4xf32>
    %66 = vector.shape_cast %62 : vector<1x4xf32> to vector<1x1x4xf32>
    %67 = vector.broadcast %66 : vector<1x1x4xf32> to vector<16x16x4xf32>
    %68 = arith.mulf %67, %65 : vector<16x16x4xf32>
    %69 = arith.addf %56, %68 : vector<16x16x4xf32>
    %70 = vector.extract_strided_slice %1 {offsets = [5, 0], sizes = [1, 4], strides = [1, 1]} : vector<12x4xf32> to vector<1x4xf32>
    %71 = vector.shape_cast %70 : vector<1x4xf32> to vector<1x1x4xf32>
    %72 = vector.broadcast %71 : vector<1x1x4xf32> to vector<16x16x4xf32>
    %73 = arith.mulf %72, %61 : vector<16x16x4xf32>
    %74 = arith.addf %69, %73 : vector<16x16x4xf32>
    %75 = vector.extract_strided_slice %1 {offsets = [8, 0], sizes = [1, 4], strides = [1, 1]} : vector<12x4xf32> to vector<1x4xf32>
    %cst_16 = arith.constant 0.000000e+00 : f32
    %76 = vector.broadcast %cst_16 : f32 to vector<1x16x4xf32>
    %77 = vector.extract_strided_slice %61 {offsets = [1, 0, 0], sizes = [15, 16, 4], strides = [1, 1, 1]} : vector<16x16x4xf32> to vector<15x16x4xf32>
    %78 = tpu.concatenate %77, %76 in 0 : vector<15x16x4xf32>, vector<1x16x4xf32> -> vector<16x16x4xf32>
    %79 = vector.shape_cast %75 : vector<1x4xf32> to vector<1x1x4xf32>
    %80 = vector.broadcast %79 : vector<1x1x4xf32> to vector<16x16x4xf32>
    %81 = arith.mulf %80, %78 : vector<16x16x4xf32>
    %82 = arith.addf %74, %81 : vector<16x16x4xf32>
    %83 = vector.extract_strided_slice %1 {offsets = [9, 0], sizes = [1, 4], strides = [1, 1]} : vector<12x4xf32> to vector<1x4xf32>
    %84 = vector.shape_cast %83 : vector<1x4xf32> to vector<1x1x4xf32>
    %85 = vector.broadcast %84 : vector<1x1x4xf32> to vector<16x16x4xf32>
    %86 = arith.mulf %82, %85 : vector<16x16x4xf32>
    %87 = vector.extract_strided_slice %1 {offsets = [10, 0], sizes = [1, 4], strides = [1, 1]} : vector<12x4xf32> to vector<1x4xf32>
    %88 = vector.shape_cast %87 : vector<1x4xf32> to vector<1x1x4xf32>
    %89 = vector.broadcast %88 : vector<1x1x4xf32> to vector<16x16x4xf32>
    %90 = arith.addf %86, %89 : vector<16x16x4xf32>
    %cst_17 = arith.constant 5.000000e-01 : f32
    %91 = vector.broadcast %cst_17 : f32 to vector<16x16x4xf32>
    %92 = arith.mulf %91, %90 : vector<16x16x4xf32>
    %cst_18 = arith.constant 0.707106769 : f32
    %93 = vector.broadcast %cst_18 : f32 to vector<16x16x4xf32>
    %94 = arith.mulf %90, %93 : vector<16x16x4xf32>
    %cst_19 = arith.constant 0.000000e+00 : f32
    %95 = vector.broadcast %cst_19 : f32 to vector<16x16x4xf32>
    %96 = arith.cmpf oge, %94, %95 : vector<16x16x4xf32>
    %cst_20 = arith.constant 1.000000e+00 : f32
    %cst_21 = arith.constant -1.000000e+00 : f32
    %97 = vector.broadcast %cst_20 : f32 to vector<16x16x4xf32>
    %98 = vector.broadcast %cst_21 : f32 to vector<16x16x4xf32>
    %99 = arith.select %96, %97, %98 : vector<16x16x4xi1>, vector<16x16x4xf32>
    %100 = math.absf %94 : vector<16x16x4xf32>
    %cst_22 = arith.constant 0.327591091 : f32
    %101 = vector.broadcast %cst_22 : f32 to vector<16x16x4xf32>
    %102 = arith.mulf %101, %100 : vector<16x16x4xf32>
    %cst_23 = arith.constant 1.000000e+00 : f32
    %103 = vector.broadcast %cst_23 : f32 to vector<16x16x4xf32>
    %104 = arith.addf %103, %102 : vector<16x16x4xf32>
    %cst_24 = arith.constant 1.000000e+00 : f32
    %105 = vector.broadcast %cst_24 : f32 to vector<16x16x4xf32>
    %106 = arith.divf %105, %104 : vector<16x16x4xf32>
    %cst_25 = arith.constant 1.06140542 : f32
    %107 = vector.broadcast %cst_25 : f32 to vector<16x16x4xf32>
    %108 = arith.mulf %106, %107 : vector<16x16x4xf32>
    %cst_26 = arith.constant -1.45315206 : f32
    %109 = vector.broadcast %cst_26 : f32 to vector<16x16x4xf32>
    %110 = arith.addf %109, %108 : vector<16x16x4xf32>
    %111 = arith.mulf %106, %110 : vector<16x16x4xf32>
    %cst_27 = arith.constant 1.42141378 : f32
    %112 = vector.broadcast %cst_27 : f32 to vector<16x16x4xf32>
    %113 = arith.addf %112, %111 : vector<16x16x4xf32>
    %114 = arith.mulf %106, %113 : vector<16x16x4xf32>
    %cst_28 = arith.constant -0.284496725 : f32
    %115 = vector.broadcast %cst_28 : f32 to vector<16x16x4xf32>
    %116 = arith.addf %115, %114 : vector<16x16x4xf32>
    %117 = arith.mulf %106, %116 : vector<16x16x4xf32>
    %cst_29 = arith.constant 0.254829586 : f32
    %118 = vector.broadcast %cst_29 : f32 to vector<16x16x4xf32>
    %119 = arith.addf %118, %117 : vector<16x16x4xf32>
    %120 = arith.mulf %106, %119 : vector<16x16x4xf32>
    %cst_30 = arith.constant 0.000000e+00 : f32
    %121 = vector.broadcast %cst_30 : f32 to vector<16x16x4xf32>
    %122 = arith.subf %121, %100 : vector<16x16x4xf32>
    %123 = arith.mulf %122, %100 : vector<16x16x4xf32>
    %124 = math.exp %123 : vector<16x16x4xf32>
    %125 = arith.mulf %120, %124 : vector<16x16x4xf32>
    %cst_31 = arith.constant 1.000000e+00 : f32
    %126 = vector.broadcast %cst_31 : f32 to vector<16x16x4xf32>
    %127 = arith.subf %126, %125 : vector<16x16x4xf32>
    %128 = arith.mulf %99, %127 : vector<16x16x4xf32>
    %cst_32 = arith.constant 1.000000e+00 : f32
    %129 = vector.broadcast %cst_32 : f32 to vector<16x16x4xf32>
    %130 = arith.addf %129, %128 : vector<16x16x4xf32>
    %131 = arith.mulf %92, %130 : vector<16x16x4xf32>
    %cst_33 = arith.constant dense<0xFF800000> : vector<16x16xf32>
    %132 = vector.multi_reduction <maximumf>, %131, %cst_33 [2] : vector<16x16x4xf32> to vector<16x16xf32>
    %133 = vector.shape_cast %132 : vector<16x16xf32> to vector<16x16x1xf32>
    %134 = vector.broadcast %133 : vector<16x16x1xf32> to vector<16x16x4xf32>
    %135 = arith.subf %131, %134 : vector<16x16x4xf32>
    %136 = math.exp %135 : vector<16x16x4xf32>
    %cst_34 = arith.constant dense<0.000000e+00> : vector<16x16xf32>
    %137 = vector.multi_reduction <add>, %136, %cst_34 [2] : vector<16x16x4xf32> to vector<16x16xf32>
    %138 = vector.shape_cast %137 : vector<16x16xf32> to vector<16x16x1xf32>
    %139 = vector.broadcast %138 : vector<16x16x1xf32> to vector<16x16x4xf32>
    %140 = arith.divf %136, %139 : vector<16x16x4xf32>
    %c15_i32_35 = arith.constant 15 : i32
    %141 = tpu.dynamic_rotate %140 by %c15_i32_35 dim 1 : vector<16x16x4xf32>, i32 -> vector<16x16x4xf32>
    %c1_i32_36 = arith.constant 1 : i32
    %142 = tpu.dynamic_rotate %140 by %c1_i32_36 dim 1 : vector<16x16x4xf32>, i32 -> vector<16x16x4xf32>
    %c15_i32_37 = arith.constant 15 : i32
    %143 = vector.broadcast %c15_i32_37 : i32 to vector<16x16x4xi32>
    %144 = arith.cmpi slt, %0, %143 : vector<16x16x4xi32>
    %c1_i32_38 = arith.constant 1 : i32
    %145 = vector.broadcast %c1_i32_38 : i32 to vector<16x16x4xi32>
    %146 = arith.cmpi sge, %0, %145 : vector<16x16x4xi32>
    %cst_39 = arith.constant -1.000000e+30 : f32
    %147 = vector.broadcast %cst_39 : f32 to vector<16x16x4xf32>
    %148 = arith.select %144, %141, %147 : vector<16x16x4xi1>, vector<16x16x4xf32>
    %cst_40 = arith.constant -1.000000e+30 : f32
    %149 = vector.broadcast %cst_40 : f32 to vector<16x16x4xf32>
    %150 = arith.select %146, %142, %149 : vector<16x16x4xi1>, vector<16x16x4xf32>
    %151 = arith.maximumf %148, %150 : vector<16x16x4xf32>
    %152 = arith.maximumf %140, %151 : vector<16x16x4xf32>
    %cst_41 = arith.constant 1.000000e+30 : f32
    %153 = vector.broadcast %cst_41 : f32 to vector<16x16x4xf32>
    %154 = arith.select %144, %141, %153 : vector<16x16x4xi1>, vector<16x16x4xf32>
    %cst_42 = arith.constant 1.000000e+30 : f32
    %155 = vector.broadcast %cst_42 : f32 to vector<16x16x4xf32>
    %156 = arith.select %146, %142, %155 : vector<16x16x4xi1>, vector<16x16x4xf32>
    %157 = arith.minimumf %154, %156 : vector<16x16x4xf32>
    %158 = arith.minimumf %140, %157 : vector<16x16x4xf32>
    %c14_i32 = arith.constant 14 : i32
    %159 = vector.broadcast %c14_i32 : i32 to vector<16x16x4xi32>
    %160 = arith.cmpi slt, %0, %159 : vector<16x16x4xi32>
    %c14_i32_43 = arith.constant 14 : i32
    %161 = tpu.dynamic_rotate %152 by %c14_i32_43 dim 1 : vector<16x16x4xf32>, i32 -> vector<16x16x4xf32>
    %cst_44 = arith.constant -1.000000e+30 : f32
    %162 = vector.broadcast %cst_44 : f32 to vector<16x16x4xf32>
    %163 = arith.select %160, %161, %162 : vector<16x16x4xi1>, vector<16x16x4xf32>
    %c2_i32 = arith.constant 2 : i32
    %164 = vector.broadcast %c2_i32 : i32 to vector<16x16x4xi32>
    %165 = arith.cmpi sge, %0, %164 : vector<16x16x4xi32>
    %c2_i32_45 = arith.constant 2 : i32
    %166 = tpu.dynamic_rotate %152 by %c2_i32_45 dim 1 : vector<16x16x4xf32>, i32 -> vector<16x16x4xf32>
    %cst_46 = arith.constant -1.000000e+30 : f32
    %167 = vector.broadcast %cst_46 : f32 to vector<16x16x4xf32>
    %168 = arith.select %165, %166, %167 : vector<16x16x4xi1>, vector<16x16x4xf32>
    %169 = arith.maximumf %163, %168 : vector<16x16x4xf32>
    %170 = arith.maximumf %152, %169 : vector<16x16x4xf32>
    %c14_i32_47 = arith.constant 14 : i32
    %171 = vector.broadcast %c14_i32_47 : i32 to vector<16x16x4xi32>
    %172 = arith.cmpi slt, %0, %171 : vector<16x16x4xi32>
    %c14_i32_48 = arith.constant 14 : i32
    %173 = tpu.dynamic_rotate %158 by %c14_i32_48 dim 1 : vector<16x16x4xf32>, i32 -> vector<16x16x4xf32>
    %cst_49 = arith.constant 1.000000e+30 : f32
    %174 = vector.broadcast %cst_49 : f32 to vector<16x16x4xf32>
    %175 = arith.select %172, %173, %174 : vector<16x16x4xi1>, vector<16x16x4xf32>
    %c2_i32_50 = arith.constant 2 : i32
    %176 = vector.broadcast %c2_i32_50 : i32 to vector<16x16x4xi32>
    %177 = arith.cmpi sge, %0, %176 : vector<16x16x4xi32>
    %c2_i32_51 = arith.constant 2 : i32
    %178 = tpu.dynamic_rotate %158 by %c2_i32_51 dim 1 : vector<16x16x4xf32>, i32 -> vector<16x16x4xf32>
    %cst_52 = arith.constant 1.000000e+30 : f32
    %179 = vector.broadcast %cst_52 : f32 to vector<16x16x4xf32>
    %180 = arith.select %177, %178, %179 : vector<16x16x4xi1>, vector<16x16x4xf32>
    %181 = arith.minimumf %175, %180 : vector<16x16x4xf32>
    %182 = arith.minimumf %158, %181 : vector<16x16x4xf32>
    %cst_53 = arith.constant -1.000000e+30 : f32
    %183 = vector.broadcast %cst_53 : f32 to vector<1x16x4xf32>
    %184 = vector.extract_strided_slice %170 {offsets = [1, 0, 0], sizes = [15, 16, 4], strides = [1, 1, 1]} : vector<16x16x4xf32> to vector<15x16x4xf32>
    %185 = tpu.concatenate %184, %183 in 0 : vector<15x16x4xf32>, vector<1x16x4xf32> -> vector<16x16x4xf32>
    %cst_54 = arith.constant -1.000000e+30 : f32
    %186 = vector.broadcast %cst_54 : f32 to vector<1x16x4xf32>
    %187 = vector.extract_strided_slice %170 {offsets = [0, 0, 0], sizes = [15, 16, 4], strides = [1, 1, 1]} : vector<16x16x4xf32> to vector<15x16x4xf32>
    %188 = tpu.concatenate %186, %187 in 0 : vector<1x16x4xf32>, vector<15x16x4xf32> -> vector<16x16x4xf32>
    %189 = arith.maximumf %185, %188 : vector<16x16x4xf32>
    %190 = arith.maximumf %170, %189 : vector<16x16x4xf32>
    %cst_55 = arith.constant 1.000000e+30 : f32
    %191 = vector.broadcast %cst_55 : f32 to vector<1x16x4xf32>
    %192 = vector.extract_strided_slice %182 {offsets = [1, 0, 0], sizes = [15, 16, 4], strides = [1, 1, 1]} : vector<16x16x4xf32> to vector<15x16x4xf32>
    %193 = tpu.concatenate %192, %191 in 0 : vector<15x16x4xf32>, vector<1x16x4xf32> -> vector<16x16x4xf32>
    %cst_56 = arith.constant 1.000000e+30 : f32
    %194 = vector.broadcast %cst_56 : f32 to vector<1x16x4xf32>
    %195 = vector.extract_strided_slice %182 {offsets = [0, 0, 0], sizes = [15, 16, 4], strides = [1, 1, 1]} : vector<16x16x4xf32> to vector<15x16x4xf32>
    %196 = tpu.concatenate %194, %195 in 0 : vector<1x16x4xf32>, vector<15x16x4xf32> -> vector<16x16x4xf32>
    %197 = arith.minimumf %193, %196 : vector<16x16x4xf32>
    %198 = arith.minimumf %182, %197 : vector<16x16x4xf32>
    %cst_57 = arith.constant -1.000000e+30 : f32
    %199 = vector.broadcast %cst_57 : f32 to vector<2x16x4xf32>
    %200 = vector.extract_strided_slice %190 {offsets = [2, 0, 0], sizes = [14, 16, 4], strides = [1, 1, 1]} : vector<16x16x4xf32> to vector<14x16x4xf32>
    %201 = tpu.concatenate %200, %199 in 0 : vector<14x16x4xf32>, vector<2x16x4xf32> -> vector<16x16x4xf32>
    %cst_58 = arith.constant -1.000000e+30 : f32
    %202 = vector.broadcast %cst_58 : f32 to vector<2x16x4xf32>
    %203 = vector.extract_strided_slice %190 {offsets = [0, 0, 0], sizes = [14, 16, 4], strides = [1, 1, 1]} : vector<16x16x4xf32> to vector<14x16x4xf32>
    %204 = tpu.concatenate %202, %203 in 0 : vector<2x16x4xf32>, vector<14x16x4xf32> -> vector<16x16x4xf32>
    %205 = arith.maximumf %201, %204 : vector<16x16x4xf32>
    %206 = arith.maximumf %190, %205 : vector<16x16x4xf32>
    %cst_59 = arith.constant 1.000000e+30 : f32
    %207 = vector.broadcast %cst_59 : f32 to vector<2x16x4xf32>
    %208 = vector.extract_strided_slice %198 {offsets = [2, 0, 0], sizes = [14, 16, 4], strides = [1, 1, 1]} : vector<16x16x4xf32> to vector<14x16x4xf32>
    %209 = tpu.concatenate %208, %207 in 0 : vector<14x16x4xf32>, vector<2x16x4xf32> -> vector<16x16x4xf32>
    %cst_60 = arith.constant 1.000000e+30 : f32
    %210 = vector.broadcast %cst_60 : f32 to vector<2x16x4xf32>
    %211 = vector.extract_strided_slice %198 {offsets = [0, 0, 0], sizes = [14, 16, 4], strides = [1, 1, 1]} : vector<16x16x4xf32> to vector<14x16x4xf32>
    %212 = tpu.concatenate %210, %211 in 0 : vector<2x16x4xf32>, vector<14x16x4xf32> -> vector<16x16x4xf32>
    %213 = arith.minimumf %209, %212 : vector<16x16x4xf32>
    %214 = arith.minimumf %198, %213 : vector<16x16x4xf32>
    %215 = arith.subf %206, %214 : vector<16x16x4xf32>
    %216 = vector.shape_cast %215 : vector<16x16x4xf32> to vector<256x4xf32>
    %217 = vector.extract_strided_slice %2 {offsets = [0, 0], sizes = [4, 4], strides = [1, 1]} : vector<8x4xf32> to vector<4x4xf32>
    %cst_61 = arith.constant dense<0.000000e+00> : vector<256x4xf32>
    %218 = tpu.matmul %216, %217, %cst_61 {dimension_numbers = #tpu.dot_dimension_numbers<[1], [0], [0], [1], [0, 0, 1, 1], [], []>} : vector<256x4xf32>, vector<4x4xf32>, vector<256x4xf32> -> vector<256x4xf32>
    %c0_62 = arith.constant 0 : index
    %c0_63 = arith.constant 0 : index
    %c0_64 = arith.constant 0 : index
    %c0_65 = arith.constant 0 : index
    %219 = vector.load %arg1[%c0_62, %c0_63, %c0_64, %c0_65] : memref<1x16x16x4xf32, #tpu.memory_space<vmem>>, vector<1x16x16x4xf32>
    %220 = vector.shape_cast %219 : vector<1x16x16x4xf32> to vector<16x16x4xf32>
    %cst_66 = arith.constant dense<0xFF800000> : vector<16x16xf32>
    %221 = vector.multi_reduction <maximumf>, %220, %cst_66 [2] : vector<16x16x4xf32> to vector<16x16xf32>
    %222 = vector.shape_cast %221 : vector<16x16xf32> to vector<16x16x1xf32>
    %223 = vector.broadcast %222 : vector<16x16x1xf32> to vector<16x16x4xf32>
    %224 = arith.subf %220, %223 : vector<16x16x4xf32>
    %225 = math.exp %224 : vector<16x16x4xf32>
    %cst_67 = arith.constant dense<0.000000e+00> : vector<16x16xf32>
    %226 = vector.multi_reduction <add>, %225, %cst_67 [2] : vector<16x16x4xf32> to vector<16x16xf32>
    %227 = vector.shape_cast %226 : vector<16x16xf32> to vector<16x16x1xf32>
    %228 = vector.broadcast %227 : vector<16x16x1xf32> to vector<16x16x4xf32>
    %229 = arith.divf %225, %228 : vector<16x16x4xf32>
    %c15_i32_68 = arith.constant 15 : i32
    %230 = tpu.dynamic_rotate %229 by %c15_i32_68 dim 1 : vector<16x16x4xf32>, i32 -> vector<16x16x4xf32>
    %c1_i32_69 = arith.constant 1 : i32
    %231 = tpu.dynamic_rotate %229 by %c1_i32_69 dim 1 : vector<16x16x4xf32>, i32 -> vector<16x16x4xf32>
    %c15_i32_70 = arith.constant 15 : i32
    %232 = vector.broadcast %c15_i32_70 : i32 to vector<16x16x4xi32>
    %233 = arith.cmpi slt, %0, %232 : vector<16x16x4xi32>
    %c1_i32_71 = arith.constant 1 : i32
    %234 = vector.broadcast %c1_i32_71 : i32 to vector<16x16x4xi32>
    %235 = arith.cmpi sge, %0, %234 : vector<16x16x4xi32>
    %cst_72 = arith.constant -1.000000e+30 : f32
    %236 = vector.broadcast %cst_72 : f32 to vector<16x16x4xf32>
    %237 = arith.select %233, %230, %236 : vector<16x16x4xi1>, vector<16x16x4xf32>
    %cst_73 = arith.constant -1.000000e+30 : f32
    %238 = vector.broadcast %cst_73 : f32 to vector<16x16x4xf32>
    %239 = arith.select %235, %231, %238 : vector<16x16x4xi1>, vector<16x16x4xf32>
    %240 = arith.maximumf %237, %239 : vector<16x16x4xf32>
    %241 = arith.maximumf %229, %240 : vector<16x16x4xf32>
    %cst_74 = arith.constant 1.000000e+30 : f32
    %242 = vector.broadcast %cst_74 : f32 to vector<16x16x4xf32>
    %243 = arith.select %233, %230, %242 : vector<16x16x4xi1>, vector<16x16x4xf32>
    %cst_75 = arith.constant 1.000000e+30 : f32
    %244 = vector.broadcast %cst_75 : f32 to vector<16x16x4xf32>
    %245 = arith.select %235, %231, %244 : vector<16x16x4xi1>, vector<16x16x4xf32>
    %246 = arith.minimumf %243, %245 : vector<16x16x4xf32>
    %247 = arith.minimumf %229, %246 : vector<16x16x4xf32>
    %c14_i32_76 = arith.constant 14 : i32
    %248 = vector.broadcast %c14_i32_76 : i32 to vector<16x16x4xi32>
    %249 = arith.cmpi slt, %0, %248 : vector<16x16x4xi32>
    %c14_i32_77 = arith.constant 14 : i32
    %250 = tpu.dynamic_rotate %241 by %c14_i32_77 dim 1 : vector<16x16x4xf32>, i32 -> vector<16x16x4xf32>
    %cst_78 = arith.constant -1.000000e+30 : f32
    %251 = vector.broadcast %cst_78 : f32 to vector<16x16x4xf32>
    %252 = arith.select %249, %250, %251 : vector<16x16x4xi1>, vector<16x16x4xf32>
    %c2_i32_79 = arith.constant 2 : i32
    %253 = vector.broadcast %c2_i32_79 : i32 to vector<16x16x4xi32>
    %254 = arith.cmpi sge, %0, %253 : vector<16x16x4xi32>
    %c2_i32_80 = arith.constant 2 : i32
    %255 = tpu.dynamic_rotate %241 by %c2_i32_80 dim 1 : vector<16x16x4xf32>, i32 -> vector<16x16x4xf32>
    %cst_81 = arith.constant -1.000000e+30 : f32
    %256 = vector.broadcast %cst_81 : f32 to vector<16x16x4xf32>
    %257 = arith.select %254, %255, %256 : vector<16x16x4xi1>, vector<16x16x4xf32>
    %258 = arith.maximumf %252, %257 : vector<16x16x4xf32>
    %259 = arith.maximumf %241, %258 : vector<16x16x4xf32>
    %c14_i32_82 = arith.constant 14 : i32
    %260 = vector.broadcast %c14_i32_82 : i32 to vector<16x16x4xi32>
    %261 = arith.cmpi slt, %0, %260 : vector<16x16x4xi32>
    %c14_i32_83 = arith.constant 14 : i32
    %262 = tpu.dynamic_rotate %247 by %c14_i32_83 dim 1 : vector<16x16x4xf32>, i32 -> vector<16x16x4xf32>
    %cst_84 = arith.constant 1.000000e+30 : f32
    %263 = vector.broadcast %cst_84 : f32 to vector<16x16x4xf32>
    %264 = arith.select %261, %262, %263 : vector<16x16x4xi1>, vector<16x16x4xf32>
    %c2_i32_85 = arith.constant 2 : i32
    %265 = vector.broadcast %c2_i32_85 : i32 to vector<16x16x4xi32>
    %266 = arith.cmpi sge, %0, %265 : vector<16x16x4xi32>
    %c2_i32_86 = arith.constant 2 : i32
    %267 = tpu.dynamic_rotate %247 by %c2_i32_86 dim 1 : vector<16x16x4xf32>, i32 -> vector<16x16x4xf32>
    %cst_87 = arith.constant 1.000000e+30 : f32
    %268 = vector.broadcast %cst_87 : f32 to vector<16x16x4xf32>
    %269 = arith.select %266, %267, %268 : vector<16x16x4xi1>, vector<16x16x4xf32>
    %270 = arith.minimumf %264, %269 : vector<16x16x4xf32>
    %271 = arith.minimumf %247, %270 : vector<16x16x4xf32>
    %cst_88 = arith.constant -1.000000e+30 : f32
    %272 = vector.broadcast %cst_88 : f32 to vector<1x16x4xf32>
    %273 = vector.extract_strided_slice %259 {offsets = [1, 0, 0], sizes = [15, 16, 4], strides = [1, 1, 1]} : vector<16x16x4xf32> to vector<15x16x4xf32>
    %274 = tpu.concatenate %273, %272 in 0 : vector<15x16x4xf32>, vector<1x16x4xf32> -> vector<16x16x4xf32>
    %cst_89 = arith.constant -1.000000e+30 : f32
    %275 = vector.broadcast %cst_89 : f32 to vector<1x16x4xf32>
    %276 = vector.extract_strided_slice %259 {offsets = [0, 0, 0], sizes = [15, 16, 4], strides = [1, 1, 1]} : vector<16x16x4xf32> to vector<15x16x4xf32>
    %277 = tpu.concatenate %275, %276 in 0 : vector<1x16x4xf32>, vector<15x16x4xf32> -> vector<16x16x4xf32>
    %278 = arith.maximumf %274, %277 : vector<16x16x4xf32>
    %279 = arith.maximumf %259, %278 : vector<16x16x4xf32>
    %cst_90 = arith.constant 1.000000e+30 : f32
    %280 = vector.broadcast %cst_90 : f32 to vector<1x16x4xf32>
    %281 = vector.extract_strided_slice %271 {offsets = [1, 0, 0], sizes = [15, 16, 4], strides = [1, 1, 1]} : vector<16x16x4xf32> to vector<15x16x4xf32>
    %282 = tpu.concatenate %281, %280 in 0 : vector<15x16x4xf32>, vector<1x16x4xf32> -> vector<16x16x4xf32>
    %cst_91 = arith.constant 1.000000e+30 : f32
    %283 = vector.broadcast %cst_91 : f32 to vector<1x16x4xf32>
    %284 = vector.extract_strided_slice %271 {offsets = [0, 0, 0], sizes = [15, 16, 4], strides = [1, 1, 1]} : vector<16x16x4xf32> to vector<15x16x4xf32>
    %285 = tpu.concatenate %283, %284 in 0 : vector<1x16x4xf32>, vector<15x16x4xf32> -> vector<16x16x4xf32>
    %286 = arith.minimumf %282, %285 : vector<16x16x4xf32>
    %287 = arith.minimumf %271, %286 : vector<16x16x4xf32>
    %cst_92 = arith.constant -1.000000e+30 : f32
    %288 = vector.broadcast %cst_92 : f32 to vector<2x16x4xf32>
    %289 = vector.extract_strided_slice %279 {offsets = [2, 0, 0], sizes = [14, 16, 4], strides = [1, 1, 1]} : vector<16x16x4xf32> to vector<14x16x4xf32>
    %290 = tpu.concatenate %289, %288 in 0 : vector<14x16x4xf32>, vector<2x16x4xf32> -> vector<16x16x4xf32>
    %cst_93 = arith.constant -1.000000e+30 : f32
    %291 = vector.broadcast %cst_93 : f32 to vector<2x16x4xf32>
    %292 = vector.extract_strided_slice %279 {offsets = [0, 0, 0], sizes = [14, 16, 4], strides = [1, 1, 1]} : vector<16x16x4xf32> to vector<14x16x4xf32>
    %293 = tpu.concatenate %291, %292 in 0 : vector<2x16x4xf32>, vector<14x16x4xf32> -> vector<16x16x4xf32>
    %294 = arith.maximumf %290, %293 : vector<16x16x4xf32>
    %295 = arith.maximumf %279, %294 : vector<16x16x4xf32>
    %cst_94 = arith.constant 1.000000e+30 : f32
    %296 = vector.broadcast %cst_94 : f32 to vector<2x16x4xf32>
    %297 = vector.extract_strided_slice %287 {offsets = [2, 0, 0], sizes = [14, 16, 4], strides = [1, 1, 1]} : vector<16x16x4xf32> to vector<14x16x4xf32>
    %298 = tpu.concatenate %297, %296 in 0 : vector<14x16x4xf32>, vector<2x16x4xf32> -> vector<16x16x4xf32>
    %cst_95 = arith.constant 1.000000e+30 : f32
    %299 = vector.broadcast %cst_95 : f32 to vector<2x16x4xf32>
    %300 = vector.extract_strided_slice %287 {offsets = [0, 0, 0], sizes = [14, 16, 4], strides = [1, 1, 1]} : vector<16x16x4xf32> to vector<14x16x4xf32>
    %301 = tpu.concatenate %299, %300 in 0 : vector<2x16x4xf32>, vector<14x16x4xf32> -> vector<16x16x4xf32>
    %302 = arith.minimumf %298, %301 : vector<16x16x4xf32>
    %303 = arith.minimumf %287, %302 : vector<16x16x4xf32>
    %304 = arith.subf %295, %303 : vector<16x16x4xf32>
    %305 = vector.shape_cast %304 : vector<16x16x4xf32> to vector<256x4xf32>
    %306 = vector.extract_strided_slice %2 {offsets = [4, 0], sizes = [4, 4], strides = [1, 1]} : vector<8x4xf32> to vector<4x4xf32>
    %cst_96 = arith.constant dense<0.000000e+00> : vector<256x4xf32>
    %307 = tpu.matmul %305, %306, %cst_96 {dimension_numbers = #tpu.dot_dimension_numbers<[1], [0], [0], [1], [0, 0, 1, 1], [], []>} : vector<256x4xf32>, vector<4x4xf32>, vector<256x4xf32> -> vector<256x4xf32>
    %308 = arith.addf %218, %307 : vector<256x4xf32>
    %c0_97 = arith.constant 0 : index
    %c0_98 = arith.constant 0 : index
    %c0_99 = arith.constant 0 : index
    %309 = vector.load %arg3[%c0_97, %c0_98, %c0_99] : memref<1x256x4xf32, #tpu.memory_space<vmem>>, vector<1x256x4xf32>
    %310 = vector.shape_cast %309 : vector<1x256x4xf32> to vector<256x4xf32>
    %311 = arith.addf %310, %308 : vector<256x4xf32>
    %312 = vector.extract_strided_slice %1 {offsets = [11, 0], sizes = [1, 4], strides = [1, 1]} : vector<12x4xf32> to vector<1x4xf32>
    %313 = vector.broadcast %312 : vector<1x4xf32> to vector<256x4xf32>
    %314 = arith.addf %311, %313 : vector<256x4xf32>
    %c0_100 = arith.constant 0 : index
    %c0_101 = arith.constant 0 : index
    %c0_102 = arith.constant 0 : index
    %315 = vector.load %arg6[%c0_100, %c0_101, %c0_102] : memref<1x256x4xf32, #tpu.memory_space<vmem>>, vector<1x256x4xf32>
    %316 = vector.shape_cast %315 : vector<1x256x4xf32> to vector<256x4xf32>
    %317 = vector.shape_cast %314 : vector<256x4xf32> to vector<1x256x4xf32>
    tpu.vector_store %arg6[%c0_100, %c0_101, %c0_102], %317 {strides = array<i32>} : memref<1x256x4xf32, #tpu.memory_space<vmem>>, vector<1x256x4xf32>,
    return
  }
  func.func @transform_0(%arg0: i32) -> (i32, i32, i32, i32) {
    %c0_i32 = arith.constant 0 : i32
    %c0_i32_0 = arith.constant 0 : i32
    %c0_i32_1 = arith.constant 0 : i32
    %c0_i32_2 = arith.constant 0 : i32
    return %arg0, %c0_i32, %c0_i32_0, %c0_i32_1 : i32, i32, i32, i32
  }
  func.func @transform_1(%arg0: i32) -> (i32, i32, i32, i32) {
    %c0_i32 = arith.constant 0 : i32
    %c0_i32_0 = arith.constant 0 : i32
    %c0_i32_1 = arith.constant 0 : i32
    %c0_i32_2 = arith.constant 0 : i32
    return %arg0, %c0_i32, %c0_i32_0, %c0_i32_1 : i32, i32, i32, i32
  }
  func.func @transform_2(%arg0: i32) -> (i32, i32, i32) {
    %c0_i32 = arith.constant 0 : i32
    %c0_i32_0 = arith.constant 0 : i32
    %c0_i32_1 = arith.constant 0 : i32
    return %arg0, %c0_i32, %c0_i32_0 : i32, i32, i32
  }
  func.func @transform_3(%arg0: i32) -> (i32, i32) {
    %c0_i32 = arith.constant 0 : i32
    %c0_i32_0 = arith.constant 0 : i32
    %c0_i32_1 = arith.constant 0 : i32
    return %c0_i32, %c0_i32_0 : i32, i32
  }
  func.func @transform_4(%arg0: i32) -> (i32, i32) {
    %c0_i32 = arith.constant 0 : i32
    %c0_i32_0 = arith.constant 0 : i32
    %c0_i32_1 = arith.constant 0 : i32
    return %c0_i32, %c0_i32_0 : i32, i32
  }
  func.func @transform_5(%arg0: i32) -> (i32, i32, i32) {
    %c0_i32 = arith.constant 0 : i32
    %c0_i32_0 = arith.constant 0 : i32
    %c0_i32_1 = arith.constant 0 : i32
    return %arg0, %c0_i32, %c0_i32_0 : i32, i32, i32
  }
}

</mosaic_0001>

<bundles_post_ra>
// kernel: tpu_custom_call.1
= control target key start
LH: loop header
LB: loop body
LE: loop exit
PB: predicated region body
PF: predicated region fallthrough
CT: control target
= control target key end

     0   :  { %s6492_s18 = smov 0   ;;  %s13575_s0 = inlined_call_operand.vmem [shape: f32[2,16,16,4], index: 0, kind: input, shape index: {}]   ;;  %s13576_s1 = inlined_call_operand.vmem [shape: f32[2,8,16,4], index: 1, kind: input, shape index: {}]   ;;  %s13577_s2 = inlined_call_operand.vmem [shape: f32[2,256,4], index: 2, kind: input, shape index: {}]   ;;  %s13578_s3 = inlined_call_operand.vmem [shape: f32[12,4], index: 3, kind: input, shape index: {}]   ;;  %s13579_s4 = inlined_call_operand.vmem [shape: f32[8,4], index: 4, kind: input, shape index: {}]   ;;  %s13580_s5 = inlined_call_operand.vmem [shape: f32[2,256,4], index: 5, kind: output, shape index: {}]  }
   0x1 LB: > { %s5755_s19 = sadd.s32 4294967295, %s6459_s18   ;;  %p5759_p0 = scmp.ge.s32.totalorder %s6459_s18, 1  ;;  %s6459_s18 = sphi %s6492_s18, %s15_s18  }
   0x2   : > { %p207_p1 = scmp.lt.s32.totalorder %s6459_s18, 3 }
   0x4   : > { %p208_p2 = pnand %p5759_p0, %p207_p1 }
   0x6   : > { %211 = sbr.rel (%p208_p2) target bundleno = 1436 (0x59c), region = 40 }
   0xd   : > { %p245_p3 = scmp.lt.s32.totalorder %s5755_s19, 1  ;;  %v265_v0 = vlaneseq  ;;  %vm1784_vm0 = vcmask 31744   ;;  %v6519_v3 = vld [vmem:[%s13578_s3] sm:$0xff]  ;;  %v269_v58 = vld [vmem:[%s13578_s3 + $0x8] sm:$0xf] }
   0xf   : > { %s14777_s19 = smov (!%p245_p3, %s5755_s19), 1  ;;  %v6502_v1 = vshrl.u32 %v265_v0, 7 }
  0x10   : > { %s6505_s20 = sshll.u32 %s14777_s19, 8  ;;  %s5837_s26 = sshll.u32 %s14777_s19, 7 }
  0x11   : > { %13958 = vst [vmem:[#allocation2_spill] sm:$0xff] %v6502_v1  ;;  %s6511_s23 = scalar_lea.vmem %s13575_s0, %s6505_s20  ;;  %v6514_v2 = vadd.s32 8, %v6502_v1  ;;  %v340_v4 = vsub.s32 0, %v6502_v1  ;;  %v378_v8 = vsub.s32 3, %v6502_v1  ;;  %v430_v9 = vsub.s32 6, %v6502_v1  ;;  %s6548_s29 = scalar_lea.vmem %s13576_s1, %s5837_s26 }
  0x12   : > { %v3330_v5 = vld [vmem:[%s6511_s23 + $0x18] sm:$0xff]  ;;  %v3329_v6 = vld [vmem:[%s6511_s23 + $0x10] sm:$0xff]  ;;  %v3332_v13 = vld [vmem:[%s6511_s23 + $0x28] sm:$0xff]  ;;  %vm305_vm1 = vcmp.lt.s32.totalorder %v6502_v1, 1  ;;  %v483_v18 = vsub.s32 1, %v6502_v1  ;;  %v536_v19 = vsub.s32 4, %v6502_v1  ;;  %s13414_s11 = scalar_lea.vmem %s13577_s2, %s6505_s20  ;;  %s13424_s14 = scalar_lea.vmem %s13580_s5, %s6505_s20 }
  0x13   : > { %13959 = vst [vmem:[#allocation3_spill] sm:$0xff] %v6514_v2  ;;  %v3334_v7 = vld [vmem:[%s6511_s23 + $0x38] sm:$0xff]  ;;  %v3368_v10 = vsel %vm1784_vm0, %v3330_v5, -inf  ;;  %v3365_v11 = vsel %vm1784_vm0, %v3329_v6, -inf  ;;  %v3333_v12 = vld [vmem:[%s6511_s23 + $0x30] sm:$0xff]  ;;  %v3331_v14 = vld [vmem:[%s6511_s23 + $0x20] sm:$0xff]  ;;  %v6553_v26 = vrot.slane %v6519_v3, %v340_v4  ;;  %v6565_v32 = vrot.slane %v6519_v3, %v378_v8 }
  0x14   : > { %3369 = vmax.xlane.f32.xlu1 %v3368_v10  ;;  %3366 = vmax.xlane.f32.xlu0 %v3365_v11  ;;  %v3328_v15 = vld [vmem:[%s6511_s23 + $0x8] sm:$0xff]  ;;  %v3327_v16 = vld [vmem:[%s6511_s23] sm:$0xff]  ;;  %v588_v20 = vsub.s32 7, %v6502_v1  ;;  %v3380_v21 = vsel %vm1784_vm0, %v3334_v7, -inf  ;;  %v3377_v22 = vsel %vm1784_vm0, %v3333_v12, -inf  ;;  %v3338_v24 = vld [vmem:[%s6511_s23 + $0x58] sm:$0xff]  ;;  %v6568_v33 = vrot.slane %v6519_v3, %v430_v9 }
  0x15   : > { %v3336_v17 = vld [vmem:[%s6511_s23 + $0x48] sm:$0xff]  ;;  %v3335_v23 = vld [vmem:[%s6511_s23 + $0x40] sm:$0xff]  ;;  %v3337_v25 = vld [vmem:[%s6511_s23 + $0x50] sm:$0xff]  ;;  %13960 = vst [vmem:[#allocation4_spill] sm:$0xff] %v6553_v26  ;;  %vm640_vm2 = vcmp.lt.s32.totalorder %v6514_v2, 15  ;;  %vm657_vm3 = vcmp.lt.s32.totalorder %v6502_v1, 7  ;;  %v6595_v44 = vrot.slane %v6519_v3, %v483_v18  ;;  %v6614_v51 = vrot.slane %v6519_v3, %v536_v19 }
  0x16   : > { %v3374_v27 = vsel %vm1784_vm0, %v3332_v13, -inf  ;;  %v3371_v28 = vsel %vm1784_vm0, %v3331_v14, -inf  ;;  %v3340_v29 = vld [vmem:[%s6511_s23 + $0x68] sm:$0xff]  ;;  %v3339_v30 = vld [vmem:[%s6511_s23 + $0x60] sm:$0xff]  ;;  %v3342_v31 = vld [vmem:[%s6511_s23 + $0x78] sm:$0xff]  ;;  %13961 = vst [vmem:[#allocation5_spill] sm:$0xff] %v6565_v32  ;;  %v6620_v55 = vrot.slane %v6519_v3, %v588_v20 }
  0x17   : > { %v3362_v34 = vsel %vm1784_vm0, %v3328_v15, -inf  ;;  %v3359_v35 = vsel %vm1784_vm0, %v3327_v16, -inf  ;;  %v6573_v36 = vsel %vm1784_vm0, %v3336_v17, -inf  ;;  %v6576_v37 = vsel %vm1784_vm0, %v3335_v23, -inf  ;;  %v3341_v41 = vld [vmem:[%s6511_s23 + $0x70] sm:$0xff]  ;;  %v3344_v42 = vld [vmem:[%s6511_s23 + $0x88] sm:$0xff] }
  0x18   : > { %3381 = vmax.xlane.f32.xlu1 %v3380_v21  ;;  %3378 = vmax.xlane.f32.xlu0 %v3377_v22  ;;  %v6579_v38 = vsel %vm1784_vm0, %v3338_v24, -inf  ;;  %v6582_v39 = vsel %vm1784_vm0, %v3337_v25, -inf  ;;  %v6585_v40 = vsel %vm1784_vm0, %v3340_v29, -inf  ;;  %v6590_v43 = vld [vmem:[%s6548_s29 + $0x10] sm:$0xff]  ;;  %v6598_v45 = vsel %vm1784_vm0, %v3339_v30, -inf  ;;  %v6604_v47 = vld [vmem:[%s6548_s29 + $0x18] sm:$0xff] }
  0x19   : > { %13962 = vst [vmem:[#allocation6_spill] sm:$0xff] %v6590_v43  ;;  %v6601_v46 = vsel %vm1784_vm0, %v3342_v31, -inf  ;;  %v6607_v48 = vld [vmem:[%s6548_s29 + $0x20] sm:$0xff]  ;;  %v6610_v49 = vld [vmem:[%s6548_s29 + $0x28] sm:$0xff]  ;;  %v290_v50 = vrot.slane %v6590_v43, 7  ;;  %13964 = vst [vmem:[#allocation8_spill] sm:$0xff] %v6614_v51  ;;  %v6676_v15 = vrot.slane %v269_v58, %v340_v4  ;;  %v6681_v17 = vmul.f32 %v6595_v44, %v6604_v47 }
  0x1a   : > { %13963 = vst [vmem:[#allocation7_spill] sm:$0xff] %v6607_v48  ;;  %v13584_v52 = vrot.slane %v6607_v48, 7  ;;  %v298_v53 = vrot.slane %v6604_v47, 7  ;;  %v13583_v54 = vrot.slane %v6610_v49, 7  ;;  %v6623_v56 = vsel %vm1784_vm0, %v3341_v41, -inf  ;;  %v3343_v5 = vld [vmem:[%s6511_s23 + $0x80] sm:$0xff] }
  0x1b   : > { %v6626_v57 = vsel %vm1784_vm0, %v3344_v42, -inf  ;;  %v13585_v59 = vrot.slane %v6590_v43, 1  ;;  %v13581_v60 = vrot.slane %v6607_v48, 1  ;;  %v13586_v63 = vrot.slane %v6604_v47, 1  ;;  %v3346_v6 = vld [vmem:[%s6511_s23 + $0x98] sm:$0xff]  ;;  %v6691_v21 = vld [vmem:[%s6548_s29] sm:$0xff] }
  0x1c   : > { %3375 = vmax.xlane.f32.xlu1 %v3374_v27  ;;  %3372 = vmax.xlane.f32.xlu0 %v3371_v28  ;;  %v307_v61 = vsel %vm305_vm1, %v290_v50, %v298_v53  ;;  %v6645_v62 = vsel %vm305_vm1, %v13584_v52, %v13583_v54  ;;  %v13582_v0 = vrot.slane %v6610_v49, 1  ;;  %vm287_vm4 = vcmp.ge.s32.totalorder %v6502_v1, 1  ;;  %v6694_v22 = vld [vmem:[%s6548_s29 + $0x8] sm:$0xff] }
  0x1d   : > { %v6653_v7 = vmul.f32 %v6553_v26, %v307_v61  ;;  %v383_v9 = vmul.f32 %v6565_v32, %v307_v61  ;;  %v6658_v10 = vmul.f32 %v6568_v33, %v6645_v62  ;;  %v692_v11 = vsub.s32 2, %v6502_v1 }
  0x1e   : > { %v667_v12 = vsel %vm657_vm3, %v13586_v63, %v13585_v59  ;;  %v668_v13 = vsel %vm657_vm3, %v13582_v0, %v13581_v60  ;;  %v745_v14 = vsub.s32 5, %v6502_v1  ;;  %v6697_v4 = vsel %vm1784_vm0, %v3343_v5, -inf }
  0x1f   : > { %v403_v16 = vadd.f32 %v383_v9, %v6653_v7  ;;  %v6685_v19 = vsel %vm640_vm2, %v668_v13, 0.0  ;;  %v6688_v20 = vrot.slane %v6519_v3, %v692_v11  ;;  %v6700_v23 = vsel %vm1784_vm0, %v3346_v6, -inf }
  0x20   : > { %3363 = vmax.xlane.f32.xlu1 %v3362_v34  ;;  %3360 = vmax.xlane.f32.xlu0 %v3359_v35  ;;  %v677_v24 = vsel %vm640_vm2, %v667_v12, 0.0  ;;  %v6705_v25 = vrot.slane %v6519_v3, %v745_v14  ;;  %v541_v28 = vmul.f32 %v6614_v51, %v6604_v47  ;;  %v6712_v29 = vmul.f32 %v6620_v55, %v6610_v49 }
  0x21   : > { %v456_v27 = vadd.f32 %v6658_v10, %v403_v16  ;;  %v6716_v30 = vrot.slane %v269_v58, %v483_v18  ;;  %v6720_v31 = vmul.f32 %v6676_v15, %v6685_v19  ;;  %v6724_v3 = vrot.slane %v269_v58, %v378_v8 }
  0x22   : > { %13965 = vst [vmem:[#allocation9_spill] sm:$0xff] %v6705_v25  ;;  %v289_v34 = vrot.slane %v6691_v21, 7  ;;  %v297_v35 = vrot.slane %v6694_v22, 7  ;;  %v6730_v42 = vmul.f32 %v6688_v20, %v677_v24  ;;  %v6733_v18 = vmul.f32 %v6705_v25, %v677_v24 }
  0x23   : > { %13966 = vst [vmem:[#allocation10_spill] sm:$0xff] %v6724_v3  ;;  %v509_v41 = vadd.f32 %v6681_v17, %v456_v27  ;;  %v6735_v5 = vrot.slane %v269_v58, %v692_v11  ;;  %v435_v6 = vmul.f32 %v6568_v33, %v307_v61  ;;  %v641_v12 = vrot.slane %v6691_v21, 1 }
  0x24   : > { %3387 = vmax.xlane.f32.xlu1 %v6573_v36  ;;  %3384 = vmax.xlane.f32.xlu0 %v6576_v37  ;;  %v306_v8 = vsel %vm305_vm1, %v289_v34, %v297_v35  ;;  %v649_v13 = vrot.slane %v6694_v22, 1  ;;  %v487_v58 = vmul.f32 %v6595_v44, %v6694_v22  ;;  %v6750_v36 = vmul.f32 %v6614_v51, %v6694_v22 }
  0x25   : > { %v561_v14 = vadd.f32 %v541_v28, %v509_v41  ;;  %v344_v16 = vmul.f32 %v6553_v26, %v306_v8  ;;  %v381_v27 = vmul.f32 %v6565_v32, %v306_v8  ;;  %v314_v61 = vsel %vm305_vm1, %v297_v35, %v289_v34 }
  0x26   : > { %v666_v37 = vsel %vm657_vm3, %v649_v13, %v641_v12  ;;  %v315_v11 = vsel %vm305_vm1, %v298_v53, %v290_v50  ;;  %v593_v34 = vmul.f32 %v6620_v55, %v6604_v47  ;;  %v802_v35 = vmul.f32 %v6676_v15, %v677_v24 }
  0x27   : > { %v614_v41 = vadd.f32 %v6712_v29, %v561_v14  ;;  %v399_v60 = vadd.f32 %v381_v27, %v344_v16  ;;  %v6765_v0 = vsel %vm640_vm2, %v666_v37, 0.0  ;;  %v401_v54 = vadd.f32 %v383_v9, %v344_v16 }
  0x28   : > { %3393 = vmax.xlane.f32.xlu1 %v6579_v38  ;;  %3390 = vmax.xlane.f32.xlu0 %v6582_v39  ;;  %v6774_v50 = vsel %vm287_vm4, %v314_v61, 0.0  ;;  %v6778_v53 = vsel %vm287_vm4, %v315_v11, 0.0  ;;  %v696_v39 = vmul.f32 %v6688_v20, %v6765_v0  ;;  %v6793_v61 = vmul.f32 %v6595_v44, %v6691_v21 }
  0x29   : > { %v718_v14 = vadd.f32 %v6730_v42, %v614_v41  ;;  %v452_v9 = vadd.f32 %v435_v6, %v399_v60  ;;  %v454_v16 = vadd.f32 %v435_v6, %v401_v54  ;;  %v343_v38 = vmul.f32 %v6553_v26, %v6774_v50 }
  0x2a   : > { %v6787_v24 = vmul.f32 %v6565_v32, %v6774_v50  ;;  %v434_v37 = vmul.f32 %v6568_v33, %v6778_v53  ;;  %v6798_v6 = vmul.f32 %v6705_v25, %v6765_v0  ;;  %v6805_v52 = vmul.f32 %v6614_v51, %v6691_v21 }
  0x2b   : > { %v770_v54 = vadd.f32 %v6733_v18, %v718_v14  ;;  %v505_v60 = vadd.f32 %v487_v58, %v452_v9  ;;  %v507_v11 = vadd.f32 %v487_v58, %v454_v16  ;;  %v6809_v59 = vmul.f32 %v6620_v55, %v6590_v43  ;;  %v3345_v9 = vld [vmem:[%s6511_s23 + $0x90] sm:$0xff] }
  0x2c   : > { %3399 = vmax.xlane.f32.xlu1 %v6585_v40  ;;  %3396 = vmax.xlane.f32.xlu0 %v6598_v45  ;;  %v398_v41 = vadd.f32 %v6787_v24, %v343_v38  ;;  %v6812_v14 = vmul.f32 0.0, %v6553_v26  ;;  %v6819_v45 = vsel %vm657_vm3, %v641_v12, %v649_v13  ;;  %v13967_v3 = vrot.slane %v6604_v47, 1 }
  0x2d   : > { %v823_v58 = vadd.f32 %v6720_v31, %v770_v54  ;;  %v557_v40 = vadd.f32 %v6750_v36, %v505_v60  ;;  %v559_v16 = vadd.f32 %v541_v28, %v507_v11  ;;  %v13968_v48 = vrot.slane %v6590_v43, 1 }
  0x2e   : > { %v451_v63 = vadd.f32 %v434_v37, %v398_v41  ;;  %v397_v26 = vadd.f32 %v381_v27, %v6812_v14  ;;  %v433_v54 = vmul.f32 %v6568_v33, %v306_v8  ;;  %v6833_v12 = vmul.f32 0.0, %v6595_v44 }
  0x2f   : > { %v6827_v2 = vsel %vm657_vm3, %v13968_v48, %v13967_v3  ;;  %v859_v60 = vmul.f32 %v6716_v30, %v823_v58  ;;  %v610_v28 = vadd.f32 %v593_v34, %v557_v40  ;;  %v612_v11 = vadd.f32 %v593_v34, %v559_v16 }
  0x30   : > { %13969 = vst [vmem:[#allocation11_spill] sm:$0xff] %v6827_v2  ;;  %3405 = vmax.xlane.f32.xlu1 %v6601_v46  ;;  %3402 = vmax.xlane.f32.xlu0 %v6623_v56  ;;  %v3413_v47 = vsel %vm1784_vm0, %v3345_v9, -inf  ;;  %v504_v48 = vadd.f32 %v6793_v61, %v451_v63  ;;  %v6841_v3 = vmul.f32 %v6688_v20, %v6819_v45 }
  0x31   : > { %v450_v8 = vadd.f32 %v433_v54, %v397_v26  ;;  %v895_v13 = vadd.f32 %v6735_v5, %v859_v60  ;;  %v714_v27 = vadd.f32 %v696_v39, %v610_v28  ;;  %v716_v34 = vadd.f32 %v696_v39, %v612_v11 }
  0x32   : > { %v6846_v41 = vmul.f32 %v6705_v25, %v6819_v45  ;;  %v556_v46 = vadd.f32 %v6805_v52, %v504_v48  ;;  %v591_v63 = vmul.f32 %v6620_v55, %v6694_v22  ;;  %v6854_v9 = vmul.f32 %v6565_v32, %v6778_v53 }
  0x33   : > { %v503_v56 = vadd.f32 %v6833_v12, %v450_v8  ;;  %v959_v26 = vmul.f32 0.70710677, %v895_v13  ;;  %v766_v58 = vadd.f32 %v6798_v6, %v714_v27  ;;  %v768_v39 = vadd.f32 %v6733_v18, %v716_v34 }
  0x34   : > { %13970 = vst [vmem:[#allocation12_spill] sm:$0xff] %v6854_v9  ;;  %v6860_v40 = vmul.f32 %v6676_v15, %v6827_v2  ;;  %3411 = vmax.xlane.f32.xlu1 %v6626_v57  ;;  %3408 = vmax.xlane.f32.xlu0 %v6697_v4  ;;  %v609_v16 = vadd.f32 %v6809_v59, %v556_v46  ;;  %v6867_v54 = vmul.f32 0.0, %v6688_v20 }
  0x35   : > { %v555_v22 = vadd.f32 %v6750_v36, %v503_v56  ;;  %v400_v60 = vadd.f32 %v6854_v9, %v343_v38  ;;  %v1055_v28 = vand.u32 2147483647, %v959_v26  ;;  %v819_v11 = vadd.f32 %v802_v35, %v766_v58 }
  0x36   : > { %v821_v18 = vadd.f32 %v802_v35, %v768_v39  ;;  %v800_v48 = vmul.f32 %v6676_v15, %v6765_v0  ;;  %v713_v8 = vadd.f32 %v6841_v3, %v609_v16  ;;  %v6875_v4 = vmul.f32 %v6614_v51, %v6590_v43 }
  0x37   : > { %v608_v57 = vadd.f32 %v591_v63, %v555_v22  ;;  %v453_v27 = vadd.f32 %v434_v37, %v400_v60  ;;  %v1087_v36 = vmul.f32 0.3275911, %v1055_v28  ;;  %v1503_v34 = vsub.f32 0.0, %v1055_v28  ;;  %v6889_v60 = vld [vmem:[%s6548_s29 + $0x30] sm:$0xff] }
  0x38   : > { %13971 = vst [vmem:[#allocation13_spill] sm:$0xff] %v6875_v4  ;;  %v855_v46 = vmul.f32 %v6716_v30, %v819_v11  ;;  %v857_v38 = vmul.f32 %v6716_v30, %v821_v18  ;;  %3417 = vmax.xlane.f32.xlu1 %v6700_v23  ;;  %3414 = vmax.xlane.f32.xlu0 %v3413_v47  ;;  %vm991_vm5 = vcmp.ge.f32.partialorder %v959_v26, 0.0 }
  0x39   : > { %v765_v0 = vadd.f32 %v6846_v41, %v713_v8  ;;  %v712_v35 = vadd.f32 %v6867_v54, %v608_v57  ;;  %v506_v37 = vadd.f32 %v6793_v61, %v453_v27  ;;  %v1119_v56 = vadd.f32 1.0, %v1087_v36 }
  0x3a   : > { %v1535_v63 = vmul.f32 %v1503_v34, %v1055_v28  ;;  %v891_v58 = vadd.f32 %v6735_v5, %v855_v46  ;;  %v893_v39 = vadd.f32 %v6735_v5, %v857_v38  ;;  %v6893_v28 = vld [vmem:[%s6548_s29 + $0x38] sm:$0xff]  ;;  %v6895_v8 = vmul.f32 0.5, %v895_v13 }
  0x3b   : > { %v818_v16 = vadd.f32 %v6860_v40, %v765_v0  ;;  %v764_v22 = vadd.f32 %v6798_v6, %v712_v35  ;;  %v558_v23 = vadd.f32 %v6875_v4, %v506_v37  ;;  %6047 = vrcp.f32 %v1119_v56 }
  0x3c   : > { %v955_v47 = vmul.f32 0.70710677, %v891_v58  ;;  %v957_v11 = vmul.f32 0.70710677, %v893_v39  ;;  %v1574_v57 = vmul.f32 1.442695, %v1535_v63 }
  0x3d   : > { %v854_v61 = vmul.f32 %v6716_v30, %v818_v16  ;;  %v817_v18 = vadd.f32 %v800_v48, %v764_v22  ;;  %v611_v36 = vadd.f32 %v6809_v59, %v558_v23  ;;  %v13594_v6 = vmov -1.0  }
  0x3e   : > { %v1051_v27 = vand.u32 2147483647, %v955_v47  ;;  %v6899_v34 = vsel %vm991_vm5, 1.0, %v13594_v6  ;;  %v1053_v26 = vand.u32 2147483647, %v957_v11  ;;  %v6907_v59 = vmul.f32 %v6705_v25, %v6827_v2 }
  0x3f   : > { %v890_v46 = vadd.f32 %v6735_v5, %v854_v61  ;;  %v853_v48 = vmul.f32 %v6716_v30, %v817_v18  ;;  %6049 = vpow2.f32 %v1574_v57  ;;  %v715_v23 = vadd.f32 %v6841_v3, %v611_v36 }
  0x40   : > { %v1083_v0 = vmul.f32 0.3275911, %v1051_v27  ;;  %v1499_v35 = vsub.f32 0.0, %v1051_v27  ;;  %v1085_v37 = vmul.f32 0.3275911, %v1053_v26  ;;  %v1501_v56 = vsub.f32 0.0, %v1053_v26 }
  0x41   : > { %v954_v63 = vmul.f32 0.70710677, %v890_v46  ;;  %13972 = vst [vmem:[#allocation14_spill] sm:$0xff] %v6907_v59  ;;  %v6910_v22 = vadd.f32 %v6735_v5, %v853_v48  ;;  %vm987_vm6 = vcmp.ge.f32.partialorder %v955_v47, 0.0  ;;  %v6913_v6 = vmul.f32 0.5, %v891_v58 }
  0x42   : > { %v1115_v16 = vadd.f32 1.0, %v1083_v0  ;;  %v1531_v61 = vmul.f32 %v1499_v35, %v1051_v27  ;;  %v1117_v38 = vadd.f32 1.0, %v1085_v37  ;;  %v6915_v13 = vmul.f32 0.5, %v893_v39 }
  0x43   : > { %v1050_v18 = vand.u32 2147483647, %v954_v63  ;;  %vm989_vm7 = vcmp.ge.f32.partialorder %v957_v11, 0.0  ;;  %v1533_v4 = vmul.f32 %v1501_v56, %v1053_v26  ;;  %v13973_v48 = vmov -1.0  }
  0x44   : > { %6051 = vrcp.f32 %v1115_v16  ;;  %v6920_v2 = vsel %vm987_vm6, 1.0, %v13973_v48  ;;  %v6923_v3 = vmul.f32 0.70710677, %v6910_v22  ;;  %v767_v47 = vadd.f32 %v6907_v59, %v715_v23 }
  0x45   : > { %6053 = vrcp.f32 %v1117_v38  ;;  %v1082_v9 = vmul.f32 0.3275911, %v1050_v18  ;;  %v1498_v57 = vsub.f32 0.0, %v1050_v18  ;;  %v6917_v0 = vpop.eup %6047  ;;  %v6928_v58 = vmul.f32 %v6565_v32, %v6645_v62 }
  0x46   : > { %v1215_v39 = vmul.f32 1.0614054, %v6917_v0  ;;  %v1566_v11 = vmul.f32 1.442695, %v1531_v61  ;;  %v6932_v27 = vsel %vm989_vm7, 1.0, %v13973_v48  ;;  %v820_v35 = vadd.f32 %v6860_v40, %v767_v47 }
  0x47   : > { %v1114_v36 = vadd.f32 1.0, %v1082_v9  ;;  %v1530_v26 = vmul.f32 %v1498_v57, %v1050_v18  ;;  %v1049_v38 = vand.u32 2147483647, %v6923_v3  ;;  %v405_v37 = vadd.f32 %v6928_v58, %v6653_v7 }
  0x48   : > { %v1247_v56 = vadd.f32 -1.4531521, %v1215_v39  ;;  %v1570_v16 = vmul.f32 1.442695, %v1533_v4  ;;  %v6938_v23 = vmul.f32 0.5, %v890_v46  ;;  %v856_v61 = vmul.f32 %v6716_v30, %v820_v35 }
  0x49   : > { %6055 = vrcp.f32 %v1114_v36  ;;  %v1081_v59 = vmul.f32 0.3275911, %v1049_v38  ;;  %v1497_v43 = vsub.f32 0.0, %v1049_v38  ;;  %v458_v32 = vadd.f32 %v6658_v10, %v405_v37  ;;  %v6050_v7 = vpop.eup %6049 }
  0x4a   : > { %v1279_v9 = vmul.f32 %v6917_v0, %v1247_v56  ;;  %6057 = vpow2.f32 %v1566_v11  ;;  %vm986_vm8 = vcmp.ge.f32.partialorder %v954_v63, 0.0  ;;  %v6945_v40 = vmul.f32 %v6614_v51, %v6610_v49 }
  0x4b   : > { %v1564_v18 = vmul.f32 1.442695, %v1530_v26  ;;  %v1113_v4 = vadd.f32 1.0, %v1081_v59  ;;  %v6948_v46 = vadd.f32 %v6735_v5, %v856_v61  ;;  %v511_v57 = vadd.f32 %v6681_v17, %v458_v32 }
  0x4c   : > { %v1311_v47 = vadd.f32 1.4214138, %v1279_v9  ;;  %6059 = vpow2.f32 %v1570_v16  ;;  %v396_v10 = vadd.f32 %v6787_v24, %v6812_v14  ;;  %v432_v63 = vmul.f32 %v6568_v33, %v6774_v50 }
  0x4d   : > { %13974 = vst [vmem:[#allocation15_spill] sm:$0xff] %v6948_v46  ;;  %v6958_v11 = vsel %vm986_vm8, 1.0, %v13973_v48  ;;  %6061 = vrcp.f32 %v1113_v4  ;;  %v1529_v59 = vmul.f32 %v1497_v43, %v1049_v38  ;;  %v6961_v36 = vmul.f32 0.70710677, %v6948_v46 }
  0x4e   : > { %v6955_v39 = vpop.eup %6051  ;;  %v1343_v32 = vmul.f32 %v6917_v0, %v1311_v47  ;;  %v563_v24 = vadd.f32 %v6945_v40, %v511_v57  ;;  %v449_v14 = vadd.f32 %v432_v63, %v396_v10  ;;  %6063 = vpow2.f32 %v1564_v18 }
  0x4f   : > { %v6963_v26 = vpop.eup %6053  ;;  %v1211_v17 = vmul.f32 1.0614054, %v6955_v39  ;;  %v1052_v35 = vand.u32 2147483647, %v6961_v36  ;;  %v6972_v43 = vmul.f32 %v6705_v25, %v6685_v19  ;;  %v590_v16 = vmul.f32 %v6620_v55, %v6691_v21 }
  0x50   : > { %v1213_v50 = vmul.f32 1.0614054, %v6963_v26  ;;  %v1375_v38 = vadd.f32 -0.28449672, %v1343_v32  ;;  %v616_v56 = vadd.f32 %v6712_v29, %v563_v24  ;;  %v502_v57 = vadd.f32 %v6833_v12, %v449_v14 }
  0x51   : > { %v1243_v37 = vadd.f32 -1.4531521, %v1211_v17  ;;  %v1084_v9 = vmul.f32 0.3275911, %v1052_v35  ;;  %v1500_v4 = vsub.f32 0.0, %v1052_v35  ;;  %vm985_vm9 = vcmp.ge.f32.partialorder %v6923_v3, 0.0 }
  0x52   : > { %v1245_v61 = vadd.f32 -1.4531521, %v1213_v50  ;;  %v1407_v18 = vmul.f32 %v6917_v0, %v1375_v38  ;;  %v1562_v63 = vmul.f32 1.442695, %v1529_v59  ;;  %v720_v32 = vadd.f32 %v6730_v42, %v616_v56 }
  0x53   : > { %v6978_v47 = vpop.eup %6055  ;;  %v1275_v10 = vmul.f32 %v6955_v39, %v1243_v37  ;;  %v1116_v24 = vadd.f32 1.0, %v1084_v9  ;;  %v1532_v21 = vmul.f32 %v1500_v4, %v1052_v35  ;;  %v554_v14 = vadd.f32 %v6805_v52, %v502_v57 }
  0x54   : > { %v1277_v17 = vmul.f32 %v6963_v26, %v1245_v61  ;;  %v1210_v29 = vmul.f32 1.0614054, %v6978_v47  ;;  %v6058_v50 = vpop.eup %6057  ;;  %v1439_v25 = vadd.f32 0.2548296, %v1407_v18  ;;  %v772_v12 = vadd.f32 %v6972_v43, %v720_v32 }
  0x55   : > { %v1307_v51 = vadd.f32 1.4214138, %v1275_v10  ;;  %v6988_v37 = vmul.f32 0.5, %v6910_v22  ;;  %6065 = vrcp.f32 %v1116_v24  ;;  %v607_v61 = vadd.f32 %v590_v16, %v554_v14  ;;  %v13975_v16 = vld [vmem:[#allocation4_spill] sm:$0xff] }
  0x56   : > { %v1309_v46 = vadd.f32 1.4214138, %v1277_v17  ;;  %v1242_v38 = vadd.f32 -1.4531521, %v1210_v29  ;;  %v6060_v42 = vpop.eup %6059  ;;  %v1471_v59 = vmul.f32 %v6917_v0, %v1439_v25  ;;  %v825_v35 = vadd.f32 %v6720_v31, %v772_v12 }
  0x57   : > { %v1339_v56 = vmul.f32 %v6955_v39, %v1307_v51  ;;  %v6993_v9 = vpop.eup %6061  ;;  %6067 = vpow2.f32 %v1562_v63  ;;  %v1568_v57 = vmul.f32 1.442695, %v1532_v21  ;;  %v711_v31 = vadd.f32 %v6867_v54, %v607_v61 }
  0x58   : > { %v1341_v4 = vmul.f32 %v6963_v26, %v1309_v46  ;;  %v1274_v52 = vmul.f32 %v6978_v47, %v1242_v38  ;;  %v1631_v18 = vmul.f32 %v6050_v7, %v1471_v59  ;;  %v1209_v10 = vmul.f32 1.0614054, %v6993_v9  ;;  %v6064_v25 = vpop.eup %6063 }
  0x59   : > { %v1371_v22 = vadd.f32 -0.28449672, %v1339_v56  ;;  %v861_v32 = vmul.f32 %v6716_v30, %v825_v35  ;;  %v7002_v17 = vmul.f32 %v13975_v16, %v6645_v62  ;;  %v763_v12 = vadd.f32 %v6846_v41, %v711_v31 }
  0x5a   : > { %v1373_v0 = vadd.f32 -0.28449672, %v1341_v4  ;;  %v1306_v51 = vadd.f32 1.4214138, %v1274_v52  ;;  %v1663_v46 = vsub.f32 1.0, %v1631_v18  ;;  %v799_v54 = vmul.f32 %v6676_v15, %v6819_v45 }
  0x5b   : > { %v1403_v29 = vmul.f32 %v6955_v39, %v1371_v22  ;;  %v1241_v63 = vadd.f32 -1.4531521, %v1209_v10  ;;  %v7006_v7 = vadd.f32 %v6735_v5, %v861_v32  ;;  %6069 = vpow2.f32 %v1568_v57 }
  0x5c   : > { %v1405_v24 = vmul.f32 %v6963_v26, %v1373_v0  ;;  %v1338_v21 = vmul.f32 %v6978_v47, %v1306_v51  ;;  %v1695_v14 = vmul.f32 %v1663_v46, %v6899_v34  ;;  %v13976_v61 = vrot.slane %v6893_v28, 7 }
  0x5d   : > { %v1435_v62 = vadd.f32 0.2548296, %v1403_v29  ;;  %v1273_v38 = vmul.f32 %v6993_v9, %v1241_v63  ;;  %v7016_v35 = vmul.f32 0.70710677, %v7006_v7  ;;  %v13977_v4 = vrot.slane %v6889_v60, 7 }
  0x5e   : > { %v1437_v59 = vadd.f32 0.2548296, %v1405_v24  ;;  %v1370_v56 = vadd.f32 -0.28449672, %v1338_v21  ;;  %v1727_v45 = vadd.f32 1.0, %v1695_v14  ;;  %v407_v57 = vadd.f32 %v6928_v58, %v7002_v17 }
  0x5f   : > { %v7024_v41 = vsel %vm305_vm1, %v13977_v4, %v13976_v61  ;;  %v1467_v34 = vmul.f32 %v6955_v39, %v1435_v62  ;;  %v1305_v52 = vadd.f32 1.4214138, %v1273_v38  ;;  %v7029_v18 = vpop.eup %6065  ;;  %v1057_v32 = vand.u32 2147483647, %v7016_v35 }
  0x60   : > { %v1469_v22 = vmul.f32 %v6963_v26, %v1437_v59  ;;  %v1402_v10 = vmul.f32 %v6978_v47, %v1370_v56  ;;  %v816_v0 = vadd.f32 %v799_v54, %v763_v12  ;;  %v7035_v51 = vmul.f32 %v1727_v45, %v6895_v8 }
  0x61   : > { %v1627_v31 = vmul.f32 %v6058_v50, %v1467_v34  ;;  %v1337_v46 = vmul.f32 %v6993_v9, %v1305_v52  ;;  %v1212_v39 = vmul.f32 1.0614054, %v7029_v18  ;;  %v6068_v29 = vpop.eup %6067  ;;  %v1089_v24 = vmul.f32 0.3275911, %v1057_v32 }
  0x62   : > { %13978 = vst [vmem:[#allocation4_spill] sm:$0xff] %v7035_v51  ;;  %v1629_v63 = vmul.f32 %v6060_v42, %v1469_v22  ;;  %v1434_v58 = vadd.f32 0.2548296, %v1402_v10  ;;  %v7041_v26 = vmul.f32 %v6568_v33, %v7024_v41  ;;  %v1806_v21 = vsel %vm1784_vm0, %v7035_v51, -inf }
  0x63   : > { %v1659_v12 = vsub.f32 1.0, %v1627_v31  ;;  %v1369_v54 = vadd.f32 -0.28449672, %v1337_v46  ;;  %v1244_v8 = vadd.f32 -1.4531521, %v1212_v39  ;;  %1807 = vmax.xlane.f32.xlu1 %v1806_v21  ;;  %v1121_v62 = vadd.f32 1.0, %v1089_v24 }
  0x64   : > { %v1661_v50 = vsub.f32 1.0, %v1629_v63  ;;  %v1466_v14 = vmul.f32 %v6978_v47, %v1434_v58  ;;  %v1505_v38 = vsub.f32 0.0, %v1057_v32  ;;  %v852_v61 = vmul.f32 %v6716_v30, %v816_v0 }
  0x65   : > { %v1691_v42 = vmul.f32 %v1659_v12, %v6920_v2  ;;  %v1401_v59 = vmul.f32 %v6993_v9, %v1369_v54  ;;  %v1276_v56 = vmul.f32 %v7029_v18, %v1244_v8  ;;  %6071 = vrcp.f32 %v1121_v62  ;;  %v6070_v52 = vpop.eup %6069 }
  0x66   : > { %v1693_v4 = vmul.f32 %v1661_v50, %v6932_v27  ;;  %v1626_v45 = vmul.f32 %v6064_v25, %v1466_v14  ;;  %v1537_v34 = vmul.f32 %v1505_v38, %v1057_v32  ;;  %v7052_v47 = vadd.f32 %v6735_v5, %v852_v61 }
  0x67   : > { %v1723_v22 = vadd.f32 1.0, %v1691_v42  ;;  %v1433_v10 = vadd.f32 0.2548296, %v1401_v59  ;;  %v1308_v31 = vadd.f32 1.4214138, %v1276_v56  ;;  %vm988_vm10 = vcmp.ge.f32.partialorder %v6961_v36, 0.0 }
  0x68   : > { %v1725_v46 = vadd.f32 1.0, %v1693_v4  ;;  %v1658_v2 = vsub.f32 1.0, %v1626_v45  ;;  %v460_v32 = vadd.f32 %v7041_v26, %v407_v57  ;;  %v1578_v58 = vmul.f32 1.442695, %v1537_v34 }
  0x69   : > { %v7057_v0 = vmul.f32 %v1723_v22, %v6913_v6  ;;  %v1465_v27 = vmul.f32 %v6993_v9, %v1433_v10  ;;  %v1340_v25 = vmul.f32 %v7029_v18, %v1308_v31  ;;  %v7067_v24 = vmul.f32 0.70710677, %v7052_v47 }
  0x6a   : > { %v7063_v39 = vmul.f32 %v1725_v46, %v6915_v13  ;;  %v1690_v63 = vmul.f32 %v1658_v2, %v6958_v11  ;;  %v7073_v9 = vmul.f32 %v6595_v44, %v6610_v49  ;;  %v1017_v11 = vsel %vm985_vm9, 1.0, %v13973_v48 }
  0x6b   : > { %13979 = vst [vmem:[#allocation16_spill] sm:$0xff] %v7057_v0  ;;  %v1794_v21 = vsel %vm1784_vm0, %v7057_v0, -inf  ;;  %v1625_v6 = vmul.f32 %v6068_v29, %v1465_v27  ;;  %v1372_v12 = vadd.f32 -0.28449672, %v1340_v25  ;;  %v1048_v54 = vand.u32 2147483647, %v7067_v24 }
  0x6c   : > { %13980 = vst [vmem:[#allocation17_spill] sm:$0xff] %v7063_v39  ;;  %1795 = vmax.xlane.f32.xlu0 %v1794_v21  ;;  %v1800_v13 = vsel %vm1784_vm0, %v7063_v39, -inf  ;;  %v1722_v57 = vadd.f32 1.0, %v1690_v63  ;;  %v1020_v29 = vsel %vm988_vm10, 1.0, %v13973_v48  ;;  %v513_v14 = vadd.f32 %v7073_v9, %v460_v32 }
  0x6d   : > { %1801 = vmax.xlane.f32.xlu1 %v1800_v13  ;;  %v1657_v8 = vsub.f32 1.0, %v1625_v6  ;;  %v1404_v50 = vmul.f32 %v7029_v18, %v1372_v12  ;;  %6073 = vpow2.f32 %v1578_v58  ;;  %v1080_v38 = vmul.f32 0.3275911, %v1048_v54  ;;  %v13984_v12 = vld [vmem:[#allocation7_spill] sm:$0xff] }
  0x6e   : > { %v7087_v62 = vmul.f32 %v1722_v57, %v6938_v23  ;;  %v7091_v3 = vmul.f32 %v6620_v55, %v6893_v28  ;;  %v565_v56 = vadd.f32 %v6945_v40, %v513_v14  ;;  %v13608_v36 = vrot.slane %v6889_v60, 1  ;;  %v13988_v14 = vld [vmem:[#allocation5_spill] sm:$0xff] }
  0x6f   : > { %v1689_v42 = vmul.f32 %v1657_v8, %v1017_v11  ;;  %v1436_v59 = vadd.f32 0.2548296, %v1404_v50  ;;  %v7095_v61 = vpop.eup %6071  ;;  %v1112_v45 = vadd.f32 1.0, %v1080_v38  ;;  %v1496_v23 = vsub.f32 0.0, %v1048_v54 }
  0x70   : > { %13981 = vst [vmem:[#allocation18_spill] sm:$0xff] %v7087_v62  ;;  %v1791_v4 = vsel %vm1784_vm0, %v7087_v62, -inf  ;;  %v13609_v34 = vrot.slane %v6893_v28, 1  ;;  %v1217_v31 = vmul.f32 1.0614054, %v7095_v61  ;;  %v618_v46 = vadd.f32 %v7091_v3, %v565_v56 }
  0x71   : > { %1792 = vmax.xlane.f32.xlu0 %v1791_v4  ;;  %v1721_v22 = vadd.f32 1.0, %v1689_v42  ;;  %v1468_v10 = vmul.f32 %v7029_v18, %v1436_v59  ;;  %vm993_vm11 = vcmp.ge.f32.partialorder %v7016_v35, 0.0  ;;  %6075 = vrcp.f32 %v1112_v45  ;;  %v13990_v59 = vld [vmem:[#allocation15_spill] sm:$0xff] }
  0x72   : > { %v669_v40 = vsel %vm657_vm3, %v13609_v34, %v13608_v36  ;;  %v7112_v2 = vmul.f32 %v6688_v20, %v6685_v19  ;;  %v1249_v25 = vadd.f32 -1.4531521, %v1217_v31  ;;  %v1528_v58 = vmul.f32 %v1496_v23, %v1048_v54 }
  0x73   : > { %v7115_v18 = vmul.f32 %v1721_v22, %v6988_v37  ;;  %v1628_v27 = vmul.f32 %v6070_v52, %v1468_v10  ;;  %v7119_v63 = vsel %vm640_vm2, %v669_v40, 0.0  ;;  %v13985_v13 = vrot.slane %v13984_v12, 7 }
  0x74   : > { %v722_v21 = vadd.f32 %v7112_v2, %v618_v46  ;;  %v7124_v6 = vmul.f32 %v6676_v15, %v7119_v63  ;;  %v13986_v19 = vrot.slane %v6610_v49, 7  ;;  %v1281_v11 = vmul.f32 %v7095_v61, %v1249_v25 }
  0x75   : > { %13982 = vst [vmem:[#allocation19_spill] sm:$0xff] %v7115_v18  ;;  %v1788_v52 = vsel %vm1784_vm0, %v7115_v18, -inf  ;;  %v1660_v57 = vsub.f32 1.0, %v1628_v27  ;;  %v7140_v50 = vmul.f32 %v13975_v16, %v6778_v53  ;;  %v924_v56 = vmul.f32 0.5, %v13990_v59  ;;  %v13991_v53 = vld [vmem:[#allocation6_spill] sm:$0xff] }
  0x76   : > { %v316_v37 = vsel %vm305_vm1, %v13986_v19, %v13985_v13  ;;  %1789 = vmax.xlane.f32.xlu1 %v1788_v52  ;;  %v774_v8 = vadd.f32 %v6972_v43, %v722_v21  ;;  %v1313_v45 = vadd.f32 1.4214138, %v1281_v11  ;;  %v1025_v22 = vsel %vm993_vm11, 1.0, %v13973_v48 }
  0x77   : > { %v326_v54 = vsel %vm287_vm4, %v316_v37, 0.0  ;;  %13987 = vst [vmem:[#allocation7_spill] sm:$0xff] %v7140_v50  ;;  %v1692_v4 = vmul.f32 %v1660_v57, %v1020_v29  ;;  %v6074_v23 = vpop.eup %6073  ;;  %v7154_v31 = vmul.f32 %v6595_v44, %v13991_v53  ;;  %v1560_v27 = vmul.f32 1.442695, %v1528_v58  ;;  %v13993_v29 = vld [vmem:[#allocation8_spill] sm:$0xff] }
  0x78   : > { %v384_v38 = vmul.f32 %v13988_v14, %v326_v54  ;;  %v7144_v42 = vmul.f32 %v6568_v33, %v326_v54  ;;  %v827_v43 = vadd.f32 %v7124_v6, %v774_v8  ;;  %v1345_v40 = vmul.f32 %v7095_v61, %v1313_v45  ;;  %v13998_v8 = vld [vmem:[#allocation11_spill] sm:$0xff] }
  0x79   : > { %13992 = vst [vmem:[#allocation15_spill] sm:$0xff] %v7154_v31  ;;  %v1724_v46 = vadd.f32 1.0, %v1692_v4  ;;  %v542_v25 = vmul.f32 %v13993_v29, %v13984_v12  ;;  %v7163_v13 = vmul.f32 %v6620_v55, %v13984_v12  ;;  %v7167_v19 = vmul.f32 %v13988_v14, %v7024_v41 }
  0x7a   : > { %13989 = vst [vmem:[#allocation5_spill] sm:$0xff] %v7144_v42  ;;  %v404_v10 = vadd.f32 %v384_v38, %v7140_v50  ;;  %v863_v21 = vmul.f32 %v6716_v30, %v827_v43  ;;  %v1377_v52 = vadd.f32 -0.28449672, %v1345_v40  ;;  %v13996_v58 = vrot.slane %v6610_v49, 1 }
  0x7b   : > { %13994 = vst [vmem:[#allocation6_spill] sm:$0xff] %v7163_v13  ;;  %v7169_v37 = vmul.f32 %v1724_v46, %v924_v56  ;;  %v13997_v57 = vrot.slane %v13984_v12, 1  ;;  %v7179_v59 = vmul.f32 %v6688_v20, %v13998_v8  ;;  %v7181_v4 = vpop.eup %6075  ;;  %v409_v43 = vadd.f32 %v7167_v19, %v7002_v17 }
  0x7c   : > { %v457_v35 = vadd.f32 %v7144_v42, %v404_v10  ;;  %v7184_v45 = vadd.f32 %v6735_v5, %v863_v21  ;;  %v14000_v49 = vrot.slane %v6889_v60, 7  ;;  %v14001_v10 = vrot.slane %v6893_v28, 7 }
  0x7d   : > { %13995 = vst [vmem:[#allocation8_spill] sm:$0xff] %v7169_v37  ;;  %v660_v11 = vsel %vm657_vm3, %v13997_v57, %v13996_v58  ;;  %13999 = vst [vmem:[#allocation11_spill] sm:$0xff] %v7179_v59  ;;  %v1797_v46 = vsel %vm1784_vm0, %v7169_v37, -inf  ;;  %v1409_v40 = vmul.f32 %v7095_v61, %v1377_v52  ;;  %v1208_v21 = vmul.f32 1.0614054, %v7181_v4 }
  0x7e   : > { %v510_v56 = vadd.f32 %v7154_v31, %v457_v35  ;;  %v317_v53 = vsel %vm305_vm1, %v14001_v10, %v14000_v49  ;;  %1798 = vmax.xlane.f32.xlu0 %v1797_v46  ;;  %v7204_v17 = vmul.f32 0.70710677, %v7184_v45  ;;  %v462_v57 = vadd.f32 %v7041_v26, %v409_v43 }
  0x7f   : > { %v7201_v35 = vsel %vm287_vm4, %v317_v53, 0.0  ;;  %v7209_v8 = vmul.f32 %v13993_v29, %v6893_v28  ;;  %v1441_v49 = vadd.f32 0.2548296, %v1409_v40  ;;  %v1240_v10 = vadd.f32 -1.4531521, %v1208_v21 }
  0x80   : > { %v562_v58 = vadd.f32 %v542_v25, %v510_v56  ;;  %v7212_v52 = vmul.f32 %v13975_v16, %v326_v54  ;;  %v7216_v53 = vmul.f32 %v6568_v33, %v7201_v35  ;;  %v1059_v46 = vand.u32 2147483647, %v7204_v17  ;;  %v14002_v56 = vld [vmem:[#allocation9_spill] sm:$0xff] }
  0x81   : > { %v751_v34 = vmul.f32 %v14002_v56, %v660_v11  ;;  %v515_v26 = vadd.f32 %v7073_v9, %v462_v57  ;;  %v1473_v43 = vmul.f32 %v7095_v61, %v1441_v49  ;;  %v1272_v40 = vmul.f32 %v7181_v4, %v1240_v10 }
  0x82   : > { %v615_v36 = vadd.f32 %v7163_v13, %v562_v58  ;;  %6077 = vpow2.f32 %v1560_v27  ;;  %v406_v54 = vadd.f32 %v384_v38, %v7212_v52  ;;  %v1091_v21 = vmul.f32 0.3275911, %v1059_v46 }
  0x83   : > { %v7227_v18 = vmul.f32 %v6676_v15, %v660_v11  ;;  %v567_v62 = vadd.f32 %v7209_v8, %v515_v26  ;;  %v1633_v58 = vmul.f32 %v6074_v23, %v1473_v43  ;;  %v1304_v39 = vadd.f32 1.4214138, %v1272_v40 }
  0x84   : > { %v719_v37 = vadd.f32 %v7179_v59, %v615_v36  ;;  %v459_v51 = vadd.f32 %v7216_v53, %v406_v54  ;;  %v7233_v9 = vmul.f32 %v6595_v44, %v13984_v12  ;;  %v1123_v61 = vadd.f32 1.0, %v1091_v21  ;;  %v7258_v54 = vld [vmem:[%s6548_s29 + $0x40] sm:$0xff]  ;;  %v7261_v21 = vld [vmem:[%s6548_s29 + $0x48] sm:$0xff] }
  0x85   : > { %14003 = vst [vmem:[#allocation9_spill] sm:$0xff] %v7227_v18  ;;  %v620_v38 = vadd.f32 %v7091_v3, %v567_v62  ;;  %v7238_v36 = vmul.f32 %v14002_v56, %v7119_v63  ;;  %v1665_v57 = vsub.f32 1.0, %v1633_v58  ;;  %v1336_v23 = vmul.f32 %v7181_v4, %v1304_v39 }
  0x86   : > { %v771_v27 = vadd.f32 %v751_v34, %v719_v37  ;;  %v512_v49 = vadd.f32 %v7233_v9, %v459_v51  ;;  %v7244_v10 = vmul.f32 %v6620_v55, %v6889_v60  ;;  %v929_v12 = vmul.f32 0.5, %v7006_v7 }
  0x87   : > { %6079 = vrcp.f32 %v1123_v61  ;;  %v724_v62 = vadd.f32 %v7112_v2, %v620_v38  ;;  %v1697_v3 = vmul.f32 %v1665_v57, %v1025_v22  ;;  %v1368_v26 = vadd.f32 -0.28449672, %v1336_v23 }
  0x88   : > { %v824_v37 = vadd.f32 %v7227_v18, %v771_v27  ;;  %v564_v43 = vadd.f32 %v542_v25, %v512_v49  ;;  %v14004_v40 = vrot.slane %v6893_v28, 1  ;;  %v14005_v39 = vrot.slane %v6889_v60, 1 }
  0x89   : > { %v1507_v7 = vsub.f32 0.0, %v1059_v46  ;;  %v776_v2 = vadd.f32 %v7238_v36, %v724_v62  ;;  %v7266_v22 = vmul.f32 %v6688_v20, %v660_v11  ;;  %v1729_v25 = vadd.f32 1.0, %v1697_v3 }
  0x8a   : > { %v7255_v51 = vsel %vm657_vm3, %v14005_v39, %v14004_v40  ;;  %v860_v58 = vmul.f32 %v6716_v30, %v824_v37  ;;  %v1400_v61 = vmul.f32 %v7181_v4, %v1368_v26  ;;  %v617_v27 = vadd.f32 %v7244_v10, %v564_v43 }
  0x8b   : > { %v7272_v38 = vmul.f32 %v6676_v15, %v7255_v51  ;;  %v829_v23 = vadd.f32 %v7124_v6, %v776_v2  ;;  %v13616_v49 = vrot.slane %v7258_v54, 7  ;;  %v13615_v37 = vrot.slane %v7261_v21, 7 }
  0x8c   : > { %v7275_v57 = vadd.f32 %v6735_v5, %v860_v58  ;;  %v6078_v11 = vpop.eup %6077  ;;  %v7280_v62 = vmul.f32 %v1729_v25, %v929_v12  ;;  %v1432_v3 = vadd.f32 0.2548296, %v1400_v61  ;;  %v721_v26 = vadd.f32 %v7266_v22, %v617_v27 }
  0x8d   : > { %v7285_v43 = vmul.f32 %v13975_v16, %v7024_v41  ;;  %vm984_vm12 = vcmp.ge.f32.partialorder %v7067_v24, 0.0  ;;  %v865_v6 = vmul.f32 %v6716_v30, %v829_v23  ;;  %v7298_v12 = vsel %vm305_vm1, %v13616_v49, %v13615_v37 }
  0x8e   : > { %14006 = vst [vmem:[#allocation20_spill] sm:$0xff] %v7280_v62  ;;  %v7289_v40 = vmul.f32 0.70710677, %v7275_v57  ;;  %v1812_v39 = vsel %vm1784_vm0, %v7280_v62, -inf  ;;  %v1464_v41 = vmul.f32 %v7181_v4, %v1432_v3  ;;  %v1539_v58 = vmul.f32 %v1507_v7, %v1059_v46 }
  0x8f   : > { %v773_v2 = vadd.f32 %v751_v34, %v721_v26  ;;  %1813 = vmax.xlane.f32.xlu1 %v1812_v39  ;;  %v7305_v61 = vadd.f32 %v6735_v5, %v865_v6  ;;  %v411_v27 = vadd.f32 %v7167_v19, %v7285_v43  ;;  %v7311_v23 = vmul.f32 %v6568_v33, %v7298_v12 }
  0x90   : > { %v1056_v25 = vand.u32 2147483647, %v7289_v40  ;;  %v1624_v37 = vmul.f32 %v6078_v11, %v1464_v41  ;;  %v1016_v34 = vsel %vm984_vm12, 1.0, %v13973_v48  ;;  %v1582_v26 = vmul.f32 1.442695, %v1539_v58 }
  0x91   : > { %v826_v49 = vadd.f32 %v7272_v38, %v773_v2  ;;  %v7314_v62 = vpop.eup %6079  ;;  %v7320_v7 = vmul.f32 0.70710677, %v7305_v61  ;;  %v464_v41 = vadd.f32 %v7311_v23, %v411_v27  ;;  %v7328_v24 = vmul.f32 %v6595_v44, %v6893_v28 }
  0x92   : > { %v1088_v4 = vmul.f32 0.3275911, %v1056_v25  ;;  %v1504_v46 = vsub.f32 0.0, %v1056_v25  ;;  %v1656_v3 = vsub.f32 1.0, %v1624_v37  ;;  %v1219_v19 = vmul.f32 1.0614054, %v7314_v62 }
  0x93   : > { %v862_v6 = vmul.f32 %v6716_v30, %v826_v49  ;;  %v1061_v39 = vand.u32 2147483647, %v7320_v7  ;;  %v920_v2 = vmul.f32 0.5, %v7052_v47  ;;  %v517_v47 = vadd.f32 %v7328_v24, %v464_v41 }
  0x94   : > { %v1120_v11 = vadd.f32 1.0, %v1088_v4  ;;  %v1688_v0 = vmul.f32 %v1656_v3, %v1016_v34  ;;  %v1251_v18 = vadd.f32 -1.4531521, %v1219_v19  ;;  %v1536_v58 = vmul.f32 %v1504_v46, %v1056_v25 }
  0x95   : > { %v7332_v37 = vadd.f32 %v6735_v5, %v862_v6  ;;  %v1093_v59 = vmul.f32 0.3275911, %v1061_v39  ;;  %v1509_v49 = vsub.f32 0.0, %v1061_v39  ;;  %v7343_v25 = vmul.f32 0.5, %v7184_v45 }
  0x96   : > { %6081 = vrcp.f32 %v1120_v11  ;;  %v1720_v4 = vadd.f32 1.0, %v1688_v0  ;;  %v1283_v13 = vmul.f32 %v7314_v62, %v1251_v18  ;;  %v1576_v46 = vmul.f32 1.442695, %v1536_v58 }
  0x97   : > { %v7336_v27 = vmul.f32 0.70710677, %v7332_v37  ;;  %6083 = vpow2.f32 %v1582_v26  ;;  %v1125_v28 = vadd.f32 1.0, %v1093_v59  ;;  %v1541_v31 = vmul.f32 %v1509_v49, %v1061_v39 }
  0x98   : > { %v7339_v34 = vmul.f32 %v1720_v4, %v920_v2  ;;  %v1315_v3 = vadd.f32 1.4214138, %v1283_v13  ;;  %v569_v0 = vadd.f32 %v7209_v8, %v517_v47  ;;  %vm995_vm13 = vcmp.ge.f32.partialorder %v7204_v17, 0.0 }
  0x99   : > { %v1058_v19 = vand.u32 2147483647, %v7336_v27  ;;  %6085 = vrcp.f32 %v1125_v28  ;;  %v1586_v6 = vmul.f32 1.442695, %v1541_v31  ;;  %v7352_v13 = vmul.f32 %v6620_v55, %v7261_v21 }
  0x9a   : > { %14007 = vst [vmem:[#allocation21_spill] sm:$0xff] %v7339_v34  ;;  %v1785_v18 = vsel %vm1784_vm0, %v7339_v34, -inf  ;;  %v1347_v59 = vmul.f32 %v7314_v62, %v1315_v3  ;;  %v13623_v45 = vrot.slane %v7258_v54, 1  ;;  %v13624_v11 = vrot.slane %v7261_v21, 1 }
  0x9b   : > { %v1090_v26 = vmul.f32 0.3275911, %v1058_v19  ;;  %1786 = vmax.xlane.f32.xlu0 %v1785_v18  ;;  %v1506_v41 = vsub.f32 0.0, %v1058_v19  ;;  %v7358_v2 = vmul.f32 %v6688_v20, %v7119_v63  ;;  %6087 = vpow2.f32 %v1576_v46 }
  0x9c   : > { %v1379_v39 = vadd.f32 -0.28449672, %v1347_v59  ;;  %v622_v58 = vadd.f32 %v7352_v13, %v569_v0  ;;  %v670_v31 = vsel %vm657_vm3, %v13624_v11, %v13623_v45  ;;  %v386_v49 = vmul.f32 %v13988_v14, %v7201_v35 }
  0x9d   : > { %v1122_v8 = vadd.f32 1.0, %v1090_v26  ;;  %v1027_v4 = vsel %vm995_vm13, 1.0, %v13973_v48  ;;  %v7375_v28 = vsel %vm640_vm2, %v670_v31, 0.0  ;;  %v1538_v59 = vmul.f32 %v1506_v41, %v1058_v19 }
  0x9e   : > { %v1411_v63 = vmul.f32 %v7314_v62, %v1379_v39  ;;  %v726_v3 = vadd.f32 %v7358_v2, %v622_v58  ;;  %v7382_v46 = vmul.f32 %v6676_v15, %v7375_v28  ;;  %v408_v0 = vadd.f32 %v386_v49, %v7212_v52 }
  0x9f   : > { %6089 = vrcp.f32 %v1122_v8  ;;  %v7388_v26 = vmul.f32 %v13988_v14, %v7298_v12  ;;  %v7394_v58 = vmul.f32 %v13993_v29, %v6889_v60  ;;  %v7398_v52 = vmul.f32 %v13993_v29, %v7261_v21 }
  0xa0   : > { %v7377_v47 = vpop.eup %6081  ;;  %6091 = vpow2.f32 %v1586_v6  ;;  %v1443_v17 = vadd.f32 0.2548296, %v1411_v63  ;;  %v778_v8 = vadd.f32 %v7238_v36, %v726_v3  ;;  %v461_v6 = vadd.f32 %v7216_v53, %v408_v0 }
  0xa1   : > { %v1216_v18 = vmul.f32 1.0614054, %v7377_v47  ;;  %v6084_v39 = vpop.eup %6083  ;;  %v413_v41 = vadd.f32 %v7388_v26, %v7285_v43  ;;  %v14008_v63 = vrot.slane %v7258_v54, 7  ;;  %v14009_v36 = vrot.slane %v7261_v21, 7 }
  0xa2   : > { %v1475_v31 = vmul.f32 %v7314_v62, %v1443_v17  ;;  %v831_v0 = vadd.f32 %v7382_v46, %v778_v8  ;;  %v514_v45 = vadd.f32 %v7233_v9, %v461_v6  ;;  %v7419_v43 = vmul.f32 %v13975_v16, %v7201_v35 }
  0xa3   : > { %v1248_v19 = vadd.f32 -1.4531521, %v1216_v18  ;;  %v318_v53 = vsel %vm305_vm1, %v14009_v36, %v14008_v63  ;;  %v7409_v3 = vpop.eup %6085  ;;  %v466_v63 = vadd.f32 %v7311_v23, %v413_v41  ;;  %vm992_vm14 = vcmp.ge.f32.partialorder %v7289_v40, 0.0 }
  0xa4   : > { %v7415_v62 = vsel %vm287_vm4, %v318_v53, 0.0  ;;  %v1635_v17 = vmul.f32 %v6084_v39, %v1475_v31  ;;  %v1221_v11 = vmul.f32 1.0614054, %v7409_v3  ;;  %v1580_v8 = vmul.f32 1.442695, %v1538_v59 }
  0xa5   : > { %v1280_v18 = vmul.f32 %v7377_v47, %v1248_v19  ;;  %v867_v9 = vmul.f32 %v6716_v30, %v831_v0  ;;  %v566_v6 = vadd.f32 %v7394_v58, %v514_v45  ;;  %v7429_v36 = vmul.f32 %v14002_v56, %v7255_v51  ;;  %v6088_v19 = vpop.eup %6087 }
  0xa6   : > { %v1667_v35 = vsub.f32 1.0, %v1635_v17  ;;  %v1253_v39 = vadd.f32 -1.4531521, %v1221_v11  ;;  %v519_v31 = vadd.f32 %v7328_v24, %v466_v63  ;;  %v410_v59 = vadd.f32 %v386_v49, %v7419_v43 }
  0xa7   : > { %v1312_v53 = vadd.f32 1.4214138, %v1280_v18  ;;  %v7433_v34 = vadd.f32 %v6735_v5, %v867_v9  ;;  %v619_v23 = vadd.f32 %v7244_v10, %v566_v6  ;;  %v7439_v45 = vmul.f32 %v6568_v33, %v7415_v62 }
  0xa8   : > { %v1699_v0 = vmul.f32 %v1667_v35, %v1027_v4  ;;  %v1285_v11 = vmul.f32 %v7409_v3, %v1253_v39  ;;  %v571_v24 = vadd.f32 %v7398_v52, %v519_v31  ;;  %6093 = vpow2.f32 %v1580_v8 }
  0xa9   : > { %v7441_v41 = vpop.eup %6089  ;;  %v1344_v17 = vmul.f32 %v7377_v47, %v1312_v53  ;;  %v7448_v10 = vmul.f32 0.70710677, %v7433_v34  ;;  %v723_v49 = vadd.f32 %v7266_v22, %v619_v23  ;;  %v7456_v31 = vmul.f32 %v14002_v56, %v7375_v28 }
  0xaa   : > { %v6092_v18 = vpop.eup %6091  ;;  %v1218_v63 = vmul.f32 1.0614054, %v7441_v41  ;;  %v1731_v9 = vadd.f32 1.0, %v1699_v0  ;;  %v1317_v42 = vadd.f32 1.4214138, %v1285_v11  ;;  %v624_v4 = vadd.f32 %v7352_v13, %v571_v24 }
  0xab   : > { %v1376_v6 = vadd.f32 -0.28449672, %v1344_v17  ;;  %v1063_v53 = vand.u32 2147483647, %v7448_v10  ;;  %v775_v39 = vadd.f32 %v7429_v36, %v723_v49  ;;  %v463_v23 = vadd.f32 %v7439_v45, %v410_v59 }
  0xac   : > { %v1250_v35 = vadd.f32 -1.4531521, %v1218_v63  ;;  %v7459_v8 = vmul.f32 %v1731_v9, %v7343_v25  ;;  %v1349_v22 = vmul.f32 %v7409_v3, %v1317_v42  ;;  %v7468_v11 = vmul.f32 %v6595_v44, %v6889_v60 }
  0xad   : > { %v1408_v50 = vmul.f32 %v7377_v47, %v1376_v6  ;;  %v1095_v0 = vmul.f32 0.3275911, %v1063_v53  ;;  %v828_v17 = vadd.f32 %v7272_v38, %v775_v39  ;;  %v728_v49 = vadd.f32 %v7358_v2, %v624_v4 }
  0xae   : > { %14010 = vst [vmem:[#allocation22_spill] sm:$0xff] %v7459_v8  ;;  %v1282_v13 = vmul.f32 %v7441_v41, %v1250_v35  ;;  %v1818_v24 = vsel %vm1784_vm0, %v7459_v8, -inf  ;;  %v1381_v63 = vadd.f32 -0.28449672, %v1349_v22  ;;  %v928_v42 = vmul.f32 0.5, %v7275_v57 }
  0xaf   : > { %v1440_v25 = vadd.f32 0.2548296, %v1408_v50  ;;  %1819 = vmax.xlane.f32.xlu1 %v1818_v24  ;;  %v1127_v9 = vadd.f32 1.0, %v1095_v0  ;;  %v864_v6 = vmul.f32 %v6716_v30, %v828_v17  ;;  %v1024_v38 = vsel %vm992_vm14, 1.0, %v13973_v48 }
  0xb0   : > { %v1314_v59 = vadd.f32 1.4214138, %v1282_v13  ;;  %v1413_v35 = vmul.f32 %v7409_v3, %v1381_v63  ;;  %v780_v50 = vadd.f32 %v7456_v31, %v728_v49  ;;  %v516_v57 = vadd.f32 %v7468_v11, %v463_v23 }
  0xb1   : > { %v1472_v60 = vmul.f32 %v7377_v47, %v1440_v25  ;;  %6095 = vrcp.f32 %v1127_v9  ;;  %v7483_v2 = vadd.f32 %v6735_v5, %v864_v6  ;;  %v933_v22 = vmul.f32 0.5, %v7305_v61 }
  0xb2   : > { %v1346_v39 = vmul.f32 %v7441_v41, %v1314_v59  ;;  %v1445_v13 = vadd.f32 0.2548296, %v1413_v35  ;;  %v833_v40 = vadd.f32 %v7382_v46, %v780_v50  ;;  %v6094_v0 = vpop.eup %6093  ;;  %vm997_vm15 = vcmp.ge.f32.partialorder %v7320_v7, 0.0 }
  0xb3   : > { %v1632_v4 = vmul.f32 %v6088_v19, %v1472_v60  ;;  %v1511_v17 = vsub.f32 0.0, %v1063_v53  ;;  %v7490_v24 = vmul.f32 0.70710677, %v7483_v2  ;;  %vm994_vm5 = vcmp.ge.f32.partialorder %v7336_v27, 0.0 }
  0xb4   : > { %v1378_v47 = vadd.f32 -0.28449672, %v1346_v39  ;;  %v1477_v63 = vmul.f32 %v7409_v3, %v1445_v13  ;;  %v869_v19 = vmul.f32 %v6716_v30, %v833_v40  ;;  %v568_v46 = vadd.f32 %v7394_v58, %v516_v57 }
  0xb5   : > { %v1664_v25 = vsub.f32 1.0, %v1632_v4  ;;  %v1060_v23 = vand.u32 2147483647, %v7490_v24  ;;  %v7500_v7 = vmul.f32 %v6620_v55, %v7258_v54  ;;  %v1029_v59 = vsel %vm997_vm15, 1.0, %v13973_v48 }
  0xb6   : > { %v1410_v61 = vmul.f32 %v7441_v41, %v1378_v47  ;;  %v1637_v9 = vmul.f32 %v6092_v18, %v1477_v63  ;;  %v7504_v3 = vadd.f32 %v6735_v5, %v869_v19  ;;  %v930_v6 = vmul.f32 0.5, %v7332_v37 }
  0xb7   : > { %v1696_v49 = vmul.f32 %v1664_v25, %v1024_v38  ;;  %v1543_v35 = vmul.f32 %v1511_v17, %v1063_v53  ;;  %v1092_v50 = vmul.f32 0.3275911, %v1060_v23  ;;  %v1026_v58 = vsel %vm994_vm5, 1.0, %v13973_v48 }
  0xb8   : > { %v1442_v60 = vadd.f32 0.2548296, %v1410_v61  ;;  %v1669_v4 = vsub.f32 1.0, %v1637_v9  ;;  %v7511_v38 = vmul.f32 0.70710677, %v7504_v3  ;;  %v621_v13 = vadd.f32 %v7500_v7, %v568_v46 }
  0xb9   : > { %v1728_v39 = vadd.f32 1.0, %v1696_v49  ;;  %v1124_v57 = vadd.f32 1.0, %v1092_v50  ;;  %v7517_v37 = vmul.f32 %v6688_v20, %v7255_v51  ;;  %v7522_v47 = vmul.f32 0.5, %v7433_v34 }
  0xba   : > { %v1474_v18 = vmul.f32 %v7441_v41, %v1442_v60  ;;  %v1701_v40 = vmul.f32 %v1669_v4, %v1029_v59  ;;  %v1065_v27 = vand.u32 2147483647, %v7511_v38  ;;  %v1590_v41 = vmul.f32 1.442695, %v1543_v35  ;;  %v7543_v35 = vld [vmem:[%s6548_s29 + $0x58] sm:$0xff] }
  0xbb   : > { %v7519_v53 = vmul.f32 %v1728_v39, %v928_v42  ;;  %v7525_v17 = vpop.eup %6095  ;;  %6097 = vrcp.f32 %v1124_v57  ;;  %v14012_v63 = vrot.slane %v7261_v21, 1  ;;  %v14013_v19 = vrot.slane %v7258_v54, 1  ;;  %v7536_v42 = vld [vmem:[%s6548_s29 + $0x50] sm:$0xff] }
  0xbc   : > { %v1634_v25 = vmul.f32 %v6094_v0, %v1474_v18  ;;  %v1733_v61 = vadd.f32 1.0, %v1701_v40  ;;  %v1223_v46 = vmul.f32 1.0614054, %v7525_v17  ;;  %v1097_v49 = vmul.f32 0.3275911, %v1065_v27 }
  0xbd   : > { %14011 = vst [vmem:[#allocation23_spill] sm:$0xff] %v7519_v53  ;;  %v7533_v51 = vsel %vm657_vm3, %v14013_v19, %v14012_v63  ;;  %v1809_v34 = vsel %vm1784_vm0, %v7519_v53, -inf  ;;  %v1508_v59 = vsub.f32 0.0, %v1060_v23  ;;  %v1513_v9 = vsub.f32 0.0, %v1065_v27 }
  0xbe   : > { %1810 = vmax.xlane.f32.xlu0 %v1809_v34  ;;  %v1666_v0 = vsub.f32 1.0, %v1634_v25  ;;  %v725_v60 = vadd.f32 %v7517_v37, %v621_v13  ;;  %v7545_v50 = vmul.f32 %v1733_v61, %v933_v22  ;;  %v1255_v39 = vadd.f32 -1.4531521, %v1223_v46 }
  0xbf   : > { %v1129_v4 = vadd.f32 1.0, %v1097_v49  ;;  %v7549_v18 = vmul.f32 %v6676_v15, %v7533_v51  ;;  %vm999_vm6 = vcmp.ge.f32.partialorder %v7448_v10, 0.0  ;;  %v13631_v25 = vrot.slane %v7536_v42, 7 }
  0xc0   : > { %14014 = vst [vmem:[#allocation24_spill] sm:$0xff] %v7545_v50  ;;  %v1698_v57 = vmul.f32 %v1666_v0, %v1026_v58  ;;  %v777_v40 = vadd.f32 %v7429_v36, %v725_v60  ;;  %v1824_v13 = vsel %vm1784_vm0, %v7545_v50, -inf  ;;  %v1287_v63 = vmul.f32 %v7525_v17, %v1255_v39 }
  0xc1   : > { %6099 = vrcp.f32 %v1129_v4  ;;  %v13630_v22 = vrot.slane %v7543_v35, 7  ;;  %1825 = vmax.xlane.f32.xlu1 %v1824_v13  ;;  %v7561_v58 = vmul.f32 %v13975_v16, %v7298_v12  ;;  %v1540_v61 = vmul.f32 %v1508_v59, %v1060_v23 }
  0xc2   : > { %v1730_v19 = vadd.f32 1.0, %v1698_v57  ;;  %6101 = vpow2.f32 %v1590_v41  ;;  %v830_v34 = vadd.f32 %v7549_v18, %v777_v40  ;;  %v1319_v36 = vadd.f32 1.4214138, %v1287_v63 }
  0xc3   : > { %v1545_v46 = vmul.f32 %v1513_v9, %v1065_v27  ;;  %v7569_v49 = vsel %vm305_vm1, %v13631_v25, %v13630_v22  ;;  %v415_v60 = vadd.f32 %v7388_v26, %v7561_v58  ;;  %v7578_v12 = vmul.f32 %v6595_v44, %v7261_v21 }
  0xc4   : > { %v7571_v0 = vmul.f32 %v1730_v19, %v930_v6  ;;  %v866_v41 = vmul.f32 %v6716_v30, %v830_v34  ;;  %v1351_v23 = vmul.f32 %v7525_v17, %v1319_v36  ;;  %v443_v27 = vmul.f32 %v6568_v33, %v7569_v49 }
  0xc5   : > { %v13628_v59 = vrot.slane %v7536_v42, 1  ;;  %v13629_v9 = vrot.slane %v7543_v35, 1  ;;  %v7585_v6 = vpop.eup %6097  ;;  %v1031_v26 = vsel %vm999_vm6, 1.0, %v13973_v48  ;;  %v7597_v4 = vmul.f32 %v13988_v14, %v7415_v62 }
  0xc6   : > { %14015 = vst [vmem:[#allocation25_spill] sm:$0xff] %v7571_v0  ;;  %v1815_v39 = vsel %vm1784_vm0, %v7571_v0, -inf  ;;  %v7593_v21 = vadd.f32 %v6735_v5, %v866_v41  ;;  %v1383_v57 = vadd.f32 -0.28449672, %v1351_v23  ;;  %v1220_v40 = vmul.f32 1.0614054, %v7585_v6 }
  0xc7   : > { %1816 = vmax.xlane.f32.xlu0 %v1815_v39  ;;  %v1584_v13 = vmul.f32 1.442695, %v1540_v61  ;;  %v468_v63 = vadd.f32 %v443_v27, %v415_v60  ;;  %v1594_v19 = vmul.f32 1.442695, %v1545_v46  ;;  %v671_v10 = vsel %vm657_vm3, %v13629_v9, %v13628_v59 }
  0xc8   : > { %v7601_v34 = vmul.f32 0.70710677, %v7593_v21  ;;  %v412_v36 = vadd.f32 %v7597_v4, %v7419_v43  ;;  %v1415_v41 = vmul.f32 %v7525_v17, %v1383_v57  ;;  %v1252_v23 = vadd.f32 -1.4531521, %v1220_v40 }
  0xc9   : > { %v521_v61 = vadd.f32 %v7578_v12, %v468_v63  ;;  %v7615_v46 = vmul.f32 %v6620_v55, %v7543_v35  ;;  %v7620_v39 = vmul.f32 %v6688_v20, %v7375_v28  ;;  %v7625_v43 = vmul.f32 %v13993_v29, %v7258_v54 }
  0xca   : > { %v1062_v60 = vand.u32 2147483647, %v7601_v34  ;;  %v465_v59 = vadd.f32 %v7439_v45, %v412_v36  ;;  %v1447_v40 = vadd.f32 0.2548296, %v1415_v41  ;;  %v1284_v63 = vmul.f32 %v7585_v6, %v1252_v23 }
  0xcb   : > { %v7627_v57 = vpop.eup %6099  ;;  %v573_v9 = vadd.f32 %v7398_v52, %v521_v61  ;;  %v7633_v22 = vsel %vm640_vm2, %v671_v10, 0.0  ;;  %6103 = vpow2.f32 %v1584_v13  ;;  %vm996_vm7 = vcmp.ge.f32.partialorder %v7490_v24, 0.0 }
  0xcc   : > { %v6102_v25 = vpop.eup %6101  ;;  %v1225_v28 = vmul.f32 1.0614054, %v7627_v57  ;;  %v1094_v45 = vmul.f32 0.3275911, %v1062_v60  ;;  %v518_v36 = vadd.f32 %v7468_v11, %v465_v59  ;;  %v1479_v0 = vmul.f32 %v7525_v17, %v1447_v40 }
  0xcd   : > { %v1316_v53 = vadd.f32 1.4214138, %v1284_v63  ;;  %6105 = vpow2.f32 %v1594_v19  ;;  %v626_v41 = vadd.f32 %v7615_v46, %v573_v9  ;;  %v7641_v52 = vmul.f32 %v6676_v15, %v7633_v22 }
  0xce   : > { %v1257_v23 = vadd.f32 -1.4531521, %v1225_v28  ;;  %v1126_v50 = vadd.f32 1.0, %v1094_v45  ;;  %v570_v10 = vadd.f32 %v7625_v43, %v518_v36  ;;  %v1639_v13 = vmul.f32 %v6102_v25, %v1479_v0 }
  0xcf   : > { %v1348_v61 = vmul.f32 %v7585_v6, %v1316_v53  ;;  %v730_v8 = vadd.f32 %v7620_v39, %v626_v41  ;;  %v7648_v11 = vmul.f32 %v13988_v14, %v7569_v49  ;;  %v7654_v9 = vmul.f32 %v14002_v56, %v7533_v51 }
  0xd0   : > { %v1289_v17 = vmul.f32 %v7627_v57, %v1257_v23  ;;  %6107 = vrcp.f32 %v1126_v50  ;;  %v623_v59 = vadd.f32 %v7500_v7, %v570_v10  ;;  %v1671_v19 = vsub.f32 1.0, %v1639_v13 }
  0xd1   : > { %v1380_v40 = vadd.f32 -0.28449672, %v1348_v61  ;;  %v782_v25 = vadd.f32 %v7456_v31, %v730_v8  ;;  %v417_v53 = vadd.f32 %v7648_v11, %v7561_v58  ;;  %v1510_v63 = vsub.f32 0.0, %v1062_v60 }
  0xd2   : > { %v1321_v0 = vadd.f32 1.4214138, %v1289_v17  ;;  %v727_v28 = vadd.f32 %v7517_v37, %v623_v59  ;;  %v7662_v50 = vmul.f32 %v13993_v29, %v7543_v35  ;;  %v1703_v7 = vmul.f32 %v1671_v19, %v1031_v26 }
  0xd3   : > { %v1412_v45 = vmul.f32 %v7585_v6, %v1380_v40  ;;  %v835_v36 = vadd.f32 %v7641_v52, %v782_v25  ;;  %v470_v41 = vadd.f32 %v443_v27, %v417_v53  ;;  %v1542_v26 = vmul.f32 %v1510_v63, %v1062_v60 }
  0xd4   : > { %v1353_v31 = vmul.f32 %v7627_v57, %v1321_v0  ;;  %v779_v8 = vadd.f32 %v7654_v9, %v727_v28  ;;  %v1735_v58 = vadd.f32 1.0, %v1703_v7  ;;  %v14016_v59 = vrot.slane %v7536_v42, 7 }
  0xd5   : > { %v1444_v23 = vadd.f32 0.2548296, %v1412_v45  ;;  %v871_v37 = vmul.f32 %v6716_v30, %v835_v36  ;;  %v523_v10 = vadd.f32 %v7578_v12, %v470_v41  ;;  %v6104_v13 = vpop.eup %6103  ;;  %v14017_v27 = vrot.slane %v7543_v35, 7 }
  0xd6   : > { %v1385_v61 = vadd.f32 -0.28449672, %v1353_v31  ;;  %v832_v17 = vadd.f32 %v7549_v18, %v779_v8  ;;  %v7679_v25 = vmul.f32 %v1735_v58, %v7522_v47  ;;  %v1028_v18 = vsel %vm996_vm7, 1.0, %v13973_v48 }
  0xd7   : > { %v319_v19 = vsel %vm305_vm1, %v14017_v27, %v14016_v59  ;;  %v6106_v40 = vpop.eup %6105  ;;  %v1476_v53 = vmul.f32 %v7585_v6, %v1444_v23  ;;  %v7683_v12 = vadd.f32 %v6735_v5, %v871_v37  ;;  %v575_v60 = vadd.f32 %v7662_v50, %v523_v10 }
  0xd8   : > { %14018 = vst [vmem:[#allocation26_spill] sm:$0xff] %v7679_v25  ;;  %v1417_v0 = vmul.f32 %v7627_v57, %v1385_v61  ;;  %v868_v63 = vmul.f32 %v6716_v30, %v832_v17  ;;  %v7693_v28 = vmul.f32 %v13975_v16, %v7415_v62  ;;  %v1830_v47 = vsel %vm1784_vm0, %v7679_v25, -inf }
  0xd9   : > { %v1636_v6 = vmul.f32 %v6104_v13, %v1476_v53  ;;  %v7698_v7 = vmul.f32 0.70710677, %v7683_v12  ;;  %v7702_v45 = vsel %vm287_vm4, %v319_v19, 0.0  ;;  %1831 = vmax.xlane.f32.xlu1 %v1830_v47  ;;  %v1588_v41 = vmul.f32 1.442695, %v1542_v26 }
  0xda   : > { %v7704_v24 = vpop.eup %6107  ;;  %v1449_v36 = vadd.f32 0.2548296, %v1417_v0  ;;  %v7707_v31 = vadd.f32 %v6735_v5, %v868_v63  ;;  %v628_v62 = vadd.f32 %v7615_v46, %v575_v60  ;;  %vm1001_vm8 = vcmp.ge.f32.partialorder %v7511_v38, 0.0 }
  0xdb   : > { %v1668_v8 = vsub.f32 1.0, %v1636_v6  ;;  %v1222_v58 = vmul.f32 1.0614054, %v7704_v24  ;;  %v1067_v23 = vand.u32 2147483647, %v7698_v7  ;;  %v414_v13 = vadd.f32 %v7597_v4, %v7693_v28 }
  0xdc   : > { %v1481_v37 = vmul.f32 %v7627_v57, %v1449_v36  ;;  %v7715_v10 = vmul.f32 0.70710677, %v7707_v31  ;;  %v7721_v61 = vmul.f32 %v6568_v33, %v7702_v45  ;;  %v932_v46 = vmul.f32 0.5, %v7483_v2 }
  0xdd   : > { %v1700_v26 = vmul.f32 %v1668_v8, %v1028_v18  ;;  %v1254_v17 = vadd.f32 -1.4531521, %v1222_v58  ;;  %v1099_v59 = vmul.f32 0.3275911, %v1067_v23  ;;  %v732_v57 = vadd.f32 %v7620_v39, %v628_v62 }
  0xde   : > { %v1641_v27 = vmul.f32 %v6106_v40, %v1481_v37  ;;  %v1064_v19 = vand.u32 2147483647, %v7715_v10  ;;  %v7728_v53 = vmul.f32 %v14002_v56, %v7633_v22  ;;  %v1033_v4 = vsel %vm1001_vm8, 1.0, %v13973_v48 }
  0xdf   : > { %v1732_v60 = vadd.f32 1.0, %v1700_v26  ;;  %v1286_v0 = vmul.f32 %v7704_v24, %v1254_v17  ;;  %v1131_v2 = vadd.f32 1.0, %v1099_v59  ;;  %6109 = vpow2.f32 %v1588_v41 }
  0xe0   : > { %v1673_v18 = vsub.f32 1.0, %v1641_v27  ;;  %v1096_v63 = vmul.f32 0.3275911, %v1064_v19  ;;  %v467_v40 = vadd.f32 %v7721_v61, %v414_v13  ;;  %v1515_v6 = vsub.f32 0.0, %v1067_v23 }
  0xe1   : > { %v7735_v47 = vmul.f32 %v1732_v60, %v932_v46  ;;  %v1318_v39 = vadd.f32 1.4214138, %v1286_v0  ;;  %6111 = vrcp.f32 %v1131_v2  ;;  %v937_v36 = vmul.f32 0.5, %v7504_v3  ;;  %v14021_v0 = vld [vmem:[#allocation7_spill] sm:$0xff] }
  0xe2   : > { %v1705_v62 = vmul.f32 %v1673_v18, %v1033_v4  ;;  %v1128_v8 = vadd.f32 1.0, %v1096_v63  ;;  %v784_v38 = vadd.f32 %v7728_v53, %v732_v57  ;;  %v494_v41 = vmul.f32 %v6595_v44, %v7258_v54 }
  0xe3   : > { %14019 = vst [vmem:[#allocation27_spill] sm:$0xff] %v7735_v47  ;;  %v1821_v58 = vsel %vm1784_vm0, %v7735_v47, -inf  ;;  %v1350_v37 = vmul.f32 %v7704_v24, %v1318_v39  ;;  %v7745_v46 = vmul.f32 0.5, %v7593_v21  ;;  %v1547_v17 = vmul.f32 %v1515_v6, %v1067_v23  ;;  %v14022_v23 = vld [vmem:[#allocation12_spill] sm:$0xff] }
  0xe4   : > { %1822 = vmax.xlane.f32.xlu0 %v1821_v58  ;;  %v1737_v13 = vadd.f32 1.0, %v1705_v62  ;;  %6113 = vrcp.f32 %v1128_v8  ;;  %v837_v3 = vadd.f32 %v7641_v52, %v784_v38  ;;  %v520_v59 = vadd.f32 %v494_v41, %v467_v40  ;;  %v14025_v8 = vld [vmem:[#allocation5_spill] sm:$0xff] }
  0xe5   : > { %v1382_v26 = vadd.f32 -0.28449672, %v1350_v37  ;;  %v600_v27 = vmul.f32 %v6620_v55, %v7536_v42  ;;  %vm998_vm9 = vcmp.ge.f32.partialorder %v7601_v34, 0.0  ;;  %v1512_v60 = vsub.f32 0.0, %v1064_v19 }
  0xe6   : > { %v7750_v57 = vmul.f32 %v1737_v13, %v937_v36  ;;  %v873_v54 = vmul.f32 %v6716_v30, %v837_v3  ;;  %v572_v21 = vadd.f32 %v7625_v43, %v520_v59  ;;  %v703_v52 = vmul.f32 %v6688_v20, %v7533_v51 }
  0xe7   : > { %v1414_v4 = vmul.f32 %v7704_v24, %v1382_v26  ;;  %v402_v2 = vadd.f32 %v14022_v23, %v14021_v0  ;;  %v14023_v40 = vrot.slane %v7543_v35, 1  ;;  %v14024_v39 = vrot.slane %v7536_v42, 1 }
  0xe8   : > { %14020 = vst [vmem:[#allocation28_spill] sm:$0xff] %v7750_v57  ;;  %v1836_v18 = vsel %vm1784_vm0, %v7750_v57, -inf  ;;  %v7763_v63 = vadd.f32 %v6735_v5, %v873_v54  ;;  %v7775_v51 = vmul.f32 %v13988_v14, %v7702_v45  ;;  %v1598_v36 = vmul.f32 1.442695, %v1547_v17 }
  0xe9   : > { %v7771_v6 = vsel %vm657_vm3, %v14024_v39, %v14023_v40  ;;  %1837 = vmax.xlane.f32.xlu1 %v1836_v18  ;;  %v1446_v43 = vadd.f32 0.2548296, %v1414_v4  ;;  %v625_v62 = vadd.f32 %v600_v27, %v572_v21  ;;  %v455_v38 = vadd.f32 %v14025_v8, %v402_v2  ;;  %v6110_v58 = vpop.eup %6109  ;;  %v14026_v21 = vld [vmem:[#allocation15_spill] sm:$0xff]  ;;  %v14027_v2 = vld [vmem:[#allocation13_spill] sm:$0xff] }
  0xea   : > { %v1030_v37 = vsel %vm998_vm9, 1.0, %v13973_v48  ;;  %v1544_v13 = vmul.f32 %v1512_v60, %v1064_v19  ;;  %v7782_v3 = vmul.f32 0.70710677, %v7763_v63  ;;  %v416_v26 = vadd.f32 %v7775_v51, %v7693_v28 }
  0xeb   : > { %v7786_v59 = vpop.eup %6111  ;;  %v1478_v54 = vmul.f32 %v7704_v24, %v1446_v43  ;;  %v729_v17 = vadd.f32 %v703_v52, %v625_v62  ;;  %v809_v4 = vmul.f32 %v6676_v15, %v7771_v6  ;;  %v508_v0 = vadd.f32 %v14026_v21, %v455_v38 }
  0xec   : > { %v1227_v34 = vmul.f32 1.0614054, %v7786_v59  ;;  %v1069_v19 = vand.u32 2147483647, %v7782_v3  ;;  %v469_v60 = vadd.f32 %v7721_v61, %v416_v26  ;;  %v7797_v23 = vmul.f32 %v13993_v29, %v7536_v42  ;;  %v14028_v26 = vld [vmem:[#allocation6_spill] sm:$0xff] }
  0xed   : > { %v1638_v28 = vmul.f32 %v6110_v58, %v1478_v54  ;;  %6115 = vpow2.f32 %v1598_v36  ;;  %v781_v24 = vadd.f32 %v7654_v9, %v729_v17  ;;  %v560_v18 = vadd.f32 %v14027_v2, %v508_v0  ;;  %v14029_v17 = vld [vmem:[#allocation11_spill] sm:$0xff] }
  0xee   : > { %v7801_v40 = vpop.eup %6113  ;;  %v1259_v39 = vadd.f32 -1.4531521, %v1227_v34  ;;  %v1592_v43 = vmul.f32 1.442695, %v1544_v13  ;;  %v1101_v62 = vmul.f32 0.3275911, %v1069_v19  ;;  %v522_v8 = vadd.f32 %v494_v41, %v469_v60 }
  0xef   : > { %v1670_v38 = vsub.f32 1.0, %v1638_v28  ;;  %v1224_v21 = vmul.f32 1.0614054, %v7801_v40  ;;  %v834_v61 = vadd.f32 %v809_v4, %v781_v24  ;;  %v613_v47 = vadd.f32 %v14028_v26, %v560_v18 }
  0xf0   : > { %v1291_v57 = vmul.f32 %v7786_v59, %v1259_v39  ;;  %v1133_v58 = vadd.f32 1.0, %v1101_v62  ;;  %v574_v36 = vadd.f32 %v7797_v23, %v522_v8  ;;  %v7809_v9 = vmul.f32 %v14002_v56, %v7771_v6  ;;  %v14030_v39 = vld [vmem:[#allocation14_spill] sm:$0xff] }
  0xf1   : > { %v1702_v54 = vmul.f32 %v1670_v38, %v1030_v37  ;;  %v1256_v13 = vadd.f32 -1.4531521, %v1224_v21  ;;  %v870_v41 = vmul.f32 %v6716_v30, %v834_v61  ;;  %v717_v0 = vadd.f32 %v14029_v17, %v613_v47  ;;  %v7820_v38 = vld [vmem:[%s6548_s29 + $0x60] sm:$0xff]  ;;  %v7830_v21 = vld [vmem:[%s6548_s29 + $0x68] sm:$0xff] }
  0xf2   : > { %v1323_v34 = vadd.f32 1.4214138, %v1291_v57  ;;  %6117 = vrcp.f32 %v1133_v58  ;;  %v1517_v60 = vsub.f32 0.0, %v1069_v19  ;;  %v627_v28 = vadd.f32 %v600_v27, %v574_v36  ;;  %v14032_v58 = vld [vmem:[#allocation9_spill] sm:$0xff] }
  0xf3   : > { %v1734_v24 = vadd.f32 1.0, %v1702_v54  ;;  %v1288_v2 = vmul.f32 %v7801_v40, %v1256_v13  ;;  %v7815_v18 = vadd.f32 %v6735_v5, %v870_v41  ;;  %v769_v62 = vadd.f32 %v14030_v39, %v717_v0 }
  0xf4   : > { %v1355_v37 = vmul.f32 %v7786_v59, %v1323_v34  ;;  %6119 = vpow2.f32 %v1592_v43  ;;  %v731_v8 = vadd.f32 %v703_v52, %v627_v28  ;;  %vm1003_vm10 = vcmp.ge.f32.partialorder %v7698_v7, 0.0 }
  0xf5   : > { %v7823_v47 = vmul.f32 %v1734_v24, %v7745_v46  ;;  %v1320_v27 = vadd.f32 1.4214138, %v1288_v2  ;;  %v7827_v57 = vmul.f32 0.70710677, %v7815_v18  ;;  %v1549_v26 = vmul.f32 %v1517_v60, %v1069_v19 }
  0xf6   : > { %v1387_v61 = vadd.f32 -0.28449672, %v1355_v37  ;;  %v822_v36 = vadd.f32 %v14032_v58, %v769_v62  ;;  %v783_v43 = vadd.f32 %v7809_v9, %v731_v8  ;;  %v13639_v41 = vrot.slane %v7820_v38, 7 }
  0xf7   : > { %14031 = vst [vmem:[#allocation7_spill] sm:$0xff] %v7823_v47  ;;  %v6116_v52 = vpop.eup %6115  ;;  %v1827_v54 = vsel %vm1784_vm0, %v7823_v47, -inf  ;;  %v1352_v46 = vmul.f32 %v7801_v40, %v1320_v27  ;;  %v1066_v13 = vand.u32 2147483647, %v7827_v57  ;;  %v13638_v34 = vrot.slane %v7830_v21, 7 }
  0xf8   : > { %1828 = vmax.xlane.f32.xlu0 %v1827_v54  ;;  %v1419_v17 = vmul.f32 %v7786_v59, %v1387_v61  ;;  %v858_v0 = vmul.f32 %v6716_v30, %v822_v36  ;;  %v836_v19 = vadd.f32 %v809_v4, %v783_v43  ;;  %v939_v60 = vmul.f32 0.5, %v7683_v12 }
  0xf9   : > { %v1035_v28 = vsel %vm1003_vm10, 1.0, %v13973_v48  ;;  %v1384_v24 = vadd.f32 -0.28449672, %v1352_v46  ;;  %v1098_v2 = vmul.f32 0.3275911, %v1066_v13  ;;  %v1514_v62 = vsub.f32 0.0, %v1066_v13 }
  0xfa   : > { %v1451_v39 = vadd.f32 0.2548296, %v1419_v17  ;;  %v7847_v37 = vadd.f32 %v6735_v5, %v858_v0  ;;  %v872_v8 = vmul.f32 %v6716_v30, %v836_v19  ;;  %vm1000_vm11 = vcmp.ge.f32.partialorder %v7715_v10, 0.0 }
  0xfb   : > { %v1416_v4 = vmul.f32 %v7801_v40, %v1384_v24  ;;  %v1602_v27 = vmul.f32 1.442695, %v1549_v26  ;;  %v1130_v61 = vadd.f32 1.0, %v1098_v2  ;;  %v7867_v43 = vsel %vm305_vm1, %v13639_v41, %v13638_v34 }
  0xfc   : > { %v7852_v12 = vpop.eup %6117  ;;  %v1483_v7 = vmul.f32 %v7786_v59, %v1451_v39  ;;  %v7856_v58 = vmul.f32 0.70710677, %v7847_v37  ;;  %v7859_v36 = vadd.f32 %v6735_v5, %v872_v8  ;;  %v7872_v59 = vmul.f32 %v13975_v16, %v7569_v49 }
  0xfd   : > { %v1448_v26 = vadd.f32 0.2548296, %v1416_v4  ;;  %v1229_v54 = vmul.f32 1.0614054, %v7852_v12  ;;  %6121 = vrcp.f32 %v1130_v61  ;;  %v936_v0 = vmul.f32 0.5, %v7707_v31 }
  0xfe   : > { %v6120_v46 = vpop.eup %6119  ;;  %v1643_v17 = vmul.f32 %v6116_v52, %v1483_v7  ;;  %v1546_v19 = vmul.f32 %v1514_v62, %v1066_v13  ;;  %v1054_v24 = vand.u32 2147483647, %v7856_v58  ;;  %v1032_v2 = vsel %vm1000_vm11, 1.0, %v13973_v48 }
  0xff   : > { %v1480_v39 = vmul.f32 %v7801_v40, %v1448_v26  ;;  %vm1005_vm12 = vcmp.ge.f32.partialorder %v7782_v3, 0.0  ;;  %v1261_v8 = vadd.f32 -1.4531521, %v1229_v54  ;;  %v7882_v49 = vmul.f32 0.70710677, %v7859_v36 }
 0x100   : > { %v1675_v4 = vsub.f32 1.0, %v1643_v17  ;;  %v1086_v61 = vmul.f32 0.3275911, %v1054_v24  ;;  %v7886_v31 = vmul.f32 %v6568_v33, %v7867_v43  ;;  %6123 = vpow2.f32 %v1602_v27 }
 0x101   : > { %v1640_v52 = vmul.f32 %v6120_v46, %v1480_v39  ;;  %v1293_v13 = vmul.f32 %v7852_v12, %v1261_v8  ;;  %v419_v10 = vadd.f32 %v7648_v11, %v7872_v59  ;;  %v1596_v62 = vmul.f32 1.442695, %v1546_v19 }
 0x102   : > { %v1707_v40 = vmul.f32 %v1675_v4, %v1035_v28  ;;  %v1118_v7 = vadd.f32 1.0, %v1086_v61  ;;  %v7893_v26 = vmul.f32 %v6595_v44, %v7543_v35  ;;  %v7896_v17 = vmul.f32 0.5, %v7763_v63 }
 0x103   : > { %v1672_v54 = vsub.f32 1.0, %v1640_v52  ;;  %v1325_v34 = vadd.f32 1.4214138, %v1293_v13  ;;  %v1068_v46 = vand.u32 2147483647, %v7882_v49  ;;  %v7902_v27 = vsel %vm1005_vm12, 1.0, %v13973_v48 }
 0x104   : > { %v1739_v39 = vadd.f32 1.0, %v1707_v40  ;;  %6125 = vrcp.f32 %v1118_v7  ;;  %v472_v11 = vadd.f32 %v7886_v31, %v419_v10  ;;  %v1502_v19 = vsub.f32 0.0, %v1054_v24 }
 0x105   : > { %v1704_v28 = vmul.f32 %v1672_v54, %v1032_v2  ;;  %v1357_v35 = vmul.f32 %v7852_v12, %v1325_v34  ;;  %v1100_v8 = vmul.f32 0.3275911, %v1068_v46  ;;  %6127 = vpow2.f32 %v1596_v62 }
 0x106   : > { %v7906_v4 = vmul.f32 %v1739_v39, %v939_v60  ;;  %v525_v63 = vadd.f32 %v7893_v26, %v472_v11  ;;  %v7911_v61 = vmul.f32 %v6620_v55, %v7830_v21  ;;  %v1516_v10 = vsub.f32 0.0, %v1068_v46 }
 0x107   : > { %v7913_v3 = vpop.eup %6121  ;;  %v1736_v52 = vadd.f32 1.0, %v1704_v28  ;;  %v1389_v13 = vadd.f32 -0.28449672, %v1357_v35  ;;  %v1132_v40 = vadd.f32 1.0, %v1100_v8  ;;  %v647_v62 = vrot.slane %v7820_v38, 1 }
 0x108   : > { %14033 = vst [vmem:[#allocation12_spill] sm:$0xff] %v7906_v4  ;;  %v1842_v34 = vsel %vm1784_vm0, %v7906_v4, -inf  ;;  %v1226_v2 = vmul.f32 1.0614054, %v7913_v3  ;;  %v577_v60 = vadd.f32 %v7662_v50, %v525_v63  ;;  %v1534_v39 = vmul.f32 %v1502_v19, %v1054_v24 }
 0x109   : > { %1843 = vmax.xlane.f32.xlu1 %v1842_v34  ;;  %v7920_v7 = vmul.f32 %v1736_v52, %v936_v0  ;;  %v1421_v54 = vmul.f32 %v7852_v12, %v1389_v13  ;;  %6129 = vrcp.f32 %v1132_v40  ;;  %v655_v35 = vrot.slane %v7830_v21, 1 }
 0x10a   : > { %v1258_v11 = vadd.f32 -1.4531521, %v1226_v2  ;;  %v630_v28 = vadd.f32 %v7911_v61, %v577_v60  ;;  %v7927_v8 = vmul.f32 %v6688_v20, %v7633_v22  ;;  %v6124_v41 = vpop.eup %6123  ;;  %v1548_v0 = vmul.f32 %v1516_v10, %v1068_v46 }
 0x10b   : > { %14034 = vst [vmem:[#allocation5_spill] sm:$0xff] %v7920_v7  ;;  %v1833_v50 = vsel %vm1784_vm0, %v7920_v7, -inf  ;;  %v1453_v63 = vadd.f32 0.2548296, %v1421_v54  ;;  %v14035_v52 = vrot.slane %v7820_v38, 7  ;;  %v14036_v24 = vrot.slane %v7830_v21, 7 }
 0x10c   : > { %1834 = vmax.xlane.f32.xlu0 %v1833_v50  ;;  %v1290_v13 = vmul.f32 %v7913_v3, %v1258_v11  ;;  %v672_v22 = vsel %vm657_vm3, %v655_v35, %v647_v62  ;;  %v734_v40 = vadd.f32 %v7927_v8, %v630_v28  ;;  %v7952_v2 = vmul.f32 %v13975_v16, %v7702_v45 }
 0x10d   : > { %v320_v19 = vsel %vm305_vm1, %v14036_v24, %v14035_v52  ;;  %v1485_v46 = vmul.f32 %v7852_v12, %v1453_v63  ;;  %v7948_v10 = vsel %vm640_vm2, %v672_v22, 0.0  ;;  %v1572_v28 = vmul.f32 1.442695, %v1534_v39 }
 0x10e   : > { %v7943_v34 = vsel %vm287_vm4, %v320_v19, 0.0  ;;  %v7958_v54 = vpop.eup %6125  ;;  %v1322_v11 = vadd.f32 1.4214138, %v1290_v13  ;;  %v786_v50 = vadd.f32 %v7728_v53, %v734_v40  ;;  %v7963_v12 = vmul.f32 %v6676_v15, %v7948_v10 }
 0x10f   : > { %v7956_v60 = vmul.f32 %v6568_v33, %v7943_v34  ;;  %v1645_v63 = vmul.f32 %v6124_v41, %v1485_v46  ;;  %v1214_v52 = vmul.f32 1.0614054, %v7958_v54  ;;  %v418_v45 = vadd.f32 %v7775_v51, %v7952_v2  ;;  %v6128_v19 = vpop.eup %6127 }
 0x110   : > { %v7970_v24 = vmul.f32 %v6595_v44, %v7536_v42  ;;  %v7973_v13 = vmul.f32 0.5, %v7815_v18  ;;  %v1354_v53 = vmul.f32 %v7913_v3, %v1322_v11  ;;  %v1600_v39 = vmul.f32 1.442695, %v1548_v0 }
 0x111   : > { %v839_v22 = vadd.f32 %v7963_v12, %v786_v50  ;;  %v1677_v40 = vsub.f32 1.0, %v1645_v63  ;;  %vm1002_vm13 = vcmp.ge.f32.partialorder %v7827_v57, 0.0  ;;  %v1246_v41 = vadd.f32 -1.4531521, %v1214_v52 }
 0x112   : > { %v471_v46 = vadd.f32 %v7956_v60, %v418_v45  ;;  %v1386_v51 = vadd.f32 -0.28449672, %v1354_v53  ;;  %6131 = vpow2.f32 %v1572_v28  ;;  %v7982_v7 = vmul.f32 %v6620_v55, %v7820_v38 }
 0x113   : > { %v875_v42 = vmul.f32 %v6716_v30, %v839_v22  ;;  %v7984_v18 = vpop.eup %6129  ;;  %v1709_v0 = vmul.f32 %v1677_v40, %v7902_v27  ;;  %v1278_v11 = vmul.f32 %v7958_v54, %v1246_v41  ;;  %v7991_v63 = vmul.f32 %v13988_v14, %v7867_v43 }
 0x114   : > { %v524_v50 = vadd.f32 %v7970_v24, %v471_v46  ;;  %v1418_v28 = vmul.f32 %v7913_v3, %v1386_v51  ;;  %v1228_v52 = vmul.f32 1.0614054, %v7984_v18  ;;  %6133 = vpow2.f32 %v1600_v39 }
 0x115   : > { %v7996_v45 = vadd.f32 %v6735_v5, %v875_v42  ;;  %v1741_v53 = vadd.f32 1.0, %v1709_v0  ;;  %v1310_v22 = vadd.f32 1.4214138, %v1278_v11  ;;  %v421_v40 = vadd.f32 %v7991_v63, %v7872_v59 }
 0x116   : > { %v576_v27 = vadd.f32 %v7797_v23, %v524_v50  ;;  %v1450_v41 = vadd.f32 0.2548296, %v1418_v28  ;;  %v1260_v46 = vadd.f32 -1.4531521, %v1228_v52  ;;  %v8003_v47 = vsel %vm657_vm3, %v647_v62, %v655_v35 }
 0x117   : > { %v8007_v51 = vmul.f32 %v6688_v20, %v7771_v6  ;;  %v8010_v39 = vmul.f32 %v1741_v53, %v7896_v17  ;;  %v1342_v42 = vmul.f32 %v7958_v54, %v1310_v22  ;;  %v8014_v23 = vmul.f32 0.70710677, %v7996_v45 }
 0x118   : > { %v629_v59 = vadd.f32 %v7982_v7, %v576_v27  ;;  %v1482_v0 = vmul.f32 %v7913_v3, %v1450_v41  ;;  %v1292_v11 = vmul.f32 %v7984_v18, %v1260_v46  ;;  %v474_v62 = vadd.f32 %v7886_v31, %v421_v40 }
 0x119   : > { %14037 = vst [vmem:[#allocation15_spill] sm:$0xff] %v8010_v39  ;;  %v8022_v6 = vmul.f32 %v13988_v14, %v7943_v34  ;;  %v1848_v17 = vsel %vm1784_vm0, %v8010_v39, -inf  ;;  %v1374_v35 = vadd.f32 -0.28449672, %v1342_v42  ;;  %v1071_v50 = vand.u32 2147483647, %v8014_v23 }
 0x11a   : > { %v8029_v28 = vmul.f32 %v13993_v29, %v7830_v21  ;;  %1849 = vmax.xlane.f32.xlu1 %v1848_v17  ;;  %v1642_v3 = vmul.f32 %v6128_v19, %v1482_v0  ;;  %v1324_v52 = vadd.f32 1.4214138, %v1292_v11  ;;  %v733_v53 = vadd.f32 %v8007_v51, %v629_v59 }
 0x11b   : > { %v8034_v31 = vmul.f32 %v6676_v15, %v8003_v47  ;;  %v1034_v22 = vsel %vm1002_vm13, 1.0, %v13973_v48  ;;  %v1406_v27 = vmul.f32 %v7958_v54, %v1374_v35  ;;  %v1103_v40 = vmul.f32 0.3275911, %v1071_v50 }
 0x11c   : > { %v527_v41 = vadd.f32 %v7893_v26, %v474_v62  ;;  %v6132_v46 = vpop.eup %6131  ;;  %v1674_v42 = vsub.f32 1.0, %v1642_v3  ;;  %v1356_v19 = vmul.f32 %v7984_v18, %v1324_v52  ;;  %v785_v0 = vadd.f32 %v7809_v9, %v733_v53 }
 0x11d   : > { %v420_v59 = vadd.f32 %v8022_v6, %v7952_v2  ;;  %vm990_vm14 = vcmp.ge.f32.partialorder %v7856_v58, 0.0  ;;  %v1438_v11 = vadd.f32 0.2548296, %v1406_v27  ;;  %v1135_v17 = vadd.f32 1.0, %v1103_v40 }
 0x11e   : > { %v579_v57 = vadd.f32 %v8029_v28, %v527_v41  ;;  %v6134_v39 = vpop.eup %6133  ;;  %v1706_v35 = vmul.f32 %v1674_v42, %v1034_v22  ;;  %v1388_v4 = vadd.f32 -0.28449672, %v1356_v19  ;;  %v838_v26 = vadd.f32 %v8034_v31, %v785_v0 }
 0x11f   : > { %v473_v62 = vadd.f32 %v7956_v60, %v420_v59  ;;  %v1470_v3 = vmul.f32 %v7958_v54, %v1438_v11  ;;  %6135 = vrcp.f32 %v1135_v17  ;;  %v8053_v2 = vmul.f32 %v14002_v56, %v7948_v10 }
 0x120   : > { %v632_v9 = vadd.f32 %v7911_v61, %v579_v57  ;;  %v1738_v52 = vadd.f32 1.0, %v1706_v35  ;;  %v1420_v53 = vmul.f32 %v7984_v18, %v1388_v4  ;;  %v874_v27 = vmul.f32 %v6716_v30, %v838_v26  ;;  %v8089_v35 = vld [vmem:[%s6548_s29 + $0x70] sm:$0xff] }
 0x121   : > { %v526_v22 = vadd.f32 %v7970_v24, %v473_v62  ;;  %v1022_v60 = vsel %vm990_vm14, 1.0, %v13973_v48  ;;  %v1630_v40 = vmul.f32 %v6132_v46, %v1470_v3  ;;  %v8064_v61 = vmul.f32 %v13993_v29, %v7820_v38 }
 0x122   : > { %v736_v54 = vadd.f32 %v7927_v8, %v632_v9  ;;  %v8067_v41 = vmul.f32 %v1738_v52, %v7973_v13  ;;  %v1452_v42 = vadd.f32 0.2548296, %v1420_v53  ;;  %v1519_v4 = vsub.f32 0.0, %v1071_v50 }
 0x123   : > { %v8070_v19 = vadd.f32 %v6735_v5, %v874_v27  ;;  %v926_v24 = vmul.f32 0.5, %v7847_v37  ;;  %v1662_v58 = vsub.f32 1.0, %v1630_v40  ;;  %v578_v8 = vadd.f32 %v8064_v61, %v526_v22 }
 0x124   : > { %14038 = vst [vmem:[#allocation13_spill] sm:$0xff] %v8067_v41  ;;  %v788_v46 = vadd.f32 %v8053_v2, %v736_v54  ;;  %v1839_v0 = vsel %vm1784_vm0, %v8067_v41, -inf  ;;  %vm1004_vm15 = vcmp.ge.f32.partialorder %v7882_v49, 0.0  ;;  %v1484_v13 = vmul.f32 %v7984_v18, %v1452_v42  ;;  %v8093_v18 = vld [vmem:[%s6548_s29 + $0x78] sm:$0xff] }
 0x125   : > { %v8080_v59 = vmul.f32 0.70710677, %v8070_v19  ;;  %1840 = vmax.xlane.f32.xlu0 %v1839_v0  ;;  %v1694_v11 = vmul.f32 %v1662_v58, %v1022_v60  ;;  %v631_v17 = vadd.f32 %v7982_v7, %v578_v8  ;;  %v8086_v57 = vmul.f32 %v14002_v56, %v8003_v47 }
 0x126   : > { %v841_v37 = vadd.f32 %v7963_v12, %v788_v46  ;;  %v1644_v26 = vmul.f32 %v6134_v39, %v1484_v13  ;;  %v1551_v62 = vmul.f32 %v1519_v4, %v1071_v50  ;;  %v1036_v9 = vsel %vm1004_vm15, 1.0, %v13973_v48  ;;  %v3348_v4 = vld [vmem:[%s6511_s23 + $0xa8] sm:$0xff] }
 0x127   : > { %v1070_v49 = vand.u32 2147483647, %v8080_v59  ;;  %v1726_v3 = vadd.f32 1.0, %v1694_v11  ;;  %v735_v7 = vadd.f32 %v8007_v51, %v631_v17  ;;  %v940_v52 = vmul.f32 0.5, %v7859_v36 }
 0x128   : > { %v877_v12 = vmul.f32 %v6716_v30, %v841_v37  ;;  %v1676_v53 = vsub.f32 1.0, %v1644_v26  ;;  %v296_v22 = vrot.slane %v8089_v35, 7  ;;  %v304_v54 = vrot.slane %v8093_v18, 7 }
 0x129   : > { %v1102_v27 = vmul.f32 0.3275911, %v1070_v49  ;;  %v8100_v39 = vpop.eup %6135  ;;  %v8102_v50 = vmul.f32 %v1726_v3, %v926_v24  ;;  %v787_v40 = vadd.f32 %v8086_v57, %v735_v7  ;;  %v1606_v36 = vmul.f32 1.442695, %v1551_v62 }
 0x12a   : > { %v8105_v60 = vadd.f32 %v6735_v5, %v877_v12  ;;  %v1708_v42 = vmul.f32 %v1676_v53, %v1036_v9  ;;  %v1231_v51 = vmul.f32 1.0614054, %v8100_v39  ;;  %v8119_v0 = vmul.f32 %v13975_v16, %v7867_v43  ;;  %v3347_v43 = vld [vmem:[%s6511_s23 + $0xa0] sm:$0xff] }
 0x12b   : > { %14039 = vst [vmem:[#allocation6_spill] sm:$0xff] %v8102_v50  ;;  %v1134_v58 = vadd.f32 1.0, %v1102_v27  ;;  %v1803_v46 = vsel %vm1784_vm0, %v8102_v50, -inf  ;;  %v840_v8 = vadd.f32 %v8034_v31, %v787_v40  ;;  %v3422_v37 = vsel %vm1784_vm0, %v3348_v4, -inf }
 0x12c   : > { %v8114_v24 = vmul.f32 0.70710677, %v8105_v60  ;;  %1804 = vmax.xlane.f32.xlu1 %v1803_v46  ;;  %v1740_v13 = vadd.f32 1.0, %v1708_v42  ;;  %v1263_v11 = vadd.f32 -1.4531521, %v1231_v51  ;;  %v8126_v62 = vsel %vm305_vm1, %v296_v22, %v304_v54 }
 0x12d   : > { %6137 = vrcp.f32 %v1134_v58  ;;  %v876_v26 = vmul.f32 %v6716_v30, %v840_v8  ;;  %v1518_v9 = vsub.f32 0.0, %v1070_v49  ;;  %v423_v53 = vadd.f32 %v7991_v63, %v8119_v0 }
 0x12e   : > { %v1073_v17 = vand.u32 2147483647, %v8114_v24  ;;  %v8128_v3 = vmul.f32 %v1740_v13, %v940_v52  ;;  %v1295_v31 = vmul.f32 %v8100_v39, %v1263_v11  ;;  %6139 = vpow2.f32 %v1606_v36 }
 0x12f   : > { %v8133_v7 = vadd.f32 %v6735_v5, %v876_v26  ;;  %v8141_v52 = vmul.f32 %v6568_v33, %v8126_v62  ;;  %v8145_v42 = vmul.f32 %v6595_v44, %v7830_v21  ;;  %v3419_v63 = vsel %vm1784_vm0, %v3347_v43, -inf }
 0x130   : > { %14040 = vst [vmem:[#allocation11_spill] sm:$0xff] %v8128_v3  ;;  %v1105_v12 = vmul.f32 0.3275911, %v1073_v17  ;;  %v1845_v27 = vsel %vm1784_vm0, %v8128_v3, -inf  ;;  %3423 = vmax.xlane.f32.xlu1 %v3422_v37  ;;  %v1327_v40 = vadd.f32 1.4214138, %v1295_v31  ;;  %v1550_v8 = vmul.f32 %v1518_v9, %v1070_v49 }
 0x131   : > { %1846 = vmax.xlane.f32.xlu0 %v1845_v27  ;;  %v8148_v51 = vmul.f32 0.70710677, %v8133_v7  ;;  %v476_v58 = vadd.f32 %v8141_v52, %v423_v53  ;;  %v648_v46 = vrot.slane %v8089_v35, 1  ;;  %v8158_v37 = vmul.f32 %v6620_v55, %v8093_v18 }
 0x132   : > { %v1137_v4 = vadd.f32 1.0, %v1105_v12  ;;  %v1359_v36 = vmul.f32 %v8100_v39, %v1327_v40  ;;  %v656_v26 = vrot.slane %v8093_v18, 1  ;;  %v1521_v31 = vsub.f32 0.0, %v1073_v17 }
 0x133   : > { %v1072_v13 = vand.u32 2147483647, %v8148_v51  ;;  %v529_v21 = vadd.f32 %v8145_v42, %v476_v58  ;;  %v8163_v12 = vmul.f32 %v6688_v20, %v7948_v10  ;;  %v321_v40 = vsel %vm305_vm1, %v304_v54, %v296_v22 }
 0x134   : > { %6141 = vrcp.f32 %v1137_v4  ;;  %v1391_v11 = vadd.f32 -0.28449672, %v1359_v36  ;;  %v673_v27 = vsel %vm657_vm3, %v656_v26, %v648_v46  ;;  %vm1007_vm5 = vcmp.ge.f32.partialorder %v8014_v23, 0.0 }
 0x135   : > { %3420 = vmax.xlane.f32.xlu0 %v3419_v63  ;;  %v1104_v43 = vmul.f32 0.3275911, %v1072_v13  ;;  %v581_v53 = vadd.f32 %v8029_v28, %v529_v21  ;;  %v8177_v10 = vsel %vm640_vm2, %v673_v27, 0.0  ;;  %v8182_v21 = vsel %vm287_vm4, %v321_v40, 0.0 }
 0x136   : > { %v1423_v9 = vmul.f32 %v8100_v39, %v1391_v11  ;;  %v1604_v11 = vmul.f32 1.442695, %v1550_v8  ;;  %v1553_v22 = vmul.f32 %v1521_v31, %v1073_v17  ;;  %v8186_v54 = vmul.f32 %v13975_v16, %v7943_v34 }
 0x137   : > { %v8165_v49 = vpop.eup %6137  ;;  %v1136_v63 = vadd.f32 1.0, %v1104_v43  ;;  %v634_v28 = vadd.f32 %v8158_v37, %v581_v53  ;;  %v8192_v8 = vmul.f32 %v6676_v15, %v8177_v10  ;;  %v1520_v17 = vsub.f32 0.0, %v1072_v13 }
 0x138   : > { %v1230_v4 = vmul.f32 1.0614054, %v8165_v49  ;;  %v6140_v36 = vpop.eup %6139  ;;  %v1455_v58 = vadd.f32 0.2548296, %v1423_v9  ;;  %v8196_v9 = vmul.f32 %v6568_v33, %v8182_v21  ;;  %v422_v31 = vadd.f32 %v8022_v6, %v8186_v54 }
 0x139   : > { %6143 = vrcp.f32 %v1136_v63  ;;  %v738_v27 = vadd.f32 %v8163_v12, %v634_v28  ;;  %v8203_v34 = vmul.f32 %v6595_v44, %v7820_v38  ;;  %vm1006_vm6 = vcmp.ge.f32.partialorder %v8080_v59, 0.0 }
 0x13a   : > { %v1262_v3 = vadd.f32 -1.4531521, %v1230_v4  ;;  %v1487_v43 = vmul.f32 %v8100_v39, %v1455_v58  ;;  %v943_v39 = vmul.f32 0.5, %v7996_v45  ;;  %6145 = vpow2.f32 %v1604_v11 }
 0x13b   : > { %v790_v4 = vadd.f32 %v8053_v2, %v738_v27  ;;  %v475_v6 = vadd.f32 %v8196_v9, %v422_v31  ;;  %v1610_v32 = vmul.f32 1.442695, %v1553_v22  ;;  %v1552_v2 = vmul.f32 %v1520_v17, %v1072_v13 }
 0x13c   : > { %v1294_v53 = vmul.f32 %v8165_v49, %v1262_v3  ;;  %v1647_v40 = vmul.f32 %v6140_v36, %v1487_v43  ;;  %v1039_v3 = vsel %vm1007_vm5, 1.0, %v13973_v48  ;;  %v8220_v23 = vmul.f32 %v6620_v55, %v8089_v35 }
 0x13d   : > { %v843_v45 = vadd.f32 %v8192_v8, %v790_v4  ;;  %v528_v11 = vadd.f32 %v8203_v34, %v475_v6  ;;  %v8225_v31 = vmul.f32 %v13988_v14, %v8126_v62  ;;  %v8230_v13 = vsel %vm657_vm3, %v648_v46, %v656_v26 }
 0x13e   : > { %v8207_v63 = vpop.eup %6141  ;;  %v1326_v58 = vadd.f32 1.4214138, %v1294_v53  ;;  %v1679_v28 = vsub.f32 1.0, %v1647_v40  ;;  %v8234_v17 = vmul.f32 %v6688_v20, %v8003_v47  ;;  %6147 = vpow2.f32 %v1610_v32 }
 0x13f   : > { %v1233_v38 = vmul.f32 1.0614054, %v8207_v63  ;;  %v879_v53 = vmul.f32 %v6716_v30, %v843_v45  ;;  %v580_v40 = vadd.f32 %v8064_v61, %v528_v11  ;;  %v425_v6 = vadd.f32 %v8225_v31, %v8119_v0  ;;  %v8251_v45 = vld [vmem:[%s6511_s23 + $0xb8] sm:$0xff] }
 0x140   : > { %v1358_v36 = vmul.f32 %v8165_v49, %v1326_v58  ;;  %v1711_v43 = vmul.f32 %v1679_v28, %v1039_v3  ;;  %v1608_v46 = vmul.f32 1.442695, %v1552_v2  ;;  %v8256_v0 = vmul.f32 %v6676_v15, %v8230_v13 }
 0x141   : > { %v1265_v27 = vadd.f32 -1.4531521, %v1233_v38  ;;  %v8238_v58 = vadd.f32 %v6735_v5, %v879_v53  ;;  %v633_v26 = vadd.f32 %v8220_v23, %v580_v40  ;;  %v8246_v38 = vpop.xlane.xlu1 %3369  ;;  %v8264_v2 = vmul.f32 %v13993_v29, %v8093_v18 }
 0x142   : > { %v1390_v22 = vadd.f32 -0.28449672, %v1358_v36  ;;  %v1743_v4 = vadd.f32 1.0, %v1711_v43  ;;  %6149 = vpow2.f32 %v1608_v46  ;;  %vm1009_vm7 = vcmp.ge.f32.partialorder %v8114_v24, 0.0 }
 0x143   : > { %v1297_v3 = vmul.f32 %v8207_v63, %v1265_v27  ;;  %v8242_v28 = vpop.eup %6143  ;;  %v8259_v27 = vmul.f32 0.70710677, %v8238_v58  ;;  %v737_v32 = vadd.f32 %v8234_v17, %v633_v26  ;;  %v8294_v46 = vmul.f32 %v14002_v56, %v8177_v10 }
 0x144   : > { %v1422_v61 = vmul.f32 %v8165_v49, %v1390_v22  ;;  %v8248_v47 = vmul.f32 %v1743_v4, %v943_v39  ;;  %v1232_v11 = vmul.f32 1.0614054, %v8242_v28  ;;  %v6146_v39 = vpop.eup %6145  ;;  %v478_v4 = vadd.f32 %v8141_v52, %v425_v6 }
 0x145   : > { %v1329_v36 = vadd.f32 1.4214138, %v1297_v3  ;;  %v8274_v26 = vand.u32 2147483647, %v8259_v27  ;;  %v789_v1 = vadd.f32 %v8086_v57, %v737_v32  ;;  %v8329_v24 = vmul.f32 %v13993_v29, %v8089_v35 }
 0x146   : > { %14041 = vst [vmem:[#allocation14_spill] sm:$0xff] %v8248_v47  ;;  %v1454_v43 = vadd.f32 0.2548296, %v1422_v61  ;;  %v1854_v53 = vsel %vm1784_vm0, %v8248_v47, -inf  ;;  %v1264_v40 = vadd.f32 -1.4531521, %v1232_v11  ;;  %v8281_v11 = vpop.xlane.xlu0 %3366  ;;  %v531_v52 = vadd.f32 %v8145_v42, %v478_v4 }
 0x147   : > { %v1361_v22 = vmul.f32 %v8207_v63, %v1329_v36  ;;  %1855 = vmax.xlane.f32.xlu1 %v1854_v53  ;;  %v3428_v61 = vsel %vm1784_vm0, %v8251_v45, -inf  ;;  %v1038_v47 = vsel %vm1006_vm6, 1.0, %v13973_v48  ;;  %v1107_v6 = vmul.f32 0.3275911, %v8274_v26  ;;  %v8286_v53 = vpop.xlane.xlu1 %3381 }
 0x148   : > { %v1486_v3 = vmul.f32 %v8165_v49, %v1454_v43  ;;  %v1296_v36 = vmul.f32 %v8242_v28, %v1264_v40  ;;  %v842_v43 = vadd.f32 %v8256_v0, %v789_v1  ;;  %v583_v32 = vadd.f32 %v8264_v2, %v531_v52 }
 0x149   : > { %v1393_v41 = vadd.f32 -0.28449672, %v1361_v22  ;;  %v1139_v40 = vadd.f32 1.0, %v1107_v6  ;;  %vm1008_vm8 = vcmp.ge.f32.partialorder %v8148_v51, 0.0  ;;  %vm1011_vm9 = vcmp.ge.f32.partialorder %v8259_v27, 0.0 }
 0x14a   : > { %v1646_v49 = vmul.f32 %v6146_v39, %v1486_v3  ;;  %v1328_v57 = vadd.f32 1.4214138, %v1296_v36  ;;  %v878_v42 = vmul.f32 %v6716_v30, %v842_v43  ;;  %v636_v4 = vadd.f32 %v8158_v37, %v583_v32  ;;  %v6148_v3 = vpop.eup %6147 }
 0x14b   : > { %v1425_v59 = vmul.f32 %v8207_v63, %v1393_v41  ;;  %3429 = vmax.xlane.f32.xlu1 %v3428_v61  ;;  %v8300_v41 = vmul.f32 %v13988_v14, %v8182_v21  ;;  %v942_v36 = vmul.f32 0.5, %v8070_v19  ;;  %6151 = vrcp.f32 %v1139_v40 }
 0x14c   : > { %v1678_v22 = vsub.f32 1.0, %v1646_v49  ;;  %v1360_v1 = vmul.f32 %v8242_v28, %v1328_v57  ;;  %v8304_v52 = vadd.f32 %v6735_v5, %v878_v42  ;;  %v740_v43 = vadd.f32 %v8163_v12, %v636_v4  ;;  %v8318_v57 = vpop.xlane.xlu1 %3375 }
 0x14d   : > { %v1457_v39 = vadd.f32 0.2548296, %v1425_v59  ;;  %v424_v37 = vadd.f32 %v8300_v41, %v8186_v54  ;;  %v8310_v59 = vpop.xlane.xlu0 %3378  ;;  %v1041_v19 = vsel %vm1009_vm7, 1.0, %v13973_v48  ;;  %v1523_v40 = vsub.f32 0.0, %v8274_v26 }
 0x14e   : > { %v1710_v61 = vmul.f32 %v1678_v22, %v1038_v47  ;;  %v1392_v6 = vadd.f32 -0.28449672, %v1360_v1  ;;  %v8316_v47 = vmul.f32 0.70710677, %v8304_v52  ;;  %v792_v12 = vadd.f32 %v8294_v46, %v740_v43 }
 0x14f   : > { %v1489_v49 = vmul.f32 %v8207_v63, %v1457_v39  ;;  %v477_v22 = vadd.f32 %v8196_v9, %v424_v37  ;;  %v8332_v39 = vld [vmem:[%s6511_s23 + $0xb0] sm:$0xff]  ;;  %vm4993_vm15 = vcmask 1043456  }
 0x150   : > { %v1742_v14 = vadd.f32 1.0, %v1710_v61  ;;  %v1424_v32 = vmul.f32 %v8242_v28, %v1392_v6  ;;  %v1074_v42 = vand.u32 2147483647, %v8316_v47  ;;  %v6150_v61 = vpop.eup %6149  ;;  %vm1010_vm10 = vcmp.ge.f32.partialorder %v8316_v47, 0.0 }
 0x151   : > { %v1649_v63 = vmul.f32 %v6148_v3, %v1489_v49  ;;  %v845_v3 = vadd.f32 %v8192_v8, %v792_v12  ;;  %v530_v6 = vadd.f32 %v8203_v34, %v477_v22  ;;  %v3425_v8 = vsel %vm1784_vm0, %v8332_v39, -inf  ;;  %v8348_v34 = vpop.xlane.xlu1 %3363 }
 0x152   : > { %v8323_v54 = vmul.f32 %v1742_v14, %v942_v36  ;;  %v1456_v4 = vadd.f32 0.2548296, %v1424_v32  ;;  %v945_v36 = vmul.f32 0.5, %v8105_v60  ;;  %v1106_v49 = vmul.f32 0.3275911, %v1074_v42  ;;  %v8342_v14 = vpop.xlane.xlu0 %3372 }
 0x153   : > { %v1681_v1 = vsub.f32 1.0, %v1649_v63  ;;  %v881_v37 = vmul.f32 %v6716_v30, %v845_v3  ;;  %v1555_v63 = vmul.f32 %v1523_v40, %v8274_v26  ;;  %v582_v32 = vadd.f32 %v8329_v24, %v530_v6 }
 0x154   : > { %14042 = vst [vmem:[#allocation9_spill] sm:$0xff] %v8323_v54  ;;  %v1851_v9 = vsel %vm1784_vm0, %v8323_v54, -inf  ;;  %v1488_v29 = vmul.f32 %v8242_v28, %v1456_v4  ;;  %v1138_v60 = vadd.f32 1.0, %v1106_v49  ;;  %v1040_v22 = vsel %vm1008_vm8, 1.0, %v13973_v48 }
 0x155   : > { %1852 = vmax.xlane.f32.xlu0 %v1851_v9  ;;  %v1713_v43 = vmul.f32 %v1681_v1, %v1041_v19  ;;  %v8351_v51 = vadd.f32 %v6735_v5, %v881_v37  ;;  %v8353_v28 = vpop.eup %6151  ;;  %v635_v1 = vadd.f32 %v8220_v23, %v582_v32  ;;  %v8359_v26 = vmul.f32 %v14002_v56, %v8230_v13 }
 0x156   : > { %v1648_v12 = vmul.f32 %v6150_v61, %v1488_v29  ;;  %6153 = vrcp.f32 %v1138_v60  ;;  %v1235_v3 = vmul.f32 1.0614054, %v8353_v28  ;;  %v8365_v61 = vld [vmem:[%s6511_s23 + $0xc8] sm:$0xff]  ;;  %v1614_v9 = vmul.f32 1.442695, %v1555_v63  ;;  %v8378_v60 = vpop.xlane.xlu1 %3387 }
 0x157   : > { %v1745_v19 = vadd.f32 1.0, %v1713_v43  ;;  %v8368_v49 = vmul.f32 0.70710677, %v8351_v51  ;;  %v739_v6 = vadd.f32 %v8234_v17, %v635_v1  ;;  %v944_v56 = vmul.f32 0.5, %v8133_v7 }
 0x158   : > { %v1680_v4 = vsub.f32 1.0, %v1648_v12  ;;  %v1267_v29 = vadd.f32 -1.4531521, %v1235_v3  ;;  %v1522_v37 = vsub.f32 0.0, %v1074_v42  ;;  %v3434_v17 = vsel %vm1784_vm0, %v8365_v61, -inf }
 0x159   : > { %3426 = vmax.xlane.f32.xlu0 %v3425_v8  ;;  %v8361_v40 = vmul.f32 %v1745_v19, %v945_v36  ;;  %v8374_v36 = vpop.xlane.xlu0 %3360  ;;  %v1077_v8 = vand.u32 2147483647, %v8368_v49  ;;  %v791_v63 = vadd.f32 %v8359_v26, %v739_v6  ;;  %6155 = vpow2.f32 %v1614_v9 }
 0x15a   : > { %v1712_v43 = vmul.f32 %v1680_v4, %v1040_v22  ;;  %v1299_v19 = vmul.f32 %v8353_v28, %v1267_v29  ;;  %v8387_v4 = vld [vmem:[%s6511_s23 + $0xc0] sm:$0xff]  ;;  %v1554_v3 = vmul.f32 %v1522_v37, %v1074_v42  ;;  %v8403_v37 = vpop.xlane.xlu1 %3393  ;;  %vm1013_vm11 = vcmp.ge.f32.partialorder %v8368_v49, 0.0 }
 0x15b   : > { %14043 = vst [vmem:[#allocation29_spill] sm:$0xff] %v8361_v40  ;;  %v1860_v23 = vsel %vm1784_vm0, %v8361_v40, -inf  ;;  %v1109_v7 = vmul.f32 0.3275911, %v1077_v8  ;;  %v844_v12 = vadd.f32 %v8256_v0, %v791_v63  ;;  %v1045_v49 = vsel %vm1013_vm11, 1.0, %v13973_v48 }
 0x15c   : > { %1861 = vmax.xlane.f32.xlu1 %v1860_v23  ;;  %v1744_v32 = vadd.f32 1.0, %v1712_v43  ;;  %v1331_v1 = vadd.f32 1.4214138, %v1299_v19  ;;  %v358_v43 = vmul.f32 %v13975_v16, %v8126_v62  ;;  %v3431_v62 = vsel %vm1784_vm0, %v8387_v4, -inf }
 0x15d   : > { %v1141_v6 = vadd.f32 1.0, %v1109_v7  ;;  %v880_v23 = vmul.f32 %v6716_v30, %v844_v12  ;;  %v8395_v40 = vpop.xlane.xlu0 %3384  ;;  %v1612_v19 = vmul.f32 1.442695, %v1554_v3  ;;  %v501_v12 = vmul.f32 %v6595_v44, %v8093_v18 }
 0x15e   : > { %v8384_v22 = vmul.f32 %v1744_v32, %v944_v56  ;;  %v1363_v9 = vmul.f32 %v8353_v28, %v1331_v1  ;;  %v427_v42 = vadd.f32 %v8225_v31, %v358_v43 }
 0x15f   : > { %6157 = vrcp.f32 %v1141_v6  ;;  %v8400_v56 = vadd.f32 %v6735_v5, %v880_v23  ;;  %v1525_v23 = vsub.f32 0.0, %v1077_v8 }
 0x160   : > { %14044 = vst [vmem:[#allocation30_spill] sm:$0xff] %v8384_v22  ;;  %3435 = vmax.xlane.f32.xlu1 %v3434_v17  ;;  %v1857_v29 = vsel %vm1784_vm0, %v8384_v22, -inf  ;;  %v8397_v0 = vpop.eup %6153  ;;  %v1395_v63 = vadd.f32 -0.28449672, %v1363_v9  ;;  %v448_v17 = vmul.f32 0.0, %v6568_v33  ;;  %v606_v33 = vmul.f32 0.0, %v6620_v55 }
 0x161   : > { %1858 = vmax.xlane.f32.xlu0 %v1857_v29  ;;  %v1234_v32 = vmul.f32 1.0614054, %v8397_v0  ;;  %v8410_v7 = vmul.f32 0.70710677, %v8400_v56  ;;  %v8418_v3 = vpop.xlane.xlu0 %3390  ;;  %6159 = vpow2.f32 %v1612_v19  ;;  %v710_v55 = vmul.f32 %v6688_v20, %v8177_v10 }
 0x162   : > { %v1427_v1 = vmul.f32 %v8353_v28, %v1395_v63  ;;  %v480_v6 = vadd.f32 %v448_v17, %v427_v42  ;;  %v357_v42 = vmul.f32 %v13975_v16, %v8182_v21  ;;  %v500_v19 = vmul.f32 %v6595_v44, %v8089_v35 }
 0x163   : > { %v1266_v31 = vadd.f32 -1.4531521, %v1234_v32  ;;  %v1076_v43 = vand.u32 2147483647, %v8410_v7  ;;  %v6156_v54 = vpop.eup %6155  ;;  %v815_v10 = vmul.f32 0.0, %v6676_v15  ;;  %v947_v35 = vmul.f32 0.5, %v8238_v58 }
 0x164   : > { %v1459_v29 = vadd.f32 0.2548296, %v1427_v1  ;;  %v533_v22 = vadd.f32 %v501_v12, %v480_v6  ;;  %v1557_v12 = vmul.f32 %v1525_v23, %v1077_v8  ;;  %v426_v6 = vadd.f32 %v8300_v41, %v357_v42 }
 0x165   : > { %3432 = vmax.xlane.f32.xlu0 %v3431_v62  ;;  %v1298_v9 = vmul.f32 %v8397_v0, %v1266_v31  ;;  %v1108_v18 = vmul.f32 0.3275911, %v1076_v43  ;;  %v8423_v62 = vpop.xlane.xlu1 %3399  ;;  %v8440_v44 = vpop.xlane.xlu0 %3396  ;;  %vm1012_vm12 = vcmp.ge.f32.partialorder %v8410_v7, 0.0 }
 0x166   : > { %v1491_v63 = vmul.f32 %v8353_v28, %v1459_v29  ;;  %v585_v1 = vadd.f32 %v8264_v2, %v533_v22  ;;  %v1043_v2 = vsel %vm1011_vm9, 1.0, %v13973_v48  ;;  %v479_v28 = vadd.f32 %v448_v17, %v426_v6 }
 0x167   : > { %v1330_v32 = vadd.f32 1.4214138, %v1298_v9  ;;  %v1140_v31 = vadd.f32 1.0, %v1108_v18  ;;  %v1524_v17 = vsub.f32 0.0, %v1076_v43 }
 0x168   : > { %v1651_v25 = vmul.f32 %v6156_v54, %v1491_v63  ;;  %v638_v21 = vadd.f32 %v606_v33, %v585_v1  ;;  %v1618_v54 = vmul.f32 1.442695, %v1557_v12  ;;  %v532_v29 = vadd.f32 %v500_v19, %v479_v28 }
 0x169   : > { %v1362_v16 = vmul.f32 %v8397_v0, %v1330_v32  ;;  %v8433_v50 = vpop.eup %6157  ;;  %6161 = vrcp.f32 %v1140_v31  ;;  %v8443_v9 = vpop.xlane.xlu1 %3405  ;;  %v709_v63 = vmul.f32 %v6688_v20, %v8230_v13  ;;  %v8459_v20 = vld [vmem:[%s6511_s23 + $0xd8] sm:$0xff]  ;;  %v1556_v13 = vmul.f32 %v1524_v17, %v1076_v43 }
 0x16a   : > { %v1683_v8 = vsub.f32 1.0, %v1651_v25  ;;  %v1237_v41 = vmul.f32 1.0614054, %v8433_v50  ;;  %v742_v23 = vadd.f32 %v710_v55, %v638_v21  ;;  %v584_v25 = vadd.f32 %v8329_v24, %v532_v29 }
 0x16b   : > { %v1394_v22 = vadd.f32 -0.28449672, %v1362_v16  ;;  %v6160_v12 = vpop.eup %6159  ;;  %6163 = vpow2.f32 %v1618_v54  ;;  %v8456_v16 = vpop.xlane.xlu0 %3402 }
 0x16c   : > { %v1715_v18 = vmul.f32 %v1683_v8, %v1043_v2  ;;  %v1269_v42 = vadd.f32 -1.4531521, %v1237_v41  ;;  %v794_v15 = vadd.f32 %v8294_v46, %v742_v23  ;;  %v637_v31 = vadd.f32 %v606_v33, %v584_v25 }
 0x16d   : > { %v1426_v27 = vmul.f32 %v8397_v0, %v1394_v22  ;;  %v8461_v2 = vpop.xlane.xlu1 %3411  ;;  %v1042_v41 = vsel %vm1010_vm10, 1.0, %v13973_v48 }
 0x16e   : > { %v1747_v32 = vadd.f32 1.0, %v1715_v18  ;;  %v1301_v58 = vmul.f32 %v8433_v50, %v1269_v42  ;;  %v847_v55 = vadd.f32 %v815_v10, %v794_v15  ;;  %v741_v21 = vadd.f32 %v709_v63, %v637_v31 }
 0x16f   : > { %v1458_v1 = vadd.f32 0.2548296, %v1426_v27  ;;  %v1616_v18 = vmul.f32 1.442695, %v1556_v13  ;;  %v946_v15 = vmul.f32 0.5, %v8304_v52  ;;  %v8480_v63 = vpop.xlane.xlu0 %3408  ;;  %v8494_v13 = vld [vmem:[%s6511_s23 + $0xd0] sm:$0xff] }
 0x170   : > { %v8452_v6 = vmul.f32 %v1747_v32, %v947_v35  ;;  %v1333_v19 = vadd.f32 1.4214138, %v1301_v58  ;;  %v883_v24 = vmul.f32 %v6716_v30, %v847_v55  ;;  %v793_v43 = vadd.f32 %v8359_v26, %v741_v21 }
 0x171   : > { %v1490_v46 = vmul.f32 %v8397_v0, %v1458_v1  ;;  %v3440_v35 = vsel %vm1784_vm0, %v8459_v20, -inf  ;;  %v8484_v1 = vpop.xlane.xlu1 %3417  ;;  %6165 = vpow2.f32 %v1616_v18 }
 0x172   : > { %v1866_v28 = vsel %vm1784_vm0, %v8452_v6, -inf  ;;  %v1365_v33 = vmul.f32 %v8433_v50, %v1333_v19  ;;  %v8467_v22 = vadd.f32 %v6735_v5, %v883_v24  ;;  %v846_v42 = vadd.f32 %v815_v10, %v793_v43 }
 0x173   : > { %v1650_v8 = vmul.f32 %v6160_v12, %v1490_v46  ;;  %v6162_v0 = vpop.eup %6161  ;;  %1867 = vmax.xlane.f32.xlu1 %v1866_v28  ;;  %v3437_v43 = vsel %vm1784_vm0, %v8494_v13, -inf }
 0x174   : > { %v1397_v54 = vadd.f32 -0.28449672, %v1365_v33  ;;  %v1236_v29 = vmul.f32 1.0614054, %v6162_v0  ;;  %v8476_v27 = vmul.f32 0.70710677, %v8467_v22  ;;  %v882_v32 = vmul.f32 %v6716_v30, %v846_v42 }
 0x175   : > { %v1682_v23 = vsub.f32 1.0, %v1650_v8  ;;  %v6164_v10 = vpop.eup %6163  ;;  %v8499_v28 = vpop.xlane.xlu1 %1807 }
 0x176   : > { %v1429_v25 = vmul.f32 %v8433_v50, %v1397_v54  ;;  %v1268_v47 = vadd.f32 -1.4531521, %v1236_v29  ;;  %v1079_v26 = vand.u32 2147483647, %v8476_v27  ;;  %v8487_v31 = vadd.f32 %v6735_v5, %v882_v32 }
 0x177   : > { %v1714_v17 = vmul.f32 %v1682_v23, %v1042_v41  ;;  %3441 = vmax.xlane.f32.xlu1 %v3440_v35  ;;  %v8503_v41 = vpop.xlane.xlu0 %3414  ;;  %v949_v29 = vmul.f32 0.5, %v8351_v51  ;;  %vm1015_vm13 = vcmp.ge.f32.partialorder %v8476_v27, 0.0 }
 0x178   : > { %v1461_v55 = vadd.f32 0.2548296, %v1429_v25  ;;  %v1300_v12 = vmul.f32 %v6162_v0, %v1268_v47  ;;  %v1111_v52 = vmul.f32 0.3275911, %v1079_v26  ;;  %v8497_v21 = vmul.f32 0.70710677, %v8487_v31 }
 0x179   : > { %v1746_v58 = vadd.f32 1.0, %v1714_v17  ;;  %v1527_v17 = vsub.f32 0.0, %v1079_v26  ;;  %v8512_v47 = vpop.xlane.xlu1 %1801 }
 0x17a   : > { %v1493_v19 = vmul.f32 %v8433_v50, %v1461_v55  ;;  %v1332_v24 = vadd.f32 1.4214138, %v1300_v12  ;;  %v1143_v30 = vadd.f32 1.0, %v1111_v52  ;;  %v1078_v50 = vand.u32 2147483647, %v8497_v21  ;;  %v8518_v52 = vld [vmem:[%s6511_s23 + $0xe8] sm:$0xff] }
 0x17b   : > { %v8489_v46 = vmul.f32 %v1746_v58, %v946_v15  ;;  %v8510_v15 = vpop.xlane.xlu0 %1795  ;;  %v6166_v55 = vpop.eup %6165  ;;  %v1559_v51 = vmul.f32 %v1527_v17, %v1079_v26  ;;  %v3446_v7 = vsel %vm1784_vm0, %v8518_v52, -inf  ;;  %vm1014_vm14 = vcmp.ge.f32.partialorder %v8497_v21, 0.0 }
 0x17c   : > { %v1653_v5 = vmul.f32 %v6164_v10, %v1493_v19  ;;  %v1364_v33 = vmul.f32 %v6162_v0, %v1332_v24  ;;  %6167 = vrcp.f32 %v1143_v30  ;;  %v1110_v54 = vmul.f32 0.3275911, %v1078_v50 }
 0x17d   : > { %v1863_v8 = vsel %vm1784_vm0, %v8489_v46, -inf  ;;  %v1622_v26 = vmul.f32 1.442695, %v1559_v51  ;;  %v8537_v51 = vld [vmem:[%s6511_s23 + $0xe0] sm:$0xff] }
 0x17e   : > { %1864 = vmax.xlane.f32.xlu0 %v1863_v8  ;;  %v1685_v23 = vsub.f32 1.0, %v1653_v5  ;;  %v1396_v35 = vadd.f32 -0.28449672, %v1364_v33  ;;  %v1142_v25 = vadd.f32 1.0, %v1110_v54  ;;  %v1044_v5 = vsel %vm1012_vm12, 1.0, %v13973_v48  ;;  %14045 = vst [vmem:[#allocation31_spill] sm:$0xff] %v8537_v51 }
 0x17f   : > { %v8522_v30 = vpop.xlane.xlu0 %1792  ;;  %v1526_v33 = vsub.f32 0.0, %v1078_v50 }
 0x180   : > { %v1717_v18 = vmul.f32 %v1685_v23, %v1045_v49  ;;  %v1428_v42 = vmul.f32 %v6162_v0, %v1396_v35  ;;  %6169 = vrcp.f32 %v1142_v25  ;;  %v8525_v49 = vpop.xlane.xlu1 %1789  ;;  %v948_v23 = vmul.f32 0.5, %v8400_v56 }
 0x181   : > { %6171 = vpow2.f32 %v1622_v26 }
 0x182   : > { %3438 = vmax.xlane.f32.xlu0 %v3437_v43  ;;  %v1749_v32 = vadd.f32 1.0, %v1717_v18  ;;  %v1460_v58 = vadd.f32 0.2548296, %v1428_v42 }
 0x183   : > { %v8530_v17 = vpop.xlane.xlu0 %1798 }
 0x184   : > { %v8514_v12 = vmul.f32 %v1749_v32, %v949_v29  ;;  %v1492_v10 = vmul.f32 %v6162_v0, %v1460_v58  ;;  %v1558_v29 = vmul.f32 %v1526_v33, %v1078_v50  ;;  %v8532_v32 = vpop.xlane.xlu1 %1813 }
 0x186   : > { %v1872_v19 = vsel %vm1784_vm0, %v8514_v12, -inf  ;;  %v1652_v24 = vmul.f32 %v6166_v55, %v1492_v10  ;;  %v6168_v8 = vpop.eup %6167  ;;  %v1620_v56 = vmul.f32 1.442695, %v1558_v29 }
 0x187   : > { %1873 = vmax.xlane.f32.xlu1 %v1872_v19  ;;  %v1239_v0 = vmul.f32 1.0614054, %v6168_v8 }
 0x188   : > { %v1684_v43 = vsub.f32 1.0, %v1652_v24  ;;  %6173 = vpow2.f32 %v1620_v56 }
 0x189   : > { %v1271_v54 = vadd.f32 -1.4531521, %v1239_v0  ;;  %v8545_v0 = vpop.xlane.xlu1 %1819 }
 0x18a   : > { %v1716_v35 = vmul.f32 %v1684_v43, %v1044_v5  ;;  %v6170_v25 = vpop.eup %6169  ;;  %v3443_v5 = vsel %vm1784_vm0, %v8537_v51, -inf }
 0x18b   : > { %3447 = vmax.xlane.f32.xlu1 %v3446_v7  ;;  %v1303_v42 = vmul.f32 %v6168_v8, %v1271_v54  ;;  %v1238_v10 = vmul.f32 1.0614054, %v6170_v25  ;;  %v8543_v7 = vpop.xlane.xlu0 %1786 }
 0x18c   : > { %v1748_v18 = vadd.f32 1.0, %v1716_v35  ;;  %v6431_v35 = vld [vmem:[%s6511_s23 + $0x18] sm:$0xff] }
 0x18d   : > { %v1335_v55 = vadd.f32 1.4214138, %v1303_v42  ;;  %v1270_v24 = vadd.f32 -1.4531521, %v1238_v10  ;;  %v3458_v54 = vsub.f32 %v6431_v35, %v8246_v38  ;;  %v6172_v42 = vpop.eup %6171  ;;  %v6433_v38 = vld [vmem:[%s6511_s23 + $0x10] sm:$0xff] }
 0x18e   : > { %v8534_v58 = vmul.f32 %v1748_v18, %v948_v23 }
 0x18f   : > { %v1367_v50 = vmul.f32 %v6168_v8, %v1335_v55  ;;  %v1302_v43 = vmul.f32 %v6170_v25, %v1270_v24  ;;  %v3493_v56 = vmul.f32 1.442695, %v3458_v54 }
 0x190   : > { %v1869_v19 = vsel %vm1784_vm0, %v8534_v58, -inf }
 0x191   : > { %1870 = vmax.xlane.f32.xlu0 %v1869_v19  ;;  %v1399_v33 = vadd.f32 -0.28449672, %v1367_v50  ;;  %v1334_v23 = vadd.f32 1.4214138, %v1302_v43  ;;  %v8550_v19 = vpop.xlane.xlu0 %1810  ;;  %v6432_v50 = vld [vmem:[%s6511_s23 + $0x38] sm:$0xff]  ;;  %6175 = vpow2.f32 %v3493_v56 }
 0x192   : > { %v3462_v24 = vsub.f32 %v6432_v50, %v8286_v53  ;;  %v951_v53 = vmul.f32 0.5, %v8467_v22  ;;  %v1046_v22 = vsel %vm1014_vm14, 1.0, %v13973_v48 }
 0x193   : > { %v1431_v26 = vmul.f32 %v6168_v8, %v1399_v33  ;;  %v1366_v18 = vmul.f32 %v6170_v25, %v1334_v23  ;;  %v8554_v33 = vpop.xlane.xlu1 %1825  ;;  %v6174_v23 = vpop.eup %6173 }
 0x194   : > { %v3501_v35 = vmul.f32 1.442695, %v3462_v24 }
 0x195   : > { %3444 = vmax.xlane.f32.xlu0 %v3443_v5  ;;  %v1463_v29 = vadd.f32 0.2548296, %v1431_v26  ;;  %v1398_v10 = vadd.f32 -0.28449672, %v1366_v18  ;;  %v3457_v5 = vsub.f32 %v6433_v38, %v8281_v11  ;;  %v1047_v26 = vsel %vm1015_vm13, 1.0, %v13973_v48 }
 0x196   : > { %6177 = vpow2.f32 %v3501_v35  ;;  %v950_v48 = vmul.f32 0.5, %v8487_v31 }
 0x197   : > { %v1495_v55 = vmul.f32 %v6168_v8, %v1463_v29  ;;  %v1430_v51 = vmul.f32 %v6170_v25, %v1398_v10  ;;  %v6434_v29 = vld [vmem:[%s6511_s23 + $0x28] sm:$0xff]  ;;  %v3491_v11 = vmul.f32 1.442695, %v3457_v5  ;;  %v6435_v10 = vld [vmem:[%s6511_s23 + $0x30] sm:$0xff]  ;;  %v8567_v56 = vpop.xlane.xlu1 %1831 }
 0x198   : > { %v3460_v54 = vsub.f32 %v6434_v29, %v8318_v57  ;;  %v6438_v29 = vld [vmem:[%s6511_s23 + $0x48] sm:$0xff] }
 0x199   : > { %v1655_v43 = vmul.f32 %v6172_v42, %v1495_v55  ;;  %v1462_v8 = vadd.f32 0.2548296, %v1430_v51  ;;  %v8563_v55 = vpop.xlane.xlu0 %1816  ;;  %v3461_v51 = vsub.f32 %v6435_v10, %v8310_v59  ;;  %6179 = vpow2.f32 %v3491_v11  ;;  %v6439_v11 = vld [vmem:[%s6511_s23] sm:$0xff] }
 0x19a   : > { %v3497_v57 = vmul.f32 1.442695, %v3460_v54  ;;  %v3464_v54 = vsub.f32 %v6438_v29, %v8378_v60  ;;  %v3455_v10 = vsub.f32 %v6439_v11, %v8374_v36 }
 0x19b   : > { %v1687_v27 = vsub.f32 1.0, %v1655_v43  ;;  %v1494_v42 = vmul.f32 %v6170_v25, %v1462_v8  ;;  %v6436_v43 = vld [vmem:[%s6511_s23 + $0x8] sm:$0xff]  ;;  %v3499_v5 = vmul.f32 1.442695, %v3461_v51 }
 0x19c   : > { %v3456_v21 = vsub.f32 %v6436_v43, %v8348_v34  ;;  %6181 = vpow2.f32 %v3497_v57  ;;  %v3505_v60 = vmul.f32 1.442695, %v3464_v54 }
 0x19d   : > { %v1719_v18 = vmul.f32 %v1687_v27, %v1047_v26  ;;  %v1654_v24 = vmul.f32 %v6174_v23, %v1494_v42  ;;  %v6437_v26 = vld [vmem:[%s6511_s23 + $0x20] sm:$0xff]  ;;  %v8577_v27 = vld [vmem:[%s6511_s23 + $0xf8] sm:$0xff]  ;;  %v8582_v35 = vpop.xlane.xlu0 %1822  ;;  %v8590_v42 = vpop.eup %6175  ;;  %6183 = vpow2.f32 %v3499_v5 }
 0x19e   : > { %v3459_v59 = vsub.f32 %v6437_v26, %v8342_v14  ;;  %v3489_v34 = vmul.f32 1.442695, %v3456_v21  ;;  %v8586_v14 = vpop.xlane.xlu1 %1837  ;;  %v3560_v43 = vsel %vm1784_vm0, %v8590_v42, 0.0  ;;  %v6441_v5 = vld [vmem:[%s6511_s23 + $0x40] sm:$0xff] }
 0x19f   : > { %v1751_v50 = vadd.f32 1.0, %v1719_v18  ;;  %v1686_v38 = vsub.f32 1.0, %v1654_v24  ;;  %v3452_v18 = vsel %vm1784_vm0, %v8577_v27, -inf  ;;  %v6440_v24 = vld [vmem:[%s6511_s23 + $0x58] sm:$0xff]  ;;  %v3463_v26 = vsub.f32 %v6441_v5, %v8395_v40 }
 0x1a0   : > { %v3495_v31 = vmul.f32 1.442695, %v3459_v59  ;;  %6185 = vpow2.f32 %v3489_v34  ;;  %v3466_v57 = vsub.f32 %v6440_v24, %v8403_v37  ;;  %v8607_v36 = vpop.eup %6177 }
 0x1a1   : > { %v8572_v25 = vmul.f32 %v1751_v50, %v951_v53  ;;  %v1718_v23 = vmul.f32 %v1686_v38, %v1046_v22  ;;  %v8597_v50 = vld [vmem:[%s6511_s23 + $0xf0] sm:$0xff]  ;;  %v8605_v21 = vpop.xlane.xlu0 %1828  ;;  %v3487_v38 = vmul.f32 1.442695, %v3455_v10  ;;  %v3572_v29 = vsel %vm1784_vm0, %v8607_v36, 0.0 }
 0x1a2   : > { %6187 = vpow2.f32 %v3495_v31  ;;  %v8611_v59 = vpop.xlane.xlu1 %1843  ;;  %v3449_v37 = vsel %vm1784_vm0, %v8597_v50, -inf  ;;  %v3503_v40 = vmul.f32 1.442695, %v3463_v26 }
 0x1a3   : > { %v1878_v8 = vsel %vm1784_vm0, %v8572_v25, -inf  ;;  %v1750_v53 = vadd.f32 1.0, %v1718_v23  ;;  %6189 = vpow2.f32 %v3505_v60  ;;  %v6442_v23 = vld [vmem:[%s6511_s23 + $0x68] sm:$0xff]  ;;  %v6444_v60 = vld [vmem:[%s6511_s23 + $0x78] sm:$0xff] }
 0x1a4   : > { %1879 = vmax.xlane.f32.xlu1 %v1878_v8  ;;  %v8615_v8 = vpop.eup %6179  ;;  %v3468_v34 = vsub.f32 %v6442_v23, %v8423_v62  ;;  %6191 = vpow2.f32 %v3487_v38  ;;  %v3470_v24 = vsub.f32 %v6444_v60, %v8443_v9  ;;  %v6445_v38 = vld [vmem:[%s6511_s23 + $0x60] sm:$0xff] }
 0x1a5   : > { %v8594_v51 = vmul.f32 %v1750_v53, %v950_v48  ;;  %v3509_v48 = vmul.f32 1.442695, %v3466_v57  ;;  %v6443_v53 = vld [vmem:[%s6511_s23 + $0x50] sm:$0xff]  ;;  %v3557_v31 = vsel %vm1784_vm0, %v8615_v8, 0.0  ;;  %v8627_v11 = vpop.xlane.xlu0 %1834  ;;  %v3467_v5 = vsub.f32 %v6445_v38, %v8440_v44 }
 0x1a6   : > { %v8621_v54 = vpop.eup %6181  ;;  %v3513_v62 = vmul.f32 1.442695, %v3468_v34  ;;  %v3517_v9 = vmul.f32 1.442695, %v3470_v24  ;;  %v6448_v24 = vld [vmem:[%s6511_s23 + $0x98] sm:$0xff] }
 0x1a7   : > { %v1875_v22 = vsel %vm1784_vm0, %v8594_v51, -inf  ;;  %v8629_v10 = vpop.eup %6183  ;;  %6193 = vpow2.f32 %v3509_v48  ;;  %v8633_v57 = vpop.xlane.xlu1 %1849  ;;  %v6446_v48 = vld [vmem:[%s6511_s23 + $0x88] sm:$0xff]  ;;  %v3511_v44 = vmul.f32 1.442695, %v3467_v5  ;;  %v6449_v5 = vld [vmem:[%s6511_s23 + $0x80] sm:$0xff] }
 0x1a8   : > { %3453 = vmax.xlane.f32.xlu1 %v3452_v18  ;;  %1876 = vmax.xlane.f32.xlu0 %v1875_v22  ;;  %v3465_v18 = vsub.f32 %v6443_v53, %v8418_v3  ;;  %v3566_v22 = vsel %vm1784_vm0, %v8621_v54, 0.0  ;;  %6195 = vpow2.f32 %v3503_v40  ;;  %v3569_v26 = vsel %vm1784_vm0, %v8629_v10, 0.0  ;;  %v6447_v53 = vld [vmem:[%s6511_s23 + $0x70] sm:$0xff] }
 0x1a9   : > { %6197 = vpow2.f32 %v3513_v62  ;;  %v3472_v23 = vsub.f32 %v6446_v48, %v8461_v2 }
 0x1aa   : > { %v8637_v3 = vpop.eup %6185 }
 0x1ab   : > { %v3554_v34 = vsel %vm1784_vm0, %v8637_v3, 0.0  ;;  %v3521_v60 = vmul.f32 1.442695, %v3472_v23 }
 0x1ac   : > { %3561 = vadd.xlane.f32.xlu1 %v3560_v43  ;;  %3450 = vmax.xlane.f32.xlu0 %v3449_v37  ;;  %v3507_v43 = vmul.f32 1.442695, %v3465_v18  ;;  %v8643_v37 = vpop.eup %6187  ;;  %v3469_v18 = vsub.f32 %v6447_v53, %v8456_v16  ;;  %v6450_v53 = vld [vmem:[%s6511_s23 + $0xa8] sm:$0xff] }
 0x1ad   : > { %v8651_v40 = vpop.eup %6189  ;;  %v3563_v62 = vsel %vm1784_vm0, %v8643_v37, 0.0 }
 0x1ae   : > { %14046 = vst [vmem:[#allocation32_spill] sm:$0xff] %v8651_v40  ;;  %6199 = vpow2.f32 %v3507_v43  ;;  %v8659_v2 = vpop.eup %6191  ;;  %v3578_v43 = vsel %vm1784_vm0, %v8651_v40, 0.0  ;;  %v3515_v16 = vmul.f32 1.442695, %v3469_v18 }
 0x1af   : > { %6201 = vpow2.f32 %v3517_v9  ;;  %v3551_v9 = vsel %vm1784_vm0, %v8659_v2, 0.0 }
 0x1b0   : > { %3573 = vadd.xlane.f32.xlu1 %v3572_v29  ;;  %3558 = vadd.xlane.f32.xlu0 %v3557_v31  ;;  %6203 = vpow2.f32 %v3511_v44 }
 0x1b1   : > { %v8665_v38 = vpop.eup %6193  ;;  %6205 = vpow2.f32 %v3521_v60 }
 0x1b2   : > { %v8649_v29 = vpop.xlane.xlu0 %1840  ;;  %v3584_v44 = vsel %vm1784_vm0, %v8665_v38, 0.0  ;;  %6207 = vpow2.f32 %v3515_v16 }
 0x1b4   : > { %3567 = vadd.xlane.f32.xlu1 %v3566_v22  ;;  %3570 = vadd.xlane.f32.xlu0 %v3569_v26  ;;  %v3474_v22 = vsub.f32 %v6448_v24, %v8484_v1  ;;  %v3471_v26 = vsub.f32 %v6449_v5, %v8480_v63 }
 0x1b6   : > { %v3525_v1 = vmul.f32 1.442695, %v3474_v22  ;;  %v3519_v63 = vmul.f32 1.442695, %v3471_v26  ;;  %v6452_v26 = vld [vmem:[%s6511_s23 + $0xa0] sm:$0xff] }
 0x1b8   : > { %3555 = vadd.xlane.f32.xlu1 %v3554_v34  ;;  %3564 = vadd.xlane.f32.xlu0 %v3563_v62  ;;  %v8673_v34 = vpop.eup %6195  ;;  %v6451_v62 = vld [vmem:[%s6511_s23 + $0x90] sm:$0xff]  ;;  %6209 = vpow2.f32 %v3525_v1 }
 0x1b9   : > { %v8655_v31 = vpop.xlane.xlu1 %1804  ;;  %v8678_v18 = vpop.eup %6197  ;;  %v3473_v5 = vsub.f32 %v6451_v62, %v8503_v41  ;;  %v3575_v40 = vsel %vm1784_vm0, %v8673_v34, 0.0  ;;  %6211 = vpow2.f32 %v3519_v63 }
 0x1bb   : > { %v3523_v16 = vmul.f32 1.442695, %v3473_v5 }
 0x1bc   : > { %3579 = vadd.xlane.f32.xlu1 %v3578_v43  ;;  %3552 = vadd.xlane.f32.xlu0 %v3551_v9  ;;  %v8684_v43 = vpop.eup %6199 }
 0x1bd   : > { %v3424_v48 = vpop.xlane.xlu1 %3423  ;;  %v3581_v41 = vsel %vm1784_vm0, %v8684_v43, 0.0 }
 0x1be   : > { %v8671_v23 = vpop.xlane.xlu0 %1846  ;;  %v3476_v24 = vsub.f32 %v6450_v53, %v3424_v48  ;;  %v3590_v48 = vsel %vm1784_vm0, %v8678_v18, 0.0  ;;  %v8688_v53 = vpop.eup %6201 }
 0x1bf   : > { %14047 = vst [vmem:[#allocation33_spill] sm:$0xff] %v8688_v53  ;;  %v8693_v62 = vpop.eup %6203  ;;  %v3596_v1 = vsel %vm1784_vm0, %v8688_v53, 0.0 }
 0x1c0   : > { %3585 = vadd.xlane.f32.xlu1 %v3584_v44  ;;  %v3529_v22 = vmul.f32 1.442695, %v3476_v24  ;;  %3576 = vadd.xlane.f32.xlu0 %v3575_v40  ;;  %14048 = vst [vmem:[#allocation34_spill] sm:$0xff] %v8693_v62  ;;  %v8697_v24 = vpop.eup %6205  ;;  %v3587_v40 = vsel %vm1784_vm0, %v8693_v62, 0.0  ;;  %v14063_v62 = vld [vmem:[#allocation18_spill] sm:$0xff] }
 0x1c1   : > { %14049 = vst [vmem:[#allocation35_spill] sm:$0xff] %v8697_v24  ;;  %v8701_v63 = vpop.eup %6207  ;;  %v3602_v5 = vsel %vm1784_vm0, %v8697_v24, 0.0 }
 0x1c2   : > { %v3421_v60 = vpop.xlane.xlu0 %3420  ;;  %6213 = vpow2.f32 %v3529_v22  ;;  %14050 = vst [vmem:[#allocation36_spill] sm:$0xff] %v8701_v63  ;;  %v3593_v22 = vsel %vm1784_vm0, %v8701_v63, 0.0 }
 0x1c3   : > { %v3475_v9 = vsub.f32 %v6452_v26, %v3421_v60  ;;  %6215 = vpow2.f32 %v3523_v16  ;;  %v8705_v60 = vpop.eup %6209 }
 0x1c4   : > { %3591 = vadd.xlane.f32.xlu1 %v3590_v48  ;;  %3582 = vadd.xlane.f32.xlu0 %v3581_v41  ;;  %14051 = vst [vmem:[#allocation37_spill] sm:$0xff] %v8705_v60  ;;  %v8709_v48 = vpop.eup %6211  ;;  %v3608_v16 = vsel %vm1784_vm0, %v8705_v60, 0.0 }
 0x1c5   : > { %v3527_v44 = vmul.f32 1.442695, %v3475_v9  ;;  %14052 = vst [vmem:[#allocation38_spill] sm:$0xff] %v8709_v48  ;;  %v3599_v9 = vsel %vm1784_vm0, %v8709_v48, 0.0 }
 0x1c7   : > { %6217 = vpow2.f32 %v3527_v44 }
 0x1c8   : > { %3597 = vadd.xlane.f32.xlu1 %v3596_v1  ;;  %3588 = vadd.xlane.f32.xlu0 %v3587_v40 }
 0x1cc   : > { %3603 = vadd.xlane.f32.xlu1 %v3602_v5  ;;  %v8713_v26 = vpop.eup %6213  ;;  %3594 = vadd.xlane.f32.xlu0 %v3593_v22 }
 0x1cd   : > { %14053 = vst [vmem:[#allocation39_spill] sm:$0xff] %v8713_v26  ;;  %v8717_v41 = vpop.eup %6215  ;;  %v3614_v44 = vsel %vm1784_vm0, %v8713_v26, 0.0 }
 0x1ce   : > { %14054 = vst [vmem:[#allocation40_spill] sm:$0xff] %v8717_v41  ;;  %v3605_v40 = vsel %vm1784_vm0, %v8717_v41, 0.0 }
 0x1d0   : > { %3609 = vadd.xlane.f32.xlu1 %v3608_v16  ;;  %3600 = vadd.xlane.f32.xlu0 %v3599_v9 }
 0x1d1   : > { %v8725_v5 = vpop.eup %6217 }
 0x1d2   : > { %14055 = vst [vmem:[#allocation41_spill] sm:$0xff] %v8725_v5  ;;  %v3611_v48 = vsel %vm1784_vm0, %v8725_v5, 0.0 }
 0x1d4   : > { %v8719_v1 = vpop.xlane.xlu1 %1855  ;;  %3615 = vadd.xlane.f32.xlu1 %v3614_v44  ;;  %3606 = vadd.xlane.f32.xlu0 %v3605_v40 }
 0x1d8   : > { %v3430_v60 = vpop.xlane.xlu1 %3429  ;;  %3612 = vadd.xlane.f32.xlu0 %v3611_v48 }
 0x1d9   : > { %v3478_v22 = vsub.f32 %v8251_v45, %v3430_v60 }
 0x1db   : > { %v3533_v16 = vmul.f32 1.442695, %v3478_v22 }
 0x1dd   : > { %6219 = vpow2.f32 %v3533_v16 }
 0x1e2   : > { %v8730_v24 = vpop.xlane.xlu0 %1852 }
 0x1e6   : > { %v3427_v26 = vpop.xlane.xlu0 %3426 }
 0x1e7   : > { %v3477_v9 = vsub.f32 %v8332_v39, %v3427_v26  ;;  %v8733_v63 = vpop.eup %6219 }
 0x1e8   : > { %14056 = vst [vmem:[#allocation42_spill] sm:$0xff] %v8733_v63  ;;  %v3620_v44 = vsel %vm1784_vm0, %v8733_v63, 0.0 }
 0x1e9   : > { %v3531_v41 = vmul.f32 1.442695, %v3477_v9  ;;  %v8735_v53 = vpop.xlane.xlu1 %1861  ;;  %3621 = vadd.xlane.f32.xlu1 %v3620_v44 }
 0x1eb   : > { %6221 = vpow2.f32 %v3531_v41  ;;  %v270_v41 = vld [vmem:[%s13579_s4] sm:$0xff] }
 0x1ec   : > { %5956 = vmatprep.subr.msk.mxu0 %vm4993_vm15, %v270_v41 }
 0x1ed   : > { %v3436_v45 = vpop.xlane.xlu1 %3435  ;;  %5957 = vmatpush3.msk.msra.mxu0 %vm4993_vm15, %v270_v41 }
 0x1ee   : > { %v3480_v60 = vsub.f32 %v8365_v61, %v3436_v45  ;;  %v8740_v40 = vpop.xlane.xlu0 %1858 }
 0x1f0   : > { %v3537_v48 = vmul.f32 1.442695, %v3480_v60 }
 0x1f2   : > { %6223 = vpow2.f32 %v3537_v48  ;;  %v3433_v22 = vpop.xlane.xlu0 %3432 }
 0x1f3   : > { %v3479_v39 = vsub.f32 %v8387_v4, %v3433_v22  ;;  %v4896_v4 = vrot.slane %v270_v41, 4  ;;  %v14060_v22 = vld [vmem:[#allocation16_spill] sm:$0xff] }
 0x1f5   : > { %v8743_v26 = vpop.eup %6221  ;;  %v3535_v16 = vmul.f32 1.442695, %v3479_v39  ;;  %5906 = vmatprep.subr.msk.mxu1 %vm4993_vm15, %v4896_v4  ;;  %v1884_v39 = vsub.f32 %v14060_v22, %v8510_v15  ;;  %v1883_v15 = vsub.f32 %v14063_v62, %v8522_v30 }
 0x1f6   : > { %14057 = vst [vmem:[#allocation43_spill] sm:$0xff] %v8743_v26  ;;  %v3617_v9 = vsel %vm1784_vm0, %v8743_v26, 0.0  ;;  %5907 = vmatpush3.msk.msra.mxu1 %vm4993_vm15, %v4896_v4 }
 0x1f7   : > { %3618 = vadd.xlane.f32.xlu0 %v3617_v9  ;;  %6225 = vpow2.f32 %v3535_v16  ;;  %v1919_v26 = vmul.f32 1.442695, %v1884_v39  ;;  %v1917_v39 = vmul.f32 1.442695, %v1883_v15 }
 0x1fc   : > { %v8747_v44 = vpop.eup %6223 }
 0x1fd   : > { %14058 = vst [vmem:[#allocation44_spill] sm:$0xff] %v8747_v44  ;;  %v3626_v61 = vsel %vm1784_vm0, %v8747_v44, 0.0 }
 0x1fe   : > { %3627 = vadd.xlane.f32.xlu1 %v3626_v61  ;;  %v14061_v61 = vld [vmem:[#allocation4_spill] sm:$0xff] }
 0x1ff   : > { %v1888_v44 = vsub.f32 %v14061_v61, %v8499_v28 }
 0x200   : > { %v8756_v60 = vpop.xlane.xlu1 %1867 }
 0x201   : > { %v8754_v45 = vpop.eup %6225  ;;  %v1927_v4 = vmul.f32 1.442695, %v1888_v44  ;;  %v14067_v44 = vld [vmem:[#allocation20_spill] sm:$0xff] }
 0x202   : > { %14059 = vst [vmem:[#allocation45_spill] sm:$0xff] %v8754_v45  ;;  %v3623_v48 = vsel %vm1784_vm0, %v8754_v45, 0.0  ;;  %v14062_v45 = vld [vmem:[#allocation17_spill] sm:$0xff]  ;;  %v1890_v30 = vsub.f32 %v14067_v44, %v8532_v32 }
 0x203   : > { %3624 = vadd.xlane.f32.xlu0 %v3623_v48  ;;  %v1886_v5 = vsub.f32 %v14062_v45, %v8512_v47 }
 0x204   : > { %v3442_v16 = vpop.xlane.xlu1 %3441 }
 0x205   : > { %v3482_v9 = vsub.f32 %v8459_v20, %v3442_v16  ;;  %v1923_v41 = vmul.f32 1.442695, %v1886_v5  ;;  %v14064_v20 = vld [vmem:[#allocation19_spill] sm:$0xff] }
 0x206   : > { %v1882_v16 = vsub.f32 %v14064_v20, %v8525_v49  ;;  %v14072_v20 = vld [vmem:[#allocation21_spill] sm:$0xff] }
 0x207   : > { %v3541_v63 = vmul.f32 1.442695, %v3482_v9 }
 0x209   : > { %6227 = vpow2.f32 %v3541_v63  ;;  %v14065_v63 = vld [vmem:[#allocation6_spill] sm:$0xff] }
 0x20a   : > { %6229 = vpow2.f32 %v1919_v26  ;;  %v1887_v9 = vsub.f32 %v14065_v63, %v8655_v31  ;;  %v1915_v26 = vmul.f32 1.442695, %v1882_v16  ;;  %v1931_v31 = vmul.f32 1.442695, %v1890_v30 }
 0x20b   : > { %v8767_v48 = vpop.xlane.xlu0 %1864  ;;  %6231 = vpow2.f32 %v1927_v4  ;;  %v14070_v4 = vld [vmem:[#allocation22_spill] sm:$0xff]  ;;  %v1881_v16 = vsub.f32 %v14072_v20, %v8543_v7 }
 0x20c   : > { %6233 = vpow2.f32 %v1923_v41  ;;  %v1925_v61 = vmul.f32 1.442695, %v1887_v9  ;;  %v1892_v15 = vsub.f32 %v14070_v4, %v8545_v0 }
 0x20f   : > { %v3439_v22 = vpop.xlane.xlu0 %3438 }
 0x210   : > { %v3481_v28 = vsub.f32 %v8494_v13, %v3439_v22  ;;  %v14069_v13 = vld [vmem:[#allocation8_spill] sm:$0xff] }
 0x211   : > { %v1885_v49 = vsub.f32 %v14069_v13, %v8530_v17  ;;  %v1935_v17 = vmul.f32 1.442695, %v1892_v15 }
 0x212   : > { %v3539_v47 = vmul.f32 1.442695, %v3481_v28  ;;  %v14073_v28 = vld [vmem:[#allocation24_spill] sm:$0xff] }
 0x213   : > { %v8776_v45 = vpop.eup %6227  ;;  %v1921_v22 = vmul.f32 1.442695, %v1885_v49 }
 0x214   : > { %14066 = vst [vmem:[#allocation16_spill] sm:$0xff] %v8776_v45  ;;  %6235 = vpow2.f32 %v3539_v47  ;;  %v3632_v62 = vsel %vm1784_vm0, %v8776_v45, 0.0  ;;  %v8782_v5 = vpop.eup %6229  ;;  %v1913_v47 = vmul.f32 1.442695, %v1881_v16 }
 0x215   : > { %14068 = vst [vmem:[#allocation4_spill] sm:$0xff] %v8782_v5  ;;  %6237 = vpow2.f32 %v1917_v39  ;;  %3633 = vadd.xlane.f32.xlu1 %v3632_v62  ;;  %v1986_v32 = vsel %vm1784_vm0, %v8782_v5, 0.0  ;;  %v8790_v41 = vpop.eup %6231  ;;  %v1894_v39 = vsub.f32 %v14073_v28, %v8554_v33  ;;  %v14078_v62 = vld [vmem:[#allocation26_spill] sm:$0xff] }
 0x216   : > { %6239 = vpow2.f32 %v1915_v26  ;;  %14071 = vst [vmem:[#allocation17_spill] sm:$0xff] %v8790_v41  ;;  %v8796_v63 = vpop.eup %6233  ;;  %v1998_v0 = vsel %vm1784_vm0, %v8790_v41, 0.0  ;;  %v14076_v26 = vld [vmem:[#allocation23_spill] sm:$0xff]  ;;  %v1896_v13 = vsub.f32 %v14078_v62, %v8567_v56  ;;  %v14082_v56 = vld [vmem:[#allocation28_spill] sm:$0xff] }
 0x217   : > { %6241 = vpow2.f32 %v1925_v61  ;;  %14074 = vst [vmem:[#allocation18_spill] sm:$0xff] %v8796_v63  ;;  %v1889_v44 = vsub.f32 %v14076_v26, %v8550_v19  ;;  %v1939_v33 = vmul.f32 1.442695, %v1894_v39  ;;  %v1992_v49 = vsel %vm1784_vm0, %v8796_v63, 0.0  ;;  %v14080_v19 = vld [vmem:[#allocation25_spill] sm:$0xff] }
 0x218   : > { %6243 = vpow2.f32 %v1931_v31  ;;  %v1891_v4 = vsub.f32 %v14080_v19, %v8563_v55  ;;  %v1898_v20 = vsub.f32 %v14082_v56, %v8586_v14  ;;  %v14084_v55 = vld [vmem:[#allocation27_spill] sm:$0xff] }
 0x219   : > { %1987 = vadd.xlane.f32.xlu1 %v1986_v32  ;;  %6245 = vpow2.f32 %v1921_v22  ;;  %v1929_v31 = vmul.f32 1.442695, %v1889_v44  ;;  %v1943_v22 = vmul.f32 1.442695, %v1896_v13  ;;  %v1893_v39 = vsub.f32 %v14084_v55, %v8582_v35  ;;  %v14086_v44 = vld [vmem:[#allocation12_spill] sm:$0xff]  ;;  %v14088_v13 = vld [vmem:[#allocation7_spill] sm:$0xff] }
 0x21a   : > { %6247 = vpow2.f32 %v1935_v17  ;;  %v1933_v28 = vmul.f32 1.442695, %v1891_v4  ;;  %v1947_v14 = vmul.f32 1.442695, %v1898_v20  ;;  %v14092_v20 = vld [vmem:[#allocation13_spill] sm:$0xff] }
 0x21b   : > { %6249 = vpow2.f32 %v1913_v47  ;;  %v1937_v35 = vmul.f32 1.442695, %v1893_v39 }
 0x21c   : > { %6251 = vpow2.f32 %v1939_v33 }
 0x21d   : > { %1999 = vadd.xlane.f32.xlu1 %v1998_v0  ;;  %6253 = vpow2.f32 %v1929_v31  ;;  %v8828_v0 = vpop.xlane.xlu1 %1873  ;;  %v14089_v31 = vld [vmem:[#allocation5_spill] sm:$0xff] }
 0x21e   : > { %v8800_v9 = vpop.eup %6235  ;;  %6255 = vpow2.f32 %v1943_v22  ;;  %v1897_v19 = vsub.f32 %v14089_v31, %v8627_v11  ;;  %v14091_v22 = vld [vmem:[#allocation15_spill] sm:$0xff]  ;;  %v14097_v31 = vld [vmem:[#allocation9_spill] sm:$0xff] }
 0x21f   : > { %14075 = vst [vmem:[#allocation19_spill] sm:$0xff] %v8800_v9  ;;  %v3629_v7 = vsel %vm1784_vm0, %v8800_v9, 0.0  ;;  %v8806_v30 = vpop.eup %6237  ;;  %6257 = vpow2.f32 %v1933_v28  ;;  %v1902_v56 = vsub.f32 %v14091_v22, %v8633_v57  ;;  %v8852_v28 = vpop.xlane.xlu0 %1870  ;;  %v14095_v57 = vld [vmem:[#allocation14_spill] sm:$0xff] }
 0x220   : > { %14077 = vst [vmem:[#allocation6_spill] sm:$0xff] %v8806_v30  ;;  %3630 = vadd.xlane.f32.xlu0 %v3629_v7  ;;  %v8812_v61 = vpop.eup %6239  ;;  %v1983_v15 = vsel %vm1784_vm0, %v8806_v30, 0.0  ;;  %v1900_v7 = vsub.f32 %v14086_v44, %v8611_v59  ;;  %6259 = vpow2.f32 %v1947_v14  ;;  %v1945_v44 = vmul.f32 1.442695, %v1897_v19 }
 0x221   : > { %14079 = vst [vmem:[#allocation20_spill] sm:$0xff] %v8812_v61  ;;  %1993 = vadd.xlane.f32.xlu1 %v1992_v49  ;;  %v8818_v32 = vpop.eup %6241  ;;  %v1980_v16 = vsel %vm1784_vm0, %v8812_v61, 0.0  ;;  %v1895_v49 = vsub.f32 %v14088_v13, %v8605_v21  ;;  %v3448_v21 = vpop.xlane.xlu1 %3447  ;;  %6261 = vpow2.f32 %v1937_v35  ;;  %v1955_v13 = vmul.f32 1.442695, %v1902_v56 }
 0x222   : > { %14081 = vst [vmem:[#allocation8_spill] sm:$0xff] %v8818_v32  ;;  %v8824_v17 = vpop.eup %6243  ;;  %v1995_v47 = vsel %vm1784_vm0, %v8818_v32, 0.0  ;;  %v1951_v59 = vmul.f32 1.442695, %v1900_v7  ;;  %v1904_v7 = vsub.f32 %v14095_v57, %v8719_v1  ;;  %v1910_v57 = vsub.f32 %v8514_v12, %v8828_v0 }
 0x223   : > { %14083 = vst [vmem:[#allocation22_spill] sm:$0xff] %v8824_v17  ;;  %v8832_v26 = vpop.eup %6245  ;;  %v2004_v33 = vsel %vm1784_vm0, %v8824_v17, 0.0  ;;  %v1941_v39 = vmul.f32 1.442695, %v1895_v49  ;;  %v14098_v49 = vld [vmem:[#allocation29_spill] sm:$0xff]  ;;  %v3445_v56 = vpop.xlane.xlu0 %3444 }
 0x224   : > { %1984 = vadd.xlane.f32.xlu0 %v1983_v15  ;;  %14085 = vst [vmem:[#allocation21_spill] sm:$0xff] %v8832_v26  ;;  %v8838_v62 = vpop.eup %6247  ;;  %v1989_v4 = vsel %vm1784_vm0, %v8832_v26, 0.0  ;;  %6263 = vpow2.f32 %v1951_v59  ;;  %v1959_v59 = vmul.f32 1.442695, %v1904_v7 }
 0x225   : > { %1981 = vadd.xlane.f32.xlu1 %v1980_v16  ;;  %14087 = vst [vmem:[#allocation24_spill] sm:$0xff] %v8838_v62  ;;  %v8846_v15 = vpop.eup %6249  ;;  %v1899_v16 = vsub.f32 %v14092_v20, %v8649_v29  ;;  %v2010_v11 = vsel %vm1784_vm0, %v8838_v62, 0.0  ;;  %6265 = vpow2.f32 %v1941_v39  ;;  %v14100_v20 = vld [vmem:[#allocation30_spill] sm:$0xff] }
 0x226   : > { %14090 = vst [vmem:[#allocation23_spill] sm:$0xff] %v8846_v15  ;;  %v8856_v55 = vpop.eup %6251  ;;  %v1977_v29 = vsel %vm1784_vm0, %v8846_v15, 0.0  ;;  %6267 = vpow2.f32 %v1945_v44 }
 0x227   : > { %14093 = vst [vmem:[#allocation26_spill] sm:$0xff] %v8856_v55  ;;  %v1949_v35 = vmul.f32 1.442695, %v1899_v16  ;;  %v2016_v19 = vsel %vm1784_vm0, %v8856_v55, 0.0  ;;  %6269 = vpow2.f32 %v1955_v13 }
 0x228   : > { %1996 = vadd.xlane.f32.xlu0 %v1995_v47  ;;  %v14094_v47 = vld [vmem:[#allocation11_spill] sm:$0xff] }
 0x229   : > { %2005 = vadd.xlane.f32.xlu1 %v2004_v33  ;;  %v1901_v14 = vsub.f32 %v14094_v47, %v8671_v23  ;;  %v8864_v33 = vpop.eup %6253  ;;  %v1906_v23 = vsub.f32 %v14098_v49, %v8735_v53  ;;  %6271 = vpow2.f32 %v1949_v35 }
 0x22a   : > { %14096 = vst [vmem:[#allocation25_spill] sm:$0xff] %v8864_v33  ;;  %v8872_v22 = vpop.eup %6255  ;;  %v2001_v53 = vsel %vm1784_vm0, %v8864_v33, 0.0 }
 0x22b   : > { %14099 = vst [vmem:[#allocation28_spill] sm:$0xff] %v8872_v22  ;;  %v1953_v1 = vmul.f32 1.442695, %v1901_v14  ;;  %v8882_v47 = vpop.eup %6257  ;;  %v1907_v14 = vsub.f32 %v8489_v46, %v8767_v48  ;;  %v2022_v44 = vsel %vm1784_vm0, %v8872_v22, 0.0 }
 0x22c   : > { %1990 = vadd.xlane.f32.xlu0 %v1989_v4  ;;  %v1903_v4 = vsub.f32 %v14097_v31, %v8730_v24  ;;  %v1908_v24 = vsub.f32 %v8452_v6, %v8756_v60  ;;  %14101 = vst [vmem:[#allocation27_spill] sm:$0xff] %v8882_v47  ;;  %v8888_v6 = vpop.eup %6259  ;;  %v2007_v46 = vsel %vm1784_vm0, %v8882_v47, 0.0 }
 0x22d   : > { %2011 = vadd.xlane.f32.xlu1 %v2010_v11  ;;  %v1905_v11 = vsub.f32 %v14100_v20, %v8740_v40  ;;  %v1963_v40 = vmul.f32 1.442695, %v1906_v23  ;;  %14102 = vst [vmem:[#allocation12_spill] sm:$0xff] %v8888_v6  ;;  %6273 = vpow2.f32 %v1953_v1  ;;  %v8895_v48 = vpop.eup %6261  ;;  %v1965_v31 = vmul.f32 1.442695, %v1907_v14 }
 0x22e   : > { %v1957_v39 = vmul.f32 1.442695, %v1903_v4  ;;  %6275 = vpow2.f32 %v1959_v59  ;;  %v1967_v7 = vmul.f32 1.442695, %v1908_v24  ;;  %14103 = vst [vmem:[#allocation7_spill] sm:$0xff] %v8895_v48  ;;  %v1909_v4 = vsub.f32 %v8534_v58, %v8852_v28  ;;  %v8901_v0 = vpop.eup %6263 }
 0x22f   : > { %v1961_v60 = vmul.f32 1.442695, %v1905_v11  ;;  %v2028_v12 = vsel %vm1784_vm0, %v8888_v6, 0.0  ;;  %14104 = vst [vmem:[#allocation5_spill] sm:$0xff] %v8901_v0  ;;  %v2013_v1 = vsel %vm1784_vm0, %v8895_v48, 0.0  ;;  %v8906_v20 = vpop.eup %6265  ;;  %v2034_v59 = vsel %vm1784_vm0, %v8901_v0, 0.0 }
 0x230   : > { %1978 = vadd.xlane.f32.xlu0 %v1977_v29  ;;  %v3484_v29 = vsub.f32 %v8518_v52, %v3448_v21  ;;  %6277 = vpow2.f32 %v1957_v39  ;;  %v1971_v52 = vmul.f32 1.442695, %v1910_v57  ;;  %v14105_v21 = vld [vmem:[#allocation31_spill] sm:$0xff]  ;;  %14106 = vst [vmem:[#allocation15_spill] sm:$0xff] %v8906_v20  ;;  %v8908_v58 = vpop.eup %6267  ;;  %v1969_v28 = vmul.f32 1.442695, %v1909_v4 }
 0x231   : > { %2017 = vadd.xlane.f32.xlu1 %v2016_v19  ;;  %v8878_v16 = vpop.xlane.xlu1 %1879  ;;  %6279 = vpow2.f32 %v1963_v40  ;;  %v3483_v49 = vsub.f32 %v14105_v21, %v3445_v56  ;;  %14107 = vst [vmem:[#allocation13_spill] sm:$0xff] %v8908_v58  ;;  %v8912_v24 = vpop.eup %6269  ;;  %v2019_v40 = vsel %vm1784_vm0, %v8906_v20, 0.0 }
 0x232   : > { %6281 = vpow2.f32 %v1961_v60  ;;  %v3545_v23 = vmul.f32 1.442695, %v3484_v29  ;;  %14108 = vst [vmem:[#allocation11_spill] sm:$0xff] %v8912_v24  ;;  %v1912_v39 = vsub.f32 %v8572_v25, %v8878_v16  ;;  %v2040_v29 = vsel %vm1784_vm0, %v8912_v24, 0.0 }
 0x233   : > { %6283 = vpow2.f32 %v1967_v7  ;;  %v3543_v56 = vmul.f32 1.442695, %v3483_v49 }
 0x234   : > { %2002 = vadd.xlane.f32.xlu0 %v2001_v53  ;;  %6285 = vpow2.f32 %v1965_v31  ;;  %v8914_v53 = vpop.eup %6271  ;;  %v1975_v16 = vmul.f32 1.442695, %v1912_v39 }
 0x235   : > { %2023 = vadd.xlane.f32.xlu1 %v2022_v44  ;;  %v3454_v13 = vpop.xlane.xlu1 %3453  ;;  %v1877_v35 = vpop.xlane.xlu0 %1876  ;;  %14109 = vst [vmem:[#allocation14_spill] sm:$0xff] %v8914_v53 }
 0x236   : > { %v3486_v57 = vsub.f32 %v8577_v27, %v3454_v13  ;;  %v1911_v31 = vsub.f32 %v8594_v51, %v1877_v35 }
 0x237   : > { %v8920_v44 = vpop.eup %6273 }
 0x238   : > { %2008 = vadd.xlane.f32.xlu0 %v2007_v46  ;;  %14110 = vst [vmem:[#allocation9_spill] sm:$0xff] %v8920_v44  ;;  %v8922_v60 = vpop.eup %6275  ;;  %v3549_v21 = vmul.f32 1.442695, %v3486_v57  ;;  %v1973_v35 = vmul.f32 1.442695, %v1911_v31 }
 0x239   : > { %2029 = vadd.xlane.f32.xlu1 %v2028_v12  ;;  %v3562_v19 = vpop.xlane.xlu1 %3561  ;;  %v3451_v11 = vpop.xlane.xlu0 %3450  ;;  %14111 = vst [vmem:[#allocation29_spill] sm:$0xff] %v8922_v60  ;;  %v2025_v12 = vsel %vm1784_vm0, %v8908_v58, 0.0 }
 0x23a   : > { %6287 = vrcp.f32 %v3562_v19  ;;  %v8927_v46 = vpop.eup %6277  ;;  %v3485_v27 = vsub.f32 %v8597_v50, %v3451_v11  ;;  %v2031_v50 = vsel %vm1784_vm0, %v8914_v53, 0.0 }
 0x23b   : > { %6289 = vpow2.f32 %v1971_v52  ;;  %14112 = vst [vmem:[#allocation30_spill] sm:$0xff] %v8927_v46  ;;  %v8929_v25 = vpop.eup %6279 }
 0x23c   : > { %2014 = vadd.xlane.f32.xlu0 %v2013_v1  ;;  %6291 = vpow2.f32 %v3545_v23  ;;  %14113 = vst [vmem:[#allocation31_spill] sm:$0xff] %v8929_v25  ;;  %v8934_v52 = vpop.eup %6281  ;;  %v2046_v23 = vsel %vm1784_vm0, %v8922_v60, 0.0  ;;  %v3547_v11 = vmul.f32 1.442695, %v3485_v27  ;;  %v2052_v39 = vsel %vm1784_vm0, %v8929_v25, 0.0 }
 0x23d   : > { %2035 = vadd.xlane.f32.xlu1 %v2034_v59  ;;  %v3574_v14 = vpop.xlane.xlu1 %3573  ;;  %v3559_v7 = vpop.xlane.xlu0 %3558  ;;  %14114 = vst [vmem:[#allocation46_spill] sm:$0xff] %v8934_v52 }
 0x23e   : > { %6293 = vrcp.f32 %v3574_v14  ;;  %v8937_v13 = vpop.eup %6283 }
 0x23f   : > { %6295 = vpow2.f32 %v1969_v28  ;;  %14115 = vst [vmem:[#allocation47_spill] sm:$0xff] %v8937_v13  ;;  %v8941_v19 = vpop.eup %6285 }
 0x240   : > { %2020 = vadd.xlane.f32.xlu0 %v2019_v40  ;;  %6297 = vpow2.f32 %v3543_v56  ;;  %14116 = vst [vmem:[#allocation48_spill] sm:$0xff] %v8941_v19 }
 0x241   : > { %2041 = vadd.xlane.f32.xlu1 %v2040_v29  ;;  %6299 = vrcp.f32 %v3559_v7  ;;  %v3568_v4 = vpop.xlane.xlu1 %3567  ;;  %v3571_v49 = vpop.xlane.xlu0 %3570  ;;  %v2037_v29 = vsel %vm1784_vm0, %v8920_v44, 0.0 }
 0x242   : > { %6301 = vrcp.f32 %v3568_v4  ;;  %v2049_v4 = vsel %vm1784_vm0, %v8934_v52, 0.0 }
 0x243   : > { %6303 = vrcp.f32 %v3571_v49  ;;  %v8971_v49 = vsel %vm1784_vm0, %v8941_v19, 0.0 }
 0x244   : > { %2026 = vadd.xlane.f32.xlu0 %v2025_v12  ;;  %v6288_v51 = vpop.eup %6287  ;;  %6305 = vpow2.f32 %v1975_v16 }
 0x245   : > { %2047 = vadd.xlane.f32.xlu1 %v2046_v23  ;;  %v3556_v1 = vpop.xlane.xlu1 %3555  ;;  %v8945_v28 = vpop.eup %6289  ;;  %v8952_v40 = vmul.f32 %v6288_v51, %v8590_v42  ;;  %v2043_v42 = vsel %vm1784_vm0, %v8927_v46, 0.0 }
 0x246   : > { %14117 = vst [vmem:[#allocation49_spill] sm:$0xff] %v8945_v28  ;;  %6307 = vrcp.f32 %v3556_v1  ;;  %v8947_v59 = vpop.eup %6291  ;;  %v3565_v56 = vpop.xlane.xlu0 %3564 }
 0x247   : > { %14118 = vst [vmem:[#allocation50_spill] sm:$0xff] %v8947_v59  ;;  %6309 = vpow2.f32 %v3549_v21  ;;  %v2058_v21 = vsel %vm1784_vm0, %v8937_v13, 0.0  ;;  %v3728_v51 = vrot.slane %v8952_v40, 1 }
 0x248   : > { %2032 = vadd.xlane.f32.xlu0 %v2031_v50  ;;  %v6294_v14 = vpop.eup %6293  ;;  %6311 = vrcp.f32 %v3565_v56 }
 0x249   : > { %2053 = vadd.xlane.f32.xlu1 %v2052_v39  ;;  %v8954_v57 = vpop.eup %6295  ;;  %6313 = vpow2.f32 %v1973_v35  ;;  %v3580_v7 = vpop.xlane.xlu1 %3579  ;;  %v8961_v31 = vmul.f32 %v6294_v14, %v8607_v36  ;;  %v2064_v36 = vsel %vm1784_vm0, %v8945_v28, 0.0  ;;  %v3638_v39 = vsel %vm1784_vm0, %v8947_v59, 0.0  ;;  %v14126_v35 = vld [vmem:[#allocation3_spill] sm:$0xff] }
 0x24a   : > { %14119 = vst [vmem:[#allocation51_spill] sm:$0xff] %v8954_v57  ;;  %v8958_v16 = vpop.eup %6297  ;;  %6315 = vpow2.f32 %v3547_v11  ;;  %v3553_v27 = vpop.xlane.xlu0 %3552  ;;  %v8985_v56 = vsel %vm1784_vm0, %v8954_v57, 0.0  ;;  %v14122_v57 = vld [vmem:[#allocation2_spill] sm:$0xff]  ;;  %vm2522_vm8 = vcmp.lt.s32.totalorder %v14126_v35, 14 }
 0x24b   : > { %14120 = vst [vmem:[#allocation52_spill] sm:$0xff] %v8958_v16  ;;  %v6300_v12 = vpop.eup %6299  ;;  %6317 = vrcp.f32 %v3580_v7  ;;  %v8991_v14 = vsel %vm1784_vm0, %v8958_v16, 0.0  ;;  %vm2555_vm5 = vcmp.lt.s32.totalorder %v14122_v57, 6  ;;  %vm2654_vm6 = vcmp.lt.s32.totalorder %v14122_v57, 2 }
 0x24c   : > { %2038 = vadd.xlane.f32.xlu0 %v2037_v29  ;;  %v6302_v23 = vpop.eup %6301  ;;  %v8978_v1 = vmul.f32 %v6300_v12, %v8615_v8  ;;  %6319 = vrcp.f32 %v3553_v27  ;;  %v3794_v27 = vrot.slane %v8961_v31, 7  ;;  %v14123_v29 = vrot.slane %v8952_v40, 7 }
 0x24d   : > { %2059 = vadd.xlane.f32.xlu1 %v2058_v21  ;;  %v8981_v50 = vmul.f32 %v6302_v23, %v8621_v54  ;;  %v3586_v11 = vpop.xlane.xlu1 %3585  ;;  %v6304_v7 = vpop.eup %6303  ;;  %v3730_v54 = vrot.slane %v8961_v31, 1  ;;  %vm2620_vm7 = vcmp.ge.s32.totalorder %v14122_v57, 2 }
 0x24e   : > { %v3712_v8 = vrot.slane %v8978_v1, 1  ;;  %6321 = vrcp.f32 %v3586_v11  ;;  %v8996_v12 = vpop.eup %6305  ;;  %v3660_v21 = vmul.f32 %v6304_v7, %v8629_v10  ;;  %v3577_v16 = vpop.xlane.xlu0 %3576  ;;  %v14124_v11 = vrot.slane %v8978_v1, 7 }
 0x24f   : > { %14121 = vst [vmem:[#allocation53_spill] sm:$0xff] %v8996_v12  ;;  %6323 = vrcp.f32 %v3577_v16 }
 0x250   : > { %2044 = vadd.xlane.f32.xlu0 %v2043_v42  ;;  %v6308_v59 = vpop.eup %6307  ;;  %v3760_v28 = vsel %vm657_vm3, %v3728_v51, %v3712_v8  ;;  %v9010_v42 = vsel %vm305_vm1, %v14124_v11, %v14123_v29  ;;  %v9014_v10 = vsel %vm657_vm3, %v3712_v8, %v3728_v51  ;;  %v3714_v13 = vrot.slane %v3660_v21, 1 }
 0x251   : > { %2065 = vadd.xlane.f32.xlu1 %v2064_v36  ;;  %v9016_v7 = vpop.eup %6309  ;;  %v9020_v23 = vsel %vm640_vm2, %v3760_v28, -1e+30  ;;  %v9024_v19 = vsel %vm640_vm2, %v3760_v28, 1e+30  ;;  %v3778_v52 = vrot.slane %v3660_v21, 7  ;;  %v3592_v29 = vpop.xlane.xlu1 %3591  ;;  %v9031_v51 = vmul.f32 %v6308_v59, %v8637_v3 }
 0x252   : > { %14125 = vst [vmem:[#allocation2_spill] sm:$0xff] %v9016_v7  ;;  %v6312_v11 = vpop.eup %6311  ;;  %6325 = vrcp.f32 %v3592_v29  ;;  %v3746_v28 = vsel %vm657_vm3, %v3714_v13, %v3730_v54  ;;  %v3762_v25 = vsel %vm657_vm3, %v3730_v54, %v3714_v13  ;;  %v3583_v36 = vpop.xlane.xlu0 %3582 }
 0x253   : > { %v9033_v8 = vpop.eup %6313  ;;  %v3810_v46 = vsel %vm305_vm1, %v3778_v52, %v3794_v27  ;;  %v3826_v16 = vsel %vm305_vm1, %v3794_v27, %v3778_v52  ;;  %v3846_v3 = vsel %vm640_vm2, %v3762_v25, -1e+30  ;;  %v9052_v13 = vmul.f32 %v6312_v11, %v8643_v37 }
 0x254   : > { %2050 = vadd.xlane.f32.xlu0 %v2049_v4  ;;  %14127 = vst [vmem:[#allocation3_spill] sm:$0xff] %v9033_v8  ;;  %v9043_v60 = vpop.eup %6315  ;;  %v3877_v59 = vsel %vm287_vm4, %v3826_v16, -1e+30  ;;  %v3974_v4 = vsel %vm640_vm2, %v3762_v25, 1e+30  ;;  %v3910_v44 = vmax.f32 %v3846_v3, %v3810_v46  ;;  %6327 = vrcp.f32 %v3583_v36 }
 0x255   : > { %14128 = vst [vmem:[#allocation54_spill] sm:$0xff] %v9043_v60  ;;  %3639 = vadd.xlane.f32.xlu1 %v3638_v39  ;;  %v6318_v54 = vpop.eup %6317  ;;  %v3909_v29 = vmax.f32 %v3746_v28, %v3877_v59  ;;  %v4005_v52 = vsel %vm287_vm4, %v3826_v16, 1e+30  ;;  %v4038_v27 = vmin.f32 %v3974_v4, %v3810_v46  ;;  %v3598_v24 = vpop.xlane.xlu1 %3597  ;;  %v3713_v58 = vrot.slane %v9052_v13, 1 }
 0x256   : > { %v6320_v53 = vpop.eup %6319  ;;  %v4037_v0 = vmin.f32 %v3746_v28, %v4005_v52  ;;  %v13686_v6 = vrot.slane %v9052_v13, 7  ;;  %v9063_v39 = vmax.f32 %v8961_v31, %v3910_v44  ;;  %v3589_v16 = vpop.xlane.xlu0 %3588  ;;  %v14129_v59 = vrot.slane %v8981_v50, 1 }
 0x257   : > { %v9060_v37 = vmax.f32 %v3660_v21, %v3909_v29  ;;  %v9066_v11 = vmin.f32 %v8961_v31, %v4038_v27  ;;  %v9069_v46 = vmul.f32 %v6320_v53, %v8659_v2  ;;  %v14130_v4 = vrot.slane %v8981_v50, 7  ;;  %v14131_v31 = vld [vmem:[#allocation32_spill] sm:$0xff] }
 0x258   : > { %2056 = vadd.xlane.f32.xlu0 %v8971_v49  ;;  %v6322_v28 = vpop.eup %6321  ;;  %v9071_v3 = vmin.f32 %v3660_v21, %v4037_v0  ;;  %v3761_v49 = vsel %vm657_vm3, %v14129_v59, %v3713_v58  ;;  %v3666_v2 = vmul.f32 %v6318_v54, %v14131_v31  ;;  %6329 = vrcp.f32 %v3589_v16 }
 0x259   : > { %v9083_v44 = vsel %vm305_vm1, %v13686_v6, %v14130_v4  ;;  %v9089_v0 = vsel %vm640_vm2, %v3761_v49, -1e+30  ;;  %v9093_v21 = vsel %vm640_vm2, %v3761_v49, 1e+30  ;;  %v3775_v29 = vrot.slane %v9069_v46, 7  ;;  %v6324_v52 = vpop.eup %6323  ;;  %v3604_v25 = vpop.xlane.xlu1 %3603 }
 0x25a   : > { %v3731_v4 = vrot.slane %v3666_v2, 1  ;;  %v3795_v31 = vrot.slane %v3666_v2, 7  ;;  %v3664_v53 = vmul.f32 %v6324_v52, %v8673_v34  ;;  %v9104_v49 = vmul.f32 %v6322_v28, %v8665_v38  ;;  %v3595_v6 = vpop.xlane.xlu0 %3594 }
 0x25b   : > { %v3711_v27 = vrot.slane %v9069_v46, 1  ;;  %v3727_v59 = vrot.slane %v9031_v51, 1  ;;  %v14132_v54 = vrot.slane %v8981_v50, 1  ;;  %6331 = vrcp.f32 %v3598_v24 }
 0x25c   : > { %2062 = vadd.xlane.f32.xlu0 %v8985_v56  ;;  %v6326_v20 = vpop.eup %6325  ;;  %v3715_v22 = vrot.slane %v3664_v53, 1  ;;  %v3779_v34 = vrot.slane %v3664_v53, 7  ;;  %v3732_v38 = vrot.slane %v9104_v49, 1  ;;  %v3796_v36 = vrot.slane %v9104_v49, 7 }
 0x25d   : > { %v9112_v56 = vsel %vm657_vm3, %v3713_v58, %v14132_v54  ;;  %v9117_v28 = vmul.f32 %v6326_v20, %v8678_v18  ;;  %v9121_v16 = vsel %vm657_vm3, %v3711_v27, %v3727_v59  ;;  %v9125_v52 = vsel %vm657_vm3, %v3727_v59, %v3711_v27  ;;  %v3610_v47 = vpop.xlane.xlu1 %3609 }
 0x25e   : > { %v3747_v58 = vsel %vm657_vm3, %v3715_v22, %v3731_v4  ;;  %v3763_v54 = vsel %vm657_vm3, %v3731_v4, %v3715_v22  ;;  %v3811_v18 = vsel %vm305_vm1, %v3779_v34, %v3795_v31  ;;  %v3827_v20 = vsel %vm305_vm1, %v3795_v31, %v3779_v34  ;;  %v3601_v24 = vpop.xlane.xlu0 %3600 }
 0x25f   : > { %v3848_v48 = vsel %vm640_vm2, %v3763_v54, -1e+30  ;;  %v3879_v27 = vsel %vm287_vm4, %v3827_v20, -1e+30  ;;  %6333 = vrcp.f32 %v3595_v6  ;;  %v4007_v22 = vsel %vm287_vm4, %v3827_v20, 1e+30 }
 0x260   : > { %3636 = vadd.xlane.f32.xlu0 %v8991_v14  ;;  %v3976_v14 = vsel %vm640_vm2, %v3763_v54, 1e+30  ;;  %v3911_v59 = vmax.f32 %v3747_v58, %v3879_v27  ;;  %v3912_v55 = vmax.f32 %v3848_v48, %v3811_v18  ;;  %v4039_v62 = vmin.f32 %v3747_v58, %v4007_v22 }
 0x261   : > { %v4040_v4 = vmin.f32 %v3976_v14, %v3811_v18  ;;  %v3733_v31 = vrot.slane %v9117_v28, 1  ;;  %v3797_v34 = vrot.slane %v9117_v28, 7  ;;  %6335 = vrcp.f32 %v3604_v25 }
 0x262   : > { %v9146_v33 = vmax.f32 %v3664_v53, %v3911_v59  ;;  %v9148_v17 = vmax.f32 %v3666_v2, %v3912_v55  ;;  %6337 = vrcp.f32 %v3601_v24  ;;  %v3607_v6 = vpop.xlane.xlu0 %3606  ;;  %v9152_v48 = vmin.f32 %v3664_v53, %v4039_v62  ;;  %v6328_v55 = vpop.eup %6327 }
 0x263   : > { %v9150_v15 = vmin.f32 %v3666_v2, %v4040_v4  ;;  %6339 = vrcp.f32 %v3610_v47  ;;  %v14134_v54 = vrot.slane %v9031_v51, 7  ;;  %v14136_v62 = vrot.slane %v8978_v1, 7  ;;  %v6330_v27 = vpop.eup %6329  ;;  %v14141_v2 = vld [vmem:[#allocation33_spill] sm:$0xff] }
 0x264   : > { %6341 = vrcp.f32 %v3607_v6  ;;  %v14137_v47 = vrot.slane %v8952_v40, 7  ;;  %v14138_v20 = vrot.slane %v9052_v13, 7  ;;  %v14139_v24 = vrot.slane %v8981_v50, 7  ;;  %v14140_v6 = vld [vmem:[#allocation34_spill] sm:$0xff] }
 0x265   : > { %14133 = vst [vmem:[#allocation32_spill] sm:$0xff] %v9150_v15  ;;  %v9158_v58 = vsel %vm305_vm1, %v3775_v29, %v14134_v54  ;;  %v14135_v18 = vmov %v14134_v54  ;;  %v3668_v59 = vmul.f32 %v6328_v55, %v8684_v43  ;;  %v9188_v22 = vsel %vm640_vm2, %v9125_v52, -1e+30 }
 0x266   : > { %v9164_v25 = vsel %vm305_vm1, %v14135_v18, %v3775_v29  ;;  %v9173_v53 = vsel %vm305_vm1, %v14137_v47, %v14136_v62  ;;  %v9181_v29 = vsel %vm305_vm1, %v14139_v24, %v14138_v20  ;;  %v3672_v54 = vmul.f32 %v6330_v27, %v14140_v6  ;;  %v6332_v62 = vpop.eup %6331 }
 0x267   : > { %v9193_v4 = vsel %vm287_vm4, %v9164_v25, -1e+30  ;;  %v9199_v18 = vsel %vm287_vm4, %v9173_v53, -1e+30  ;;  %v9204_v43 = vsel %vm287_vm4, %v9181_v29, -1e+30  ;;  %v9213_v61 = vmul.f32 %v6332_v62, %v14141_v2 }
 0x268   : > { %v3716_v47 = vrot.slane %v3668_v59, 1  ;;  %v3780_v20 = vrot.slane %v3668_v59, 7  ;;  %v3717_v6 = vrot.slane %v3672_v54, 1  ;;  %v3781_v14 = vrot.slane %v3672_v54, 7 }
 0x269   : > { %v6334_v63 = vpop.eup %6333 }
 0x26a   : > { %v3748_v55 = vsel %vm657_vm3, %v3716_v47, %v3732_v38  ;;  %v3764_v32 = vsel %vm657_vm3, %v3732_v38, %v3716_v47  ;;  %v3812_v24 = vsel %vm305_vm1, %v3780_v20, %v3796_v36  ;;  %v3828_v27 = vsel %vm305_vm1, %v3796_v36, %v3780_v20 }
 0x26b   : > { %v3850_v2 = vsel %vm640_vm2, %v3764_v32, -1e+30  ;;  %v3881_v62 = vsel %vm287_vm4, %v3828_v27, -1e+30  ;;  %v3978_v26 = vsel %vm640_vm2, %v3764_v32, 1e+30  ;;  %v3749_v41 = vsel %vm657_vm3, %v3717_v6, %v3733_v31  ;;  %v6336_v30 = vpop.eup %6335 }
 0x26c   : > { %v3913_v38 = vmax.f32 %v3748_v55, %v3881_v62  ;;  %v3914_v47 = vmax.f32 %v3850_v2, %v3812_v24  ;;  %v4009_v5 = vsel %vm287_vm4, %v3828_v27, 1e+30  ;;  %v4042_v9 = vmin.f32 %v3978_v26, %v3812_v24  ;;  %v6338_v36 = vpop.eup %6337  ;;  %v14147_v62 = vld [vmem:[#allocation38_spill] sm:$0xff] }
 0x26d   : > { %v4041_v20 = vmin.f32 %v3748_v55, %v4009_v5  ;;  %v3765_v45 = vsel %vm657_vm3, %v3733_v31, %v3717_v6  ;;  %v3813_v60 = vsel %vm305_vm1, %v3781_v14, %v3797_v34  ;;  %v3829_v32 = vsel %vm305_vm1, %v3797_v34, %v3781_v14  ;;  %v6340_v7 = vpop.eup %6339 }
 0x26e   : > { %v9241_v8 = vmax.f32 %v3668_v59, %v3913_v38  ;;  %v9244_v2 = vmax.f32 %v9104_v49, %v3914_v47  ;;  %v9247_v27 = vmin.f32 %v9104_v49, %v4042_v9  ;;  %v3852_v5 = vsel %vm640_vm2, %v3765_v45, -1e+30  ;;  %v9251_v26 = vpop.eup %6341 }
 0x26f   : > { %v9253_v31 = vmin.f32 %v3668_v59, %v4041_v20  ;;  %v3883_v55 = vsel %vm287_vm4, %v3829_v32, -1e+30  ;;  %v3916_v34 = vmax.f32 %v3852_v5, %v3813_v60  ;;  %v3980_v14 = vsel %vm640_vm2, %v3765_v45, 1e+30 }
 0x270   : > { %14142 = vst [vmem:[#allocation34_spill] sm:$0xff] %v9247_v27  ;;  %v3915_v9 = vmax.f32 %v3749_v41, %v3883_v55  ;;  %v4011_v49 = vsel %vm287_vm4, %v3829_v32, 1e+30  ;;  %v4044_v5 = vmin.f32 %v3980_v14, %v3813_v60  ;;  %v3734_v45 = vrot.slane %v9213_v61, 1  ;;  %v14145_v55 = vld [vmem:[#allocation36_spill] sm:$0xff]  ;;  %v14146_v32 = vld [vmem:[#allocation35_spill] sm:$0xff] }
 0x271   : > { %v9266_v38 = vmax.f32 %v9117_v28, %v3916_v34  ;;  %v4043_v47 = vmin.f32 %v3749_v41, %v4011_v49  ;;  %v3798_v24 = vrot.slane %v9213_v61, 7  ;;  %v3676_v12 = vmul.f32 %v6334_v63, %v14145_v55  ;;  %v14149_v60 = vld [vmem:[#allocation37_spill] sm:$0xff] }
 0x272   : > { %v9268_v20 = vmax.f32 %v3672_v54, %v3915_v9  ;;  %v3682_v27 = vmul.f32 %v6336_v30, %v14146_v32  ;;  %v3680_v15 = vmul.f32 %v6338_v36, %v14147_v62  ;;  %v9278_v59 = vmin.f32 %v9117_v28, %v4044_v5 }
 0x273   : > { %v9272_v6 = vmin.f32 %v3672_v54, %v4043_v47  ;;  %v9283_v14 = vmul.f32 %v6340_v7, %v14149_v60  ;;  %v3718_v49 = vrot.slane %v3676_v12, 1  ;;  %v3782_v63 = vrot.slane %v3676_v12, 7 }
 0x274   : > { %14143 = vst [vmem:[#allocation33_spill] sm:$0xff] %v9268_v20  ;;  %14148 = vst [vmem:[#allocation36_spill] sm:$0xff] %v9278_v59  ;;  %v3735_v47 = vrot.slane %v3682_v27, 1  ;;  %v3799_v30 = vrot.slane %v3682_v27, 7  ;;  %v3719_v55 = vrot.slane %v3680_v15, 1  ;;  %v3783_v36 = vrot.slane %v3680_v15, 7 }
 0x275   : > { %14144 = vst [vmem:[#allocation55_spill] sm:$0xff] %v9272_v6  ;;  %v3750_v28 = vsel %vm657_vm3, %v3718_v49, %v3734_v45  ;;  %v3766_v62 = vsel %vm657_vm3, %v3734_v45, %v3718_v49  ;;  %v3814_v7 = vsel %vm305_vm1, %v3782_v63, %v3798_v24  ;;  %v3830_v5 = vsel %vm305_vm1, %v3798_v24, %v3782_v63 }
 0x276   : > { %v3854_v32 = vsel %vm640_vm2, %v3766_v62, -1e+30  ;;  %v3885_v60 = vsel %vm287_vm4, %v3830_v5, -1e+30  ;;  %v3982_v54 = vsel %vm640_vm2, %v3766_v62, 1e+30  ;;  %v3751_v9 = vsel %vm657_vm3, %v3719_v55, %v3735_v47 }
 0x277   : > { %v3917_v34 = vmax.f32 %v3750_v28, %v3885_v60  ;;  %v3918_v45 = vmax.f32 %v3854_v32, %v3814_v7  ;;  %v4013_v49 = vsel %vm287_vm4, %v3830_v5, 1e+30  ;;  %v4046_v41 = vmin.f32 %v3982_v54, %v3814_v7 }
 0x278   : > { %v4045_v6 = vmin.f32 %v3750_v28, %v4013_v49  ;;  %v3767_v24 = vsel %vm657_vm3, %v3735_v47, %v3719_v55  ;;  %v3815_v63 = vsel %vm305_vm1, %v3783_v36, %v3799_v30  ;;  %v3831_v59 = vsel %vm305_vm1, %v3799_v30, %v3783_v36 }
 0x279   : > { %v9311_v62 = vmax.f32 %v3676_v12, %v3917_v34  ;;  %v9314_v20 = vmax.f32 %v9213_v61, %v3918_v45  ;;  %v9317_v32 = vmin.f32 %v9213_v61, %v4046_v41  ;;  %v3856_v54 = vsel %vm640_vm2, %v3767_v24, -1e+30 }
 0x27a   : > { %v9321_v28 = vmin.f32 %v3676_v12, %v4045_v6  ;;  %v3887_v47 = vsel %vm287_vm4, %v3831_v59, -1e+30  ;;  %v3920_v55 = vmax.f32 %v3856_v54, %v3815_v63  ;;  %v3984_v30 = vsel %vm640_vm2, %v3767_v24, 1e+30 }
 0x27b   : > { %14150 = vst [vmem:[#allocation35_spill] sm:$0xff] %v9311_v62  ;;  %14151 = vst [vmem:[#allocation38_spill] sm:$0xff] %v9317_v32  ;;  %v3919_v7 = vmax.f32 %v3751_v9, %v3887_v47  ;;  %v4015_v61 = vsel %vm287_vm4, %v3831_v59, 1e+30  ;;  %v4048_v45 = vmin.f32 %v3984_v30, %v3815_v63  ;;  %v3736_v49 = vrot.slane %v9283_v14, 1  ;;  %v14156_v47 = vld [vmem:[#allocation40_spill] sm:$0xff] }
 0x27c   : > { %14152 = vst [vmem:[#allocation37_spill] sm:$0xff] %v9321_v28  ;;  %v9333_v6 = vmax.f32 %v3682_v27, %v3920_v55  ;;  %v4047_v5 = vmin.f32 %v3751_v9, %v4015_v61  ;;  %v3800_v24 = vrot.slane %v9283_v14, 7  ;;  %v3684_v36 = vmul.f32 %v9251_v26, %v14156_v47 }
 0x27d   : > { %v9335_v60 = vmax.f32 %v3680_v15, %v3919_v7  ;;  %v14157_v59 = vmax.f32 %v9121_v16, %v9193_v4  ;;  %v14158_v9 = vmax.f32 %v9188_v22, %v9158_v58  ;;  %v9355_v55 = vmin.f32 %v3682_v27, %v4048_v45 }
 0x27e   : > { %14153 = vst [vmem:[#allocation56_spill] sm:$0xff] %v9333_v6  ;;  %v9339_v54 = vmin.f32 %v3680_v15, %v4047_v5  ;;  %v14160_v26 = vmax.f32 %v9014_v10, %v9199_v18  ;;  %v3720_v22 = vrot.slane %v3684_v36, 1  ;;  %v3784_v5 = vrot.slane %v3684_v36, 7 }
 0x27f   : > { %14154 = vst [vmem:[#allocation57_spill] sm:$0xff] %v9335_v60  ;;  %v9347_v12 = vmax.f32 %v9069_v46, %v14157_v59  ;;  %v9353_v63 = vmax.f32 %v9031_v51, %v14158_v9  ;;  %14159 = vst [vmem:[#allocation40_spill] sm:$0xff] %v9355_v55  ;;  %v14161_v27 = vmax.f32 %v9020_v23, %v9010_v42  ;;  %v13729_v41 = vrot.slane %v9148_v17, 6 }
 0x280   : > { %14155 = vst [vmem:[#allocation58_spill] sm:$0xff] %v9339_v54  ;;  %v9363_v4 = vmax.f32 %v8978_v1, %v14160_v26  ;;  %v14162_v47 = vmax.f32 %v9112_v56, %v9204_v43  ;;  %v14163_v59 = vmax.f32 %v9089_v0, %v9083_v44  ;;  %v3968_v26 = vsel %vm640_vm2, %v9125_v52, 1e+30 }
 0x281   : > { %v9371_v45 = vmax.f32 %v8952_v40, %v14161_v27  ;;  %v3752_v23 = vsel %vm657_vm3, %v3720_v22, %v3736_v49  ;;  %v3768_v43 = vsel %vm657_vm3, %v3736_v49, %v3720_v22  ;;  %v3816_v27 = vsel %vm305_vm1, %v3784_v5, %v3800_v24 }
 0x282   : > { %v9377_v18 = vmax.f32 %v9052_v13, %v14162_v47  ;;  %v9383_v9 = vmax.f32 %v8981_v50, %v14163_v59  ;;  %v3832_v0 = vsel %vm305_vm1, %v3800_v24, %v3784_v5  ;;  %v3858_v47 = vsel %vm640_vm2, %v3768_v43, -1e+30 }
 0x283   : > { %v3889_v52 = vsel %vm287_vm4, %v3832_v0, -1e+30  ;;  %v3986_v59 = vsel %vm640_vm2, %v3768_v43, 1e+30  ;;  %v4032_v61 = vmin.f32 %v3968_v26, %v9158_v58  ;;  %v3922_v30 = vmax.f32 %v3858_v47, %v3816_v27 }
 0x284   : > { %v3921_v7 = vmax.f32 %v3752_v23, %v3889_v52  ;;  %v4017_v49 = vsel %vm287_vm4, %v3832_v0, 1e+30  ;;  %v4050_v22 = vmin.f32 %v3986_v59, %v3816_v27  ;;  %v3999_v24 = vsel %vm287_vm4, %v9164_v25, 1e+30 }
 0x285   : > { %v4049_v15 = vmin.f32 %v3752_v23, %v4017_v49  ;;  %v4001_v5 = vsel %vm287_vm4, %v9173_v53, 1e+30  ;;  %v4003_v43 = vsel %vm287_vm4, %v9181_v29, 1e+30  ;;  %v9419_v26 = vmax.f32 %v9283_v14, %v3922_v30 }
 0x286   : > { %v9416_v58 = vmax.f32 %v3684_v36, %v3921_v7  ;;  %v9422_v23 = vmin.f32 %v9283_v14, %v4050_v22  ;;  %v4031_v25 = vmin.f32 %v9121_v16, %v3999_v24  ;;  %v4033_v53 = vmin.f32 %v9014_v10, %v4001_v5 }
 0x287   : > { %14165 = vst [vmem:[#allocation60_spill] sm:$0xff] %v9419_v26  ;;  %v9425_v27 = vmin.f32 %v3684_v36, %v4049_v15  ;;  %v4035_v0 = vmin.f32 %v9112_v56, %v4003_v43  ;;  %v9430_v29 = vmin.f32 %v9031_v51, %v4032_v61  ;;  %v14168_v16 = vmin.f32 %v9024_v19, %v9010_v42 }
 0x288   : > { %14164 = vst [vmem:[#allocation59_spill] sm:$0xff] %v9416_v58  ;;  %14166 = vst [vmem:[#allocation61_spill] sm:$0xff] %v9422_v23  ;;  %v9436_v14 = vmin.f32 %v9069_v46, %v4031_v25  ;;  %v9447_v56 = vmin.f32 %v8978_v1, %v4033_v53  ;;  %v14169_v46 = vmin.f32 %v9093_v21, %v9083_v44  ;;  %v13746_v19 = vrot.slane %v9347_v12, 2 }
 0x289   : > { %14167 = vst [vmem:[#allocation62_spill] sm:$0xff] %v9425_v27  ;;  %v9442_v36 = vmin.f32 %v8952_v40, %v14168_v16  ;;  %v9450_v15 = vmin.f32 %v9052_v13, %v4035_v0  ;;  %v13733_v40 = vrot.slane %v9363_v4, 2  ;;  %v13730_v42 = vrot.slane %v9377_v18, 2 }
 0x28a   : > { %v9456_v61 = vmin.f32 %v8981_v50, %v14169_v46  ;;  %v13720_v47 = vrot.slane %v9060_v37, 2  ;;  %v13718_v1 = vrot.slane %v9146_v33, 2  ;;  %v13742_v52 = vrot.slane %v9353_v63, 2 }
 0x28b   : > { %v13732_v13 = vrot.slane %v9371_v45, 2  ;;  %v13728_v59 = vrot.slane %v9383_v9, 2  ;;  %v13719_v44 = vrot.slane %v9063_v39, 2  ;;  %v13716_v50 = vrot.slane %v9148_v17, 2 }
 0x28c   : > { %v13717_v21 = vrot.slane %v9244_v2, 2  ;;  %v4127_v49 = vsel %vm2555_vm5, %v13746_v19, %v13742_v52  ;;  %v13721_v24 = vrot.slane %v9347_v12, 6  ;;  %v13723_v5 = vrot.slane %v9363_v4, 6 }
 0x28d   : > { %v4128_v22 = vsel %vm2555_vm5, %v13733_v40, %v13732_v13  ;;  %v4129_v43 = vsel %vm2555_vm5, %v13730_v42, %v13728_v59  ;;  %v4130_v25 = vsel %vm2555_vm5, %v13720_v47, %v13719_v44  ;;  %v4131_v53 = vsel %vm2555_vm5, %v13718_v1, %v13716_v50 }
 0x28e   : > { %v14170_v0 = vrot.slane %v9241_v8, 2  ;;  %v13725_v46 = vrot.slane %v9377_v18, 6  ;;  %v13722_v51 = vrot.slane %v9353_v63, 6  ;;  %v13724_v10 = vrot.slane %v9371_v45, 6 }
 0x28f   : > { %v13726_v30 = vrot.slane %v9383_v9, 6  ;;  %v13727_v7 = vrot.slane %v9063_v39, 6  ;;  %v13731_v34 = vrot.slane %v9244_v2, 6  ;;  %v13741_v50 = vrot.slane %v9436_v14, 2 }
 0x290   : > { %v4132_v16 = vsel %vm2555_vm5, %v14170_v0, %v13717_v21  ;;  %v4239_v0 = vsel %vm2654_vm6, %v13722_v51, %v13721_v24  ;;  %v4240_v21 = vsel %vm2654_vm6, %v13724_v10, %v13723_v5  ;;  %v13735_v44 = vrot.slane %v9447_v56, 2 }
 0x291   : > { %v4241_v1 = vsel %vm2654_vm6, %v13726_v30, %v13725_v46  ;;  %v14171_v47 = vrot.slane %v9060_v37, 6  ;;  %v14172_v51 = vrot.slane %v9146_v33, 6  ;;  %v14173_v10 = vrot.slane %v9241_v8, 6 }
 0x292   : > { %v4255_v30 = vsel %vm2620_vm7, %v4239_v0, -1e+30  ;;  %v14193_v6 = vrot.slane %v9383_v9, 6  ;;  %v14195_v28 = vrot.slane %v9063_v39, 6 }
 0x293   : > { %v4242_v24 = vsel %vm2654_vm6, %v13727_v7, %v14171_v47  ;;  %v4243_v5 = vsel %vm2654_vm6, %v13729_v41, %v14172_v51  ;;  %v4244_v46 = vsel %vm2654_vm6, %v13731_v34, %v14173_v10  ;;  %v4257_v47 = vsel %vm2620_vm7, %v4240_v21, -1e+30 }
 0x294   : > { %v4259_v7 = vsel %vm2620_vm7, %v4241_v1, -1e+30  ;;  %v4261_v59 = vsel %vm2620_vm7, %v4242_v24, -1e+30  ;;  %v4287_v51 = vmax.f32 %v4127_v49, %v4255_v30  ;;  %v4263_v41 = vsel %vm2620_vm7, %v4243_v5, -1e+30 }
 0x295   : > { %v4265_v42 = vsel %vm2620_vm7, %v4244_v46, -1e+30  ;;  %v4289_v10 = vmax.f32 %v4128_v22, %v4257_v47  ;;  %v4291_v34 = vmax.f32 %v4129_v43, %v4259_v7  ;;  %v4293_v13 = vmax.f32 %v4130_v25, %v4261_v59  ;;  %v14174_v25 = vld [vmem:[#allocation32_spill] sm:$0xff] }
 0x296   : > { %v4295_v0 = vmax.f32 %v4131_v53, %v4263_v41  ;;  %v4297_v40 = vmax.f32 %v4132_v16, %v4265_v42  ;;  %v9565_v21 = vmax.f32 %v9347_v12, %v4287_v51  ;;  %v13737_v30 = vrot.slane %v9450_v15, 2 }
 0x297   : > { %v9568_v1 = vmax.f32 %v9363_v4, %v4289_v10  ;;  %v9571_v24 = vmax.f32 %v9377_v18, %v4291_v34  ;;  %v13740_v49 = vrot.slane %v9071_v3, 2  ;;  %v9576_v5 = vmax.f32 %v9060_v37, %v4293_v13  ;;  %v14175_v13 = vld [vmem:[#allocation34_spill] sm:$0xff] }
 0x298   : > { %v9579_v7 = vmax.f32 %v9146_v33, %v4295_v0  ;;  %v9582_v41 = vmax.f32 %v9241_v8, %v4297_v40  ;;  %v13745_v42 = vrot.slane %v9152_v48, 2  ;;  %v13738_v59 = vrot.slane %v9430_v29, 2 }
 0x299   : > { %v13734_v34 = vrot.slane %v9442_v36, 2  ;;  %v13736_v22 = vrot.slane %v9456_v61, 2  ;;  %v13739_v43 = vrot.slane %v9066_v11, 2  ;;  %v13743_v53 = vrot.slane %v14174_v25, 2 }
 0x29a   : > { %v13744_v16 = vrot.slane %v14175_v13, 2  ;;  %v13747_v46 = vrot.slane %v9436_v14, 6  ;;  %v13749_v47 = vrot.slane %v9447_v56, 6  ;;  %v4383_v40 = vsel %vm2555_vm5, %v13741_v50, %v13738_v59 }
 0x29b   : > { %v4384_v51 = vsel %vm2555_vm5, %v13735_v44, %v13734_v34  ;;  %v4385_v10 = vsel %vm2555_vm5, %v13737_v30, %v13736_v22  ;;  %v4386_v0 = vsel %vm2555_vm5, %v13740_v49, %v13739_v43  ;;  %v4387_v34 = vsel %vm2555_vm5, %v13745_v42, %v13743_v53 }
 0x29c   : > { %v14176_v44 = vrot.slane %v9253_v31, 2  ;;  %v13753_v30 = vrot.slane %v9450_v15, 6  ;;  %v13748_v59 = vrot.slane %v9430_v29, 6  ;;  %v13750_v43 = vrot.slane %v9442_v36, 6 }
 0x29d   : > { %v13754_v49 = vrot.slane %v9456_v61, 6  ;;  %v13755_v50 = vrot.slane %v9066_v11, 6  ;;  %v13757_v52 = vrot.slane %v14174_v25, 6  ;;  %v14180_v27 = vrot.slane %v14175_v13, 6 }
 0x29e   : > { %v4388_v22 = vsel %vm2555_vm5, %v14176_v44, %v13744_v16  ;;  %v4495_v44 = vsel %vm2654_vm6, %v13748_v59, %v13747_v46  ;;  %v4607_v16 = vmax.f32 %v9568_v1, -1e+30  ;;  %v4496_v19 = vsel %vm2654_vm6, %v13750_v43, %v13749_v47 }
 0x29f   : > { %v4497_v53 = vsel %vm2654_vm6, %v13754_v49, %v13753_v30  ;;  %v14177_v46 = vrot.slane %v9071_v3, 6  ;;  %v14178_v59 = vrot.slane %v9152_v48, 6  ;;  %v14179_v43 = vrot.slane %v9253_v31, 6 }
 0x2a0   : > { %v4511_v49 = vsel %vm2620_vm7, %v4495_v44, 1e+30 }
 0x2a1   : > { %v4498_v42 = vsel %vm2654_vm6, %v13755_v50, %v14177_v46  ;;  %v4499_v47 = vsel %vm2654_vm6, %v13757_v52, %v14178_v59  ;;  %v4500_v30 = vsel %vm2654_vm6, %v14180_v27, %v14179_v43  ;;  %v4513_v46 = vsel %vm2620_vm7, %v4496_v19, 1e+30 }
 0x2a2   : > { %v4515_v50 = vsel %vm2620_vm7, %v4497_v53, 1e+30  ;;  %v4517_v23 = vsel %vm2620_vm7, %v4498_v42, 1e+30  ;;  %v4519_v59 = vsel %vm2620_vm7, %v4499_v47, 1e+30  ;;  %v4543_v58 = vmin.f32 %v4383_v40, %v4511_v49 }
 0x2a3   : > { %v4521_v52 = vsel %vm2620_vm7, %v4500_v30, 1e+30  ;;  %v4545_v27 = vmin.f32 %v4384_v51, %v4513_v46  ;;  %v4547_v43 = vmin.f32 %v4385_v10, %v4515_v50  ;;  %v4549_v26 = vmin.f32 %v4386_v0, %v4517_v23 }
 0x2a4   : > { %v4551_v44 = vmin.f32 %v4387_v34, %v4519_v59  ;;  %v4553_v54 = vmin.f32 %v4388_v22, %v4521_v52  ;;  %v9689_v19 = vmin.f32 %v9436_v14, %v4543_v58  ;;  %v4611_v53 = vmax.f32 %v9576_v5, %v9568_v1 }
 0x2a5   : > { %v4615_v42 = vmax.f32 %v9582_v41, %v9576_v5  ;;  %v9696_v47 = vmin.f32 %v9447_v56, %v4545_v27  ;;  %v9699_v30 = vmin.f32 %v9450_v15, %v4547_v43  ;;  %v9702_v50 = vmin.f32 %v9071_v3, %v4549_v26 }
 0x2a6   : > { %v9705_v23 = vmin.f32 %v9152_v48, %v4551_v44  ;;  %v9708_v58 = vmin.f32 %v9253_v31, %v4553_v54  ;;  %v9711_v52 = vmax.f32 %v9565_v21, %v4607_v16  ;;  %v9714_v49 = vmax.f32 %v9571_v24, %v4611_v53 }
 0x2a7   : > { %v9717_v34 = vmax.f32 %v9579_v7, %v4615_v42  ;;  %v4671_v22 = vmin.f32 %v9696_v47, 1e+30  ;;  %v4675_v40 = vmin.f32 %v9702_v50, %v9696_v47  ;;  %v14181_v54 = vrot.slane %v9347_v12, 2 }
 0x2a8   : > { %v14182_v51 = vrot.slane %v9353_v63, 2  ;;  %v4679_v10 = vmin.f32 %v9708_v58, %v9702_v50  ;;  %v4735_v0 = vmax.f32 %v9714_v49, -1e+30  ;;  %v14183_v59 = vrot.slane %v9363_v4, 2 }
 0x2a9   : > { %v14184_v27 = vrot.slane %v9371_v45, 2  ;;  %v9742_v44 = vmin.f32 %v9689_v19, %v4671_v22  ;;  %v9745_v53 = vmin.f32 %v9699_v30, %v4675_v40  ;;  %v14185_v42 = vrot.slane %v9377_v18, 2 }
 0x2aa   : > { %v4143_v16 = vsel %vm2555_vm5, %v14182_v51, %v14181_v54  ;;  %v14186_v54 = vrot.slane %v9383_v9, 2  ;;  %v14187_v46 = vrot.slane %v9060_v37, 2  ;;  %v14188_v26 = vrot.slane %v9063_v39, 2 }
 0x2ab   : > { %v4144_v43 = vsel %vm2555_vm5, %v14184_v27, %v14183_v59  ;;  %v9760_v22 = vmin.f32 %v9705_v23, %v4679_v10  ;;  %v4767_v40 = vmax.f32 %v9711_v52, %v4735_v0  ;;  %v4160_v27 = vsel %vm2522_vm8, %v4143_v16, -1e+30 }
 0x2ac   : > { %v4145_v51 = vsel %vm2555_vm5, %v14186_v54, %v14185_v42  ;;  %v4146_v59 = vsel %vm2555_vm5, %v14188_v26, %v14187_v46  ;;  %v4162_v55 = vsel %vm2522_vm8, %v4144_v43, -1e+30  ;;  %v4799_v42 = vmin.f32 %v9745_v53, 1e+30 }
 0x2ad   : > { %v4164_v54 = vsel %vm2522_vm8, %v4145_v51, -1e+30  ;;  %v4166_v60 = vsel %vm2522_vm8, %v4146_v59, -1e+30  ;;  %v14189_v26 = vrot.slane %v9353_v63, 6  ;;  %v14190_v10 = vrot.slane %v9347_v12, 6 }
 0x2ae   : > { %v14191_v46 = vrot.slane %v9371_v45, 6  ;;  %v14192_v43 = vrot.slane %v9363_v4, 6  ;;  %v14194_v59 = vrot.slane %v9377_v18, 6  ;;  %v4831_v16 = vmin.f32 %v9742_v44, %v4799_v42 }
 0x2af   : > { %v4223_v0 = vsel %vm2654_vm6, %v14190_v10, %v14189_v26  ;;  %v14196_v26 = vrot.slane %v9060_v37, 6  ;;  %v14198_v18 = vrot.slane %v9430_v29, 2  ;;  %v14200_v37 = vrot.slane %v9442_v36, 2 }
 0x2b0   : > { %v4224_v51 = vsel %vm2654_vm6, %v14192_v43, %v14191_v46  ;;  %v4225_v12 = vsel %vm2654_vm6, %v14194_v59, %v14193_v6  ;;  %v4288_v4 = vmax.f32 %v4160_v27, %v4223_v0  ;;  %v14197_v43 = vrot.slane %v9436_v14, 2 }
 0x2b1   : > { %v4226_v10 = vsel %vm2654_vm6, %v14196_v26, %v14195_v28  ;;  %v4290_v62 = vmax.f32 %v4162_v55, %v4224_v51  ;;  %v4292_v32 = vmax.f32 %v4164_v54, %v4225_v12  ;;  %v14199_v59 = vrot.slane %v9447_v56, 2 }
 0x2b2   : > { %v4294_v46 = vmax.f32 %v4166_v60, %v4226_v10  ;;  %v4399_v6 = vsel %vm2555_vm5, %v14198_v18, %v14197_v43  ;;  %v14201_v42 = vrot.slane %v9450_v15, 2  ;;  %v14202_v55 = vrot.slane %v9456_v61, 2 }
 0x2b3   : > { %v4400_v28 = vsel %vm2555_vm5, %v14200_v37, %v14199_v59  ;;  %v4863_v27 = vsub.f32 %v4767_v40, %v4831_v16  ;;  %v4320_v54 = vmax.f32 %v9353_v63, %v4288_v4  ;;  %v4322_v0 = vmax.f32 %v9371_v45, %v4290_v62 }
 0x2b4   : > { %v4401_v60 = vsel %vm2555_vm5, %v14202_v55, %v14201_v42  ;;  %v9820_v51 = vmax.f32 %v9383_v9, %v4292_v32  ;;  %v9823_v12 = vmax.f32 %v9063_v39, %v4294_v46  ;;  %v14203_v26 = vrot.slane %v9071_v3, 2 }
 0x2b5   : > { %v14204_v10 = vrot.slane %v9066_v11, 2  ;;  %v4416_v40 = vsel %vm2522_vm8, %v4399_v6, 1e+30  ;;  %v4418_v63 = vsel %vm2522_vm8, %v4400_v28, 1e+30  ;;  %5908 = vmatprep.mubr.msk.f32.mxu1 %vm1784_vm0, %v4863_v27  ;;  %v14205_v32 = vrot.slane %v9430_v29, 6 }
 0x2b6   : > { %v4420_v62 = vsel %vm2522_vm8, %v4401_v60, 1e+30  ;;  %v14206_v45 = vrot.slane %v9436_v14, 6  ;;  %v14207_v16 = vrot.slane %v9442_v36, 6  ;;  %v14208_v4 = vrot.slane %v9447_v56, 6 }
 0x2b7   : > { %v4402_v43 = vsel %vm2555_vm5, %v14204_v10, %v14203_v26  ;;  %v14209_v18 = vrot.slane %v9456_v61, 6  ;;  %v14210_v6 = vrot.slane %v9450_v15, 6  ;;  %v14211_v37 = vrot.slane %v9066_v11, 6 }
 0x2b8   : > { %v4422_v39 = vsel %vm2522_vm8, %v4402_v43, 1e+30  ;;  %v4479_v9 = vsel %vm2654_vm6, %v14206_v45, %v14205_v32  ;;  %v4480_v46 = vsel %vm2654_vm6, %v14208_v4, %v14207_v16  ;;  %v14212_v14 = vrot.slane %v9071_v3, 6 }
 0x2b9   : > { %v4481_v59 = vsel %vm2654_vm6, %v14210_v6, %v14209_v18  ;;  %v4544_v42 = vmin.f32 %v4416_v40, %v4479_v9  ;;  %v4546_v55 = vmin.f32 %v4418_v63, %v4480_v46  ;;  %v4608_v27 = vmax.f32 %v4322_v0, -1e+30 }
 0x2ba   : > { %v4482_v28 = vsel %vm2654_vm6, %v14212_v14, %v14211_v37  ;;  %v4548_v56 = vmin.f32 %v4420_v62, %v4481_v59  ;;  %v4612_v26 = vmax.f32 %v9823_v12, %v4322_v0  ;;  %v4613_v43 = vmax.f32 %v9579_v7, %v9571_v24 }
 0x2bb   : > { %v4550_v60 = vmin.f32 %v4422_v39, %v4482_v28  ;;  %v4576_v10 = vmin.f32 %v9430_v29, %v4544_v42  ;;  %v4578_v15 = vmin.f32 %v9442_v36, %v4546_v55  ;;  %v14213_v3 = vmax.f32 %v9571_v24, %v9565_v21 }
 0x2bc   : > { %v4580_v40 = vmin.f32 %v9456_v61, %v4548_v56  ;;  %v9879_v62 = vmax.f32 %v4320_v54, %v4608_v27  ;;  %v9882_v29 = vmax.f32 %v9820_v51, %v4612_v26  ;;  %v9885_v39 = vmax.f32 %v9576_v5, %v4613_v43 }
 0x2bd   : > { %v9873_v32 = vmax.f32 %v9568_v1, %v14213_v3  ;;  %v9877_v63 = vmin.f32 %v9066_v11, %v4550_v60  ;;  %v4672_v36 = vmin.f32 %v4578_v15, 1e+30  ;;  %v4677_v21 = vmin.f32 %v9705_v23, %v9699_v30 }
 0x2be   : > { %v14214_v1 = vmin.f32 %v9699_v30, %v9689_v19  ;;  %v4736_v24 = vmax.f32 %v9882_v29, -1e+30  ;;  %v14215_v45 = vrot.slane %v9146_v33, 2  ;;  %v14216_v9 = vrot.slane %v9148_v17, 2 }
 0x2bf   : > { %v4676_v11 = vmin.f32 %v9877_v63, %v4578_v15  ;;  %v14217_v16 = vrot.slane %v9148_v17, 6  ;;  %v14218_v4 = vrot.slane %v9146_v33, 6  ;;  %v9912_v30 = vmin.f32 %v9702_v50, %v4677_v21 }
 0x2c0   : > { %v9893_v61 = vmin.f32 %v9696_v47, %v14214_v1  ;;  %v4147_v5 = vsel %vm2555_vm5, %v14216_v9, %v14215_v45  ;;  %v9909_v47 = vmin.f32 %v4576_v10, %v4672_v36  ;;  %v4737_v46 = vmax.f32 %v9885_v39, -1e+30 }
 0x2c1   : > { %v4227_v19 = vsel %vm2654_vm6, %v14218_v4, %v14217_v16  ;;  %v4168_v18 = vsel %vm2522_vm8, %v4147_v5, -1e+30  ;;  %v9917_v6 = vmin.f32 %v4580_v40, %v4676_v11  ;;  %v4768_v59 = vmax.f32 %v9879_v62, %v4736_v24 }
 0x2c2   : > { %v4296_v37 = vmax.f32 %v4168_v18, %v4227_v19  ;;  %v14219_v33 = vrot.slane %v9152_v48, 2  ;;  %v14220_v14 = vrot.slane %v14174_v25, 2  ;;  %v4769_v50 = vmax.f32 %v9873_v32, %v4737_v46 }
 0x2c3   : > { %v4801_v42 = vmin.f32 %v9912_v30, 1e+30  ;;  %v14221_v56 = vrot.slane %v14174_v25, 6  ;;  %v14222_v60 = vrot.slane %v9152_v48, 6  ;;  %v4800_v26 = vmin.f32 %v9917_v6, 1e+30 }
 0x2c4   : > { %v4403_v28 = vsel %vm2555_vm5, %v14220_v14, %v14219_v33  ;;  %v9938_v43 = vmax.f32 %v9148_v17, %v4296_v37  ;;  %v4610_v36 = vmax.f32 %v9820_v51, %v4320_v54  ;;  %v4674_v1 = vmin.f32 %v4580_v40, %v4576_v10 }
 0x2c5   : > { %v4424_v55 = vsel %vm2522_vm8, %v4403_v28, 1e+30  ;;  %v4483_v27 = vsel %vm2654_vm6, %v14222_v60, %v14221_v56  ;;  %v4833_v21 = vmin.f32 %v9893_v61, %v4801_v42  ;;  %v14223_v11 = vmax.f32 %v9717_v34, %v9711_v52 }
 0x2c6   : > { %v4552_v3 = vmin.f32 %v4424_v55, %v4483_v27  ;;  %v14224_v48 = vmin.f32 %v9760_v22, %v9742_v44  ;;  %v4832_v9 = vmin.f32 %v9909_v47, %v4800_v26  ;;  %v4614_v54 = vmax.f32 %v9938_v43, %v9820_v51 }
 0x2c7   : > { %v4771_v24 = vmax.f32 %v9714_v49, %v14223_v11  ;;  %v9956_v5 = vmax.f32 %v4322_v0, %v4610_v36  ;;  %v4865_v10 = vsub.f32 %v4769_v50, %v4833_v21  ;;  %v9958_v16 = vmin.f32 %v4578_v15, %v4674_v1  ;;  %v14235_v21 = vld [vmem:[#allocation36_spill] sm:$0xff] }
 0x2c8   : > { %v4835_v45 = vmin.f32 %v9745_v53, %v14224_v48  ;;  %v9952_v17 = vmin.f32 %v14174_v25, %v4552_v3  ;;  %v14225_v4 = vrot.slane %v9241_v8, 2  ;;  %v14226_v44 = vrot.slane %v9244_v2, 2 }
 0x2c9   : > { %v4864_v46 = vsub.f32 %v4768_v59, %v4832_v9  ;;  %v9967_v25 = vmax.f32 %v9823_v12, %v4614_v54  ;;  %v14227_v51 = vrot.slane %v9244_v2, 6  ;;  %v14228_v15 = vrot.slane %v9241_v8, 6 }
 0x2ca   : > { %v4867_v52 = vsub.f32 %v4771_v24, %v4835_v45  ;;  %v4148_v19 = vsel %vm2555_vm5, %v14226_v44, %v14225_v4  ;;  %v4678_v18 = vmin.f32 %v9952_v17, %v4580_v40  ;;  %v14229_v33 = vrot.slane %v9253_v31, 2  ;;  %v14237_v4 = vld [vmem:[#allocation55_spill] sm:$0xff] }
 0x2cb   : > { %v4170_v0 = vsel %vm2522_vm8, %v4148_v19, -1e+30  ;;  %v4228_v37 = vsel %vm2654_vm6, %v14228_v15, %v14227_v51  ;;  %v14230_v14 = vrot.slane %v14175_v13, 2  ;;  %v14231_v28 = vrot.slane %v14175_v13, 6  ;;  %5909 = vmatmul.mubr.msk.f32.vlgmr.msra.gmra.mrb[0].mxu1 %vm1784_vm0, %v4864_v46  ;;  %v14239_v46 = vld [vmem:[#allocation53_spill] sm:$0xff] }
 0x2cc   : > { %v14232_v40 = vrot.slane %v9253_v31, 6  ;;  %v4117_v42 = vrot.slane %v9266_v38, 2  ;;  %v9993_v8 = vmin.f32 %v9877_v63, %v4678_v18  ;;  %v4738_v55 = vmax.f32 %v9967_v25, -1e+30  ;;  %5911 = vmatprep.mubr.msk.f32.mxu1 %vm1784_vm0, %v4865_v10  ;;  %v14233_v31 = vld [vmem:[#allocation33_spill] sm:$0xff] }
 0x2cd   : > { %v4404_v59 = vsel %vm2555_vm5, %v14230_v14, %v14229_v33  ;;  %v4298_v56 = vmax.f32 %v4170_v0, %v4228_v37  ;;  %v14234_v26 = vrot.slane %v14233_v31, 2  ;;  %v4213_v36 = vrot.slane %v9266_v38, 6 }
 0x2ce   : > { %v4484_v50 = vsel %vm2654_vm6, %v14232_v40, %v14231_v28  ;;  %v4426_v60 = vsel %vm2522_vm8, %v4404_v59, 1e+30  ;;  %v4373_v1 = vrot.slane %v14235_v21, 2  ;;  %v4770_v11 = vmax.f32 %v9956_v5, %v4738_v55  ;;  %v14241_v59 = vld [vmem:[#allocation3_spill] sm:$0xff] }
 0x2cf   : > { %v4554_v27 = vmin.f32 %v4426_v60, %v4484_v50  ;;  %v4133_v3 = vsel %vm2555_vm5, %v14234_v26, %v4117_v42  ;;  %v4802_v24 = vmin.f32 %v9993_v8, 1e+30  ;;  %v10008_v48 = vmax.f32 %v9244_v2, %v4298_v56 }
 0x2d0   : > { %v4469_v45 = vrot.slane %v14235_v21, 6  ;;  %v14236_v54 = vrot.slane %v14233_v31, 6  ;;  %v14238_v44 = vrot.slane %v14237_v4, 2  ;;  %v2070_v18 = vsel %vm1784_vm0, %v14239_v46, 0.0 }
 0x2d1   : > { %v10012_v9 = vmin.f32 %v14175_v13, %v4554_v27  ;;  %v4834_v2 = vmin.f32 %v9958_v16, %v4802_v24  ;;  %v4616_v0 = vmax.f32 %v10008_v48, %v9823_v12  ;;  %v14240_v51 = vrot.slane %v14237_v4, 6  ;;  %2071 = vadd.xlane.f32.xlu1 %v2070_v18 }
 0x2d2   : > { %v4245_v10 = vsel %vm2654_vm6, %v4213_v36, %v14236_v54  ;;  %v4389_v19 = vsel %vm2555_vm5, %v14238_v44, %v4373_v1  ;;  %v2067_v28 = vsel %vm1784_vm0, %v14241_v59, 0.0  ;;  %v14242_v55 = vmov %v14234_v26 }
 0x2d3   : > { %v4267_v13 = vsel %vm2620_vm7, %v4245_v10, -1e+30  ;;  %v4501_v15 = vsel %vm2654_vm6, %v4469_v45, %v14240_v51  ;;  %v4680_v37 = vmin.f32 %v10012_v9, %v9877_v63  ;;  %v4866_v12 = vsub.f32 %v4770_v11, %v4834_v2  ;;  %2068 = vadd.xlane.f32.xlu0 %v2067_v28 }
 0x2d4   : > { %v4299_v33 = vmax.f32 %v4133_v3, %v4267_v13  ;;  %v4523_v14 = vsel %vm2620_vm7, %v4501_v15, 1e+30  ;;  %v10040_v40 = vmax.f32 %v9938_v43, %v4616_v0  ;;  %v4149_v56 = vsel %vm2555_vm5, %v4117_v42, %v14242_v55 }
 0x2d5   : > { %v4555_v50 = vmin.f32 %v4389_v19, %v4523_v14  ;;  %v10047_v63 = vmin.f32 %v9952_v17, %v4680_v37  ;;  %v4172_v27 = vsel %vm2522_vm8, %v4149_v56, -1e+30  ;;  %v14243_v26 = vmov %v14236_v54  ;;  %5912 = vmatmul.mubr.msk.f32.gmra.mrb[2].mxu1 %vm1784_vm0, %v4866_v12 }
 0x2d6   : > { %v10050_v60 = vmax.f32 %v14233_v31, %v4299_v33  ;;  %v4229_v3 = vsel %vm2654_vm6, %v14243_v26, %v4213_v36  ;;  %v4740_v11 = vmax.f32 %v10040_v40, %v9879_v62  ;;  %v14244_v54 = vmov %v14238_v44  ;;  %5914 = vmatprep.mubr.msk.f32.mxu1 %vm1784_vm0, %v4867_v52  ;;  %v14247_v33 = vld [vmem:[#allocation35_spill] sm:$0xff]  ;;  %v14250_v26 = vld [vmem:[#allocation37_spill] sm:$0xff] }
 0x2d7   : > { %v10062_v42 = vmin.f32 %v14237_v4, %v4555_v50  ;;  %v4300_v24 = vmax.f32 %v4172_v27, %v4229_v3  ;;  %v4405_v10 = vsel %vm2555_vm5, %v4373_v1, %v14244_v54  ;;  %v4804_v31 = vmin.f32 %v10047_v63, %v9909_v47 }
 0x2d8   : > { %v4617_v36 = vmax.f32 %v10050_v60, %v9579_v7  ;;  %v4428_v62 = vsel %vm2522_vm8, %v4405_v10, 1e+30  ;;  %v14245_v44 = vmov %v14240_v51  ;;  %v4772_v18 = vmax.f32 %v9882_v29, %v4740_v11  ;;  %v14252_v10 = vld [vmem:[#allocation2_spill] sm:$0xff] }
 0x2d9   : > { %v4485_v19 = vsel %vm2654_vm6, %v14245_v44, %v4469_v45  ;;  %v4681_v1 = vmin.f32 %v10062_v42, %v9705_v23  ;;  %v10083_v52 = vmax.f32 %v9266_v38, %v4300_v24  ;;  %v4836_v2 = vmin.f32 %v9917_v6, %v4804_v31  ;;  %v14246_v23 = vld [vmem:[#allocation38_spill] sm:$0xff] }
 0x2da   : > { %v4556_v47 = vmin.f32 %v4428_v62, %v4485_v19  ;;  %v10087_v7 = vmax.f32 %v9582_v41, %v4617_v36  ;;  %v4118_v0 = vrot.slane %v9314_v20, 2  ;;  %v4214_v4 = vrot.slane %v9314_v20, 6  ;;  %v14254_v19 = vld [vmem:[#allocation54_spill] sm:$0xff] }
 0x2db   : > { %v10092_v45 = vmin.f32 %v9708_v58, %v4681_v1  ;;  %v4618_v38 = vmax.f32 %v10083_v52, %v9938_v43  ;;  %v4374_v51 = vrot.slane %v14246_v23, 2  ;;  %v4868_v15 = vsub.f32 %v4772_v18, %v4836_v2 }
 0x2dc   : > { %v10095_v13 = vmin.f32 %v14235_v21, %v4556_v47  ;;  %v4741_v37 = vmax.f32 %v10087_v7, %v9873_v32  ;;  %v14248_v14 = vrot.slane %v14247_v33, 2  ;;  %v14249_v12 = vrot.slane %v14247_v33, 6 }
 0x2dd   : > { %v4805_v50 = vmin.f32 %v10092_v45, %v9893_v61  ;;  %v10113_v43 = vmax.f32 %v10008_v48, %v4618_v38  ;;  %5915 = vmatmul.mubr.msk.f32.gmra.mrb[4].mxu1 %vm1784_vm0, %v4868_v15  ;;  %v14251_v3 = vrot.slane %v14250_v26, 2  ;;  %v4470_v61 = vrot.slane %v14246_v23, 6 }
 0x2de   : > { %v4134_v28 = vsel %vm2555_vm5, %v14248_v14, %v4118_v0  ;;  %v4246_v21 = vsel %vm2654_vm6, %v4214_v4, %v14249_v12  ;;  %v4682_v55 = vmin.f32 %v10095_v13, %v9952_v17  ;;  %v4773_v56 = vmax.f32 %v9885_v39, %v4741_v37  ;;  %v10152_v37 = vpop.xlane.xlu1 %3615 }
 0x2df   : > { %v4269_v32 = vsel %vm2620_vm7, %v4246_v21, -1e+30  ;;  %v4390_v11 = vsel %vm2555_vm5, %v14251_v3, %v4374_v51  ;;  %v4837_v24 = vmin.f32 %v9912_v30, %v4805_v50  ;;  %v4742_v17 = vmax.f32 %v10113_v43, %v9956_v5 }
 0x2e0   : > { %v4301_v27 = vmax.f32 %v4134_v28, %v4269_v32  ;;  %v10128_v54 = vmin.f32 %v10012_v9, %v4682_v55  ;;  %v3644_v31 = vsel %vm1784_vm0, %v14252_v10, 0.0  ;;  %v14253_v62 = vrot.slane %v14250_v26, 6 }
 0x2e1   : > { %3645 = vadd.xlane.f32.xlu1 %v3644_v31  ;;  %v3641_v18 = vsel %vm1784_vm0, %v14254_v19, 0.0  ;;  %v14255_v1 = vmov %v14248_v14  ;;  %v4869_v47 = vsub.f32 %v4773_v56, %v4837_v24  ;;  %v4774_v2 = vmax.f32 %v9967_v25, %v4742_v17 }
 0x2e2   : > { %v10135_v36 = vmax.f32 %v14247_v33, %v4301_v27  ;;  %v4502_v44 = vsel %vm2654_vm6, %v4470_v61, %v14253_v62  ;;  %v4150_v5 = vsel %vm2555_vm5, %v4118_v0, %v14255_v1  ;;  %v4806_v38 = vmin.f32 %v10128_v54, %v9958_v16  ;;  %3642 = vadd.xlane.f32.xlu0 %v3641_v18 }
 0x2e3   : > { %v4525_v15 = vsel %vm2620_vm7, %v4502_v44, 1e+30  ;;  %v4174_v12 = vsel %vm2522_vm8, %v4150_v5, -1e+30  ;;  %v14256_v0 = vrot.slane %v14247_v33, 6  ;;  %5917 = vmatprep.mubr.msk.f32.mxu1 %vm1784_vm0, %v4869_v47  ;;  %v14257_v55 = vmov %v14251_v3  ;;  %v14259_v3 = vld [vmem:[#allocation56_spill] sm:$0xff] }
 0x2e4   : > { %v4557_v14 = vmin.f32 %v4390_v11, %v4525_v15  ;;  %v4619_v28 = vmax.f32 %v10135_v36, %v9582_v41  ;;  %v4838_v16 = vmin.f32 %v9993_v8, %v4806_v38  ;;  %v4406_v32 = vsel %vm2555_vm5, %v4374_v51, %v14257_v55  ;;  %v14260_v44 = vld [vmem:[#allocation57_spill] sm:$0xff]  ;;  %v14262_v5 = vld [vmem:[#allocation40_spill] sm:$0xff] }
 0x2e5   : > { %v4230_v21 = vsel %vm2654_vm6, %v14256_v0, %v4214_v4  ;;  %v14258_v41 = vmov %v14253_v62  ;;  %v4430_v27 = vsel %vm2522_vm8, %v4406_v32, 1e+30  ;;  %v4119_v11 = vrot.slane %v14259_v3, 2  ;;  %v10185_v62 = vpop.xlane.xlu1 %3621 }
 0x2e6   : > { %v4302_v50 = vmax.f32 %v4174_v12, %v4230_v21  ;;  %v4486_v56 = vsel %vm2654_vm6, %v14258_v41, %v4470_v61  ;;  %v10173_v33 = vmin.f32 %v14250_v26, %v4557_v14  ;;  %v10176_v4 = vmax.f32 %v10050_v60, %v4619_v28 }
 0x2e7   : > { %v4870_v24 = vsub.f32 %v4774_v2, %v4838_v16  ;;  %v4558_v51 = vmin.f32 %v4430_v27, %v4486_v56  ;;  %v4215_v31 = vrot.slane %v14259_v3, 6  ;;  %v14261_v18 = vrot.slane %v14260_v44, 2 }
 0x2e8   : > { %v10182_v17 = vmax.f32 %v9314_v20, %v4302_v50  ;;  %v4683_v26 = vmin.f32 %v10173_v33, %v9708_v58  ;;  %v4743_v61 = vmax.f32 %v10176_v4, %v9714_v49  ;;  %v4375_v47 = vrot.slane %v14262_v5, 2  ;;  %v10196_v20 = vpop.xlane.xlu0 %3612 }
 0x2e9   : > { %v4135_v1 = vsel %vm2555_vm5, %v14261_v18, %v4119_v11  ;;  %5918 = vmatmul.mubr.msk.f32.gmra.mrb[6].mxu1 %vm1784_vm0, %v4870_v24  ;;  %v10200_v2 = vmin.f32 %v14246_v23, %v4558_v51  ;;  %v14263_v38 = vrot.slane %v14260_v44, 6  ;;  %v4471_v15 = vrot.slane %v14262_v5, 6  ;;  %v14264_v23 = vld [vmem:[#allocation58_spill] sm:$0xff]  ;;  %v10228_v41 = vpop.xlane.xlu1 %3627 }
 0x2ea   : > { %v4620_v58 = vmax.f32 %v10182_v17, %v10008_v48  ;;  %v10210_v14 = vmin.f32 %v10062_v42, %v4683_v26  ;;  %v4775_v28 = vmax.f32 %v9717_v34, %v4743_v61  ;;  %v14265_v0 = vrot.slane %v14264_v23, 2 }
 0x2eb   : > { %v4247_v49 = vsel %vm2654_vm6, %v4215_v31, %v14263_v38  ;;  %v4684_v16 = vmin.f32 %v10200_v2, %v10012_v9  ;;  %v14266_v55 = vrot.slane %v14264_v23, 6  ;;  %v14267_v24 = vmov %v14261_v18 }
 0x2ec   : > { %v4271_v12 = vsel %vm2620_vm7, %v4247_v49, -1e+30  ;;  %v4391_v48 = vsel %vm2555_vm5, %v14265_v0, %v4375_v47  ;;  %v10220_v21 = vmax.f32 %v10083_v52, %v4620_v58  ;;  %v4807_v56 = vmin.f32 %v10210_v14, %v9745_v53  ;;  %v10242_v61 = vpop.xlane.xlu0 %3618 }
 0x2ed   : > { %v4303_v50 = vmax.f32 %v4135_v1, %v4271_v12  ;;  %v4503_v32 = vsel %vm2654_vm6, %v4471_v15, %v14266_v55  ;;  %v4151_v51 = vsel %vm2555_vm5, %v4119_v11, %v14267_v24  ;;  %v14268_v9 = vmov %v14263_v38 }
 0x2ee   : > { %v4527_v27 = vsel %vm2620_vm7, %v4503_v32, 1e+30  ;;  %v4231_v26 = vsel %vm2654_vm6, %v14268_v9, %v4215_v31  ;;  %v10245_v18 = vmin.f32 %v10095_v13, %v4684_v16  ;;  %v4744_v53 = vmax.f32 %v10220_v21, %v9882_v29 }
 0x2ef   : > { %v10250_v1 = vmax.f32 %v14260_v44, %v4303_v50  ;;  %v4559_v58 = vmin.f32 %v4391_v48, %v4527_v27  ;;  %v4839_v38 = vmin.f32 %v9760_v22, %v4807_v56  ;;  %v4176_v11 = vsel %vm2522_vm8, %v4151_v51, -1e+30  ;;  %v10271_v50 = vpop.xlane.xlu1 %3633  ;;  %v14271_v56 = vld [vmem:[#allocation60_spill] sm:$0xff]  ;;  %v14272_v51 = vld [vmem:[#allocation59_spill] sm:$0xff] }
 0x2f0   : > { %v14269_v49 = vmov %v14265_v0  ;;  %v14270_v12 = vmov %v14266_v55  ;;  %v4776_v29 = vmax.f32 %v10040_v40, %v4744_v53  ;;  %v4808_v44 = vmin.f32 %v10245_v18, %v9917_v6  ;;  %v10276_v27 = vpop.xlane.xlu0 %3624 }
 0x2f1   : > { %v4407_v31 = vsel %vm2555_vm5, %v4375_v47, %v14269_v49  ;;  %v4487_v0 = vsel %vm2654_vm6, %v14270_v12, %v4471_v15  ;;  %v10267_v48 = vmin.f32 %v14264_v23, %v4559_v58  ;;  %v4621_v16 = vmax.f32 %v10250_v1, %v10050_v60  ;;  %v14274_v58 = vld [vmem:[#allocation61_spill] sm:$0xff] }
 0x2f2   : > { %v4871_v55 = vsub.f32 %v4775_v28, %v4839_v38  ;;  %v4304_v47 = vmax.f32 %v4176_v11, %v4231_v26  ;;  %v4432_v32 = vsel %vm2522_vm8, %v4407_v31, 1e+30  ;;  %v4120_v15 = vrot.slane %v14271_v56, 2 }
 0x2f3   : > { %v4840_v24 = vmin.f32 %v10047_v63, %v4808_v44  ;;  %v10280_v6 = vmax.f32 %v10135_v36, %v4621_v16  ;;  %v4685_v23 = vmin.f32 %v10267_v48, %v10062_v42  ;;  %v4560_v60 = vmin.f32 %v4432_v32, %v4487_v0  ;;  %v14276_v44 = vld [vmem:[#allocation62_spill] sm:$0xff] }
 0x2f4   : > { %5920 = vmatprep.mubr.msk.f32.mxu1 %vm1784_vm0, %v4871_v55  ;;  %v10286_v28 = vmax.f32 %v14259_v3, %v4304_v47  ;;  %v14273_v9 = vrot.slane %v14272_v51, 2  ;;  %v4216_v53 = vrot.slane %v14271_v56, 6  ;;  %v4376_v38 = vrot.slane %v14274_v58, 2  ;;  %v3631_v47 = vpop.xlane.xlu0 %3630 }
 0x2f5   : > { %v4872_v11 = vsub.f32 %v4776_v29, %v4840_v24  ;;  %v10295_v49 = vmin.f32 %v10173_v33, %v4685_v23  ;;  %v4745_v42 = vmax.f32 %v10280_v6, %v9885_v39  ;;  %v10300_v31 = vmin.f32 %v14262_v5, %v4560_v60  ;;  %v1988_v24 = vpop.xlane.xlu1 %1987 }
 0x2f6   : > { %v4136_v26 = vsel %vm2555_vm5, %v14273_v9, %v4120_v15  ;;  %v4622_v3 = vmax.f32 %v10286_v28, %v10083_v52  ;;  %v14275_v12 = vrot.slane %v14272_v51, 6  ;;  %v14277_v16 = vrot.slane %v14276_v44, 2 }
 0x2f7   : > { %v4472_v55 = vrot.slane %v14274_v58, 6  ;;  %5921 = vmatmul.mubr.msk.f32.gmra.mrb[8].mxu1 %vm1784_vm0, %v4872_v11  ;;  %v4777_v39 = vmax.f32 %v10087_v7, %v4745_v42  ;;  %v4809_v52 = vmin.f32 %v10295_v49, %v9912_v30  ;;  %v4686_v5 = vmin.f32 %v10300_v31, %v10095_v13 }
 0x2f8   : > { %v4248_v0 = vsel %vm2654_vm6, %v4216_v53, %v14275_v12  ;;  %v4392_v29 = vsel %vm2555_vm5, %v14277_v16, %v4376_v38  ;;  %v10322_v23 = vmax.f32 %v10182_v17, %v4622_v3  ;;  %v14278_v9 = vrot.slane %v14276_v44, 6 }
 0x2f9   : > { %v4273_v32 = vsel %vm2620_vm7, %v4248_v0, -1e+30  ;;  %v14279_v42 = vrot.slane %v14272_v51, 2  ;;  %v4841_v13 = vmin.f32 %v10092_v45, %v4809_v52  ;;  %v10334_v12 = vmin.f32 %v10200_v2, %v4686_v5 }
 0x2fa   : > { %v4305_v60 = vmax.f32 %v4136_v26, %v4273_v32  ;;  %v4504_v11 = vsel %vm2654_vm6, %v4472_v55, %v14278_v9  ;;  %v4746_v0 = vmax.f32 %v10322_v23, %v9967_v25  ;;  %6343 = vrcp.f32 %v10152_v37 }
 0x2fb   : > { %v4152_v30 = vsel %vm2555_vm5, %v4120_v15, %v14279_v42  ;;  %v4529_v3 = vsel %vm2620_vm7, %v4504_v11, 1e+30  ;;  %v14280_v15 = vrot.slane %v14272_v51, 6  ;;  %v4873_v5 = vsub.f32 %v4777_v39, %v4841_v13 }
 0x2fc   : > { %v4178_v26 = vsel %vm2522_vm8, %v4152_v30, -1e+30  ;;  %v10343_v16 = vmax.f32 %v14272_v51, %v4305_v60  ;;  %v4561_v32 = vmin.f32 %v4392_v29, %v4529_v3  ;;  %v4810_v9 = vmin.f32 %v10334_v12, %v9993_v8  ;;  %v1985_v29 = vpop.xlane.xlu0 %1984  ;;  %v2000_v3 = vpop.xlane.xlu1 %1999 }
 0x2fd   : > { %v4232_v52 = vsel %vm2654_vm6, %v14280_v15, %v4216_v53  ;;  %v14281_v42 = vrot.slane %v14276_v44, 2  ;;  %v4778_v25 = vmax.f32 %v10113_v43, %v4746_v0  ;;  %5923 = vmatprep.mubr.msk.f32.mxu1 %vm1784_vm0, %v4873_v5  ;;  %6345 = vrcp.f32 %v10196_v20  ;;  %v14284_v5 = vld [vmem:[#allocation39_spill] sm:$0xff] }
 0x2fe   : > { %v4306_v11 = vmax.f32 %v4178_v26, %v4232_v52  ;;  %v10357_v60 = vmin.f32 %v14276_v44, %v4561_v32  ;;  %v4623_v51 = vmax.f32 %v10343_v16, %v10135_v36  ;;  %v4842_v8 = vmin.f32 %v10128_v54, %v4810_v9 }
 0x2ff   : > { %v4408_v30 = vsel %vm2555_vm5, %v4376_v38, %v14281_v42  ;;  %v14282_v38 = vrot.slane %v14276_v44, 6  ;;  %6347 = vrcp.f32 %v10185_v62 }
 0x300   : > { %v4434_v53 = vsel %vm2522_vm8, %v4408_v30, 1e+30  ;;  %v10366_v39 = vmax.f32 %v14271_v56, %v4306_v11  ;;  %v10374_v36 = vmax.f32 %v10250_v1, %v4623_v51  ;;  %v4687_v26 = vmin.f32 %v10357_v60, %v10173_v33  ;;  %v1997_v20 = vpop.xlane.xlu0 %1996 }
 0x301   : > { %v4488_v13 = vsel %vm2654_vm6, %v14282_v38, %v4472_v55  ;;  %v4874_v32 = vsub.f32 %v4778_v25, %v4842_v8  ;;  %6349 = vrcp.f32 %v10242_v61 }
 0x302   : > { %v4562_v0 = vmin.f32 %v4434_v53, %v4488_v13  ;;  %v4624_v56 = vmax.f32 %v10366_v39, %v10182_v17  ;;  %v10383_v44 = vmin.f32 %v10267_v48, %v4687_v26  ;;  %v4747_v37 = vmax.f32 %v10374_v36, %v9717_v34  ;;  %v14287_v26 = vld [vmem:[#allocation43_spill] sm:$0xff] }
 0x303   : > { %5924 = vmatmul.mubr.msk.f32.gmra.mrb[10].mxu1 %vm1784_vm0, %v4874_v32  ;;  %6351 = vrcp.f32 %v10228_v41 }
 0x304   : > { %v10388_v55 = vmin.f32 %v14274_v58, %v4562_v0  ;;  %v10393_v33 = vmax.f32 %v10286_v28, %v4624_v56  ;;  %v4779_v17 = vmax.f32 %v10176_v4, %v4747_v37  ;;  %v4811_v62 = vmin.f32 %v10383_v44, %v9760_v22  ;;  %v1994_v58 = vpop.xlane.xlu1 %1993  ;;  %v1991_v11 = vpop.xlane.xlu0 %1990 }
 0x305   : > { %6353 = vrcp.f32 %v10276_v27  ;;  %v6344_v27 = vpop.eup %6343 }
 0x306   : > { %v4688_v34 = vmin.f32 %v10388_v55, %v10200_v2  ;;  %v4748_v61 = vmax.f32 %v10393_v33, %v10040_v40  ;;  %6355 = vrcp.f32 %v10271_v50  ;;  %v4843_v15 = vmin.f32 %v10210_v14, %v4811_v62 }
 0x307   : > { %6357 = vrcp.f32 %v3631_v47  ;;  %v6346_v40 = vpop.eup %6345  ;;  %v3690_v9 = vmul.f32 %v6344_v27, %v14284_v5 }
 0x308   : > { %v10407_v41 = vmin.f32 %v10300_v31, %v4688_v34  ;;  %6359 = vrcp.f32 %v1988_v24  ;;  %v4875_v22 = vsub.f32 %v4779_v17, %v4843_v15  ;;  %v4780_v52 = vmax.f32 %v10220_v21, %v4748_v61  ;;  %v14285_v24 = vld [vmem:[#allocation41_spill] sm:$0xff]  ;;  %v1982_v30 = vpop.xlane.xlu1 %1981  ;;  %v14288_v17 = vld [vmem:[#allocation44_spill] sm:$0xff] }
 0x309   : > { %6361 = vrcp.f32 %v1985_v29  ;;  %v6348_v47 = vpop.eup %6347  ;;  %v3688_v42 = vmul.f32 %v6346_v40, %v14285_v24  ;;  %v3801_v53 = vrot.slane %v3690_v9, 7  ;;  %v14286_v29 = vld [vmem:[#allocation42_spill] sm:$0xff]  ;;  %v14289_v40 = vld [vmem:[#allocation45_spill] sm:$0xff] }
 0x30a   : > { %14283 = vst [vmem:[#allocation32_spill] sm:$0xff] %v10407_v41  ;;  %v4812_v2 = vmin.f32 %v10407_v41, %v10047_v63  ;;  %6363 = vrcp.f32 %v2000_v3  ;;  %5926 = vmatprep.mubr.msk.f32.mxu1 %vm1784_vm0, %v4875_v22  ;;  %v3737_v63 = vrot.slane %v3690_v9, 1  ;;  %v10417_v8 = vmul.f32 %v6348_v47, %v14286_v29 }
 0x30b   : > { %6365 = vrcp.f32 %v1997_v20  ;;  %v6350_v25 = vpop.eup %6349  ;;  %v3721_v13 = vrot.slane %v3688_v42, 1  ;;  %v3785_v3 = vrot.slane %v3688_v42, 7 }
 0x30c   : > { %v4844_v50 = vmin.f32 %v10245_v18, %v4812_v2  ;;  %6367 = vrcp.f32 %v1994_v58  ;;  %v3692_v0 = vmul.f32 %v6350_v25, %v14287_v26  ;;  %v3738_v56 = vrot.slane %v10417_v8, 1 }
 0x30d   : > { %v6352_v38 = vpop.eup %6351  ;;  %6369 = vrcp.f32 %v1991_v11  ;;  %v3802_v37 = vrot.slane %v10417_v8, 7  ;;  %v3753_v20 = vsel %vm657_vm3, %v3721_v13, %v3737_v63  ;;  %v3769_v61 = vsel %vm657_vm3, %v3737_v63, %v3721_v13 }
 0x30e   : > { %v4876_v51 = vsub.f32 %v4780_v52, %v4844_v50  ;;  %v10424_v62 = vmul.f32 %v6352_v38, %v14288_v17  ;;  %6371 = vrcp.f32 %v1982_v30  ;;  %v3817_v58 = vsel %vm305_vm1, %v3785_v3, %v3801_v53 }
 0x30f   : > { %v6354_v32 = vpop.eup %6353  ;;  %v3833_v15 = vsel %vm305_vm1, %v3801_v53, %v3785_v3  ;;  %v3860_v52 = vsel %vm640_vm2, %v3769_v61, -1e+30  ;;  %v3988_v27 = vsel %vm640_vm2, %v3769_v61, 1e+30  ;;  %v3722_v63 = vrot.slane %v3692_v0, 1 }
 0x310   : > { %5927 = vmatmul.mubr.msk.f32.gmra.mrb[12].mxu1 %vm1784_vm0, %v4876_v51  ;;  %v6356_v34 = vpop.eup %6355  ;;  %v3891_v2 = vsel %vm287_vm4, %v3833_v15, -1e+30  ;;  %v10443_v50 = vmul.f32 %v6354_v32, %v14289_v40  ;;  %v3924_v47 = vmax.f32 %v3860_v52, %v3817_v58  ;;  %v4019_v24 = vsel %vm287_vm4, %v3833_v15, 1e+30 }
 0x311   : > { %v10434_v22 = vpop.eup %6357  ;;  %v3923_v11 = vmax.f32 %v3753_v20, %v3891_v2  ;;  %v4052_v30 = vmin.f32 %v3988_v27, %v3817_v58  ;;  %v4051_v51 = vmin.f32 %v3753_v20, %v4019_v24  ;;  %v3786_v53 = vrot.slane %v3692_v0, 7 }
 0x312   : > { %v10445_v5 = vpop.eup %6359  ;;  %v3739_v29 = vrot.slane %v10424_v62, 1  ;;  %v10452_v3 = vmax.f32 %v3690_v9, %v3924_v47  ;;  %v3803_v32 = vrot.slane %v10424_v62, 7  ;;  %v3754_v20 = vsel %vm657_vm3, %v3722_v63, %v3738_v56 }
 0x313   : > { %v6362_v25 = vpop.eup %6361  ;;  %v10450_v13 = vmax.f32 %v3688_v42, %v3923_v11  ;;  %v10454_v26 = vmin.f32 %v3690_v9, %v4052_v30  ;;  %v10459_v61 = vmin.f32 %v3688_v42, %v4051_v51  ;;  %v3770_v58 = vsel %vm657_vm3, %v3738_v56, %v3722_v63 }
 0x314   : > { %v6364_v38 = vpop.eup %6363  ;;  %v3818_v15 = vsel %vm305_vm1, %v3786_v53, %v3802_v37  ;;  %v3834_v27 = vsel %vm305_vm1, %v3802_v37, %v3786_v53  ;;  %v3862_v42 = vsel %vm640_vm2, %v3770_v58, -1e+30  ;;  %v3990_v51 = vsel %vm640_vm2, %v3770_v58, 1e+30 }
 0x315   : > { %v10457_v17 = vpop.eup %6365  ;;  %v3893_v56 = vsel %vm287_vm4, %v3834_v27, -1e+30  ;;  %v3926_v47 = vmax.f32 %v3862_v42, %v3818_v15  ;;  %v4021_v37 = vsel %vm287_vm4, %v3834_v27, 1e+30  ;;  %v3723_v63 = vrot.slane %v10443_v50, 1  ;;  %v14290_v27 = vld [vmem:[#allocation16_spill] sm:$0xff] }
 0x316   : > { %v10467_v52 = vpop.eup %6367  ;;  %v3925_v30 = vmax.f32 %v3754_v20, %v3893_v56  ;;  %v4053_v11 = vmin.f32 %v3754_v20, %v4021_v37  ;;  %v4054_v2 = vmin.f32 %v3990_v51, %v3818_v15  ;;  %v3787_v42 = vrot.slane %v10443_v50, 7 }
 0x317   : > { %v10479_v24 = vpop.eup %6369  ;;  %v10489_v40 = vmax.f32 %v10417_v8, %v3926_v47  ;;  %v3755_v56 = vsel %vm657_vm3, %v3723_v63, %v3739_v29  ;;  %v3771_v58 = vsel %vm657_vm3, %v3739_v29, %v3723_v63  ;;  %v3702_v19 = vmul.f32 %v6356_v34, %v14290_v27  ;;  %v14291_v47 = vld [vmem:[#allocation19_spill] sm:$0xff] }
 0x318   : > { %v10486_v53 = vpop.eup %6371  ;;  %v10492_v9 = vmax.f32 %v3692_v0, %v3925_v30  ;;  %v10499_v10 = vmin.f32 %v3692_v0, %v4053_v11  ;;  %v10502_v59 = vmin.f32 %v10417_v8, %v4054_v2  ;;  %v3819_v20 = vsel %vm305_vm1, %v3787_v42, %v3803_v32 }
 0x319   : > { %v3835_v15 = vsel %vm305_vm1, %v3803_v32, %v3787_v42  ;;  %v3864_v29 = vsel %vm640_vm2, %v3771_v58, -1e+30  ;;  %v3992_v51 = vsel %vm640_vm2, %v3771_v58, 1e+30  ;;  %v3740_v37 = vrot.slane %v3702_v19, 1  ;;  %v14294_v58 = vld [vmem:[#allocation6_spill] sm:$0xff] }
 0x31a   : > { %v3895_v0 = vsel %vm287_vm4, %v3835_v15, -1e+30  ;;  %v3928_v11 = vmax.f32 %v3864_v29, %v3819_v20  ;;  %v4023_v32 = vsel %vm287_vm4, %v3835_v15, 1e+30  ;;  %v3804_v63 = vrot.slane %v3702_v19, 7  ;;  %v14292_v29 = vld [vmem:[#allocation4_spill] sm:$0xff] }
 0x31b   : > { %v3927_v2 = vmax.f32 %v3755_v56, %v3895_v0  ;;  %v4055_v30 = vmin.f32 %v3755_v56, %v4023_v32  ;;  %v4056_v34 = vmin.f32 %v3992_v51, %v3819_v20  ;;  %v3700_v0 = vmul.f32 %v10434_v22, %v14291_v47  ;;  %v14296_v15 = vld [vmem:[#allocation17_spill] sm:$0xff] }
 0x31c   : > { %v10524_v27 = vmax.f32 %v10424_v62, %v3928_v11  ;;  %v10530_v8 = vmul.f32 %v10445_v5, %v14292_v29  ;;  %v10533_v46 = vmul.f32 %v6362_v25, %v14294_v58  ;;  %v10536_v41 = vmul.f32 %v6364_v38, %v14296_v15 }
 0x31d   : > { %v10521_v42 = vmax.f32 %v10443_v50, %v3927_v2  ;;  %v10539_v2 = vmin.f32 %v10443_v50, %v4055_v30  ;;  %v10542_v11 = vmin.f32 %v10424_v62, %v4056_v34  ;;  %v3724_v20 = vrot.slane %v3700_v0, 1 }
 0x31e   : > { %14293 = vst [vmem:[#allocation34_spill] sm:$0xff] %v10530_v8  ;;  %14295 = vst [vmem:[#allocation33_spill] sm:$0xff] %v10533_v46  ;;  %v3788_v47 = vrot.slane %v3700_v0, 7  ;;  %v13777_v5 = vrot.slane %v10530_v8, 1  ;;  %v13774_v25 = vrot.slane %v10530_v8, 7  ;;  %v13776_v50 = vrot.slane %v10533_v46, 1 }
 0x31f   : > { %v13775_v30 = vrot.slane %v10533_v46, 7  ;;  %v3756_v62 = vsel %vm657_vm3, %v3724_v20, %v3740_v37  ;;  %v3772_v34 = vsel %vm657_vm3, %v3740_v37, %v3724_v20 }
 0x320   : > { %v3820_v32 = vsel %vm305_vm1, %v3788_v47, %v3804_v63  ;;  %v3836_v29 = vsel %vm305_vm1, %v3804_v63, %v3788_v47  ;;  %v3866_v58 = vsel %vm640_vm2, %v3772_v34, -1e+30  ;;  %v3994_v38 = vsel %vm640_vm2, %v3772_v34, 1e+30 }
 0x321   : > { %v3897_v15 = vsel %vm287_vm4, %v3836_v29, -1e+30  ;;  %v2186_v37 = vsel %vm657_vm3, %v13777_v5, %v13776_v50  ;;  %v3930_v51 = vmax.f32 %v3866_v58, %v3820_v32  ;;  %v4025_v63 = vsel %vm287_vm4, %v3836_v29, 1e+30  ;;  %v14306_v5 = vld [vmem:[#allocation20_spill] sm:$0xff] }
 0x322   : > { %v3929_v20 = vmax.f32 %v3756_v62, %v3897_v15  ;;  %v4058_v47 = vmin.f32 %v3994_v38, %v3820_v32  ;;  %v4057_v22 = vmin.f32 %v3756_v62, %v4025_v63  ;;  %v10580_v34 = vsel %vm305_vm1, %v13775_v30, %v13774_v25  ;;  %v14304_v63 = vld [vmem:[#allocation21_spill] sm:$0xff] }
 0x323   : > { %14297 = vst [vmem:[#allocation36_spill] sm:$0xff] %v10580_v34  ;;  %v10584_v56 = vsel %vm640_vm2, %v2186_v37, -1e+30  ;;  %v10588_v58 = vsel %vm640_vm2, %v2186_v37, 1e+30  ;;  %v10592_v38 = vmax.f32 %v3702_v19, %v3930_v51  ;;  %v2156_v25 = vrot.slane %v10536_v41, 1 }
 0x324   : > { %14298 = vst [vmem:[#allocation55_spill] sm:$0xff] %v10584_v56  ;;  %14299 = vst [vmem:[#allocation38_spill] sm:$0xff] %v10588_v58  ;;  %v10590_v15 = vmax.f32 %v3700_v0, %v3929_v20  ;;  %v10594_v62 = vmin.f32 %v3702_v19, %v4058_v47  ;;  %v10598_v29 = vmin.f32 %v3700_v0, %v4057_v22  ;;  %v2220_v30 = vrot.slane %v10536_v41, 7  ;;  %v14301_v51 = vld [vmem:[#allocation8_spill] sm:$0xff]  ;;  %v14302_v47 = vld [vmem:[#allocation18_spill] sm:$0xff]  ;;  %v1979_v56 = vpop.xlane.xlu0 %1978 }
 0x325   : > { %v2086_v19 = vmul.f32 %v10457_v17, %v14301_v51  ;;  %v10610_v50 = vmul.f32 %v10467_v52, %v14302_v47  ;;  %v10616_v32 = vmul.f32 %v10479_v24, %v14304_v63  ;;  %v10620_v37 = vmul.f32 %v10486_v53, %v14306_v5 }
 0x326   : > { %14300 = vst [vmem:[#allocation35_spill] sm:$0xff] %v10598_v29  ;;  %v4121_v0 = vrot.slane %v10452_v3, 2  ;;  %6373 = vrcp.f32 %v1979_v56 }
 0x327   : > { %14303 = vst [vmem:[#allocation37_spill] sm:$0xff] %v10610_v50  ;;  %14305 = vst [vmem:[#allocation56_spill] sm:$0xff] %v10616_v32  ;;  %v2140_v20 = vrot.slane %v2086_v19, 1  ;;  %v2204_v58 = vrot.slane %v2086_v19, 7  ;;  %v13791_v17 = vrot.slane %v10610_v50, 1  ;;  %v13790_v52 = vrot.slane %v10616_v32, 1 }
 0x328   : > { %14307 = vst [vmem:[#allocation57_spill] sm:$0xff] %v10620_v37  ;;  %v14308_v8 = vrot.slane %v10610_v50, 7  ;;  %v14309_v37 = vrot.slane %v10616_v32, 7 }
 0x329   : > { %v2172_v24 = vsel %vm657_vm3, %v2140_v20, %v2156_v25  ;;  %v2188_v53 = vsel %vm657_vm3, %v2156_v25, %v2140_v20  ;;  %v2236_v5 = vsel %vm305_vm1, %v2204_v58, %v2220_v30  ;;  %v2252_v63 = vsel %vm305_vm1, %v2220_v30, %v2204_v58 }
 0x32a   : > { %v2272_v51 = vsel %vm640_vm2, %v2188_v53, -1e+30  ;;  %v2303_v22 = vsel %vm287_vm4, %v2252_v63, -1e+30  ;;  %v2400_v47 = vsel %vm640_vm2, %v2188_v53, 1e+30  ;;  %v2187_v25 = vsel %vm657_vm3, %v13791_v17, %v13790_v52 }
 0x32b   : > { %v2335_v20 = vmax.f32 %v2172_v24, %v2303_v22  ;;  %v2336_v34 = vmax.f32 %v2272_v51, %v2236_v5  ;;  %v2431_v30 = vsel %vm287_vm4, %v2252_v63, 1e+30  ;;  %v2464_v58 = vmin.f32 %v2400_v47, %v2236_v5  ;;  %v2006_v51 = vpop.xlane.xlu1 %2005 }
 0x32c   : > { %v2463_v46 = vmin.f32 %v2172_v24, %v2431_v30  ;;  %v10656_v53 = vsel %vm305_vm1, %v14309_v37, %v14308_v8  ;;  %v10660_v29 = vsel %vm640_vm2, %v2187_v25, -1e+30  ;;  %v10664_v22 = vsel %vm640_vm2, %v2187_v25, 1e+30 }
 0x32d   : > { %14310 = vst [vmem:[#allocation40_spill] sm:$0xff] %v10656_v53  ;;  %14311 = vst [vmem:[#allocation58_spill] sm:$0xff] %v10660_v29  ;;  %v10666_v47 = vmax.f32 %v2086_v19, %v2335_v20  ;;  %v10669_v24 = vmax.f32 %v10536_v41, %v2336_v34  ;;  %v10672_v5 = vmin.f32 %v10536_v41, %v2464_v58  ;;  %v14317_v25 = vrot.slane %v10450_v13, 2 }
 0x32e   : > { %14312 = vst [vmem:[#allocation60_spill] sm:$0xff] %v10664_v22  ;;  %v10676_v37 = vmin.f32 %v2086_v19, %v2463_v46  ;;  %v4217_v30 = vrot.slane %v10452_v3, 6  ;;  %v4377_v41 = vrot.slane %v10454_v26, 2  ;;  %v4473_v58 = vrot.slane %v10454_v26, 6 }
 0x32f   : > { %14313 = vst [vmem:[#allocation59_spill] sm:$0xff] %v10666_v47  ;;  %14314 = vst [vmem:[#allocation61_spill] sm:$0xff] %v10669_v24  ;;  %v4137_v20 = vsel %vm2555_vm5, %v14317_v25, %v4121_v0  ;;  %v14318_v19 = vrot.slane %v10450_v13, 6  ;;  %v14319_v8 = vmov %v14317_v25  ;;  %v14321_v46 = vrot.slane %v10459_v61, 2 }
 0x330   : > { %14315 = vst [vmem:[#allocation62_spill] sm:$0xff] %v10672_v5  ;;  %14316 = vst [vmem:[#allocation39_spill] sm:$0xff] %v10676_v37  ;;  %v4153_v25 = vsel %vm2555_vm5, %v4121_v0, %v14319_v8  ;;  %v2003_v8 = vpop.xlane.xlu0 %2002  ;;  %6375 = vrcp.f32 %v2006_v51 }
 0x331   : > { %v4249_v63 = vsel %vm2654_vm6, %v4217_v30, %v14318_v19  ;;  %v14320_v52 = vmov %v14318_v19  ;;  %v4393_v17 = vsel %vm2555_vm5, %v14321_v46, %v4377_v41  ;;  %v14322_v19 = vrot.slane %v10459_v61, 6 }
 0x332   : > { %v4233_v34 = vsel %vm2654_vm6, %v14320_v52, %v4217_v30  ;;  %v4275_v56 = vsel %vm2620_vm7, %v4249_v63, -1e+30  ;;  %v4180_v0 = vsel %vm2522_vm8, %v4153_v25, -1e+30  ;;  %v14323_v63 = vmov %v14321_v46  ;;  %v2012_v46 = vpop.xlane.xlu1 %2011 }
 0x333   : > { %v4505_v5 = vsel %vm2654_vm6, %v4473_v58, %v14322_v19  ;;  %v4307_v37 = vmax.f32 %v4137_v20, %v4275_v56  ;;  %v4308_v30 = vmax.f32 %v4180_v0, %v4233_v34  ;;  %v4409_v24 = vsel %vm2555_vm5, %v4377_v41, %v14323_v63 }
 0x334   : > { %v4531_v52 = vsel %vm2620_vm7, %v4505_v5, 1e+30  ;;  %v4436_v22 = vsel %vm2522_vm8, %v4409_v24, 1e+30  ;;  %v4489_v25 = vsel %vm2654_vm6, %v14322_v19, %v4473_v58  ;;  %6377 = vrcp.f32 %v2003_v8  ;;  %v2009_v8 = vpop.xlane.xlu0 %2008 }
 0x335   : > { %v4563_v47 = vmin.f32 %v4393_v17, %v4531_v52  ;;  %v10726_v20 = vmax.f32 %v10450_v13, %v4307_v37  ;;  %v10729_v5 = vmax.f32 %v10452_v3, %v4308_v30  ;;  %v4564_v34 = vmin.f32 %v4436_v22, %v4489_v25  ;;  %v6374_v52 = vpop.eup %6373 }
 0x336   : > { %6379 = vrcp.f32 %v2012_v46  ;;  %v4122_v17 = vrot.slane %v10489_v40, 2  ;;  %v4218_v24 = vrot.slane %v10489_v40, 6  ;;  %v4378_v3 = vrot.slane %v10502_v59, 2 }
 0x337   : > { %v10732_v41 = vmin.f32 %v10459_v61, %v4563_v47  ;;  %v4625_v58 = vmax.f32 %v10726_v20, %v10250_v1  ;;  %v10739_v51 = vmin.f32 %v10454_v26, %v4564_v34  ;;  %v4626_v13 = vmax.f32 %v10729_v5, %v10286_v28 }
 0x338   : > { %v14324_v22 = vrot.slane %v10492_v9, 2  ;;  %v14325_v37 = vrot.slane %v10492_v9, 6  ;;  %v13799_v26 = vrot.slane %v10502_v59, 6  ;;  %v14329_v46 = vrot.slane %v10499_v10, 2 }
 0x339   : > { %v4689_v61 = vmin.f32 %v10732_v41, %v10267_v48  ;;  %v10756_v56 = vmax.f32 %v10343_v16, %v4625_v58  ;;  %v10759_v28 = vmax.f32 %v10366_v39, %v4626_v13  ;;  %v4690_v48 = vmin.f32 %v10739_v51, %v10300_v31  ;;  %v14331_v58 = vld [vmem:[#allocation23_spill] sm:$0xff] }
 0x33a   : > { %v4138_v47 = vsel %vm2555_vm5, %v14324_v22, %v4122_v17  ;;  %v4250_v1 = vsel %vm2654_vm6, %v4218_v24, %v14325_v37  ;;  %v4394_v19 = vsel %vm2555_vm5, %v14329_v46, %v4378_v3  ;;  %v14330_v25 = vrot.slane %v10499_v10, 6 }
 0x33b   : > { %14326 = vst [vmem:[#allocation41_spill] sm:$0xff] %v10756_v56  ;;  %14327 = vst [vmem:[#allocation42_spill] sm:$0xff] %v10759_v28  ;;  %v4277_v0 = vsel %vm2620_vm7, %v4250_v1, -1e+30  ;;  %v10766_v30 = vmin.f32 %v10357_v60, %v4689_v61  ;;  %v4749_v34 = vmax.f32 %v10756_v56, %v10087_v7  ;;  %v10781_v13 = vmul.f32 %v6374_v52, %v14331_v58  ;;  %v14334_v58 = vld [vmem:[#allocation22_spill] sm:$0xff] }
 0x33c   : > { %v4309_v63 = vmax.f32 %v4138_v47, %v4277_v0  ;;  %v4506_v31 = vsel %vm2654_vm6, %v13799_v26, %v14330_v25  ;;  %v10784_v61 = vmin.f32 %v10388_v55, %v4690_v48  ;;  %v4750_v22 = vmax.f32 %v10759_v28, %v10113_v43  ;;  %v6376_v43 = vpop.eup %6375 }
 0x33d   : > { %14328 = vst [vmem:[#allocation43_spill] sm:$0xff] %v10766_v30  ;;  %v4813_v47 = vmin.f32 %v10766_v30, %v10092_v45  ;;  %v4533_v1 = vsel %vm2620_vm7, %v4506_v31, 1e+30  ;;  %6381 = vrcp.f32 %v2009_v8  ;;  %v4781_v7 = vmax.f32 %v10280_v6, %v4749_v34 }
 0x33e   : > { %14332 = vst [vmem:[#allocation44_spill] sm:$0xff] %v10784_v61  ;;  %v10791_v37 = vmax.f32 %v10492_v9, %v4309_v63  ;;  %v4782_v48 = vmax.f32 %v10322_v23, %v4750_v22  ;;  %v4814_v52 = vmin.f32 %v10784_v61, %v10128_v54  ;;  %v4565_v45 = vmin.f32 %v4394_v19, %v4533_v1  ;;  %v6378_v31 = vpop.eup %6377  ;;  %v14336_v1 = vld [vmem:[#allocation25_spill] sm:$0xff] }
 0x33f   : > { %v4845_v46 = vmin.f32 %v10295_v49, %v4813_v47  ;;  %v14333_v25 = vrot.slane %v10492_v9, 2  ;;  %v2092_v22 = vmul.f32 %v6376_v43, %v14334_v58  ;;  %v14335_v0 = vrot.slane %v10492_v9, 6  ;;  %v14338_v58 = vld [vmem:[#allocation24_spill] sm:$0xff] }
 0x340   : > { %v4627_v63 = vmax.f32 %v10791_v37, %v10343_v16  ;;  %v4846_v34 = vmin.f32 %v10334_v12, %v4814_v52  ;;  %v6380_v47 = vpop.eup %6379  ;;  %v2090_v26 = vmul.f32 %v6378_v31, %v14336_v1  ;;  %v10817_v53 = vmin.f32 %v10499_v10, %v4565_v45 }
 0x341   : > { %v4154_v8 = vsel %vm2555_vm5, %v4122_v17, %v14333_v25  ;;  %v4234_v19 = vsel %vm2654_vm6, %v14335_v0, %v4218_v24  ;;  %v4877_v16 = vsub.f32 %v4781_v7, %v4845_v46  ;;  %v2157_v43 = vrot.slane %v2092_v22, 1 }
 0x342   : > { %v4182_v54 = vsel %vm2522_vm8, %v4154_v8, -1e+30  ;;  %v10820_v17 = vmax.f32 %v10726_v20, %v4627_v63  ;;  %v4878_v52 = vsub.f32 %v4782_v48, %v4846_v34  ;;  %v2221_v25 = vrot.slane %v2092_v22, 7 }
 0x343   : > { %v2096_v8 = vmul.f32 %v6380_v47, %v14338_v58  ;;  %5929 = vmatprep.mubr.msk.f32.mxu1 %vm1784_vm0, %v4877_v16  ;;  %v2141_v9 = vrot.slane %v2090_v26, 1  ;;  %v2205_v29 = vrot.slane %v2090_v26, 7  ;;  %v4691_v24 = vmin.f32 %v10817_v53, %v10357_v60 }
 0x344   : > { %14337 = vst [vmem:[#allocation45_spill] sm:$0xff] %v10820_v17  ;;  %v4751_v7 = vmax.f32 %v10820_v17, %v10176_v4  ;;  %5930 = vmatmul.mubr.msk.f32.gmra.mrb[14].mxu1 %vm1784_vm0, %v4878_v52  ;;  %v4310_v45 = vmax.f32 %v4182_v54, %v4234_v19  ;;  %v14339_v48 = vrot.slane %v10499_v10, 2 }
 0x345   : > { %v2158_v0 = vrot.slane %v2096_v8, 1  ;;  %v2222_v46 = vrot.slane %v2096_v8, 7  ;;  %v2173_v31 = vsel %vm657_vm3, %v2141_v9, %v2157_v43  ;;  %v2189_v34 = vsel %vm657_vm3, %v2157_v43, %v2141_v9 }
 0x346   : > { %v4410_v63 = vsel %vm2555_vm5, %v4378_v3, %v14339_v48  ;;  %v2237_v60 = vsel %vm305_vm1, %v2205_v29, %v2221_v25  ;;  %v2253_v4 = vsel %vm305_vm1, %v2221_v25, %v2205_v29  ;;  %v2274_v54 = vsel %vm640_vm2, %v2189_v34, -1e+30  ;;  %v14341_v48 = vld [vmem:[#allocation27_spill] sm:$0xff] }
 0x347   : > { %v2305_v19 = vsel %vm287_vm4, %v2253_v4, -1e+30  ;;  %v2402_v3 = vsel %vm640_vm2, %v2189_v34, 1e+30  ;;  %v10848_v47 = vmin.f32 %v10732_v41, %v4691_v24  ;;  %v6382_v16 = vpop.eup %6381  ;;  %v2338_v52 = vmax.f32 %v2274_v54, %v2237_v60 }
 0x348   : > { %v2337_v1 = vmax.f32 %v2173_v31, %v2305_v19  ;;  %v2433_v43 = vsel %vm287_vm4, %v2253_v4, 1e+30  ;;  %v2466_v58 = vmin.f32 %v2402_v3, %v2237_v60  ;;  %v4783_v25 = vmax.f32 %v10374_v36, %v4751_v7  ;;  %v2018_v19 = vpop.xlane.xlu1 %2017 }
 0x349   : > { %14340 = vst [vmem:[#allocation16_spill] sm:$0xff] %v10848_v47  ;;  %v2465_v29 = vmin.f32 %v2173_v31, %v2433_v43  ;;  %v4815_v9 = vmin.f32 %v10848_v47, %v10210_v14  ;;  %v2094_v32 = vmul.f32 %v6382_v16, %v14341_v48  ;;  %v10858_v34 = vmax.f32 %v2092_v22, %v2338_v52 }
 0x34a   : > { %v10856_v50 = vmax.f32 %v2090_v26, %v2337_v1  ;;  %v10860_v24 = vmin.f32 %v2092_v22, %v2466_v58  ;;  %v10863_v54 = vmax.f32 %v10489_v40, %v4310_v45  ;;  %v4438_v3 = vsel %vm2522_vm8, %v4410_v63, 1e+30  ;;  %v2015_v63 = vpop.xlane.xlu0 %2014 }
 0x34b   : > { %v10865_v4 = vmin.f32 %v2090_v26, %v2465_v29  ;;  %v4847_v31 = vmin.f32 %v10383_v44, %v4815_v9  ;;  %v2142_v7 = vrot.slane %v2094_v32, 1  ;;  %v2206_v60 = vrot.slane %v2094_v32, 7 }
 0x34c   : > { %v14342_v16 = vrot.slane %v10502_v59, 6  ;;  %v14343_v22 = vrot.slane %v10499_v10, 6  ;;  %v4628_v26 = vmax.f32 %v10863_v54, %v10366_v39  ;;  %6383 = vrcp.f32 %v2018_v19 }
 0x34d   : > { %v4879_v1 = vsub.f32 %v4783_v25, %v4847_v31  ;;  %v2174_v52 = vsel %vm657_vm3, %v2142_v7, %v2158_v0  ;;  %v2190_v43 = vsel %vm657_vm3, %v2158_v0, %v2142_v7  ;;  %v2238_v58 = vsel %vm305_vm1, %v2206_v60, %v2222_v46 }
 0x34e   : > { %v4490_v40 = vsel %vm2654_vm6, %v14343_v22, %v14342_v16  ;;  %v2254_v10 = vsel %vm305_vm1, %v2222_v46, %v2206_v60  ;;  %v2276_v29 = vsel %vm640_vm2, %v2190_v43, -1e+30  ;;  %v2404_v39 = vsel %vm640_vm2, %v2190_v43, 1e+30  ;;  %v2024_v60 = vpop.xlane.xlu1 %2023 }
 0x34f   : > { %5932 = vmatprep.mubr.msk.f32.mxu1 %vm1784_vm0, %v4879_v1  ;;  %v2307_v25 = vsel %vm287_vm4, %v2254_v10, -1e+30  ;;  %v2340_v9 = vmax.f32 %v2276_v29, %v2238_v58  ;;  %v2435_v0 = vsel %vm287_vm4, %v2254_v10, 1e+30  ;;  %v2468_v48 = vmin.f32 %v2404_v39, %v2238_v58 }
 0x350   : > { %v2339_v31 = vmax.f32 %v2174_v52, %v2307_v25  ;;  %v2467_v7 = vmin.f32 %v2174_v52, %v2435_v0  ;;  %v4566_v16 = vmin.f32 %v4438_v3, %v4490_v40  ;;  %v10898_v46 = vmax.f32 %v10729_v5, %v4628_v26  ;;  %v2021_v52 = vpop.xlane.xlu0 %2020 }
 0x351   : > { %v10900_v22 = vmax.f32 %v2096_v8, %v2340_v9  ;;  %v10902_v43 = vmin.f32 %v2096_v8, %v2468_v48  ;;  %v4123_v1 = vrot.slane %v10524_v27, 2  ;;  %6385 = vrcp.f32 %v2015_v63 }
 0x352   : > { %14344 = vst [vmem:[#allocation19_spill] sm:$0xff] %v10898_v46  ;;  %v10905_v45 = vmax.f32 %v2094_v32, %v2339_v31  ;;  %v10907_v29 = vmin.f32 %v2094_v32, %v2467_v7  ;;  %v10910_v58 = vmin.f32 %v10502_v59, %v4566_v16  ;;  %v4752_v3 = vmax.f32 %v10898_v46, %v10220_v21 }
 0x353   : > { %14345 = vst [vmem:[#allocation4_spill] sm:$0xff] %v10900_v22  ;;  %14346 = vst [vmem:[#allocation6_spill] sm:$0xff] %v10902_v43  ;;  %v14348_v40 = vrot.slane %v10521_v42, 2  ;;  %v4219_v19 = vrot.slane %v10524_v27, 6  ;;  %v4379_v26 = vrot.slane %v10542_v11, 2  ;;  %6387 = vrcp.f32 %v2024_v60 }
 0x354   : > { %14347 = vst [vmem:[#allocation17_spill] sm:$0xff] %v10907_v29  ;;  %v4692_v21 = vmin.f32 %v10910_v58, %v10388_v55  ;;  %v4784_v63 = vmax.f32 %v10393_v33, %v4752_v3  ;;  %v14349_v25 = vrot.slane %v10521_v42, 6  ;;  %v14350_v48 = vrot.slane %v10539_v2, 2  ;;  %v2030_v55 = vpop.xlane.xlu1 %2029  ;;  %v2027_v39 = vpop.xlane.xlu0 %2026 }
 0x355   : > { %v4139_v8 = vsel %vm2555_vm5, %v14348_v40, %v4123_v1  ;;  %v4475_v7 = vrot.slane %v10542_v11, 6  ;;  %6389 = vrcp.f32 %v2021_v52  ;;  %v14352_v3 = vmov %v14348_v40 }
 0x356   : > { %v4251_v9 = vsel %vm2654_vm6, %v4219_v19, %v14349_v25  ;;  %v4395_v31 = vsel %vm2555_vm5, %v14350_v48, %v4379_v26  ;;  %v10939_v16 = vmin.f32 %v10739_v51, %v4692_v21  ;;  %v4155_v40 = vsel %vm2555_vm5, %v4123_v1, %v14352_v3  ;;  %v6384_v10 = vpop.eup %6383 }
 0x357   : > { %v4279_v0 = vsel %vm2620_vm7, %v4251_v9, -1e+30  ;;  %v4235_v9 = vsel %vm2654_vm6, %v14349_v25, %v4219_v19  ;;  %v14353_v48 = vrot.slane %v10539_v2, 6  ;;  %v4184_v21 = vsel %vm2522_vm8, %v4155_v40, -1e+30 }
 0x358   : > { %14351 = vst [vmem:[#allocation8_spill] sm:$0xff] %v10939_v16  ;;  %v4311_v60 = vmax.f32 %v4139_v8, %v4279_v0  ;;  %v14354_v8 = vrot.slane %v10539_v2, 2  ;;  %v4816_v19 = vmin.f32 %v10939_v16, %v10245_v18  ;;  %v4312_v40 = vmax.f32 %v4184_v21, %v4235_v9  ;;  %v2036_v21 = vpop.xlane.xlu1 %2035 }
 0x359   : > { %v4507_v52 = vsel %vm2654_vm6, %v4475_v7, %v14353_v48  ;;  %v14355_v1 = vmov %v14353_v48  ;;  %6391 = vrcp.f32 %v2030_v55  ;;  %v14361_v55 = vrot.slane %v10590_v15, 2 }
 0x35a   : > { %v4411_v0 = vsel %vm2555_vm5, %v4379_v26, %v14354_v8  ;;  %v4491_v3 = vsel %vm2654_vm6, %v14355_v1, %v4475_v7  ;;  %v10966_v25 = vmax.f32 %v10521_v42, %v4311_v60  ;;  %v4535_v48 = vsel %vm2620_vm7, %v4507_v52, 1e+30  ;;  %v14357_v7 = vld [vmem:[#allocation32_spill] sm:$0xff]  ;;  %v14359_v52 = vld [vmem:[#allocation26_spill] sm:$0xff] }
 0x35b   : > { %v4567_v59 = vmin.f32 %v4395_v31, %v4535_v48  ;;  %v4440_v26 = vsel %vm2522_vm8, %v4411_v0, 1e+30  ;;  %v13807_v8 = vrot.slane %v10592_v38, 2  ;;  %v4848_v1 = vmin.f32 %v14357_v7, %v4816_v19 }
 0x35c   : > { %14356 = vst [vmem:[#allocation18_spill] sm:$0xff] %v10966_v25  ;;  %v4629_v18 = vmax.f32 %v10966_v25, %v10726_v20  ;;  %v10977_v42 = vmax.f32 %v10524_v27, %v4312_v40  ;;  %v4568_v60 = vmin.f32 %v4440_v26, %v4491_v3  ;;  %v2100_v9 = vmul.f32 %v6384_v10, %v14359_v52  ;;  %v6386_v20 = vpop.eup %6385  ;;  %v14364_v3 = vld [vmem:[#allocation7_spill] sm:$0xff]  ;;  %v14366_v52 = vld [vmem:[#allocation28_spill] sm:$0xff] }
 0x35d   : > { %v10981_v31 = vmin.f32 %v10539_v2, %v4567_v59  ;;  %6393 = vrcp.f32 %v2027_v39  ;;  %v10989_v0 = vsel %vm2555_vm5, %v14361_v55, %v13807_v8  ;;  %v4880_v19 = vsub.f32 %v4784_v63, %v4848_v1  ;;  %v6388_v26 = vpop.eup %6387 }
 0x35e   : > { %14358 = vst [vmem:[#allocation21_spill] sm:$0xff] %v10977_v42  ;;  %v10992_v27 = vmax.f32 %v10791_v37, %v4629_v18  ;;  %v10995_v10 = vmin.f32 %v10542_v11, %v4568_v60  ;;  %v4630_v2 = vmax.f32 %v10977_v42, %v10729_v5  ;;  %v2159_v59 = vrot.slane %v2100_v9, 1 }
 0x35f   : > { %14360 = vst [vmem:[#allocation20_spill] sm:$0xff] %v10981_v31  ;;  %v2223_v39 = vrot.slane %v2100_v9, 7  ;;  %v2098_v48 = vmul.f32 %v6386_v20, %v14364_v3  ;;  %v4693_v40 = vmin.f32 %v10981_v31, %v10732_v41  ;;  %5933 = vmatmul.mubr.msk.f32.gmra.mrb[16].mxu1 %vm1784_vm0, %v4880_v19  ;;  %6395 = vrcp.f32 %v2036_v21  ;;  %v6390_v5 = vpop.eup %6389  ;;  %v14368_v19 = vld [vmem:[#allocation15_spill] sm:$0xff] }
 0x360   : > { %14362 = vst [vmem:[#allocation23_spill] sm:$0xff] %v10992_v27  ;;  %14363 = vst [vmem:[#allocation22_spill] sm:$0xff] %v10995_v10  ;;  %v4753_v63 = vmax.f32 %v10992_v27, %v10280_v6  ;;  %v11006_v1 = vmax.f32 %v10863_v54, %v4630_v2  ;;  %v4694_v11 = vmin.f32 %v10995_v10, %v10739_v51 }
 0x361   : > { %v2143_v18 = vrot.slane %v2098_v48, 1  ;;  %v2207_v60 = vrot.slane %v2098_v48, 7  ;;  %v2104_v55 = vmul.f32 %v6388_v26, %v14366_v52  ;;  %v11012_v41 = vmin.f32 %v10817_v53, %v4693_v40 }
 0x362   : > { %14365 = vst [vmem:[#allocation25_spill] sm:$0xff] %v11006_v1  ;;  %v4785_v20 = vmax.f32 %v10756_v56, %v4753_v63  ;;  %v2102_v3 = vmul.f32 %v6390_v5, %v14368_v19  ;;  %v11017_v6 = vmin.f32 %v10910_v58, %v4694_v11  ;;  %v4754_v2 = vmax.f32 %v11006_v1, %v10322_v23 }
 0x363   : > { %14367 = vst [vmem:[#allocation24_spill] sm:$0xff] %v11012_v41  ;;  %v2175_v51 = vsel %vm657_vm3, %v2143_v18, %v2159_v59  ;;  %v2191_v21 = vsel %vm657_vm3, %v2159_v59, %v2143_v18  ;;  %v2239_v40 = vsel %vm305_vm1, %v2207_v60, %v2223_v39  ;;  %v2255_v26 = vsel %vm305_vm1, %v2223_v39, %v2207_v60  ;;  %v6392_v52 = vpop.eup %6391 }
 0x364   : > { %14369 = vst [vmem:[#allocation27_spill] sm:$0xff] %v11017_v6  ;;  %v2278_v63 = vsel %vm640_vm2, %v2191_v21, -1e+30  ;;  %v2309_v11 = vsel %vm287_vm4, %v2255_v26, -1e+30  ;;  %v4817_v5 = vmin.f32 %v11012_v41, %v10295_v49  ;;  %v2160_v60 = vrot.slane %v2104_v55, 1 }
 0x365   : > { %v2406_v23 = vsel %vm640_vm2, %v2191_v21, 1e+30  ;;  %v2341_v59 = vmax.f32 %v2175_v51, %v2309_v11  ;;  %v2342_v18 = vmax.f32 %v2278_v63, %v2239_v40  ;;  %v2437_v19 = vsel %vm287_vm4, %v2255_v26, 1e+30 }
 0x366   : > { %v2470_v14 = vmin.f32 %v2406_v23, %v2239_v40  ;;  %v2469_v39 = vmin.f32 %v2175_v51, %v2437_v19  ;;  %v2224_v32 = vrot.slane %v2104_v55, 7  ;;  %v4849_v8 = vmin.f32 %v10766_v30, %v4817_v5  ;;  %v14375_v40 = vld [vmem:[#allocation13_spill] sm:$0xff] }
 0x367   : > { %v6394_v1 = vpop.eup %6393  ;;  %v11040_v27 = vmax.f32 %v2098_v48, %v2341_v59  ;;  %v11042_v56 = vmax.f32 %v2100_v9, %v2342_v18  ;;  %v2144_v49 = vrot.slane %v2102_v3, 1  ;;  %v2208_v11 = vrot.slane %v2102_v3, 7 }
 0x368   : > { %v11044_v21 = vmin.f32 %v2100_v9, %v2470_v14  ;;  %v11046_v41 = vmin.f32 %v2098_v48, %v2469_v39  ;;  %v4881_v63 = vsub.f32 %v4785_v20, %v4849_v8  ;;  %v4786_v26 = vmax.f32 %v10759_v28, %v4754_v2 }
 0x369   : > { %14370 = vst [vmem:[#allocation32_spill] sm:$0xff] %v11040_v27  ;;  %14371 = vst [vmem:[#allocation26_spill] sm:$0xff] %v11042_v56  ;;  %v2176_v23 = vsel %vm657_vm3, %v2144_v49, %v2160_v60  ;;  %v2192_v5 = vsel %vm657_vm3, %v2160_v60, %v2144_v49  ;;  %v6396_v59 = vpop.eup %6395  ;;  %v2240_v8 = vsel %vm305_vm1, %v2208_v11, %v2224_v32 }
 0x36a   : > { %14372 = vst [vmem:[#allocation7_spill] sm:$0xff] %v11044_v21  ;;  %14373 = vst [vmem:[#allocation28_spill] sm:$0xff] %v11046_v41  ;;  %5935 = vmatprep.mubr.msk.f32.mxu1 %vm1784_vm0, %v4881_v63  ;;  %v2256_v48 = vsel %vm305_vm1, %v2224_v32, %v2208_v11  ;;  %v2280_v20 = vsel %vm640_vm2, %v2192_v5, -1e+30  ;;  %v2408_v18 = vsel %vm640_vm2, %v2192_v5, 1e+30  ;;  %v4818_v19 = vmin.f32 %v11017_v6, %v10334_v12 }
 0x36b   : > { %v2311_v2 = vsel %vm287_vm4, %v2256_v48, -1e+30  ;;  %v2344_v60 = vmax.f32 %v2280_v20, %v2240_v8  ;;  %v2439_v49 = vsel %vm287_vm4, %v2256_v48, 1e+30  ;;  %v2472_v63 = vmin.f32 %v2408_v18, %v2240_v8  ;;  %v14374_v11 = vld [vmem:[#allocation12_spill] sm:$0xff]  ;;  %v14379_v12 = vld [vmem:[#allocation5_spill] sm:$0xff] }
 0x36c   : > { %v2343_v39 = vmax.f32 %v2176_v23, %v2311_v2  ;;  %v2471_v9 = vmin.f32 %v2176_v23, %v2439_v49  ;;  %v4850_v32 = vmin.f32 %v10784_v61, %v4818_v19  ;;  %v2108_v14 = vmul.f32 %v6392_v52, %v14374_v11 }
 0x36d   : > { %v2106_v51 = vmul.f32 %v6394_v1, %v14375_v40  ;;  %v11077_v28 = vmax.f32 %v2104_v55, %v2344_v60  ;;  %v11079_v5 = vmin.f32 %v2104_v55, %v2472_v63  ;;  %v11082_v2 = vmul.f32 %v6396_v59, %v14379_v12  ;;  %v2033_v40 = vpop.xlane.xlu0 %2032 }
 0x36e   : > { %v11075_v30 = vmax.f32 %v2102_v3, %v2343_v39  ;;  %v11084_v20 = vmin.f32 %v2102_v3, %v2471_v9  ;;  %v4882_v48 = vsub.f32 %v4786_v26, %v4850_v32  ;;  %v2161_v8 = vrot.slane %v2108_v14, 1  ;;  %v2042_v26 = vpop.xlane.xlu1 %2041 }
 0x36f   : > { %14377 = vst [vmem:[#allocation12_spill] sm:$0xff] %v11077_v28  ;;  %14378 = vst [vmem:[#allocation13_spill] sm:$0xff] %v11079_v5  ;;  %v2225_v23 = vrot.slane %v2108_v14, 7  ;;  %v2145_v19 = vrot.slane %v2106_v51, 1  ;;  %v2209_v1 = vrot.slane %v2106_v51, 7  ;;  %6397 = vrcp.f32 %v2033_v40 }
 0x370   : > { %14376 = vst [vmem:[#allocation15_spill] sm:$0xff] %v11075_v30  ;;  %14380 = vst [vmem:[#allocation5_spill] sm:$0xff] %v11084_v20  ;;  %5936 = vmatmul.mubr.msk.f32.gmra.mrb[18].mxu1 %vm1784_vm0, %v4882_v48  ;;  %v4220_v52 = vrot.slane %v10592_v38, 6  ;;  %v14384_v40 = vrot.slane %v10590_v15, 2  ;;  %6399 = vrcp.f32 %v2042_v26 }
 0x371   : > { %v2177_v9 = vsel %vm657_vm3, %v2145_v19, %v2161_v8  ;;  %v2193_v60 = vsel %vm657_vm3, %v2161_v8, %v2145_v19  ;;  %v2241_v49 = vsel %vm305_vm1, %v2209_v1, %v2225_v23  ;;  %v2257_v63 = vsel %vm305_vm1, %v2225_v23, %v2209_v1 }
 0x372   : > { %v2282_v32 = vsel %vm640_vm2, %v2193_v60, -1e+30  ;;  %v2313_v11 = vsel %vm287_vm4, %v2257_v63, -1e+30  ;;  %v2410_v12 = vsel %vm640_vm2, %v2193_v60, 1e+30 }
 0x373   : > { %v2345_v48 = vmax.f32 %v2177_v9, %v2313_v11  ;;  %v2346_v55 = vmax.f32 %v2282_v32, %v2241_v49  ;;  %v2441_v8 = vsel %vm287_vm4, %v2257_v63, 1e+30  ;;  %v2474_v19 = vmin.f32 %v2410_v12, %v2241_v49  ;;  %v14388_v12 = vld [vmem:[#allocation35_spill] sm:$0xff] }
 0x374   : > { %v2473_v39 = vmin.f32 %v2177_v9, %v2441_v8  ;;  %v4380_v23 = vrot.slane %v10594_v62, 2  ;;  %v4476_v1 = vrot.slane %v10594_v62, 6  ;;  %v14385_v60 = vrot.slane %v10592_v38, 2  ;;  %v2039_v9 = vpop.xlane.xlu0 %2038 }
 0x375   : > { %v11112_v18 = vmax.f32 %v2106_v51, %v2345_v48  ;;  %v11114_v3 = vmax.f32 %v2108_v14, %v2346_v55  ;;  %v11116_v59 = vmin.f32 %v2108_v14, %v2474_v19  ;;  %v14387_v32 = vrot.slane %v10590_v15, 6  ;;  %v2048_v19 = vpop.xlane.xlu1 %2047 }
 0x376   : > { %v4156_v49 = vsel %vm2555_vm5, %v14385_v60, %v14384_v40  ;;  %v11124_v63 = vmin.f32 %v2106_v51, %v2473_v39  ;;  %v14389_v55 = vrot.slane %v14388_v12, 2  ;;  %v14390_v48 = vrot.slane %v14388_v12, 6 }
 0x377   : > { %14381 = vst [vmem:[#allocation63_spill] sm:$0xff] %v11112_v18  ;;  %14382 = vst [vmem:[#allocation64_spill] sm:$0xff] %v11114_v3  ;;  %v4252_v11 = vsel %vm2654_vm6, %v4220_v52, %v14387_v32  ;;  %v14391_v40 = vmov %v14387_v32  ;;  %v14393_v32 = vrot.slane %v14388_v12, 6  ;;  %6401 = vrcp.f32 %v2039_v9 }
 0x378   : > { %14383 = vst [vmem:[#allocation65_spill] sm:$0xff] %v11116_v59  ;;  %14386 = vst [vmem:[#allocation66_spill] sm:$0xff] %v11124_v63  ;;  %v4396_v14 = vsel %vm2555_vm5, %v14389_v55, %v4380_v23  ;;  %v4508_v8 = vsel %vm2654_vm6, %v4476_v1, %v14390_v48  ;;  %v4281_v39 = vsel %vm2620_vm7, %v4252_v11, -1e+30  ;;  %v4186_v48 = vsel %vm2522_vm8, %v4156_v49, -1e+30 }
 0x379   : > { %v4537_v60 = vsel %vm2620_vm7, %v4508_v8, 1e+30  ;;  %v4313_v6 = vmax.f32 %v10989_v0, %v4281_v39  ;;  %v4236_v51 = vsel %vm2654_vm6, %v14391_v40, %v4220_v52  ;;  %v14392_v11 = vmov %v14389_v55  ;;  %v2045_v39 = vpop.xlane.xlu0 %2044  ;;  %v6398_v63 = vpop.eup %6397 }
 0x37a   : > { %v4569_v61 = vmin.f32 %v4396_v14, %v4537_v60  ;;  %v4412_v8 = vsel %vm2555_vm5, %v4380_v23, %v14392_v11  ;;  %v4492_v55 = vsel %vm2654_vm6, %v14393_v32, %v4476_v1  ;;  %v4314_v14 = vmax.f32 %v4186_v48, %v4236_v51  ;;  %v14396_v60 = vld [vmem:[#allocation57_spill] sm:$0xff] }
 0x37b   : > { %v11162_v0 = vmax.f32 %v10590_v15, %v4313_v6  ;;  %v4442_v52 = vsel %vm2522_vm8, %v4412_v8, 1e+30  ;;  %v13823_v23 = vrot.slane %v10781_v13, 1  ;;  %v13822_v11 = vrot.slane %v14396_v60, 1  ;;  %v2054_v6 = vpop.xlane.xlu1 %2053  ;;  %v14403_v8 = vld [vmem:[#allocation34_spill] sm:$0xff] }
 0x37c   : > { %v11165_v49 = vmin.f32 %v14388_v12, %v4569_v61  ;;  %v4570_v40 = vmin.f32 %v4442_v52, %v4492_v55  ;;  %v11176_v61 = vmax.f32 %v10592_v38, %v4314_v14  ;;  %v14398_v12 = vld [vmem:[#allocation14_spill] sm:$0xff]  ;;  %6403 = vrcp.f32 %v2048_v19  ;;  %v14405_v52 = vld [vmem:[#allocation33_spill] sm:$0xff] }
 0x37d   : > { %14394 = vst [vmem:[#allocation35_spill] sm:$0xff] %v11162_v0  ;;  %v4631_v1 = vmax.f32 %v11162_v0, %v10791_v37  ;;  %v2110_v51 = vmul.f32 %v6398_v63, %v14398_v12  ;;  %v11188_v37 = vsel %vm657_vm3, %v13823_v23, %v13822_v11  ;;  %6405 = vrcp.f32 %v2045_v39  ;;  %v14445_v0 = vld [vmem:[#allocation58_spill] sm:$0xff] }
 0x37e   : > { %14395 = vst [vmem:[#allocation67_spill] sm:$0xff] %v11165_v49  ;;  %v4695_v15 = vmin.f32 %v11165_v49, %v10817_v53  ;;  %14397 = vst [vmem:[#allocation57_spill] sm:$0xff] %v11176_v61  ;;  %v11180_v26 = vmin.f32 %v10594_v62, %v4570_v40  ;;  %v4632_v9 = vmax.f32 %v11176_v61, %v10863_v54  ;;  %6407 = vrcp.f32 %v2054_v6 }
 0x37f   : > { %v11191_v53 = vmax.f32 %v10966_v25, %v4631_v1  ;;  %v2146_v62 = vrot.slane %v2110_v51, 1  ;;  %v2210_v63 = vrot.slane %v2110_v51, 7  ;;  %v14404_v14 = vrot.slane %v14403_v8, 1  ;;  %v14446_v25 = vld [vmem:[#allocation40_spill] sm:$0xff] }
 0x380   : > { %14399 = vst [vmem:[#allocation14_spill] sm:$0xff] %v11180_v26  ;;  %v11194_v38 = vmin.f32 %v10981_v31, %v4695_v15  ;;  %v4696_v19 = vmin.f32 %v11180_v26, %v10910_v58  ;;  %v11205_v48 = vmax.f32 %v10977_v42, %v4632_v9  ;;  %v14406_v54 = vrot.slane %v14405_v52, 1 }
 0x381   : > { %14400 = vst [vmem:[#allocation68_spill] sm:$0xff] %v11191_v53  ;;  %v4755_v32 = vmax.f32 %v11191_v53, %v10374_v36  ;;  %v14407_v58 = vrot.slane %v11082_v2, 1  ;;  %v14409_v1 = vrot.slane %v11082_v2, 7  ;;  %v14416_v53 = vld [vmem:[#allocation56_spill] sm:$0xff]  ;;  %v14472_v59 = vrot.slane %v10907_v29, 6 }
 0x382   : > { %14401 = vst [vmem:[#allocation69_spill] sm:$0xff] %v11194_v38  ;;  %v4819_v55 = vmin.f32 %v11194_v38, %v10383_v44  ;;  %14402 = vst [vmem:[#allocation70_spill] sm:$0xff] %v11205_v48  ;;  %v11213_v40 = vsel %vm657_vm3, %v14406_v54, %v14404_v14 }
 0x383   : > { %v2178_v39 = vsel %vm657_vm3, %v2146_v62, %v14407_v58  ;;  %v14408_v36 = vmov %v14407_v58  ;;  %v2242_v15 = vsel %vm305_vm1, %v2210_v63, %v14409_v1  ;;  %v14410_v6 = vmov %v14409_v1 }
 0x384   : > { %v2194_v44 = vsel %vm657_vm3, %v14408_v36, %v2146_v62  ;;  %v2258_v12 = vsel %vm305_vm1, %v14410_v6, %v2210_v63  ;;  %v4787_v9 = vmax.f32 %v10820_v17, %v4755_v32  ;;  %v4851_v14 = vmin.f32 %v10848_v47, %v4819_v55  ;;  %v6400_v55 = vpop.eup %6399 }
 0x385   : > { %v2284_v54 = vsel %vm640_vm2, %v2194_v44, -1e+30  ;;  %v2315_v62 = vsel %vm287_vm4, %v2258_v12, -1e+30  ;;  %v2412_v1 = vsel %vm640_vm2, %v2194_v44, 1e+30  ;;  %v11242_v32 = vmin.f32 %v10995_v10, %v4696_v19 }
 0x386   : > { %v2347_v58 = vmax.f32 %v2178_v39, %v2315_v62  ;;  %v2348_v36 = vmax.f32 %v2284_v54, %v2242_v15  ;;  %v2443_v11 = vsel %vm287_vm4, %v2258_v12, 1e+30  ;;  %v4883_v23 = vsub.f32 %v4787_v9, %v4851_v14  ;;  %v14414_v62 = vld [vmem:[#allocation37_spill] sm:$0xff] }
 0x387   : > { %v2475_v63 = vmin.f32 %v2178_v39, %v2443_v11  ;;  %v2476_v6 = vmin.f32 %v2412_v1, %v2242_v15  ;;  %14411 = vst [vmem:[#allocation34_spill] sm:$0xff] %v11242_v32  ;;  %v4756_v54 = vmax.f32 %v11205_v48, %v10393_v33  ;;  %v14415_v44 = vrot.slane %v14414_v62, 1  ;;  %v6402_v39 = vpop.eup %6401  ;;  %v14420_v33 = vld [vmem:[#allocation11_spill] sm:$0xff]  ;;  %v14421_v1 = vld [vmem:[#allocation9_spill] sm:$0xff] }
 0x388   : > { %v11244_v38 = vmax.f32 %v2110_v51, %v2347_v58  ;;  %v11247_v47 = vmax.f32 %v11082_v2, %v2348_v36  ;;  %v14417_v17 = vrot.slane %v14416_v53, 1  ;;  %5938 = vmatprep.mubr.msk.f32.mxu1 %vm1784_vm0, %v4883_v23  ;;  %v4820_v12 = vmin.f32 %v11242_v32, %v14357_v7  ;;  %v6404_v14 = vpop.eup %6403  ;;  %v14422_v48 = vld [vmem:[#allocation29_spill] sm:$0xff]  ;;  %v14423_v36 = vld [vmem:[#allocation30_spill] sm:$0xff] }
 0x389   : > { %v11260_v19 = vmin.f32 %v2110_v51, %v2475_v63  ;;  %v11263_v15 = vmin.f32 %v11082_v2, %v2476_v6  ;;  %v2116_v9 = vmul.f32 %v6400_v55, %v14420_v33  ;;  %v6406_v23 = vpop.eup %6405  ;;  %v2120_v58 = vmul.f32 %v6404_v14, %v14422_v48 }
 0x38a   : > { %14412 = vst [vmem:[#allocation33_spill] sm:$0xff] %v11244_v38  ;;  %14413 = vst [vmem:[#allocation71_spill] sm:$0xff] %v11247_v47  ;;  %v11257_v11 = vsel %vm657_vm3, %v14417_v17, %v14415_v44  ;;  %v4788_v17 = vmax.f32 %v10898_v46, %v4756_v54  ;;  %v2114_v44 = vmul.f32 %v6402_v39, %v14421_v1  ;;  %v6408_v7 = vpop.eup %6407  ;;  %v14424_v54 = vld [vmem:[#allocation31_spill] sm:$0xff]  ;;  %v14425_v39 = vrot.slane %v10781_v13, 1 }
 0x38b   : > { %14418 = vst [vmem:[#allocation37_spill] sm:$0xff] %v11260_v19  ;;  %14419 = vst [vmem:[#allocation56_spill] sm:$0xff] %v11263_v15  ;;  %v4852_v63 = vmin.f32 %v10939_v16, %v4820_v12  ;;  %v2163_v6 = vrot.slane %v2116_v9, 1  ;;  %v2227_v32 = vrot.slane %v2116_v9, 7  ;;  %v2118_v10 = vmul.f32 %v6406_v23, %v14423_v36 }
 0x38c   : > { %v2147_v55 = vrot.slane %v2114_v44, 1  ;;  %v2211_v33 = vrot.slane %v2114_v44, 7  ;;  %v11278_v46 = vmul.f32 %v6408_v7, %v14424_v54  ;;  %v14426_v1 = vrot.slane %v14396_v60, 1 }
 0x38d   : > { %v4884_v26 = vsub.f32 %v4788_v17, %v4852_v63  ;;  %v14427_v7 = vrot.slane %v14396_v60, 7  ;;  %v2228_v51 = vrot.slane %v2120_v58, 7  ;;  %v2148_v16 = vrot.slane %v2118_v10, 1 }
 0x38e   : > { %v11286_v12 = vsel %vm657_vm3, %v14426_v1, %v14425_v39  ;;  %v2179_v2 = vsel %vm657_vm3, %v2147_v55, %v2163_v6  ;;  %v2195_v48 = vsel %vm657_vm3, %v2163_v6, %v2147_v55  ;;  %v2243_v14 = vsel %vm305_vm1, %v2211_v33, %v2227_v32 }
 0x38f   : > { %v2259_v36 = vsel %vm305_vm1, %v2227_v32, %v2211_v33  ;;  %5939 = vmatmul.mubr.msk.f32.gmra.mrb[20].mxu1 %vm1784_vm0, %v4884_v26  ;;  %v2286_v17 = vsel %vm640_vm2, %v2195_v48, -1e+30  ;;  %v2414_v63 = vsel %vm640_vm2, %v2195_v48, 1e+30  ;;  %v14428_v6 = vrot.slane %v10781_v13, 7 }
 0x390   : > { %v2317_v23 = vsel %vm287_vm4, %v2259_v36, -1e+30  ;;  %v2350_v33 = vmax.f32 %v2286_v17, %v2243_v14  ;;  %v2445_v26 = vsel %vm287_vm4, %v2259_v36, 1e+30  ;;  %v2478_v54 = vmin.f32 %v2414_v63, %v2243_v14  ;;  %v14442_v14 = vld [vmem:[#allocation55_spill] sm:$0xff] }
 0x391   : > { %v11309_v55 = vsel %vm305_vm1, %v14428_v6, %v14427_v7  ;;  %v2349_v32 = vmax.f32 %v2179_v2, %v2317_v23  ;;  %v2477_v39 = vmin.f32 %v2179_v2, %v2445_v26  ;;  %v2164_v1 = vrot.slane %v2120_v58, 1 }
 0x392   : > { %v11315_v48 = vmax.f32 %v2116_v9, %v2350_v33  ;;  %v11317_v61 = vmin.f32 %v2116_v9, %v2478_v54  ;;  %v2212_v31 = vrot.slane %v2118_v10, 7  ;;  %v14470_v47 = vrot.slane %v10865_v4, 6 }
 0x393   : > { %v11313_v49 = vmax.f32 %v2114_v44, %v2349_v32  ;;  %v11319_v42 = vmin.f32 %v2114_v44, %v2477_v39  ;;  %v2180_v17 = vsel %vm657_vm3, %v2148_v16, %v2164_v1  ;;  %v2196_v36 = vsel %vm657_vm3, %v2164_v1, %v2148_v16 }
 0x394   : > { %14430 = vst [vmem:[#allocation9_spill] sm:$0xff] %v11315_v48  ;;  %14431 = vst [vmem:[#allocation29_spill] sm:$0xff] %v11317_v61  ;;  %v2244_v63 = vsel %vm305_vm1, %v2212_v31, %v2228_v51  ;;  %v2260_v9 = vsel %vm305_vm1, %v2228_v51, %v2212_v31  ;;  %v2288_v6 = vsel %vm640_vm2, %v2196_v36, -1e+30  ;;  %v2416_v26 = vsel %vm640_vm2, %v2196_v36, 1e+30 }
 0x395   : > { %14429 = vst [vmem:[#allocation11_spill] sm:$0xff] %v11313_v49  ;;  %14432 = vst [vmem:[#allocation30_spill] sm:$0xff] %v11319_v42  ;;  %v2319_v16 = vsel %vm287_vm4, %v2260_v9, -1e+30  ;;  %v2352_v33 = vmax.f32 %v2288_v6, %v2244_v63  ;;  %v2447_v54 = vsel %vm287_vm4, %v2260_v9, 1e+30  ;;  %v2480_v31 = vmin.f32 %v2416_v26, %v2244_v63 }
 0x396   : > { %v2351_v32 = vmax.f32 %v2180_v17, %v2319_v16  ;;  %v2479_v39 = vmin.f32 %v2180_v17, %v2447_v54  ;;  %v14433_v1 = vrot.slane %v10781_v13, 7  ;;  %v14436_v36 = vrot.slane %v14405_v52, 7 }
 0x397   : > { %v11351_v6 = vmax.f32 %v2120_v58, %v2352_v33  ;;  %v14437_v16 = vrot.slane %v14403_v8, 7  ;;  %v14438_v63 = vrot.slane %v14416_v53, 7  ;;  %v14439_v9 = vrot.slane %v14414_v62, 7 }
 0x398   : > { %v2249_v44 = vsel %vm305_vm1, %v14427_v7, %v14433_v1  ;;  %v11349_v23 = vmax.f32 %v2118_v10, %v2351_v32  ;;  %v11365_v54 = vmin.f32 %v2118_v10, %v2479_v39  ;;  %v11367_v7 = vmin.f32 %v2120_v58, %v2480_v31  ;;  %v14448_v39 = vld [vmem:[#allocation38_spill] sm:$0xff] }
 0x399   : > { %14435 = vst [vmem:[#allocation72_spill] sm:$0xff] %v11351_v6  ;;  %v2250_v17 = vsel %vm305_vm1, %v14437_v16, %v14436_v36  ;;  %v2251_v26 = vsel %vm305_vm1, %v14439_v9, %v14438_v63  ;;  %v2266_v32 = vsel %vm640_vm2, %v11286_v12, -1e+30  ;;  %v2297_v33 = vsel %vm287_vm4, %v2249_v44, -1e+30  ;;  %v14443_v36 = vld [vmem:[#allocation36_spill] sm:$0xff] }
 0x39a   : > { %14434 = vst [vmem:[#allocation31_spill] sm:$0xff] %v11349_v23  ;;  %14440 = vst [vmem:[#allocation73_spill] sm:$0xff] %v11365_v54  ;;  %v2299_v16 = vsel %vm287_vm4, %v2250_v17, -1e+30  ;;  %v2301_v10 = vsel %vm287_vm4, %v2251_v26, -1e+30  ;;  %v2329_v31 = vmax.f32 %v11188_v37, %v2297_v33  ;;  %v2330_v63 = vmax.f32 %v2266_v32, %v11309_v55 }
 0x39b   : > { %14441 = vst [vmem:[#allocation74_spill] sm:$0xff] %v11367_v7  ;;  %v2331_v9 = vmax.f32 %v11213_v40, %v2299_v16  ;;  %v2333_v1 = vmax.f32 %v11257_v11, %v2301_v10  ;;  %v14444_v51 = vmax.f32 %v14442_v14, %v14443_v36  ;;  %v14447_v7 = vmax.f32 %v14445_v0, %v14446_v25  ;;  %v14450_v54 = vld [vmem:[#allocation60_spill] sm:$0xff] }
 0x39c   : > { %v11399_v33 = vmax.f32 %v10781_v13, %v2329_v31  ;;  %v11402_v32 = vmax.f32 %v14396_v60, %v2330_v63  ;;  %v2394_v16 = vsel %vm640_vm2, %v11286_v12, 1e+30  ;;  %v2425_v14 = vsel %vm287_vm4, %v2249_v44, 1e+30 }
 0x39d   : > { %v11390_v2 = vmax.f32 %v14403_v8, %v14444_v51  ;;  %v11396_v58 = vmax.f32 %v14414_v62, %v14447_v7  ;;  %v11410_v51 = vmax.f32 %v14405_v52, %v2331_v9  ;;  %v11413_v0 = vmax.f32 %v14416_v53, %v2333_v1 }
 0x39e   : > { %v2427_v7 = vsel %vm287_vm4, %v2250_v17, 1e+30  ;;  %v2429_v10 = vsel %vm287_vm4, %v2251_v26, 1e+30  ;;  %v2457_v31 = vmin.f32 %v11188_v37, %v2425_v14  ;;  %v2458_v63 = vmin.f32 %v2394_v16, %v11309_v55 }
 0x39f   : > { %v2459_v12 = vmin.f32 %v11213_v40, %v2427_v7  ;;  %v2461_v44 = vmin.f32 %v11257_v11, %v2429_v10  ;;  %v14449_v9 = vmin.f32 %v14448_v39, %v14443_v36  ;;  %v14451_v17 = vmin.f32 %v14450_v54, %v14446_v25 }
 0x3a0   : > { %v13863_v37 = vrot.slane %v11399_v33, 2  ;;  %v13858_v55 = vrot.slane %v11410_v51, 2  ;;  %v11438_v40 = vmin.f32 %v10781_v13, %v2457_v31  ;;  %v11441_v11 = vmin.f32 %v14396_v60, %v2458_v63  ;;  %v14453_v60 = vld [vmem:[#allocation61_spill] sm:$0xff] }
 0x3a1   : > { %v11427_v1 = vmin.f32 %v14403_v8, %v14449_v9  ;;  %v11433_v23 = vmin.f32 %v14414_v62, %v14451_v17  ;;  %v11444_v26 = vmin.f32 %v14405_v52, %v2459_v12  ;;  %v11447_v8 = vmin.f32 %v14416_v53, %v2461_v44  ;;  %v14452_v62 = vld [vmem:[#allocation59_spill] sm:$0xff] }
 0x3a2   : > { %v13854_v25 = vrot.slane %v11413_v0, 2  ;;  %v13857_v54 = vrot.slane %v14452_v62, 2  ;;  %v13861_v36 = vrot.slane %v10856_v50, 2  ;;  %v13859_v39 = vrot.slane %v11402_v32, 2 }
 0x3a3   : > { %v13855_v13 = vrot.slane %v11390_v2, 2  ;;  %v13853_v16 = vrot.slane %v11396_v58, 2  ;;  %v13856_v14 = vrot.slane %v14453_v60, 2  ;;  %v13860_v52 = vrot.slane %v10858_v34, 2 }
 0x3a4   : > { %v13862_v7 = vrot.slane %v10900_v22, 2  ;;  %v2556_v53 = vsel %vm2555_vm5, %v13863_v37, %v13859_v39  ;;  %v13864_v10 = vrot.slane %v11399_v33, 6  ;;  %v13866_v31 = vrot.slane %v11410_v51, 6 }
 0x3a5   : > { %v2557_v63 = vsel %vm2555_vm5, %v13858_v55, %v13855_v13  ;;  %v2558_v12 = vsel %vm2555_vm5, %v13854_v25, %v13853_v16  ;;  %v2559_v44 = vsel %vm2555_vm5, %v13857_v54, %v13856_v14  ;;  %v2560_v9 = vsel %vm2555_vm5, %v13861_v36, %v13860_v52  ;;  %v2051_v36 = vpop.xlane.xlu0 %2050 }
 0x3a6   : > { %v14454_v17 = vrot.slane %v10905_v45, 2  ;;  %v13869_v25 = vrot.slane %v11413_v0, 6  ;;  %v13865_v13 = vrot.slane %v11402_v32, 6  ;;  %v13867_v14 = vrot.slane %v11390_v2, 6 }
 0x3a7   : > { %v13870_v54 = vrot.slane %v11396_v58, 6  ;;  %v13871_v55 = vrot.slane %v14453_v60, 6  ;;  %v14458_v37 = vrot.slane %v10905_v45, 6  ;;  %v14459_v6 = vrot.slane %v10900_v22, 6 }
 0x3a8   : > { %v2561_v16 = vsel %vm2555_vm5, %v14454_v17, %v13862_v7  ;;  %v2671_v17 = vsel %vm2654_vm6, %v13865_v13, %v13864_v10  ;;  %v2672_v7 = vsel %vm2654_vm6, %v13867_v14, %v13866_v31  ;;  %v14455_v10 = vrot.slane %v14452_v62, 6 }
 0x3a9   : > { %v2673_v52 = vsel %vm2654_vm6, %v13870_v54, %v13869_v25  ;;  %v14456_v31 = vrot.slane %v10856_v50, 6  ;;  %v14457_v14 = vrot.slane %v10858_v34, 6  ;;  %v2676_v25 = vsel %vm2654_vm6, %v14459_v6, %v14458_v37 }
 0x3aa   : > { %v2674_v13 = vsel %vm2654_vm6, %v13871_v55, %v14455_v10  ;;  %v2687_v54 = vsel %vm2620_vm7, %v2671_v17, -1e+30  ;;  %v2689_v10 = vsel %vm2620_vm7, %v2672_v7, -1e+30  ;;  %v2691_v55 = vsel %vm2620_vm7, %v2673_v52, -1e+30 }
 0x3ab   : > { %v2675_v39 = vsel %vm2654_vm6, %v14457_v14, %v14456_v31  ;;  %6409 = vrcp.f32 %v2051_v36  ;;  %v2693_v14 = vsel %vm2620_vm7, %v2674_v13, -1e+30  ;;  %v2697_v42 = vsel %vm2620_vm7, %v2676_v25, -1e+30  ;;  %v14460_v52 = vld [vmem:[#allocation39_spill] sm:$0xff] }
 0x3ac   : > { %v2695_v31 = vsel %vm2620_vm7, %v2675_v39, -1e+30  ;;  %v2719_v6 = vmax.f32 %v2556_v53, %v2687_v54  ;;  %v2721_v37 = vmax.f32 %v2557_v63, %v2689_v10  ;;  %v2723_v49 = vmax.f32 %v2558_v12, %v2691_v55  ;;  %v14462_v12 = vld [vmem:[#allocation62_spill] sm:$0xff] }
 0x3ad   : > { %v2725_v17 = vmax.f32 %v2559_v44, %v2693_v14  ;;  %v2727_v61 = vmax.f32 %v2560_v9, %v2695_v31  ;;  %v2729_v48 = vmax.f32 %v2561_v16, %v2697_v42  ;;  %v13881_v36 = vrot.slane %v11447_v8, 2 }
 0x3ae   : > { %v11554_v7 = vmax.f32 %v11399_v33, %v2719_v6  ;;  %v13884_v19 = vrot.slane %v14460_v52, 2  ;;  %v11559_v13 = vmax.f32 %v11410_v51, %v2721_v37  ;;  %v11562_v39 = vmax.f32 %v11413_v0, %v2723_v49 }
 0x3af   : > { %v11565_v25 = vmax.f32 %v14452_v62, %v2725_v17  ;;  %v11568_v55 = vmax.f32 %v10856_v50, %v2727_v61  ;;  %v11571_v42 = vmax.f32 %v10905_v45, %v2729_v48  ;;  %v13887_v54 = vrot.slane %v10865_v4, 2 }
 0x3b0   : > { %v13885_v16 = vrot.slane %v11441_v11, 2  ;;  %v13882_v53 = vrot.slane %v11427_v1, 2  ;;  %v13880_v63 = vrot.slane %v11433_v23, 2  ;;  %v13883_v49 = vrot.slane %v14462_v12, 2 }
 0x3b1   : > { %14461 = vst [vmem:[#allocation55_spill] sm:$0xff] %v11571_v42  ;;  %v13886_v44 = vrot.slane %v10860_v24, 2  ;;  %v13890_v9 = vrot.slane %v10902_v43, 2  ;;  %v14463_v61 = vrot.slane %v11438_v40, 2  ;;  %v14464_v10 = vrot.slane %v11444_v26, 2 }
 0x3b2   : > { %v2817_v37 = vsel %vm2555_vm5, %v13881_v36, %v13880_v63  ;;  %v2818_v17 = vsel %vm2555_vm5, %v13884_v19, %v13883_v49  ;;  %v13896_v36 = vrot.slane %v11447_v8, 6  ;;  %v13894_v49 = vrot.slane %v11427_v1, 6 }
 0x3b3   : > { %v2815_v48 = vsel %vm2555_vm5, %v14463_v61, %v13885_v16  ;;  %v2816_v14 = vsel %vm2555_vm5, %v14464_v10, %v13882_v53  ;;  %v2819_v61 = vsel %vm2555_vm5, %v13887_v54, %v13886_v44  ;;  %v14465_v10 = vrot.slane %v10907_v29, 2 }
 0x3b4   : > { %v13892_v53 = vrot.slane %v11441_v11, 6  ;;  %v13897_v19 = vrot.slane %v11433_v23, 6  ;;  %v3039_v31 = vmax.f32 %v11559_v13, -1e+30  ;;  %v14466_v38 = vrot.slane %v11438_v40, 6 }
 0x3b5   : > { %v2820_v63 = vsel %vm2555_vm5, %v14465_v10, %v13890_v9  ;;  %v6410_v16 = vpop.eup %6409  ;;  %v14467_v9 = vrot.slane %v11444_v26, 6  ;;  %v14468_v15 = vrot.slane %v14460_v52, 6  ;;  %v14482_v30 = vrot.slane %v14452_v62, 2 }
 0x3b6   : > { %v2927_v10 = vsel %vm2654_vm6, %v13892_v53, %v14466_v38  ;;  %v2929_v54 = vsel %vm2654_vm6, %v13897_v19, %v13896_v36  ;;  %v14469_v38 = vrot.slane %v14462_v12, 6  ;;  %v14473_v36 = vrot.slane %v10902_v43, 6 }
 0x3b7   : > { %v2928_v6 = vsel %vm2654_vm6, %v13894_v49, %v14467_v9  ;;  %v14471_v9 = vrot.slane %v10860_v24, 6  ;;  %v2943_v19 = vsel %vm2620_vm7, %v2927_v10, 1e+30 }
 0x3b8   : > { %v2930_v53 = vsel %vm2654_vm6, %v14469_v38, %v14468_v15  ;;  %v2932_v44 = vsel %vm2654_vm6, %v14473_v36, %v14472_v59  ;;  %v2945_v15 = vsel %vm2620_vm7, %v2928_v6, 1e+30  ;;  %v2947_v38 = vsel %vm2620_vm7, %v2929_v54, 1e+30 }
 0x3b9   : > { %v2931_v49 = vsel %vm2654_vm6, %v14471_v9, %v14470_v47  ;;  %v2949_v18 = vsel %vm2620_vm7, %v2930_v53, 1e+30  ;;  %v2975_v47 = vmin.f32 %v2815_v48, %v2943_v19  ;;  %v2953_v3 = vsel %vm2620_vm7, %v2932_v44, 1e+30 }
 0x3ba   : > { %v2951_v9 = vsel %vm2620_vm7, %v2931_v49, 1e+30  ;;  %v2977_v59 = vmin.f32 %v2816_v14, %v2945_v15  ;;  %v2979_v36 = vmin.f32 %v2817_v37, %v2947_v38  ;;  %v2981_v20 = vmin.f32 %v2818_v17, %v2949_v18 }
 0x3bb   : > { %v2983_v10 = vmin.f32 %v2819_v61, %v2951_v9  ;;  %v2985_v5 = vmin.f32 %v2820_v63, %v2953_v3  ;;  %v11677_v6 = vmin.f32 %v11438_v40, %v2975_v47  ;;  %v3043_v19 = vmax.f32 %v11565_v25, %v11559_v13  ;;  %v14475_v61 = vld [vmem:[#allocation46_spill] sm:$0xff] }
 0x3bc   : > { %v11680_v54 = vmin.f32 %v11444_v26, %v2977_v59  ;;  %v11683_v53 = vmin.f32 %v11447_v8, %v2979_v36  ;;  %v3047_v49 = vmax.f32 %v11571_v42, %v11565_v25  ;;  %v11690_v44 = vmin.f32 %v14460_v52, %v2981_v20 }
 0x3bd   : > { %v11693_v18 = vmin.f32 %v10865_v4, %v2983_v10  ;;  %v11696_v3 = vmin.f32 %v10907_v29, %v2985_v5  ;;  %v11699_v63 = vmax.f32 %v11554_v7, %v3039_v31  ;;  %v11702_v48 = vmax.f32 %v11562_v39, %v3043_v19 }
 0x3be   : > { %v11705_v14 = vmax.f32 %v11568_v55, %v3047_v49  ;;  %v3103_v37 = vmin.f32 %v11680_v54, 1e+30  ;;  %v3107_v17 = vmin.f32 %v11690_v44, %v11680_v54  ;;  %v2122_v31 = vmul.f32 %v6410_v16, %v14475_v61 }
 0x3bf   : > { %14474 = vst [vmem:[#allocation36_spill] sm:$0xff] %v11696_v3  ;;  %v3111_v5 = vmin.f32 %v11696_v3, %v11690_v44  ;;  %v14476_v15 = vrot.slane %v11399_v33, 2  ;;  %v14477_v38 = vrot.slane %v11402_v32, 2  ;;  %v3167_v59 = vmax.f32 %v11702_v48, -1e+30 }
 0x3c0   : > { %v11722_v9 = vmin.f32 %v11677_v6, %v3103_v37  ;;  %v14478_v10 = vrot.slane %v11410_v51, 2  ;;  %v14479_v19 = vrot.slane %v11390_v2, 2  ;;  %v11734_v49 = vmin.f32 %v11683_v53, %v3107_v17 }
 0x3c1   : > { %v2572_v47 = vsel %vm2555_vm5, %v14477_v38, %v14476_v15  ;;  %v11737_v61 = vmin.f32 %v11693_v18, %v3111_v5  ;;  %v2149_v37 = vrot.slane %v2122_v31, 1  ;;  %v2213_v15 = vrot.slane %v2122_v31, 7 }
 0x3c2   : > { %v2573_v16 = vsel %vm2555_vm5, %v14479_v19, %v14478_v10  ;;  %v3199_v38 = vmax.f32 %v11699_v63, %v3167_v59  ;;  %v14480_v20 = vrot.slane %v11413_v0, 2  ;;  %v14481_v36 = vrot.slane %v11396_v58, 2 }
 0x3c3   : > { %v14483_v10 = vrot.slane %v14453_v60, 2  ;;  %v2589_v5 = vsel %vm2522_vm8, %v2572_v47, -1e+30  ;;  %v3231_v19 = vmin.f32 %v11734_v49, 1e+30  ;;  %v14484_v42 = vrot.slane %v11278_v46, 1 }
 0x3c4   : > { %v2574_v3 = vsel %vm2555_vm5, %v14481_v36, %v14480_v20 }
 0x3c5   : > { %v2575_v17 = vsel %vm2555_vm5, %v14483_v10, %v14482_v30  ;;  %v2181_v20 = vsel %vm657_vm3, %v2149_v37, %v14484_v42  ;;  %v14485_v36 = vmov %v14484_v42  ;;  %v14486_v30 = vrot.slane %v11278_v46, 7 }
 0x3c6   : > { %v2197_v28 = vsel %vm657_vm3, %v14485_v36, %v2149_v37  ;;  %v3263_v21 = vmin.f32 %v11722_v9, %v3231_v19  ;;  %v2595_v19 = vsel %vm2522_vm8, %v2575_v17, -1e+30 }
 0x3c7   : > { %v2245_v47 = vsel %vm305_vm1, %v2213_v15, %v14486_v30  ;;  %v14487_v10 = vmov %v14486_v30  ;;  %v2290_v41 = vsel %vm640_vm2, %v2197_v28, -1e+30  ;;  %v2418_v42 = vsel %vm640_vm2, %v2197_v28, 1e+30 }
 0x3c8   : > { %v2261_v59 = vsel %vm305_vm1, %v14487_v10, %v2213_v15  ;;  %v2354_v36 = vmax.f32 %v2290_v41, %v2245_v47  ;;  %v2482_v43 = vmin.f32 %v2418_v42, %v2245_v47  ;;  %v2591_v15 = vsel %vm2522_vm8, %v2573_v16, -1e+30  ;;  %v14538_v42 = vld [vmem:[#allocation52_spill] sm:$0xff] }
 0x3c9   : > { %v2321_v37 = vsel %vm287_vm4, %v2261_v59, -1e+30  ;;  %v2449_v30 = vsel %vm287_vm4, %v2261_v59, 1e+30  ;;  %v3295_v10 = vsub.f32 %v3199_v38, %v3263_v21  ;;  %v2593_v28 = vsel %vm2522_vm8, %v2574_v3, -1e+30 }
 0x3ca   : > { %v2353_v27 = vmax.f32 %v2181_v20, %v2321_v37  ;;  %v2481_v56 = vmin.f32 %v2181_v20, %v2449_v30  ;;  %v11785_v29 = vmax.f32 %v11278_v46, %v2354_v36  ;;  %v11796_v59 = vmin.f32 %v11278_v46, %v2482_v43 }
 0x3cb   : > { %v14488_v20 = vrot.slane %v11402_v32, 6  ;;  %v14489_v21 = vrot.slane %v11399_v33, 6  ;;  %5958 = vmatprep.mubr.msk.f32.mxu0 %vm1784_vm0, %v3295_v10  ;;  %v14490_v3 = vrot.slane %v11390_v2, 6  ;;  %v14491_v38 = vrot.slane %v11410_v51, 6 }
 0x3cc   : > { %v11791_v41 = vmax.f32 %v2122_v31, %v2353_v27  ;;  %v11793_v22 = vmin.f32 %v2122_v31, %v2481_v56  ;;  %v14492_v27 = vrot.slane %v11396_v58, 6  ;;  %v14493_v46 = vrot.slane %v11413_v0, 6 }
 0x3cd   : > { %v2655_v16 = vsel %vm2654_vm6, %v14489_v21, %v14488_v20  ;;  %v2656_v56 = vsel %vm2654_vm6, %v14491_v38, %v14490_v3  ;;  %v14494_v33 = vrot.slane %v14453_v60, 6  ;;  %v14495_v31 = vrot.slane %v14452_v62, 6  ;;  %v2060_v21 = vpop.xlane.xlu1 %2059 }
 0x3ce   : > { %v2657_v43 = vsel %vm2654_vm6, %v14493_v46, %v14492_v27  ;;  %v2720_v47 = vmax.f32 %v2589_v5, %v2655_v16  ;;  %v2722_v0 = vmax.f32 %v2591_v15, %v2656_v56  ;;  %v14496_v62 = vrot.slane %v11438_v40, 2 }
 0x3cf   : > { %v2658_v17 = vsel %vm2654_vm6, %v14495_v31, %v14494_v33  ;;  %v2724_v30 = vmax.f32 %v2593_v28, %v2657_v43  ;;  %v14497_v3 = vrot.slane %v11441_v11, 2  ;;  %v14498_v16 = vrot.slane %v11444_v26, 2  ;;  %v2057_v43 = vpop.xlane.xlu0 %2056 }
 0x3d0   : > { %v2726_v10 = vmax.f32 %v2595_v19, %v2658_v17  ;;  %v11828_v20 = vmax.f32 %v11402_v32, %v2720_v47  ;;  %v14499_v38 = vrot.slane %v11427_v1, 2  ;;  %v14500_v28 = vrot.slane %v11447_v8, 2 }
 0x3d1   : > { %v2831_v5 = vsel %vm2555_vm5, %v14497_v3, %v14496_v62  ;;  %v14501_v32 = vrot.slane %v11433_v23, 2  ;;  %v14502_v56 = vrot.slane %v14460_v52, 2  ;;  %v14503_v27 = vrot.slane %v14462_v12, 2 }
 0x3d2   : > { %v2832_v15 = vsel %vm2555_vm5, %v14499_v38, %v14498_v16  ;;  %v2754_v33 = vmax.f32 %v11390_v2, %v2722_v0  ;;  %v11856_v31 = vmax.f32 %v11396_v58, %v2724_v30  ;;  %v11859_v17 = vmax.f32 %v14453_v60, %v2726_v10 }
 0x3d3   : > { %v2833_v19 = vsel %vm2555_vm5, %v14501_v32, %v14500_v28  ;;  %v2834_v46 = vsel %vm2555_vm5, %v14503_v27, %v14502_v56  ;;  %v2848_v47 = vsel %vm2522_vm8, %v2831_v5, 1e+30  ;;  %v2850_v62 = vsel %vm2522_vm8, %v2832_v15, 1e+30 }
 0x3d4   : > { %v2852_v3 = vsel %vm2522_vm8, %v2833_v19, 1e+30  ;;  %v2854_v16 = vsel %vm2522_vm8, %v2834_v46, 1e+30  ;;  %v14504_v2 = vrot.slane %v11441_v11, 6  ;;  %v14505_v58 = vrot.slane %v11438_v40, 6 }
 0x3d5   : > { %v14506_v0 = vrot.slane %v11427_v1, 6  ;;  %v14507_v30 = vrot.slane %v11444_v26, 6  ;;  %v14508_v5 = vrot.slane %v11433_v23, 6  ;;  %v14509_v38 = vrot.slane %v11447_v8, 6  ;;  %v2066_v8 = vpop.xlane.xlu1 %2065 }
 0x3d6   : > { %v2911_v60 = vsel %vm2654_vm6, %v14505_v58, %v14504_v2  ;;  %v14510_v28 = vrot.slane %v14462_v12, 6  ;;  %v14511_v40 = vrot.slane %v14460_v52, 6  ;;  %v3040_v46 = vmax.f32 %v2754_v33, -1e+30 }
 0x3d7   : > { %v2912_v10 = vsel %vm2654_vm6, %v14507_v30, %v14506_v0  ;;  %v2913_v15 = vsel %vm2654_vm6, %v14509_v38, %v14508_v5  ;;  %v2976_v19 = vmin.f32 %v2848_v47, %v2911_v60  ;;  %v3044_v58 = vmax.f32 %v11859_v17, %v2754_v33 }
 0x3d8   : > { %v2914_v32 = vsel %vm2654_vm6, %v14511_v40, %v14510_v28  ;;  %v2978_v56 = vmin.f32 %v2850_v62, %v2912_v10  ;;  %v2980_v26 = vmin.f32 %v2852_v3, %v2913_v15  ;;  %6411 = vrcp.f32 %v2060_v21  ;;  %v2063_v3 = vpop.xlane.xlu0 %2062 }
 0x3d9   : > { %v2982_v27 = vmin.f32 %v2854_v16, %v2914_v32  ;;  %v3008_v2 = vmin.f32 %v11441_v11, %v2976_v19  ;;  %v3045_v0 = vmax.f32 %v11568_v55, %v11562_v39  ;;  %v11905_v62 = vmax.f32 %v11828_v20, %v3040_v46 }
 0x3da   : > { %v3010_v30 = vmin.f32 %v11427_v1, %v2978_v56  ;;  %v11899_v52 = vmin.f32 %v11433_v23, %v2980_v26  ;;  %v11908_v11 = vmax.f32 %v11856_v31, %v3044_v58  ;;  %6413 = vrcp.f32 %v2057_v43 }
 0x3db   : > { %v11902_v47 = vmin.f32 %v14462_v12, %v2982_v27  ;;  %v14512_v21 = vmax.f32 %v11562_v39, %v11554_v7  ;;  %v11917_v23 = vmax.f32 %v11565_v25, %v3045_v0  ;;  %6415 = vrcp.f32 %v2066_v8  ;;  %v3640_v8 = vpop.xlane.xlu1 %3639 }
 0x3dc   : > { %v3104_v1 = vmin.f32 %v3010_v30, 1e+30  ;;  %v3109_v60 = vmin.f32 %v11693_v18, %v11683_v53  ;;  %v3168_v10 = vmax.f32 %v11908_v11, -1e+30  ;;  %v14513_v43 = vmin.f32 %v11683_v53, %v11677_v6 }
 0x3dd   : > { %v11914_v16 = vmax.f32 %v11559_v13, %v14512_v21  ;;  %v3108_v12 = vmin.f32 %v11902_v47, %v3010_v30  ;;  %v3169_v13 = vmax.f32 %v11917_v23, -1e+30  ;;  %6417 = vrcp.f32 %v2063_v3 }
 0x3de   : > { %v11927_v7 = vmin.f32 %v11680_v54, %v14513_v43  ;;  %v11930_v39 = vmin.f32 %v3008_v2, %v3104_v1  ;;  %v11936_v5 = vmin.f32 %v11690_v44, %v3109_v60  ;;  %v14514_v38 = vrot.slane %v10856_v50, 2 }
 0x3df   : > { %v11933_v25 = vmin.f32 %v11899_v52, %v3108_v12  ;;  %v14515_v15 = vrot.slane %v10858_v34, 2  ;;  %v3200_v54 = vmax.f32 %v11905_v62, %v3168_v10  ;;  %v3201_v53 = vmax.f32 %v11914_v16, %v3169_v13 }
 0x3e0   : > { %v14516_v40 = vrot.slane %v10858_v34, 6  ;;  %v14517_v32 = vrot.slane %v10856_v50, 6  ;;  %v3233_v56 = vmin.f32 %v11936_v5, 1e+30  ;;  %v14518_v27 = vrot.slane %v10865_v4, 2 }
 0x3e1   : > { %v2576_v6 = vsel %vm2555_vm5, %v14515_v15, %v14514_v38  ;;  %v3232_v19 = vmin.f32 %v11933_v25, 1e+30  ;;  %v14519_v46 = vrot.slane %v10860_v24, 2  ;;  %v14520_v50 = vrot.slane %v10860_v24, 6  ;;  %v3637_v38 = vpop.xlane.xlu0 %3636 }
 0x3e2   : > { %v2597_v28 = vsel %vm2522_vm8, %v2576_v6, -1e+30  ;;  %v2659_v44 = vsel %vm2654_vm6, %v14517_v32, %v14516_v40  ;;  %v14521_v3 = vrot.slane %v10865_v4, 6  ;;  %v3042_v1 = vmax.f32 %v11856_v31, %v11828_v20  ;;  %v6412_v15 = vpop.eup %6411  ;;  %v14523_v40 = vld [vmem:[#allocation47_spill] sm:$0xff] }
 0x3e3   : > { %v2728_v26 = vmax.f32 %v2597_v28, %v2659_v44  ;;  %v2835_v58 = vsel %vm2555_vm5, %v14519_v46, %v14518_v27  ;;  %v3106_v12 = vmin.f32 %v11899_v52, %v3008_v2  ;;  %v3264_v60 = vmin.f32 %v11930_v39, %v3232_v19 }
 0x3e4   : > { %v2856_v0 = vsel %vm2522_vm8, %v2835_v58, 1e+30  ;;  %v2915_v21 = vsel %vm2654_vm6, %v14521_v3, %v14520_v50  ;;  %v3265_v10 = vmin.f32 %v11927_v7, %v3233_v56  ;;  %v11978_v6 = vmax.f32 %v2754_v33, %v3042_v1  ;;  %v6414_v19 = vpop.eup %6413 }
 0x3e5   : > { %v11976_v43 = vmax.f32 %v10858_v34, %v2728_v26  ;;  %v2984_v13 = vmin.f32 %v2856_v0, %v2915_v21  ;;  %v11980_v4 = vmin.f32 %v3010_v30, %v3106_v12  ;;  %6419 = vrcp.f32 %v3640_v8  ;;  %v14529_v0 = vld [vmem:[#allocation49_spill] sm:$0xff] }
 0x3e6   : > { %v14522_v20 = vmax.f32 %v11705_v14, %v11699_v63  ;;  %v3296_v28 = vsub.f32 %v3200_v54, %v3264_v60  ;;  %v2128_v32 = vmul.f32 %v6412_v15, %v14523_v40  ;;  %v3297_v44 = vsub.f32 %v3201_v53, %v3265_v10  ;;  %v14526_v54 = vld [vmem:[#allocation4_spill] sm:$0xff]  ;;  %v14530_v10 = vld [vmem:[#allocation51_spill] sm:$0xff] }
 0x3e7   : > { %v11990_v34 = vmin.f32 %v10860_v24, %v2984_v13  ;;  %v3046_v33 = vmax.f32 %v11976_v43, %v11856_v31  ;;  %v14524_v30 = vmin.f32 %v11737_v61, %v11722_v9  ;;  %6421 = vrcp.f32 %v3637_v38  ;;  %v6416_v24 = vpop.eup %6415  ;;  %v14528_v31 = vld [vmem:[#allocation48_spill] sm:$0xff] }
 0x3e8   : > { %v11986_v2 = vmax.f32 %v11702_v48, %v14522_v20  ;;  %v14525_v63 = vrot.slane %v10905_v45, 2  ;;  %v14527_v26 = vrot.slane %v14526_v54, 2  ;;  %5959 = vmatmul.mubr.msk.f32.vlgmr.msra.gmra.mrb[0].mxu0 %vm1784_vm0, %v3296_v28  ;;  %v2166_v27 = vrot.slane %v2128_v32, 1  ;;  %v6418_v8 = vpop.eup %6417 }
 0x3e9   : > { %v11998_v56 = vmin.f32 %v11734_v49, %v14524_v30  ;;  %v2230_v46 = vrot.slane %v2128_v32, 7  ;;  %v2126_v58 = vmul.f32 %v6414_v19, %v14528_v31  ;;  %v3110_v9 = vmin.f32 %v11990_v34, %v11899_v52  ;;  %5961 = vmatprep.mubr.msk.f32.mxu0 %vm1784_vm0, %v3297_v44 }
 0x3ea   : > { %v2577_v53 = vsel %vm2555_vm5, %v14527_v26, %v14525_v63  ;;  %v2132_v50 = vmul.f32 %v6416_v24, %v14529_v0  ;;  %v12013_v3 = vmax.f32 %v11859_v17, %v3046_v33  ;;  %v2130_v13 = vmul.f32 %v6418_v8, %v14530_v10 }
 0x3eb   : > { %v12019_v1 = vsel %vm2522_vm8, %v2577_v53, -1e+30  ;;  %v2150_v12 = vrot.slane %v2126_v58, 1  ;;  %v2214_v60 = vrot.slane %v2126_v58, 7  ;;  %v12023_v52 = vmin.f32 %v11902_v47, %v3110_v9 }
 0x3ec   : > { %v2167_v38 = vrot.slane %v2132_v50, 1  ;;  %v2231_v15 = vrot.slane %v2132_v50, 7  ;;  %v3170_v20 = vmax.f32 %v12013_v3, -1e+30  ;;  %v14531_v28 = vrot.slane %v14526_v54, 6 }
 0x3ed   : > { %v14532_v40 = vrot.slane %v10905_v45, 6  ;;  %v2182_v19 = vsel %vm657_vm3, %v2150_v12, %v2166_v27  ;;  %v2198_v33 = vsel %vm657_vm3, %v2166_v27, %v2150_v12  ;;  %v2246_v30 = vsel %vm305_vm1, %v2214_v60, %v2230_v46 }
 0x3ee   : > { %v2262_v63 = vsel %vm305_vm1, %v2230_v46, %v2214_v60  ;;  %v2292_v26 = vsel %vm640_vm2, %v2198_v33, -1e+30  ;;  %v2420_v53 = vsel %vm640_vm2, %v2198_v33, 1e+30  ;;  %v3202_v24 = vmax.f32 %v11978_v6, %v3170_v20  ;;  %v14534_v33 = vld [vmem:[#allocation50_spill] sm:$0xff] }
 0x3ef   : > { %v2660_v44 = vsel %vm2654_vm6, %v14532_v40, %v14531_v28  ;;  %v2323_v45 = vsel %vm287_vm4, %v2262_v63, -1e+30  ;;  %v2356_v9 = vmax.f32 %v2292_v26, %v2246_v30  ;;  %v2451_v27 = vsel %vm287_vm4, %v2262_v63, 1e+30  ;;  %v6420_v0 = vpop.eup %6419 }
 0x3f0   : > { %v2355_v31 = vmax.f32 %v2182_v19, %v2323_v45  ;;  %v2484_v8 = vmin.f32 %v2420_v53, %v2246_v30  ;;  %v2483_v12 = vmin.f32 %v2182_v19, %v2451_v27  ;;  %v2151_v46 = vrot.slane %v2130_v13, 1 }
 0x3f1   : > { %v2215_v60 = vrot.slane %v2130_v13, 7  ;;  %v3234_v10 = vmin.f32 %v12023_v52, 1e+30  ;;  %v12052_v40 = vmax.f32 %v2128_v32, %v2356_v9  ;;  %v3706_v20 = vmul.f32 %v6420_v0, %v14534_v33  ;;  %v6422_v45 = vpop.eup %6421 }
 0x3f2   : > { %v12050_v28 = vmax.f32 %v2126_v58, %v2355_v31  ;;  %v12054_v36 = vmin.f32 %v2128_v32, %v2484_v8  ;;  %v12057_v26 = vmin.f32 %v2126_v58, %v2483_v12  ;;  %v2183_v30 = vsel %vm657_vm3, %v2151_v46, %v2167_v38 }
 0x3f3   : > { %v2199_v19 = vsel %vm657_vm3, %v2167_v38, %v2151_v46  ;;  %v2247_v63 = vsel %vm305_vm1, %v2215_v60, %v2231_v15  ;;  %v2263_v32 = vsel %vm305_vm1, %v2231_v15, %v2215_v60  ;;  %v3266_v15 = vmin.f32 %v11980_v4, %v3234_v10  ;;  %v14543_v10 = vld [vmem:[#allocation6_spill] sm:$0xff] }
 0x3f4   : > { %14533 = vst [vmem:[#allocation58_spill] sm:$0xff] %v12050_v28  ;;  %14535 = vst [vmem:[#allocation40_spill] sm:$0xff] %v12057_v26  ;;  %v2294_v58 = vsel %vm640_vm2, %v2199_v19, -1e+30  ;;  %v2325_v38 = vsel %vm287_vm4, %v2263_v32, -1e+30 }
 0x3f5   : > { %v2358_v8 = vmax.f32 %v2294_v58, %v2247_v63  ;;  %v2357_v0 = vmax.f32 %v2183_v30, %v2325_v38  ;;  %v2422_v12 = vsel %vm640_vm2, %v2199_v19, 1e+30  ;;  %v2453_v46 = vsel %vm287_vm4, %v2263_v32, 1e+30  ;;  %v14541_v32 = vld [vmem:[#allocation17_spill] sm:$0xff] }
 0x3f6   : > { %v2485_v33 = vmin.f32 %v2183_v30, %v2453_v46  ;;  %v2486_v31 = vmin.f32 %v2422_v12, %v2247_v63  ;;  %v3741_v9 = vrot.slane %v3706_v20, 1  ;;  %v3298_v27 = vsub.f32 %v3202_v24, %v3266_v15 }
 0x3f7   : > { %v12080_v60 = vmax.f32 %v2132_v50, %v2358_v8  ;;  %v12082_v53 = vmax.f32 %v2130_v13, %v2357_v0  ;;  %v3805_v37 = vrot.slane %v3706_v20, 7  ;;  %v3704_v58 = vmul.f32 %v6422_v45, %v14538_v42 }
 0x3f8   : > { %v12085_v38 = vmin.f32 %v2130_v13, %v2485_v33  ;;  %v12087_v51 = vmin.f32 %v2132_v50, %v2486_v31  ;;  %v2730_v19 = vmax.f32 %v12019_v1, %v2660_v44  ;;  %v14542_v21 = vrot.slane %v14541_v32, 2  ;;  %5962 = vmatmul.mubr.msk.f32.gmra.mrb[2].mxu0 %vm1784_vm0, %v3298_v27  ;;  %v14551_v50 = vld [vmem:[#allocation26_spill] sm:$0xff] }
 0x3f9   : > { %14536 = vst [vmem:[#allocation38_spill] sm:$0xff] %v12080_v60  ;;  %14537 = vst [vmem:[#allocation60_spill] sm:$0xff] %v12082_v53  ;;  %v14544_v8 = vrot.slane %v14543_v10, 2  ;;  %v3725_v42 = vrot.slane %v3704_v58, 1  ;;  %v3789_v13 = vrot.slane %v3704_v58, 7  ;;  %v14545_v1 = vsub.f32 %v11986_v2, %v11998_v56  ;;  %v2072_v56 = vpop.xlane.xlu1 %2071 }
 0x3fa   : > { %14539 = vst [vmem:[#allocation59_spill] sm:$0xff] %v12085_v38  ;;  %14540 = vst [vmem:[#allocation61_spill] sm:$0xff] %v12087_v51  ;;  %v12106_v44 = vmax.f32 %v14526_v54, %v2730_v19  ;;  %v14546_v15 = vrot.slane %v14543_v10, 6  ;;  %6423 = vrcp.f32 %v2072_v56  ;;  %v14553_v56 = vld [vmem:[#allocation32_spill] sm:$0xff] }
 0x3fb   : > { %v2836_v30 = vsel %vm2555_vm5, %v14544_v8, %v14542_v21  ;;  %5964 = vmatprep.mubr.msk.f32.mxu0 %vm1784_vm0, %v14545_v1  ;;  %v3757_v31 = vsel %vm657_vm3, %v3725_v42, %v3741_v9  ;;  %v3773_v27 = vsel %vm657_vm3, %v3741_v9, %v3725_v42  ;;  %v3821_v0 = vsel %vm305_vm1, %v3789_v13, %v3805_v37 }
 0x3fc   : > { %v2858_v21 = vsel %vm2522_vm8, %v2836_v30, 1e+30  ;;  %v3837_v2 = vsel %vm305_vm1, %v3805_v37, %v3789_v13  ;;  %v3868_v54 = vsel %vm640_vm2, %v3773_v27, -1e+30  ;;  %v3996_v46 = vsel %vm640_vm2, %v3773_v27, 1e+30 }
 0x3fd   : > { %v3899_v12 = vsel %vm287_vm4, %v3837_v2, -1e+30  ;;  %v14547_v9 = vrot.slane %v14541_v32, 6  ;;  %v3932_v8 = vmax.f32 %v3868_v54, %v3821_v0  ;;  %v4027_v37 = vsel %vm287_vm4, %v3837_v2, 1e+30 }
 0x3fe   : > { %v3931_v19 = vmax.f32 %v3757_v31, %v3899_v12  ;;  %v4060_v30 = vmin.f32 %v3996_v46, %v3821_v0  ;;  %v4059_v42 = vmin.f32 %v3757_v31, %v4027_v37  ;;  %v3048_v1 = vmax.f32 %v12106_v44, %v11859_v17  ;;  %v2069_v17 = vpop.xlane.xlu0 %2068 }
 0x3ff   : > { %v2916_v33 = vsel %vm2654_vm6, %v14547_v9, %v14546_v15  ;;  %v12136_v45 = vmax.f32 %v3706_v20, %v3932_v8  ;;  %v2545_v15 = vrot.slane %v14551_v50, 2  ;;  %v14556_v37 = vrot.slane %v14553_v56, 6 }
 0x400   : > { %v2986_v13 = vmin.f32 %v2858_v21, %v2916_v33  ;;  %v12134_v27 = vmax.f32 %v3704_v58, %v3931_v19  ;;  %v12138_v32 = vmin.f32 %v3706_v20, %v4060_v30  ;;  %v12141_v12 = vmin.f32 %v3704_v58, %v4059_v42  ;;  %v14555_v58 = vld [vmem:[#allocation7_spill] sm:$0xff]  ;;  %v14557_v42 = vld [vmem:[#allocation28_spill] sm:$0xff] }
 0x401   : > { %14549 = vst [vmem:[#allocation62_spill] sm:$0xff] %v12136_v45  ;;  %v12147_v31 = vmax.f32 %v11976_v43, %v3048_v1  ;;  %v2644_v21 = vrot.slane %v14551_v50, 6  ;;  %v14554_v20 = vrot.slane %v14553_v56, 2  ;;  %v2805_v9 = vrot.slane %v14555_v58, 2 }
 0x402   : > { %14548 = vst [vmem:[#allocation39_spill] sm:$0xff] %v12134_v27  ;;  %14550 = vst [vmem:[#allocation46_spill] sm:$0xff] %v12138_v32  ;;  %v12144_v54 = vmin.f32 %v14543_v10, %v2986_v13  ;;  %v14558_v13 = vrot.slane %v14557_v42, 2  ;;  %6425 = vrcp.f32 %v2069_v17  ;;  %v14559_v10 = vrot.slane %v14553_v56, 2  ;;  %v14573_v27 = vld [vmem:[#allocation5_spill] sm:$0xff] }
 0x403   : > { %14552 = vst [vmem:[#allocation47_spill] sm:$0xff] %v12141_v12  ;;  %v2562_v46 = vsel %vm2555_vm5, %v14554_v20, %v2545_v15  ;;  %v3172_v8 = vmax.f32 %v12147_v31, %v11905_v62  ;;  %v2677_v30 = vsel %vm2654_vm6, %v2644_v21, %v14556_v37  ;;  %v2901_v20 = vrot.slane %v14555_v58, 6  ;;  %v3643_v12 = vpop.xlane.xlu0 %3642 }
 0x404   : > { %v3112_v19 = vmin.f32 %v12144_v54, %v11902_v47  ;;  %v2821_v1 = vsel %vm2555_vm5, %v14558_v13, %v2805_v9  ;;  %v2699_v62 = vsel %vm2620_vm7, %v2677_v30, -1e+30  ;;  %v2578_v37 = vsel %vm2555_vm5, %v2545_v15, %v14559_v10  ;;  %v3646_v30 = vpop.xlane.xlu1 %3645  ;;  %v6424_v63 = vpop.eup %6423 }
 0x405   : > { %v3204_v47 = vmax.f32 %v11908_v11, %v3172_v8  ;;  %v2731_v2 = vmax.f32 %v2562_v46, %v2699_v62  ;;  %v14560_v0 = vrot.slane %v14557_v42, 6  ;;  %v2601_v17 = vsel %vm2522_vm8, %v2578_v37, -1e+30 }
 0x406   : > { %v12173_v33 = vmin.f32 %v11990_v34, %v3112_v19  ;;  %v14561_v19 = vrot.slane %v14553_v56, 6  ;;  %v14562_v10 = vrot.slane %v14557_v42, 2  ;;  %6427 = vrcp.f32 %v3646_v30 }
 0x407   : > { %v2933_v13 = vsel %vm2654_vm6, %v2901_v20, %v14560_v0  ;;  %v12201_v62 = vmax.f32 %v14553_v56, %v2731_v2  ;;  %v14574_v32 = vrot.slane %v14573_v27, 2  ;;  %6429 = vrcp.f32 %v3643_v12 }
 0x408   : > { %v2661_v8 = vsel %vm2654_vm6, %v14561_v19, %v2644_v21  ;;  %v3236_v24 = vmin.f32 %v12173_v33, %v11930_v39  ;;  %v2955_v15 = vsel %vm2620_vm7, %v2933_v13, 1e+30  ;;  %v2837_v0 = vsel %vm2555_vm5, %v2805_v9, %v14562_v10  ;;  %v14564_v9 = vld [vmem:[#allocation53_spill] sm:$0xff] }
 0x409   : > { %v2732_v46 = vmax.f32 %v2601_v17, %v2661_v8  ;;  %v2987_v37 = vmin.f32 %v2821_v1, %v2955_v15  ;;  %v2860_v21 = vsel %vm2522_vm8, %v2837_v0, 1e+30  ;;  %v14563_v19 = vrot.slane %v14557_v42, 6  ;;  %v14565_v15 = vld [vmem:[#allocation12_spill] sm:$0xff] }
 0x40a   : > { %v3268_v13 = vmin.f32 %v11933_v25, %v3236_v24  ;;  %v2136_v2 = vmul.f32 %v6424_v63, %v14564_v9  ;;  %v3049_v1 = vmax.f32 %v12201_v62, %v11568_v55  ;;  %v13923_v10 = vrot.slane %v14565_v15, 2  ;;  %v14566_v63 = vld [vmem:[#allocation55_spill] sm:$0xff] }
 0x40b   : > { %v2917_v39 = vsel %vm2654_vm6, %v14563_v19, %v2901_v20  ;;  %v12211_v17 = vmax.f32 %v14551_v50, %v2732_v46  ;;  %v12215_v56 = vmin.f32 %v14557_v42, %v2987_v37  ;;  %v13924_v50 = vrot.slane %v14565_v15, 6 }
 0x40c   : > { %v2988_v8 = vmin.f32 %v2860_v21, %v2917_v39  ;;  %v3300_v0 = vsub.f32 %v3204_v47, %v3268_v13  ;;  %v2168_v30 = vrot.slane %v2136_v2, 1  ;;  %v2232_v46 = vrot.slane %v2136_v2, 7  ;;  %v6426_v39 = vpop.eup %6425  ;;  %v14570_v13 = vld [vmem:[#allocation36_spill] sm:$0xff] }
 0x40d   : > { %v3050_v24 = vmax.f32 %v12211_v17, %v11976_v43  ;;  %v12227_v21 = vmax.f32 %v14566_v63, %v3049_v1  ;;  %v3113_v42 = vmin.f32 %v12215_v56, %v11693_v18  ;;  %v14567_v43 = vld [vmem:[#allocation15_spill] sm:$0xff]  ;;  %v14571_v1 = vld [vmem:[#allocation13_spill] sm:$0xff] }
 0x40e   : > { %v12221_v20 = vmin.f32 %v14555_v58, %v2988_v8  ;;  %5965 = vmatmul.mubr.msk.f32.gmra.mrb[4].mxu0 %vm1784_vm0, %v3300_v0  ;;  %v14568_v47 = vrot.slane %v14567_v43, 2  ;;  %v14569_v19 = vrot.slane %v14567_v43, 6  ;;  %v2806_v0 = vrot.slane %v14571_v1, 2 }
 0x40f   : > { %v12233_v55 = vmax.f32 %v12106_v44, %v3050_v24  ;;  %v12250_v8 = vmin.f32 %v14570_v13, %v3113_v42  ;;  %v14572_v24 = vld [vmem:[#allocation3_spill] sm:$0xff] }
 0x410   : > { %v3114_v58 = vmin.f32 %v12221_v20, %v11990_v34  ;;  %v2563_v37 = vsel %vm2555_vm5, %v14568_v47, %v13923_v10  ;;  %v2678_v18 = vsel %vm2654_vm6, %v13924_v50, %v14569_v19  ;;  %v3173_v34 = vmax.f32 %v12227_v21, %v11914_v16 }
 0x411   : > { %v2701_v9 = vsel %vm2620_vm7, %v2678_v18, -1e+30  ;;  %v2134_v47 = vmul.f32 %v6426_v39, %v14572_v24  ;;  %v3174_v19 = vmax.f32 %v12233_v55, %v11978_v6  ;;  %v3237_v16 = vmin.f32 %v12250_v8, %v11927_v7 }
 0x412   : > { %v12259_v10 = vmin.f32 %v12144_v54, %v3114_v58  ;;  %v2733_v50 = vmax.f32 %v2563_v37, %v2701_v9  ;;  %v3205_v42 = vmax.f32 %v11917_v23, %v3173_v34  ;;  %v2822_v18 = vsel %vm2555_vm5, %v14574_v32, %v2806_v0  ;;  %v6428_v32 = vpop.eup %6427 }
 0x413   : > { %v2902_v39 = vrot.slane %v14571_v1, 6  ;;  %v2152_v24 = vrot.slane %v2134_v47, 1  ;;  %v2216_v58 = vrot.slane %v2134_v47, 7  ;;  %v3206_v45 = vmax.f32 %v12013_v3, %v3174_v19 }
 0x414   : > { %v3238_v6 = vmin.f32 %v12259_v10, %v11980_v4  ;;  %v3269_v37 = vmin.f32 %v11936_v5, %v3237_v16  ;;  %v12276_v34 = vmax.f32 %v14567_v43, %v2733_v50  ;;  %v14575_v7 = vrot.slane %v14573_v27, 6 }
 0x415   : > { %v2184_v38 = vsel %vm657_vm3, %v2152_v24, %v2168_v30  ;;  %v2200_v19 = vsel %vm657_vm3, %v2168_v30, %v2152_v24  ;;  %v2248_v4 = vsel %vm305_vm1, %v2216_v58, %v2232_v46  ;;  %v2264_v50 = vsel %vm305_vm1, %v2232_v46, %v2216_v58 }
 0x416   : > { %v2934_v9 = vsel %vm2654_vm6, %v2902_v39, %v14575_v7  ;;  %v3301_v16 = vsub.f32 %v3205_v42, %v3269_v37  ;;  %v2296_v53 = vsel %vm640_vm2, %v2200_v19, -1e+30  ;;  %v2327_v12 = vsel %vm287_vm4, %v2264_v50, -1e+30  ;;  %v14576_v42 = vld [vmem:[#allocation2_spill] sm:$0xff] }
 0x417   : > { %v2424_v7 = vsel %vm640_vm2, %v2200_v19, 1e+30  ;;  %v2359_v51 = vmax.f32 %v2184_v38, %v2327_v12  ;;  %v2360_v60 = vmax.f32 %v2296_v53, %v2248_v4  ;;  %v2455_v30 = vsel %vm287_vm4, %v2264_v50, 1e+30 }
 0x418   : > { %v2488_v24 = vmin.f32 %v2424_v7, %v2248_v4  ;;  %5967 = vmatprep.mubr.msk.f32.mxu0 %vm1784_vm0, %v3301_v16  ;;  %v2487_v26 = vmin.f32 %v2184_v38, %v2455_v30  ;;  %v3270_v46 = vmin.f32 %v12023_v52, %v3238_v6  ;;  %v12301_v58 = vmul.f32 %v6428_v32, %v14576_v42 }
 0x419   : > { %v2957_v37 = vsel %vm2620_vm7, %v2934_v9, 1e+30  ;;  %v12305_v28 = vmax.f32 %v2134_v47, %v2359_v51  ;;  %v12307_v19 = vmax.f32 %v2136_v2, %v2360_v60  ;;  %v3051_v51 = vmax.f32 %v12276_v34, %v14566_v63 }
 0x41a   : > { %v12309_v53 = vmin.f32 %v2136_v2, %v2488_v24  ;;  %v2989_v12 = vmin.f32 %v2822_v18, %v2957_v37  ;;  %v12311_v50 = vmin.f32 %v2134_v47, %v2487_v26  ;;  %v3302_v4 = vsub.f32 %v3206_v45, %v3270_v46 }
 0x41b   : > { %14577 = vst [vmem:[#allocation4_spill] sm:$0xff] %v12305_v28  ;;  %v3742_v38 = vrot.slane %v12301_v58, 1  ;;  %v3806_v6 = vrot.slane %v12301_v58, 7  ;;  %v14580_v45 = vrot.slane %v14567_v43, 2  ;;  %v14581_v2 = vrot.slane %v14565_v15, 2 }
 0x41c   : > { %14578 = vst [vmem:[#allocation48_spill] sm:$0xff] %v12309_v53  ;;  %14579 = vst [vmem:[#allocation49_spill] sm:$0xff] %v12311_v50  ;;  %v12318_v9 = vmin.f32 %v14573_v27, %v2989_v12  ;;  %5968 = vmatmul.mubr.msk.f32.gmra.mrb[6].mxu0 %vm1784_vm0, %v3302_v4  ;;  %v14582_v18 = vrot.slane %v14565_v15, 6  ;;  %v14583_v7 = vrot.slane %v14567_v43, 6  ;;  %v12338_v30 = vmax.f32 %v12201_v62, %v3051_v51  ;;  %v6430_v12 = vpop.eup %6429 }
 0x41d   : > { %v2579_v47 = vsel %vm2555_vm5, %v14581_v2, %v14580_v45  ;;  %v14584_v42 = vrot.slane %v14573_v27, 2  ;;  %v14585_v45 = vrot.slane %v14573_v27, 6  ;;  %v14586_v2 = vld [vmem:[#allocation64_spill] sm:$0xff] }
 0x41e   : > { %v2662_v63 = vsel %vm2654_vm6, %v14583_v7, %v14582_v18  ;;  %v3115_v24 = vmin.f32 %v12318_v9, %v14570_v13  ;;  %v2603_v46 = vsel %vm2522_vm8, %v2579_v47, -1e+30  ;;  %v2547_v13 = vrot.slane %v14586_v2, 2  ;;  %v14587_v7 = vld [vmem:[#allocation54_spill] sm:$0xff] }
 0x41f   : > { %v2838_v37 = vsel %vm2555_vm5, %v2806_v0, %v14584_v42  ;;  %v2734_v4 = vmax.f32 %v2603_v46, %v2662_v63  ;;  %v2918_v51 = vsel %vm2654_vm6, %v14585_v45, %v2902_v39  ;;  %v3175_v47 = vmax.f32 %v12338_v30, %v11702_v48  ;;  %v14588_v46 = vld [vmem:[#allocation63_spill] sm:$0xff]  ;;  %v14590_v45 = vld [vmem:[#allocation65_spill] sm:$0xff] }
 0x420   : > { %v2862_v43 = vsel %vm2522_vm8, %v2838_v37, 1e+30  ;;  %v12356_v18 = vmin.f32 %v12215_v56, %v3115_v24  ;;  %v3708_v0 = vmul.f32 %v6430_v12, %v14587_v7  ;;  %v14589_v37 = vrot.slane %v14588_v46, 2  ;;  %v14592_v7 = vld [vmem:[#allocation66_spill] sm:$0xff] }
 0x421   : > { %v2990_v42 = vmin.f32 %v2862_v43, %v2918_v51  ;;  %v12362_v63 = vmax.f32 %v14565_v15, %v2734_v4  ;;  %v2646_v39 = vrot.slane %v14586_v2, 6  ;;  %v2807_v26 = vrot.slane %v14590_v45, 2 }
 0x422   : > { %v2564_v27 = vsel %vm2555_vm5, %v14589_v37, %v2547_v13  ;;  %v3207_v24 = vmax.f32 %v11705_v14, %v3175_v47  ;;  %v3239_v48 = vmin.f32 %v12356_v18, %v11734_v49  ;;  %v3726_v60 = vrot.slane %v3708_v0, 1 }
 0x423   : > { %v3790_v12 = vrot.slane %v3708_v0, 7  ;;  %v12374_v43 = vmin.f32 %v14571_v1, %v2990_v42  ;;  %v3052_v15 = vmax.f32 %v12362_v63, %v12106_v44  ;;  %v14591_v4 = vrot.slane %v14588_v46, 6 }
 0x424   : > { %v14593_v37 = vrot.slane %v14592_v7, 2  ;;  %v3271_v49 = vmin.f32 %v11737_v61, %v3239_v48  ;;  %v3758_v16 = vsel %vm657_vm3, %v3726_v60, %v3742_v38  ;;  %v3774_v1 = vsel %vm657_vm3, %v3742_v38, %v3726_v60 }
 0x425   : > { %v2679_v51 = vsel %vm2654_vm6, %v2646_v39, %v14591_v4  ;;  %v3822_v44 = vsel %vm305_vm1, %v3790_v12, %v3806_v6  ;;  %v3838_v42 = vsel %vm305_vm1, %v3806_v6, %v3790_v12  ;;  %v3870_v4 = vsel %vm640_vm2, %v3774_v1, -1e+30 }
 0x426   : > { %v2823_v47 = vsel %vm2555_vm5, %v14593_v37, %v2807_v26  ;;  %v3998_v37 = vsel %vm640_vm2, %v3774_v1, 1e+30  ;;  %v12400_v48 = vmax.f32 %v12211_v17, %v3052_v15  ;;  %v3303_v32 = vsub.f32 %v3207_v24, %v3271_v49 }
 0x427   : > { %v3901_v50 = vsel %vm287_vm4, %v3838_v42, -1e+30  ;;  %v3934_v38 = vmax.f32 %v3870_v4, %v3822_v44  ;;  %v4029_v60 = vsel %vm287_vm4, %v3838_v42, 1e+30  ;;  %v4062_v6 = vmin.f32 %v3998_v37, %v3822_v44  ;;  %v12417_v42 = vpop.f32.mrb[0].mxu1 }
 0x428   : > { %v3933_v53 = vmax.f32 %v3758_v16, %v3901_v50  ;;  %v4061_v28 = vmin.f32 %v3758_v16, %v4029_v60  ;;  %v3116_v12 = vmin.f32 %v12374_v43, %v12144_v54  ;;  %5970 = vmatprep.mubr.msk.f32.mxu0 %vm1784_vm0, %v3303_v32  ;;  %v3176_v24 = vmax.f32 %v12400_v48, %v11908_v11  ;;  %v12429_v44 = vpop.f32.mrb[1].mxu1 }
 0x429   : > { %v12410_v1 = vmax.f32 %v12301_v58, %v3934_v38  ;;  %v2703_v15 = vsel %vm2620_vm7, %v2679_v51, -1e+30  ;;  %v2903_v49 = vrot.slane %v14590_v45, 6  ;;  %14594 = vst [vmem:[#allocation51_spill] sm:$0xff] %v12417_v42  ;;  %v12424_v54 = vmin.f32 %v12301_v58, %v4062_v6  ;;  %14595 = vst [vmem:[#allocation50_spill] sm:$0xff] %v12429_v44 }
 0x42a   : > { %v12419_v50 = vmax.f32 %v3708_v0, %v3933_v53  ;;  %v12421_v16 = vmin.f32 %v3708_v0, %v4061_v28  ;;  %v12427_v32 = vmin.f32 %v12221_v20, %v3116_v12  ;;  %v3208_v11 = vmax.f32 %v12147_v31, %v3176_v24  ;;  %v12453_v24 = vpop.f32.mrb[2].mxu1 }
 0x42b   : > { %v2735_v4 = vmax.f32 %v2564_v27, %v2703_v15  ;;  %v14596_v51 = vrot.slane %v14592_v7, 6  ;;  %v14597_v53 = vrot.slane %v14588_v46, 2  ;;  %14598 = vst [vmem:[#allocation52_spill] sm:$0xff] %v12453_v24  ;;  %v14600_v60 = vrot.slane %v14592_v7, 2  ;;  %v12467_v38 = vpop.f32.mrb[3].mxu1 }
 0x42c   : > { %v3240_v27 = vmin.f32 %v12427_v32, %v11933_v25  ;;  %14602 = vst [vmem:[#allocation17_spill] sm:$0xff] %v12467_v38 }
 0x42d   : > { %v2935_v37 = vsel %vm2654_vm6, %v2903_v49, %v14596_v51  ;;  %v2580_v28 = vsel %vm2555_vm5, %v2547_v13, %v14597_v53  ;;  %v12447_v6 = vmax.f32 %v14588_v46, %v2735_v4  ;;  %v14599_v51 = vrot.slane %v14588_v46, 6 }
 0x42e   : > { %v2959_v12 = vsel %vm2620_vm7, %v2935_v37, 1e+30  ;;  %v2605_v13 = vsel %vm2522_vm8, %v2580_v28, -1e+30  ;;  %v2839_v25 = vsel %vm2555_vm5, %v2807_v26, %v14600_v60  ;;  %v14601_v4 = vrot.slane %v14592_v7, 6 }
 0x42f   : > { %v2991_v15 = vmin.f32 %v2823_v47, %v2959_v12  ;;  %v2663_v53 = vsel %vm2654_vm6, %v14599_v51, %v2646_v39  ;;  %v3272_v28 = vmin.f32 %v12173_v33, %v3240_v27  ;;  %v3053_v46 = vmax.f32 %v12447_v6, %v12201_v62  ;;  %v12474_v12 = vpop.f32.mrb[4].mxu1  ;;  %v14604_v51 = vld [vmem:[#allocation71_spill] sm:$0xff] }
 0x430   : > { %v2919_v37 = vsel %vm2654_vm6, %v14601_v4, %v2903_v49  ;;  %v2736_v47 = vmax.f32 %v2605_v13, %v2663_v53  ;;  %v2864_v39 = vsel %vm2522_vm8, %v2839_v25, 1e+30  ;;  %14603 = vst [vmem:[#allocation6_spill] sm:$0xff] %v12474_v12  ;;  %v2548_v0 = vrot.slane %v14604_v51, 2  ;;  %v12481_v4 = vpop.f32.mrb[5].mxu1  ;;  %v14606_v13 = vld [vmem:[#allocation56_spill] sm:$0xff] }
 0x431   : > { %v12477_v26 = vmin.f32 %v14592_v7, %v2991_v15  ;;  %v2992_v60 = vmin.f32 %v2864_v39, %v2919_v37  ;;  %v2647_v49 = vrot.slane %v14604_v51, 6  ;;  %14605 = vst [vmem:[#allocation26_spill] sm:$0xff] %v12481_v4  ;;  %v3304_v27 = vsub.f32 %v3208_v11, %v3272_v28  ;;  %v12490_v25 = vpop.f32.mrb[6].mxu1  ;;  %v14608_v37 = vld [vmem:[#allocation33_spill] sm:$0xff] }
 0x432   : > { %v12484_v58 = vmax.f32 %v12276_v34, %v3053_v46  ;;  %v12487_v62 = vmax.f32 %v14586_v2, %v2736_v47  ;;  %v2808_v53 = vrot.slane %v14606_v13, 2  ;;  %14607 = vst [vmem:[#allocation32_spill] sm:$0xff] %v12490_v25  ;;  %v14609_v39 = vrot.slane %v14608_v37, 2  ;;  %v12505_v46 = vpop.f32.mrb[7].mxu1 }
 0x433   : > { %v3117_v7 = vmin.f32 %v12477_v26, %v12215_v56  ;;  %v12495_v15 = vmin.f32 %v14590_v45, %v2992_v60  ;;  %v14610_v28 = vrot.slane %v14608_v37, 6  ;;  %14611 = vst [vmem:[#allocation7_spill] sm:$0xff] %v12505_v46  ;;  %5971 = vmatmul.mubr.msk.f32.gmra.mrb[8].mxu0 %vm1784_vm0, %v3304_v27  ;;  %v14612_v60 = vld [vmem:[#allocation37_spill] sm:$0xff]  ;;  %v12518_v4 = vpop.f32.mrb[8].mxu1  ;;  %v2904_v46 = vrot.slane %v14606_v13, 6 }
 0x434   : > { %v2565_v11 = vsel %vm2555_vm5, %v14609_v39, %v2548_v0  ;;  %v3177_v56 = vmax.f32 %v12484_v58, %v11917_v23  ;;  %v3054_v45 = vmax.f32 %v12487_v62, %v12211_v17  ;;  %v14613_v39 = vrot.slane %v14612_v60, 2  ;;  %14614 = vst [vmem:[#allocation28_spill] sm:$0xff] %v12518_v4  ;;  %v12526_v17 = vpop.f32.mrb[9].mxu1 }
 0x435   : > { %v2680_v2 = vsel %vm2654_vm6, %v2647_v49, %v14610_v28  ;;  %v12521_v28 = vmin.f32 %v12318_v9, %v3117_v7  ;;  %v3118_v27 = vmin.f32 %v12495_v15, %v12221_v20  ;;  %14615 = vst [vmem:[#allocation53_spill] sm:$0xff] %v12526_v17  ;;  %v14617_v7 = vrot.slane %v14608_v37, 6 }
 0x436   : > { %v2705_v47 = vsel %vm2620_vm7, %v2680_v2, -1e+30  ;;  %v2824_v25 = vsel %vm2555_vm5, %v14613_v39, %v2808_v53  ;;  %v3209_v2 = vmax.f32 %v12227_v21, %v3177_v56  ;;  %v12530_v12 = vmax.f32 %v12362_v63, %v3054_v45 }
 0x437   : > { %v2737_v23 = vmax.f32 %v2565_v11, %v2705_v47  ;;  %v14616_v39 = vrot.slane %v14608_v37, 2  ;;  %v2664_v20 = vsel %vm2654_vm6, %v14617_v7, %v2647_v49  ;;  %v12540_v11 = vpop.f32.mrb[10].mxu1  ;;  %v3241_v47 = vmin.f32 %v12521_v28, %v11936_v5 }
 0x438   : > { %14618 = vst [vmem:[#allocation12_spill] sm:$0xff] %v12540_v11  ;;  %v12545_v56 = vmin.f32 %v12374_v43, %v3118_v27  ;;  %v14619_v17 = vrot.slane %v14612_v60, 6  ;;  %v3178_v49 = vmax.f32 %v12530_v12, %v12013_v3  ;;  %v14621_v27 = vrot.slane %v14612_v60, 2 }
 0x439   : > { %v2581_v4 = vsel %vm2555_vm5, %v2548_v0, %v14616_v39  ;;  %v12548_v45 = vmax.f32 %v14608_v37, %v2737_v23  ;;  %v12554_v39 = vpop.f32.mrb[11].mxu1 }
 0x43a   : > { %v2936_v0 = vsel %vm2654_vm6, %v2904_v46, %v14619_v17  ;;  %14620 = vst [vmem:[#allocation55_spill] sm:$0xff] %v12554_v39  ;;  %v2607_v5 = vsel %vm2522_vm8, %v2581_v4, -1e+30  ;;  %v2840_v37 = vsel %vm2555_vm5, %v2808_v53, %v14621_v27  ;;  %v12566_v23 = vpop.f32.mrb[12].mxu1  ;;  %v3273_v17 = vmin.f32 %v12250_v8, %v3241_v47 }
 0x43b   : > { %v2961_v7 = vsel %vm2620_vm7, %v2936_v0, 1e+30  ;;  %14622 = vst [vmem:[#allocation15_spill] sm:$0xff] %v12566_v23  ;;  %v3242_v39 = vmin.f32 %v12545_v56, %v12023_v52  ;;  %v3055_v3 = vmax.f32 %v12548_v45, %v12276_v34  ;;  %v12573_v0 = vpop.f32.mrb[13].mxu1  ;;  %v3210_v4 = vmax.f32 %v12233_v55, %v3178_v49 }
 0x43c   : > { %v2993_v11 = vmin.f32 %v2824_v25, %v2961_v7  ;;  %14623 = vst [vmem:[#allocation36_spill] sm:$0xff] %v12573_v0  ;;  %v2738_v38 = vmax.f32 %v2607_v5, %v2664_v20  ;;  %v2866_v24 = vsel %vm2522_vm8, %v2840_v37, 1e+30  ;;  %v14624_v53 = vrot.slane %v14612_v60, 6  ;;  %v12582_v27 = vpop.f32.mrb[14].mxu1  ;;  %v14627_v37 = vld [vmem:[#allocation9_spill] sm:$0xff] }
 0x43d   : > { %14625 = vst [vmem:[#allocation13_spill] sm:$0xff] %v12582_v27  ;;  %v3305_v52 = vsub.f32 %v3209_v2, %v3273_v17  ;;  %v3274_v25 = vmin.f32 %v12259_v10, %v3242_v39  ;;  %v12589_v7 = vmax.f32 %v12447_v6, %v3055_v3  ;;  %v12591_v20 = vpop.f32.mrb[15].mxu1  ;;  %v2549_v0 = vrot.slane %v14627_v37, 2  ;;  %v14628_v39 = vld [vmem:[#allocation29_spill] sm:$0xff] }
 0x43e   : > { %v2920_v47 = vsel %vm2654_vm6, %v14624_v53, %v2904_v46  ;;  %v12586_v34 = vmin.f32 %v14612_v60, %v2993_v11  ;;  %14626 = vst [vmem:[#allocation3_spill] sm:$0xff] %v12591_v20  ;;  %v12594_v49 = vmax.f32 %v14604_v51, %v2738_v38  ;;  %v2648_v46 = vrot.slane %v14627_v37, 6 }
 0x43f   : > { %v2994_v5 = vmin.f32 %v2866_v24, %v2920_v47  ;;  %5973 = vmatprep.mubr.msk.f32.mxu0 %vm1784_vm0, %v3305_v52  ;;  %v3306_v2 = vsub.f32 %v3210_v4, %v3274_v25  ;;  %v3179_v11 = vmax.f32 %v12589_v7, %v11705_v14  ;;  %v2809_v17 = vrot.slane %v14628_v39, 2  ;;  %v14629_v24 = vld [vmem:[#allocation11_spill] sm:$0xff]  ;;  %v14632_v47 = vld [vmem:[#allocation30_spill] sm:$0xff] }
 0x440   : > { %v3119_v60 = vmin.f32 %v12586_v34, %v12318_v9  ;;  %v3056_v38 = vmax.f32 %v12594_v49, %v12362_v63  ;;  %v14630_v51 = vrot.slane %v14629_v24, 2  ;;  %v14631_v4 = vrot.slane %v14629_v24, 6 }
 0x441   : > { %v12605_v3 = vmin.f32 %v14606_v13, %v2994_v5  ;;  %5974 = vmatmul.mubr.msk.f32.gmra.mrb[10].mxu0 %vm1784_vm0, %v3306_v2  ;;  %v3211_v13 = vmax.f32 %v12338_v30, %v3179_v11  ;;  %v14633_v52 = vrot.slane %v14632_v47, 2  ;;  %v14635_v20 = vrot.slane %v14629_v24, 6 }
 0x442   : > { %v2566_v53 = vsel %vm2555_vm5, %v14630_v51, %v2549_v0  ;;  %v2681_v9 = vsel %vm2654_vm6, %v2648_v46, %v14631_v4  ;;  %v12619_v14 = vmin.f32 %v12477_v26, %v3119_v60  ;;  %v12629_v5 = vmax.f32 %v12487_v62, %v3056_v38 }
 0x443   : > { %v2707_v63 = vsel %vm2620_vm7, %v2681_v9, -1e+30  ;;  %v2825_v25 = vsel %vm2555_vm5, %v14633_v52, %v2809_v17  ;;  %v3120_v51 = vmin.f32 %v12605_v3, %v12374_v43  ;;  %v2905_v60 = vrot.slane %v14628_v39, 6 }
 0x444   : > { %v2739_v2 = vmax.f32 %v2566_v53, %v2707_v63  ;;  %v3243_v11 = vmin.f32 %v12619_v14, %v11737_v61  ;;  %v14634_v4 = vrot.slane %v14629_v24, 2  ;;  %v2665_v38 = vsel %vm2654_vm6, %v14635_v20, %v2648_v46 }
 0x445   : > { %v2841_v43 = vsel %vm2555_vm5, %v2809_v17, %v14633_v52  ;;  %v12649_v53 = vmin.f32 %v12495_v15, %v3120_v51  ;;  %v3180_v61 = vmax.f32 %v12629_v5, %v12147_v31  ;;  %v14637_v27 = vrot.slane %v14632_v47, 6 }
 0x446   : > { %v2582_v9 = vsel %vm2555_vm5, %v2549_v0, %v14634_v4  ;;  %v12654_v63 = vmax.f32 %v14629_v24, %v2739_v2  ;;  %v14636_v0 = vrot.slane %v14632_v47, 6  ;;  %v3275_v20 = vmin.f32 %v12356_v18, %v3243_v11 }
 0x447   : > { %v2609_v17 = vsel %vm2522_vm8, %v2582_v9, -1e+30  ;;  %v2868_v51 = vsel %vm2522_vm8, %v2841_v43, 1e+30  ;;  %v3212_v31 = vmax.f32 %v12400_v48, %v3180_v61  ;;  %v3244_v24 = vmin.f32 %v12649_v53, %v12173_v33  ;;  %v14638_v9 = vld [vmem:[#allocation72_spill] sm:$0xff] }
 0x448   : > { %v2937_v4 = vsel %vm2654_vm6, %v2905_v60, %v14636_v0  ;;  %v3057_v52 = vmax.f32 %v12654_v63, %v12447_v6  ;;  %v3307_v0 = vsub.f32 %v3211_v13, %v3275_v20  ;;  %v2740_v11 = vmax.f32 %v2609_v17, %v2665_v38  ;;  %v14639_v13 = vld [vmem:[#allocation31_spill] sm:$0xff]  ;;  %v14641_v20 = vld [vmem:[#allocation74_spill] sm:$0xff] }
 0x449   : > { %v2963_v46 = vsel %vm2620_vm7, %v2937_v4, 1e+30  ;;  %v2921_v4 = vsel %vm2654_vm6, %v14637_v27, %v2905_v60  ;;  %v2550_v23 = vrot.slane %v14638_v9, 2  ;;  %v3276_v43 = vmin.f32 %v12427_v32, %v3244_v24 }
 0x44a   : > { %v2995_v2 = vmin.f32 %v2825_v25, %v2963_v46  ;;  %v12682_v33 = vmax.f32 %v12548_v45, %v3057_v52  ;;  %v2996_v25 = vmin.f32 %v2868_v51, %v2921_v4  ;;  %5976 = vmatprep.mubr.msk.f32.mxu0 %vm1784_vm0, %v3307_v0  ;;  %v12686_v6 = vmax.f32 %v14627_v37, %v2740_v11  ;;  %v12701_v37 = vpop.f32.mrb[16].mxu1 }
 0x44b   : > { %v14640_v38 = vrot.slane %v14639_v13, 2  ;;  %v2649_v60 = vrot.slane %v14638_v9, 6  ;;  %v2810_v46 = vrot.slane %v14641_v20, 2  ;;  %14642 = vst [vmem:[#allocation5_spill] sm:$0xff] %v12701_v37  ;;  %v14643_v52 = vrot.slane %v14639_v13, 6  ;;  %v12714_v4 = vpop.f32.mrb[17].mxu1 }
 0x44c   : > { %v12679_v61 = vmin.f32 %v14632_v47, %v2995_v2  ;;  %v3308_v47 = vsub.f32 %v3212_v31, %v3276_v43  ;;  %v3181_v51 = vmax.f32 %v12682_v33, %v12227_v21  ;;  %v12699_v24 = vmin.f32 %v14628_v39, %v2996_v25  ;;  %v14644_v31 = vld [vmem:[#allocation73_spill] sm:$0xff]  ;;  %14646 = vst [vmem:[#allocation2_spill] sm:$0xff] %v12714_v4 }
 0x44d   : > { %v2567_v27 = vsel %vm2555_vm5, %v14640_v38, %v2550_v23  ;;  %v3058_v2 = vmax.f32 %v12686_v6, %v12487_v62  ;;  %v2682_v0 = vsel %vm2654_vm6, %v2649_v60, %v14643_v52  ;;  %v14645_v11 = vrot.slane %v14644_v31, 2 }
 0x44e   : > { %v3121_v17 = vmin.f32 %v12679_v61, %v12477_v26  ;;  %v2906_v21 = vrot.slane %v14641_v20, 6  ;;  %5977 = vmatmul.mubr.msk.f32.gmra.mrb[12].mxu0 %vm1784_vm0, %v3308_v47  ;;  %v3213_v62 = vmax.f32 %v12484_v58, %v3181_v51  ;;  %v3122_v43 = vmin.f32 %v12699_v24, %v12495_v15 }
 0x44f   : > { %v2826_v26 = vsel %vm2555_vm5, %v14645_v11, %v2810_v46  ;;  %v2709_v25 = vsel %vm2620_vm7, %v2682_v0, -1e+30  ;;  %v12726_v38 = vmax.f32 %v12594_v49, %v3058_v2  ;;  %v14647_v11 = vrot.slane %v14644_v31, 6 }
 0x450   : > { %v12718_v39 = vmin.f32 %v12586_v34, %v3121_v17  ;;  %v2741_v52 = vmax.f32 %v2567_v27, %v2709_v25  ;;  %v14648_v17 = vrot.slane %v14639_v13, 2  ;;  %v12739_v4 = vmin.f32 %v12605_v3, %v3122_v43 }
 0x451   : > { %v2938_v47 = vsel %vm2654_vm6, %v2906_v21, %v14647_v11  ;;  %v3182_v0 = vmax.f32 %v12726_v38, %v12233_v55 }
 0x452   : > { %v2583_v51 = vsel %vm2555_vm5, %v2550_v23, %v14648_v17  ;;  %v3245_v15 = vmin.f32 %v12718_v39, %v12250_v8  ;;  %v2965_v2 = vsel %vm2620_vm7, %v2938_v47, 1e+30  ;;  %v12748_v25 = vmax.f32 %v14639_v13, %v2741_v52 }
 0x453   : > { %v2611_v27 = vsel %vm2522_vm8, %v2583_v51, -1e+30  ;;  %v2997_v11 = vmin.f32 %v2826_v26, %v2965_v2  ;;  %v14649_v23 = vrot.slane %v14639_v13, 6  ;;  %v3246_v47 = vmin.f32 %v12739_v4, %v12259_v10 }
 0x454   : > { %v3277_v43 = vmin.f32 %v12521_v28, %v3245_v15  ;;  %v14650_v51 = vrot.slane %v14644_v31, 2  ;;  %v3214_v52 = vmax.f32 %v12530_v12, %v3182_v0  ;;  %v3059_v13 = vmax.f32 %v12748_v25, %v12548_v45 }
 0x455   : > { %v2666_v8 = vsel %vm2654_vm6, %v14649_v23, %v2649_v60  ;;  %v12763_v26 = vmin.f32 %v14644_v31, %v2997_v11  ;;  %v3278_v10 = vmin.f32 %v12545_v56, %v3246_v47  ;;  %v2551_v23 = vrot.slane %v11785_v29, 2 }
 0x456   : > { %v2742_v17 = vmax.f32 %v2611_v27, %v2666_v8  ;;  %v2842_v55 = vsel %vm2555_vm5, %v2810_v46, %v14650_v51  ;;  %v3309_v15 = vsub.f32 %v3213_v62, %v3277_v43  ;;  %v14651_v27 = vrot.slane %v14644_v31, 6 }
 0x457   : > { %v2870_v60 = vsel %vm2522_vm8, %v2842_v55, 1e+30  ;;  %v12778_v0 = vmax.f32 %v12654_v63, %v3059_v13  ;;  %v3123_v45 = vmin.f32 %v12763_v26, %v12586_v34  ;;  %v3310_v62 = vsub.f32 %v3214_v52, %v3278_v10 }
 0x458   : > { %v12771_v2 = vmax.f32 %v14638_v9, %v2742_v17  ;;  %v2922_v46 = vsel %vm2654_vm6, %v14651_v27, %v2906_v21  ;;  %5979 = vmatprep.mubr.msk.f32.mxu0 %vm1784_vm0, %v3309_v15  ;;  %v2650_v31 = vrot.slane %v11785_v29, 6  ;;  %v2811_v8 = vrot.slane %v11796_v59, 2 }
 0x459   : > { %v2998_v11 = vmin.f32 %v2870_v60, %v2922_v46  ;;  %v12789_v21 = vmin.f32 %v12679_v61, %v3123_v45  ;;  %v3183_v43 = vmax.f32 %v12778_v0, %v12338_v30  ;;  %v14652_v47 = vrot.slane %v11791_v41, 2  ;;  %5980 = vmatmul.mubr.msk.f32.gmra.mrb[14].mxu0 %vm1784_vm0, %v3310_v62 }
 0x45a   : > { %v3060_v9 = vmax.f32 %v12771_v2, %v12594_v49  ;;  %v14653_v51 = vrot.slane %v11791_v41, 6  ;;  %v14654_v30 = vrot.slane %v11793_v22, 2  ;;  %v2907_v52 = vrot.slane %v11796_v59, 6 }
 0x45b   : > { %v12794_v34 = vmin.f32 %v14641_v20, %v2998_v11  ;;  %v2568_v17 = vsel %vm2555_vm5, %v14652_v47, %v2551_v23  ;;  %v3215_v13 = vmax.f32 %v12589_v7, %v3183_v43  ;;  %v3247_v60 = vmin.f32 %v12789_v21, %v12356_v18 }
 0x45c   : > { %v12802_v49 = vmax.f32 %v12686_v6, %v3060_v9  ;;  %v2683_v55 = vsel %vm2654_vm6, %v2650_v31, %v14653_v51  ;;  %v2827_v20 = vsel %vm2555_vm5, %v14654_v30, %v2811_v8  ;;  %v14655_v45 = vrot.slane %v11793_v22, 6 }
 0x45d   : > { %v3124_v15 = vmin.f32 %v12794_v34, %v12605_v3  ;;  %v2711_v10 = vsel %vm2620_vm7, %v2683_v55, -1e+30  ;;  %v14656_v62 = vmov %v14652_v47  ;;  %v3279_v9 = vmin.f32 %v12619_v14, %v3247_v60 }
 0x45e   : > { %v3184_v27 = vmax.f32 %v12802_v49, %v12400_v48  ;;  %v2743_v46 = vmax.f32 %v2568_v17, %v2711_v10  ;;  %v2939_v11 = vsel %vm2654_vm6, %v2907_v52, %v14655_v45  ;;  %v2584_v18 = vsel %vm2555_vm5, %v2551_v23, %v14656_v62 }
 0x45f   : > { %v12832_v3 = vmin.f32 %v12699_v24, %v3124_v15  ;;  %v2967_v43 = vsel %vm2620_vm7, %v2939_v11, 1e+30  ;;  %v2613_v48 = vsel %vm2522_vm8, %v2584_v18, -1e+30  ;;  %v14657_v55 = vrot.slane %v11791_v41, 6 }
 0x460   : > { %v3216_v47 = vmax.f32 %v12629_v5, %v3184_v27  ;;  %v12840_v17 = vmax.f32 %v11791_v41, %v2743_v46  ;;  %v2999_v51 = vmin.f32 %v2827_v20, %v2967_v43  ;;  %v3311_v30 = vsub.f32 %v3215_v13, %v3279_v9  ;;  %v12852_v27 = vpop.f32.mrb[18].mxu1 }
 0x461   : > { %v2667_v23 = vsel %vm2654_vm6, %v14657_v55, %v2650_v31  ;;  %v3248_v60 = vmin.f32 %v12832_v3, %v12427_v32  ;;  %v14658_v10 = vrot.slane %v11793_v22, 2  ;;  %14659 = vst [vmem:[#allocation64_spill] sm:$0xff] %v12852_v27  ;;  %v14660_v20 = vrot.slane %v11793_v22, 6  ;;  %v12865_v13 = vpop.f32.mrb[19].mxu1  ;;  %v14718_v27 = vld [vmem:[#allocation42_spill] sm:$0xff] }
 0x462   : > { %v2744_v15 = vmax.f32 %v2613_v48, %v2667_v23  ;;  %v12855_v46 = vmin.f32 %v11793_v22, %v2999_v51  ;;  %v3061_v41 = vmax.f32 %v12840_v17, %v12654_v63  ;;  %14661 = vst [vmem:[#allocation54_spill] sm:$0xff] %v12865_v13  ;;  %5982 = vmatprep.mubr.msk.f32.mxu0 %vm1784_vm0, %v3311_v30  ;;  %v2552_v63 = vrot.slane %v12052_v40, 2  ;;  %v14662_v51 = vld [vmem:[#allocation58_spill] sm:$0xff] }
 0x463   : > { %v2843_v45 = vsel %vm2555_vm5, %v2811_v8, %v14658_v10  ;;  %v2923_v32 = vsel %vm2654_vm6, %v14660_v20, %v2907_v52  ;;  %v3280_v8 = vmin.f32 %v12649_v53, %v3248_v60  ;;  %v2651_v52 = vrot.slane %v12052_v40, 6  ;;  %v14717_v13 = vld [vmem:[#allocation22_spill] sm:$0xff] }
 0x464   : > { %v2872_v31 = vsel %vm2522_vm8, %v2843_v45, 1e+30  ;;  %v12870_v11 = vmax.f32 %v11785_v29, %v2744_v15  ;;  %v12874_v18 = vmax.f32 %v12748_v25, %v3061_v41  ;;  %v3125_v22 = vmin.f32 %v12855_v46, %v12679_v61 }
 0x465   : > { %v3000_v62 = vmin.f32 %v2872_v31, %v2923_v32  ;;  %v2812_v9 = vrot.slane %v12054_v36, 2  ;;  %v3312_v43 = vsub.f32 %v3216_v47, %v3280_v8  ;;  %v14663_v55 = vrot.slane %v14662_v51, 2  ;;  %v14665_v47 = vld [vmem:[#allocation40_spill] sm:$0xff] }
 0x466   : > { %v3062_v29 = vmax.f32 %v12870_v11, %v12686_v6  ;;  %v12890_v30 = vmin.f32 %v12763_v26, %v3125_v22  ;;  %v3185_v61 = vmax.f32 %v12874_v18, %v12484_v58  ;;  %v14664_v60 = vrot.slane %v14662_v51, 6 }
 0x467   : > { %v12881_v48 = vmin.f32 %v11796_v59, %v3000_v62  ;;  %v2569_v23 = vsel %vm2555_vm5, %v14663_v55, %v2552_v63  ;;  %v14666_v15 = vrot.slane %v14665_v47, 2  ;;  %5983 = vmatmul.mubr.msk.f32.gmra.mrb[16].mxu0 %vm1784_vm0, %v3312_v43  ;;  %v2908_v41 = vrot.slane %v12054_v36, 6 }
 0x468   : > { %v2684_v59 = vsel %vm2654_vm6, %v2651_v52, %v14664_v60  ;;  %v12904_v10 = vmax.f32 %v12771_v2, %v3062_v29  ;;  %v3217_v31 = vmax.f32 %v12682_v33, %v3185_v61  ;;  %v3249_v20 = vmin.f32 %v12890_v30, %v12521_v28 }
 0x469   : > { %v2828_v6 = vsel %vm2555_vm5, %v14666_v15, %v2812_v9  ;;  %v3126_v45 = vmin.f32 %v12881_v48, %v12699_v24  ;;  %v2713_v58 = vsel %vm2620_vm7, %v2684_v59, -1e+30  ;;  %v14667_v8 = vmov %v14663_v55 }
 0x46a   : > { %v2745_v32 = vmax.f32 %v2569_v23, %v2713_v58  ;;  %v2585_v62 = vsel %vm2555_vm5, %v2552_v63, %v14667_v8  ;;  %v3186_v24 = vmax.f32 %v12904_v10, %v12530_v12  ;;  %v14668_v43 = vrot.slane %v14665_v47, 6 }
 0x46b   : > { %v12919_v22 = vmin.f32 %v12794_v34, %v3126_v45  ;;  %v2615_v28 = vsel %vm2522_vm8, %v2585_v62, -1e+30  ;;  %v3281_v55 = vmin.f32 %v12718_v39, %v3249_v20  ;;  %v14669_v61 = vmov %v14664_v60 }
 0x46c   : > { %v2940_v29 = vsel %vm2654_vm6, %v2908_v41, %v14668_v43  ;;  %v12931_v23 = vmax.f32 %v14662_v51, %v2745_v32  ;;  %v2668_v12 = vsel %vm2654_vm6, %v14669_v61, %v2651_v52  ;;  %v3218_v60 = vmax.f32 %v12726_v38, %v3186_v24  ;;  %v14672_v24 = vld [vmem:[#allocation38_spill] sm:$0xff] }
 0x46d   : > { %v2969_v63 = vsel %vm2620_vm7, %v2940_v29, 1e+30  ;;  %v3250_v59 = vmin.f32 %v12919_v22, %v12545_v56  ;;  %v2746_v45 = vmax.f32 %v2615_v28, %v2668_v12  ;;  %v3313_v58 = vsub.f32 %v3217_v31, %v3281_v55  ;;  %v14673_v28 = vld [vmem:[#allocation61_spill] sm:$0xff]  ;;  %v14674_v12 = vld [vmem:[#allocation60_spill] sm:$0xff] }
 0x46e   : > { %v3001_v15 = vmin.f32 %v2828_v6, %v2969_v63  ;;  %v3063_v20 = vmax.f32 %v12931_v23, %v12748_v25  ;;  %v14670_v32 = vrot.slane %v14665_v47, 2  ;;  %v14671_v51 = vmov %v14668_v43 }
 0x46f   : > { %v2924_v52 = vsel %vm2654_vm6, %v14671_v51, %v2908_v41  ;;  %v3282_v62 = vmin.f32 %v12739_v4, %v3250_v59  ;;  %v12957_v6 = vmax.f32 %v12052_v40, %v2746_v45  ;;  %5985 = vmatprep.mubr.msk.f32.mxu0 %vm1784_vm0, %v3313_v58  ;;  %v2553_v43 = vrot.slane %v14672_v24, 2  ;;  %v14677_v45 = vld [vmem:[#allocation59_spill] sm:$0xff] }
 0x470   : > { %v2844_v8 = vsel %vm2555_vm5, %v2812_v9, %v14670_v32  ;;  %v12954_v56 = vmin.f32 %v14665_v47, %v3001_v15  ;;  %v12963_v9 = vmax.f32 %v12840_v17, %v3063_v20  ;;  %v2652_v41 = vrot.slane %v14672_v24, 6 }
 0x471   : > { %v2874_v25 = vsel %vm2522_vm8, %v2844_v8, 1e+30  ;;  %v3314_v29 = vsub.f32 %v3218_v60, %v3282_v62  ;;  %v3064_v40 = vmax.f32 %v12957_v6, %v12771_v2  ;;  %v2813_v55 = vrot.slane %v14673_v28, 2 }
 0x472   : > { %v3002_v31 = vmin.f32 %v2874_v25, %v2924_v52  ;;  %v3127_v47 = vmin.f32 %v12954_v56, %v12763_v26  ;;  %v3187_v63 = vmax.f32 %v12963_v9, %v12589_v7  ;;  %v14675_v59 = vrot.slane %v14674_v12, 2 }
 0x473   : > { %v14676_v60 = vrot.slane %v14674_v12, 6  ;;  %5986 = vmatmul.mubr.msk.f32.gmra.mrb[18].mxu0 %vm1784_vm0, %v3314_v29  ;;  %v12990_v7 = vmax.f32 %v12870_v11, %v3064_v40  ;;  %v14678_v58 = vrot.slane %v14677_v45, 2  ;;  %v2909_v52 = vrot.slane %v14673_v28, 6 }
 0x474   : > { %v12975_v61 = vmin.f32 %v12054_v36, %v3002_v31  ;;  %v2570_v15 = vsel %vm2555_vm5, %v14675_v59, %v2553_v43  ;;  %v12987_v2 = vmin.f32 %v12855_v46, %v3127_v47  ;;  %v3219_v32 = vmax.f32 %v12778_v0, %v3187_v63 }
 0x475   : > { %v2685_v26 = vsel %vm2654_vm6, %v2652_v41, %v14676_v60  ;;  %v2829_v20 = vsel %vm2555_vm5, %v14678_v58, %v2813_v55  ;;  %v3188_v25 = vmax.f32 %v12990_v7, %v12629_v5  ;;  %v14679_v31 = vmov %v14675_v59 }
 0x476   : > { %v2715_v36 = vsel %vm2620_vm7, %v2685_v26, -1e+30  ;;  %v3128_v8 = vmin.f32 %v12975_v61, %v12794_v34  ;;  %v3251_v62 = vmin.f32 %v12987_v2, %v12619_v14  ;;  %v2586_v29 = vsel %vm2555_vm5, %v2553_v43, %v14679_v31 }
 0x477   : > { %v2747_v51 = vmax.f32 %v2570_v15, %v2715_v36  ;;  %v14680_v47 = vmov %v14676_v60  ;;  %v14681_v14 = vrot.slane %v14677_v45, 6  ;;  %v2617_v59 = vsel %vm2522_vm8, %v2586_v29, -1e+30 }
 0x478   : > { %v2669_v40 = vsel %vm2654_vm6, %v14680_v47, %v2652_v41  ;;  %v13015_v34 = vmin.f32 %v12881_v48, %v3128_v8  ;;  %v3283_v43 = vmin.f32 %v12789_v21, %v3251_v62  ;;  %v3220_v15 = vmax.f32 %v12802_v49, %v3188_v25 }
 0x479   : > { %v13018_v63 = vmax.f32 %v14674_v12, %v2747_v51  ;;  %v2941_v5 = vsel %vm2654_vm6, %v2909_v52, %v14681_v14  ;;  %v2748_v60 = vmax.f32 %v2617_v59, %v2669_v40  ;;  %v2845_v8 = vsel %vm2555_vm5, %v2813_v55, %v14678_v58 }
 0x47a   : > { %v2971_v41 = vsel %vm2620_vm7, %v2941_v5, 1e+30  ;;  %v3252_v12 = vmin.f32 %v13015_v34, %v12649_v53  ;;  %v3315_v51 = vsub.f32 %v3219_v32, %v3283_v43  ;;  %v2876_v25 = vsel %vm2522_vm8, %v2845_v8, 1e+30  ;;  %v14683_v32 = vld [vmem:[#allocation62_spill] sm:$0xff] }
 0x47b   : > { %v3003_v26 = vmin.f32 %v2829_v20, %v2971_v41  ;;  %v3065_v36 = vmax.f32 %v13018_v63, %v12840_v17  ;;  %v13039_v62 = vmax.f32 %v14672_v24, %v2748_v60  ;;  %v14682_v31 = vmov %v14681_v14  ;;  %v14684_v14 = vld [vmem:[#allocation46_spill] sm:$0xff] }
 0x47c   : > { %v2925_v53 = vsel %vm2654_vm6, %v14682_v31, %v2909_v52  ;;  %v3284_v20 = vmin.f32 %v12832_v3, %v3252_v12  ;;  %5988 = vmatprep.mubr.msk.f32.mxu0 %vm1784_vm0, %v3315_v51  ;;  %v4125_v47 = vrot.slane %v14683_v32, 2  ;;  %v4221_v40 = vrot.slane %v14683_v32, 6 }
 0x47d   : > { %v13049_v17 = vmin.f32 %v14677_v45, %v3003_v26  ;;  %v13052_v29 = vmax.f32 %v12931_v23, %v3065_v36  ;;  %v3004_v55 = vmin.f32 %v2876_v25, %v2925_v53  ;;  %v3066_v24 = vmax.f32 %v13039_v62, %v12870_v11  ;;  %v14685_v11 = vld [vmem:[#allocation39_spill] sm:$0xff] }
 0x47e   : > { %v4381_v52 = vrot.slane %v14684_v14, 2  ;;  %v3316_v5 = vsub.f32 %v3220_v15, %v3284_v20  ;;  %v14686_v60 = vrot.slane %v14685_v11, 2  ;;  %v14687_v26 = vrot.slane %v14685_v11, 6 }
 0x47f   : > { %v3129_v45 = vmin.f32 %v13049_v17, %v12855_v46  ;;  %v3189_v59 = vmax.f32 %v13052_v29, %v12682_v33  ;;  %v13065_v43 = vmin.f32 %v14673_v28, %v3004_v55  ;;  %v13068_v41 = vmax.f32 %v12957_v6, %v3066_v24  ;;  %v14688_v46 = vld [vmem:[#allocation47_spill] sm:$0xff]  ;;  %v13098_v24 = vpop.f32.mrb[20].mxu1 }
 0x480   : > { %v4141_v12 = vsel %vm2555_vm5, %v14686_v60, %v4125_v47  ;;  %v4253_v15 = vsel %vm2654_vm6, %v4221_v40, %v14687_v26  ;;  %v14689_v36 = vrot.slane %v14688_v46, 2  ;;  %5989 = vmatmul.mubr.msk.f32.gmra.mrb[20].mxu0 %vm1784_vm0, %v3316_v5  ;;  %v4477_v53 = vrot.slane %v14684_v14, 6  ;;  %14691 = vst [vmem:[#allocation63_spill] sm:$0xff] %v13098_v24 }
 0x481   : > { %v13084_v28 = vmin.f32 %v12954_v56, %v3129_v45  ;;  %v3221_v58 = vmax.f32 %v12874_v18, %v3189_v59  ;;  %v3130_v8 = vmin.f32 %v13065_v43, %v12881_v48  ;;  %v4283_v51 = vsel %vm2620_vm7, %v4253_v15, -1e+30 }
 0x482   : > { %v4397_v33 = vsel %vm2555_vm5, %v14689_v36, %v4381_v52  ;;  %v3190_v25 = vmax.f32 %v13068_v41, %v12726_v38  ;;  %v4315_v31 = vmax.f32 %v4141_v12, %v4283_v51  ;;  %v14690_v20 = vmov %v14686_v60  ;;  %v13111_v60 = vpop.f32.mrb[21].mxu1 }
 0x483   : > { %v4157_v55 = vsel %vm2555_vm5, %v4125_v47, %v14690_v20  ;;  %v3253_v5 = vmin.f32 %v13084_v28, %v12718_v39  ;;  %v13103_v48 = vmin.f32 %v12975_v61, %v3130_v8  ;;  %v14693_v38 = vmov %v14687_v26  ;;  %14694 = vst [vmem:[#allocation66_spill] sm:$0xff] %v13111_v60 }
 0x484   : > { %v4188_v45 = vsel %vm2522_vm8, %v4157_v55, -1e+30  ;;  %v4237_v59 = vsel %vm2654_vm6, %v14693_v38, %v4221_v40  ;;  %v3222_v47 = vmax.f32 %v12904_v10, %v3190_v25  ;;  %v13115_v12 = vmax.f32 %v14685_v11, %v4315_v31  ;;  %v14697_v31 = vld [vmem:[#allocation18_spill] sm:$0xff] }
 0x485   : > { %14692 = vst [vmem:[#allocation65_spill] sm:$0xff] %v13103_v48  ;;  %v14695_v39 = vrot.slane %v14688_v46, 6  ;;  %v4316_v15 = vmax.f32 %v4188_v45, %v4237_v59  ;;  %v3285_v36 = vmin.f32 %v12890_v30, %v3253_v5  ;;  %v3254_v8 = vmin.f32 %v13103_v48, %v12739_v4 }
 0x486   : > { %v14696_v51 = vrot.slane %v14688_v46, 2  ;;  %v4633_v20 = vmax.f32 %v13115_v12, %v14697_v31 }
 0x487   : > { %v4509_v26 = vsel %vm2654_vm6, %v4477_v53, %v14695_v39  ;;  %v13133_v55 = vmax.f32 %v14683_v32, %v4316_v15  ;;  %v3317_v45 = vsub.f32 %v3221_v58, %v3285_v36  ;;  %v3286_v4 = vmin.f32 %v12919_v22, %v3254_v8  ;;  %v14701_v15 = vld [vmem:[#allocation21_spill] sm:$0xff]  ;;  %v14702_v36 = vld [vmem:[#allocation4_spill] sm:$0xff] }
 0x488   : > { %v4539_v40 = vsel %vm2620_vm7, %v4509_v26, 1e+30  ;;  %v4413_v11 = vsel %vm2555_vm5, %v4381_v52, %v14696_v51  ;;  %v14698_v38 = vmov %v14695_v39  ;;  %v2554_v52 = vrot.slane %v12307_v19, 2  ;;  %v14699_v39 = vld [vmem:[#allocation35_spill] sm:$0xff] }
 0x489   : > { %v4571_v25 = vmin.f32 %v4397_v33, %v4539_v40  ;;  %v4444_v5 = vsel %vm2522_vm8, %v4413_v11, 1e+30  ;;  %v4493_v59 = vsel %vm2654_vm6, %v14698_v38, %v4477_v53  ;;  %v13147_v26 = vmax.f32 %v14699_v39, %v4633_v20  ;;  %5991 = vmatprep.mubr.msk.f32.mxu0 %vm1784_vm0, %v3317_v45  ;;  %v14704_v11 = vld [vmem:[#allocation48_spill] sm:$0xff]  ;;  %v14706_v20 = vld [vmem:[#allocation41_spill] sm:$0xff] }
 0x48a   : > { %v4572_v32 = vmin.f32 %v4444_v5, %v4493_v59  ;;  %v4634_v40 = vmax.f32 %v13133_v55, %v14701_v15  ;;  %v3318_v58 = vsub.f32 %v3222_v47, %v3286_v4  ;;  %v14703_v8 = vrot.slane %v14702_v36, 2  ;;  %v14708_v45 = vld [vmem:[#allocation57_spill] sm:$0xff] }
 0x48b   : > { %v13144_v33 = vmin.f32 %v14688_v46, %v4571_v25  ;;  %14700 = vst [vmem:[#allocation71_spill] sm:$0xff] %v13147_v26  ;;  %v2653_v51 = vrot.slane %v12307_v19, 6  ;;  %v2814_v46 = vrot.slane %v14704_v11, 2  ;;  %v14705_v25 = vld [vmem:[#allocation20_spill] sm:$0xff]  ;;  %v4757_v5 = vmax.f32 %v13147_v26, %v14706_v20  ;;  %v14711_v15 = vld [vmem:[#allocation49_spill] sm:$0xff] }
 0x48c   : > { %v2571_v53 = vsel %vm2555_vm5, %v14703_v8, %v2554_v52  ;;  %v13163_v38 = vmin.f32 %v14684_v14, %v4572_v32  ;;  %v13166_v47 = vmax.f32 %v14708_v45, %v4634_v40  ;;  %5992 = vmatmul.mubr.msk.f32.gmra.mrb[22].mxu0 %vm1784_vm0, %v3318_v58  ;;  %v14710_v4 = vrot.slane %v14702_v36, 6  ;;  %v14714_v40 = vld [vmem:[#allocation67_spill] sm:$0xff] }
 0x48d   : > { %v4697_v31 = vmin.f32 %v13144_v33, %v14705_v25  ;;  %v14712_v8 = vrot.slane %v14711_v15, 2  ;;  %v2910_v20 = vrot.slane %v14704_v11, 6  ;;  %v14713_v14 = vrot.slane %v14702_v36, 2  ;;  %v14716_v58 = vld [vmem:[#allocation23_spill] sm:$0xff] }
 0x48e   : > { %14707 = vst [vmem:[#allocation56_spill] sm:$0xff] %v13163_v38  ;;  %14709 = vst [vmem:[#allocation33_spill] sm:$0xff] %v13166_v47  ;;  %v2686_v59 = vsel %vm2654_vm6, %v2653_v51, %v14710_v4  ;;  %v4789_v24 = vmax.f32 %v14716_v58, %v4757_v5  ;;  %v4698_v4 = vmin.f32 %v13163_v38, %v14717_v13  ;;  %v14719_v44 = vrot.slane %v14711_v15, 6  ;;  %v14721_v13 = vld [vmem:[#allocation43_spill] sm:$0xff] }
 0x48f   : > { %v2830_v25 = vsel %vm2555_vm5, %v14712_v8, %v2814_v46  ;;  %v2587_v32 = vsel %vm2555_vm5, %v2554_v52, %v14713_v14  ;;  %v13183_v60 = vmin.f32 %v14714_v40, %v4697_v31  ;;  %v4758_v37 = vmax.f32 %v13166_v47, %v14718_v27  ;;  %v14722_v27 = vld [vmem:[#allocation14_spill] sm:$0xff] }
 0x490   : > { %v2717_v8 = vsel %vm2620_vm7, %v2686_v59, -1e+30  ;;  %v2942_v42 = vsel %vm2654_vm6, %v2910_v20, %v14719_v44  ;;  %v2619_v52 = vsel %vm2522_vm8, %v2587_v32, -1e+30  ;;  %v14720_v31 = vrot.slane %v14702_v36, 6  ;;  %v14724_v59 = vld [vmem:[#allocation25_spill] sm:$0xff] }
 0x491   : > { %14715 = vst [vmem:[#allocation37_spill] sm:$0xff] %v13183_v60  ;;  %v4821_v14 = vmin.f32 %v13183_v60, %v14721_v13  ;;  %v13205_v47 = vmin.f32 %v14722_v27, %v4698_v4  ;;  %v4790_v26 = vmax.f32 %v14724_v59, %v4758_v37  ;;  %v2749_v48 = vmax.f32 %v2571_v53, %v2717_v8  ;;  %v14727_v13 = vld [vmem:[#allocation24_spill] sm:$0xff] }
 0x492   : > { %v2670_v5 = vsel %vm2654_vm6, %v14720_v31, %v2653_v51  ;;  %v2973_v44 = vsel %vm2620_vm7, %v2942_v42, 1e+30  ;;  %v14725_v32 = vrot.slane %v14711_v15, 2  ;;  %v14726_v51 = vrot.slane %v14711_v15, 6  ;;  %v14728_v60 = vld [vmem:[#allocation44_spill] sm:$0xff] }
 0x493   : > { %14723 = vst [vmem:[#allocation9_spill] sm:$0xff] %v13205_v47  ;;  %v2750_v38 = vmax.f32 %v2619_v52, %v2670_v5  ;;  %v4853_v4 = vmin.f32 %v14727_v13, %v4821_v14  ;;  %v4822_v37 = vmin.f32 %v13205_v47, %v14728_v60  ;;  %v2781_v53 = vmax.f32 %v14702_v36, %v2749_v48 }
 0x494   : > { %v2846_v58 = vsel %vm2555_vm5, %v2814_v46, %v14725_v32  ;;  %v2926_v31 = vsel %vm2654_vm6, %v14726_v51, %v2910_v20  ;;  %v3005_v8 = vmin.f32 %v2830_v25, %v2973_v44  ;;  %v3069_v46 = vmax.f32 %v13018_v63, -1e+30  ;;  %v14729_v20 = vld [vmem:[#allocation27_spill] sm:$0xff] }
 0x495   : > { %v13223_v42 = vmax.f32 %v12307_v19, %v2750_v38  ;;  %v2878_v52 = vsel %vm2522_vm8, %v2846_v58, 1e+30  ;;  %v3133_v5 = vmin.f32 %v13049_v17, 1e+30  ;;  %v4885_v32 = vsub.f32 %v4789_v24, %v4853_v4 }
 0x496   : > { %v4854_v51 = vmin.f32 %v14729_v20, %v4822_v37  ;;  %v3037_v14 = vmin.f32 %v14711_v15, %v3005_v8  ;;  %v3067_v60 = vmax.f32 %v2781_v53, %v12931_v23  ;;  %v3006_v47 = vmin.f32 %v2878_v52, %v2926_v31 }
 0x497   : > { %v3068_v48 = vmax.f32 %v13223_v42, %v12957_v6  ;;  %v13234_v19 = vmax.f32 %v2781_v53, %v3069_v46  ;;  %v4126_v36 = vrot.slane %v12410_v1, 2  ;;  %5941 = vmatprep.mubr.msk.f32.mxu1 %vm1784_vm0, %v4885_v32  ;;  %v14730_v44 = vrot.slane %v12419_v50, 2 }
 0x498   : > { %v4886_v38 = vsub.f32 %v4790_v26, %v4854_v51  ;;  %v13239_v25 = vmax.f32 %v13018_v63, %v3067_v60  ;;  %v3131_v24 = vmin.f32 %v3037_v14, %v12954_v56  ;;  %v13242_v58 = vmin.f32 %v3037_v14, %v3133_v5 }
 0x499   : > { %v3038_v23 = vmin.f32 %v14704_v11, %v3006_v47  ;;  %v13246_v15 = vmax.f32 %v13039_v62, %v3068_v48  ;;  %v3193_v6 = vmax.f32 %v13234_v19, %v12874_v18  ;;  %v4142_v26 = vsel %vm2555_vm5, %v14730_v44, %v4126_v36 }
 0x49a   : > { %5942 = vmatmul.mubr.msk.f32.gmra.mrb[22].mxu1 %vm1784_vm0, %v4886_v38  ;;  %v13256_v63 = vmin.f32 %v13049_v17, %v3131_v24  ;;  %v3191_v56 = vmax.f32 %v13239_v25, %v12778_v0  ;;  %v3257_v11 = vmin.f32 %v13242_v58, %v12890_v30  ;;  %v4222_v47 = vrot.slane %v12410_v1, 6 }
 0x49b   : > { %v3132_v18 = vmin.f32 %v3038_v23, %v12975_v61  ;;  %v3192_v31 = vmax.f32 %v13246_v15, %v12802_v49  ;;  %v3225_v4 = vmax.f32 %v13052_v29, %v3193_v6  ;;  %v4382_v37 = vrot.slane %v12424_v54, 2 }
 0x49c   : > { %v3223_v17 = vmax.f32 %v12963_v9, %v3191_v56  ;;  %v3255_v53 = vmin.f32 %v13256_v63, %v12789_v21  ;;  %v3289_v0 = vmin.f32 %v13084_v28, %v3257_v11  ;;  %v14731_v30 = vrot.slane %v12419_v50, 6 }
 0x49d   : > { %v13277_v61 = vmin.f32 %v13065_v43, %v3132_v18  ;;  %v3224_v49 = vmax.f32 %v12990_v7, %v3192_v31  ;;  %v14732_v46 = vrot.slane %v12421_v16, 2  ;;  %v4478_v14 = vrot.slane %v12424_v54, 6 }
 0x49e   : > { %v4254_v8 = vsel %vm2654_vm6, %v4222_v47, %v14731_v30  ;;  %v3287_v5 = vmin.f32 %v12987_v2, %v3255_v53  ;;  %v3321_v32 = vsub.f32 %v3225_v4, %v3289_v0  ;;  %v14733_v48 = vmov %v14730_v44 }
 0x49f   : > { %v4285_v52 = vsel %vm2620_vm7, %v4254_v8, -1e+30  ;;  %v4398_v21 = vsel %vm2555_vm5, %v14732_v46, %v4382_v37  ;;  %v3256_v60 = vmin.f32 %v13277_v61, %v12832_v3  ;;  %v4158_v38 = vsel %vm2555_vm5, %v4126_v36, %v14733_v48  ;;  %v14739_v48 = vld [vmem:[#allocation68_spill] sm:$0xff] }
 0x4a0   : > { %v4317_v51 = vmax.f32 %v4142_v26, %v4285_v52  ;;  %v14734_v24 = vmov %v14731_v30  ;;  %v14735_v44 = vmov %v14732_v46  ;;  %v3319_v56 = vsub.f32 %v3223_v17, %v3287_v5 }
 0x4a1   : > { %v4238_v6 = vsel %vm2654_vm6, %v14734_v24, %v4222_v47  ;;  %v4414_v26 = vsel %vm2555_vm5, %v4382_v37, %v14735_v44  ;;  %v14736_v3 = vrot.slane %v12421_v16, 6  ;;  %v4190_v36 = vsel %vm2522_vm8, %v4158_v38, -1e+30  ;;  %v14740_v24 = vld [vmem:[#allocation23_spill] sm:$0xff] }
 0x4a2   : > { %v4349_v11 = vmax.f32 %v12419_v50, %v4317_v51  ;;  %v3288_v31 = vmin.f32 %v13015_v34, %v3256_v60  ;;  %v4318_v4 = vmax.f32 %v4190_v36, %v4238_v6  ;;  %v4446_v37 = vsel %vm2522_vm8, %v4414_v26, 1e+30  ;;  %5994 = vmatprep.mubr.msk.f32.mxu0 %vm1784_vm0, %v3319_v56  ;;  %v14741_v6 = vld [vmem:[#allocation56_spill] sm:$0xff]  ;;  %v14742_v26 = vld [vmem:[#allocation19_spill] sm:$0xff] }
 0x4a3   : > { %v4510_v18 = vsel %vm2654_vm6, %v4478_v14, %v14736_v3  ;;  %v14737_v53 = vmov %v14736_v3  ;;  %v3070_v30 = vmax.f32 %v13039_v62, -1e+30  ;;  %v3134_v5 = vmin.f32 %v13065_v43, 1e+30  ;;  %v14738_v43 = vld [vmem:[#allocation45_spill] sm:$0xff]  ;;  %v14744_v3 = vld [vmem:[#allocation16_spill] sm:$0xff] }
 0x4a4   : > { %v4541_v47 = vsel %vm2620_vm7, %v4510_v18, 1e+30  ;;  %v4635_v17 = vmax.f32 %v4349_v11, %v14699_v39  ;;  %v4494_v0 = vsel %vm2654_vm6, %v14737_v53, %v4478_v14  ;;  %v3320_v8 = vsub.f32 %v3224_v49, %v3288_v31  ;;  %v14745_v36 = vld [vmem:[#allocation71_spill] sm:$0xff] }
 0x4a5   : > { %v4573_v50 = vmin.f32 %v4398_v21, %v4541_v47  ;;  %v4350_v52 = vmax.f32 %v12410_v1, %v4318_v4  ;;  %v4574_v46 = vmin.f32 %v4446_v37, %v4494_v0  ;;  %v13326_v21 = vmax.f32 %v13223_v42, %v3070_v30  ;;  %v14746_v4 = vld [vmem:[#allocation70_spill] sm:$0xff]  ;;  %v14748_v0 = vld [vmem:[#allocation37_spill] sm:$0xff] }
 0x4a6   : > { %v4667_v51 = vmax.f32 %v13115_v12, %v4635_v17  ;;  %v4637_v39 = vmax.f32 %v13115_v12, -1e+30  ;;  %5995 = vmatmul.mubr.msk.f32.gmra.mrb[24].mxu0 %vm1784_vm0, %v3320_v8  ;;  %v13332_v49 = vmin.f32 %v3038_v23, %v3134_v5  ;;  %v4701_v1 = vmin.f32 %v13144_v33, 1e+30  ;;  %v14749_v8 = vld [vmem:[#allocation69_spill] sm:$0xff] }
 0x4a7   : > { %v4605_v35 = vmin.f32 %v12421_v16, %v4573_v50  ;;  %v4606_v57 = vmin.f32 %v12424_v54, %v4574_v46  ;;  %v4636_v62 = vmax.f32 %v4350_v52, %v14708_v45  ;;  %5997 = vmatprep.mubr.msk.f32.mxu0 %vm1784_vm0, %v3321_v32  ;;  %v3194_v42 = vmax.f32 %v13326_v21, %v12904_v10  ;;  %v14747_v50 = vld [vmem:[#allocation8_spill] sm:$0xff] }
 0x4a8   : > { %v4759_v14 = vmax.f32 %v4667_v51, %v14738_v43  ;;  %v13340_v12 = vmax.f32 %v4349_v11, %v4637_v39  ;;  %v3258_v45 = vmin.f32 %v13332_v49, %v12919_v22  ;;  %v14743_v11 = vld [vmem:[#allocation65_spill] sm:$0xff]  ;;  %v3195_v31 = vmax.f32 %v12963_v9, -1e+30  ;;  %v14750_v39 = vld [vmem:[#allocation34_spill] sm:$0xff] }
 0x4a9   : > { %v4699_v16 = vmin.f32 %v4605_v35, %v14714_v40  ;;  %v4668_v60 = vmax.f32 %v13133_v55, %v4636_v62  ;;  %v4700_v54 = vmin.f32 %v4606_v57, %v14722_v27  ;;  %v13346_v23 = vmin.f32 %v4605_v35, %v4701_v1 }
 0x4aa   : > { %v4791_v40 = vmax.f32 %v14739_v48, %v4759_v14  ;;  %v3226_v38 = vmax.f32 %v13068_v41, %v3194_v42  ;;  %v4761_v10 = vmax.f32 %v13340_v12, %v14740_v24  ;;  %v3290_v27 = vmin.f32 %v14743_v11, %v3258_v45 }
 0x4ab   : > { %v4731_v32 = vmin.f32 %v13144_v33, %v4699_v16  ;;  %v4732_v44 = vmin.f32 %v14741_v6, %v4700_v54  ;;  %v4760_v56 = vmax.f32 %v4668_v60, %v14742_v26  ;;  %v4825_v22 = vmin.f32 %v13346_v23, %v14727_v13 }
 0x4ac   : > { %v4793_v33 = vmax.f32 %v14745_v36, %v4761_v10  ;;  %v3259_v47 = vmin.f32 %v12987_v2, 1e+30  ;;  %v3322_v53 = vsub.f32 %v3226_v38, %v3290_v27  ;;  %v3227_v5 = vmax.f32 %v13239_v25, %v3195_v31 }
 0x4ad   : > { %v4823_v18 = vmin.f32 %v4731_v32, %v14744_v3  ;;  %v4792_v37 = vmax.f32 %v14746_v4, %v4760_v56  ;;  %v4824_v17 = vmin.f32 %v4732_v44, %v14747_v50  ;;  %v4857_v30 = vmin.f32 %v14748_v0, %v4825_v22 }
 0x4ae   : > { %v3291_v13 = vmin.f32 %v13256_v63, %v3259_v47  ;;  %v4638_v35 = vmax.f32 %v13133_v55, -1e+30  ;;  %5998 = vmatmul.mubr.msk.f32.gmra.mrb[26].mxu0 %vm1784_vm0, %v3322_v53  ;;  %v4702_v2 = vmin.f32 %v14741_v6, 1e+30  ;;  %v3196_v1 = vmax.f32 %v12990_v7, -1e+30 }
 0x4af   : > { %v4855_v46 = vmin.f32 %v14749_v8, %v4823_v18  ;;  %v4856_v62 = vmin.f32 %v14750_v39, %v4824_v17  ;;  %v4889_v9 = vsub.f32 %v4793_v33, %v4857_v30  ;;  %v3260_v42 = vmin.f32 %v13015_v34, 1e+30  ;;  %v14752_v6 = vld [vmem:[#allocation9_spill] sm:$0xff]  ;;  %v5544_v53 = vld [vmem:[%s13414_s11] sm:$0xff] }
 0x4b0   : > { %v3323_v43 = vsub.f32 %v3227_v5, %v3291_v13  ;;  %v4670_v14 = vmax.f32 %v4350_v52, %v4638_v35  ;;  %v4734_v25 = vmin.f32 %v4606_v57, %v4702_v2  ;;  %v3228_v63 = vmax.f32 %v13246_v15, %v3196_v1  ;;  %v14755_v5 = vld [vmem:[#allocation10_spill] sm:$0xff] }
 0x4b1   : > { %v4887_v16 = vsub.f32 %v4791_v40, %v4855_v46  ;;  %v4888_v54 = vsub.f32 %v4792_v37, %v4856_v62  ;;  %v4763_v55 = vmax.f32 %v14739_v48, -1e+30  ;;  %v3292_v38 = vmin.f32 %v13277_v61, %v3260_v42  ;;  %v14751_v40 = vld [vmem:[#allocation33_spill] sm:$0xff]  ;;  %v14753_v37 = vld [vmem:[#allocation51_spill] sm:$0xff] }
 0x4b2   : > { %6000 = vmatprep.mubr.msk.f32.mxu0 %vm1784_vm0, %v3323_v43  ;;  %v4762_v45 = vmax.f32 %v4670_v14, %v14724_v59  ;;  %v4827_v7 = vmin.f32 %v14749_v8, 1e+30  ;;  %v3197_v52 = vmax.f32 %v13052_v29, -1e+30  ;;  %v4826_v34 = vmin.f32 %v4734_v25, %v14729_v20  ;;  %v5547_v62 = vld [vmem:[%s13414_s11 + $0x18] sm:$0xff] }
 0x4b3   : > { %5944 = vmatprep.mubr.msk.f32.mxu1 %vm1784_vm0, %v4887_v16  ;;  %v4795_v57 = vmax.f32 %v4667_v51, %v4763_v55  ;;  %v3261_v15 = vmin.f32 %v13084_v28, 1e+30  ;;  %v4764_v48 = vmax.f32 %v14746_v4, -1e+30  ;;  %v3324_v59 = vsub.f32 %v3228_v63, %v3292_v38  ;;  %v5545_v4 = vld [vmem:[%s13414_s11 + $0x8] sm:$0xff]  ;;  %v5546_v16 = vld [vmem:[%s13414_s11 + $0x10] sm:$0xff] }
 0x4b4   : > { %5945 = vmatmul.mubr.msk.f32.gmra.mrb[24].mxu1 %vm1784_vm0, %v4888_v54  ;;  %v4794_v24 = vmax.f32 %v14751_v40, %v4762_v45  ;;  %v4859_v10 = vmin.f32 %v4731_v32, %v4827_v7  ;;  %v3229_v61 = vmax.f32 %v13234_v19, %v3197_v52  ;;  %v4858_v26 = vmin.f32 %v14752_v6, %v4826_v34  ;;  %v14757_v43 = vld [vmem:[#allocation17_spill] sm:$0xff]  ;;  %v5549_v45 = vld [vmem:[%s13414_s11 + $0x28] sm:$0xff]  ;;  %v14758_v38 = vld [vmem:[#allocation6_spill] sm:$0xff] }
 0x4b5   : > { %5947 = vmatprep.mubr.msk.f32.mxu1 %vm1784_vm0, %v4889_v9  ;;  %v3293_v29 = vmin.f32 %v13242_v58, %v3261_v15  ;;  %v4828_v56 = vmin.f32 %v14750_v39, 1e+30  ;;  %6001 = vmatmul.mubr.msk.f32.gmra.mrb[28].mxu0 %vm1784_vm0, %v3324_v59  ;;  %v4796_v20 = vmax.f32 %v4668_v60, %v4764_v48  ;;  %v3198_v28 = vmax.f32 %v13068_v41, -1e+30  ;;  %v14756_v9 = vld [vmem:[#allocation52_spill] sm:$0xff]  ;;  %v5548_v34 = vld [vmem:[%s13414_s11 + $0x20] sm:$0xff] }
 0x4b6   : > { %v3262_v51 = vmin.f32 %v14743_v11, 1e+30  ;;  %v4765_v27 = vmax.f32 %v14745_v36, -1e+30  ;;  %v4890_v22 = vsub.f32 %v4794_v24, %v4858_v26  ;;  %v4829_v19 = vmin.f32 %v14748_v0, 1e+30 }
 0x4b7   : > { %v3325_v3 = vsub.f32 %v3229_v61, %v3293_v29  ;;  %v4860_v32 = vmin.f32 %v4732_v44, %v4828_v56  ;;  %v4891_v18 = vsub.f32 %v4795_v57, %v4859_v10  ;;  %v3230_v33 = vmax.f32 %v13326_v21, %v3198_v28  ;;  %v14754_v0 = vld [vmem:[#allocation50_spill] sm:$0xff]  ;;  %v5551_v61 = vld [vmem:[%s13414_s11 + $0x38] sm:$0xff]  ;;  %v5550_v56 = vld [vmem:[%s13414_s11 + $0x30] sm:$0xff] }
 0x4b8   : > { %v3294_v58 = vmin.f32 %v13332_v49, %v3262_v51  ;;  %v4797_v31 = vmax.f32 %v13340_v12, %v4765_v27  ;;  %5948 = vmatmul.mubr.msk.f32.gmra.mrb[26].mxu1 %vm1784_vm0, %v4890_v22  ;;  %v4861_v41 = vmin.f32 %v13346_v23, %v4829_v19  ;;  %v4766_v60 = vmax.f32 %v14751_v40, -1e+30  ;;  %v14759_v57 = vld [vmem:[#allocation26_spill] sm:$0xff]  ;;  %v5553_v19 = vld [vmem:[%s13414_s11 + $0x48] sm:$0xff] }
 0x4b9   : > { %6003 = vmatprep.mubr.msk.f32.mxu0 %vm1784_vm0, %v3325_v3  ;;  %v4830_v44 = vmin.f32 %v14752_v6, 1e+30  ;;  %5950 = vmatprep.mubr.msk.f32.mxu1 %vm1784_vm0, %v4891_v18  ;;  %v4892_v36 = vsub.f32 %v4796_v20, %v4860_v32  ;;  %v14760_v6 = vld [vmem:[#allocation32_spill] sm:$0xff]  ;;  %v14761_v20 = vld [vmem:[#allocation7_spill] sm:$0xff] }
 0x4ba   : > { %v3326_v11 = vsub.f32 %v3230_v33, %v3294_v58  ;;  %v4798_v21 = vmax.f32 %v4670_v14, %v4766_v60  ;;  %v4893_v12 = vsub.f32 %v4797_v31, %v4861_v41  ;;  %v14762_v18 = vld [vmem:[#allocation28_spill] sm:$0xff]  ;;  %v5552_v31 = vld [vmem:[%s13414_s11 + $0x40] sm:$0xff]  ;;  %v14763_v41 = vld [vmem:[#allocation53_spill] sm:$0xff] }
 0x4bb   : > { %v4862_v49 = vmin.f32 %v4734_v25, %v4830_v44  ;;  %v5960_v23 = vpop.f32.mrb[0].mxu0 }
 0x4bc   : > { %6004 = vmatmul.mubr.msk.f32.gmra.mrb[30].mxu0 %vm1784_vm0, %v3326_v11  ;;  %5951 = vmatmul.mubr.msk.f32.gmra.mrb[28].mxu1 %vm1784_vm0, %v4892_v36  ;;  %v5391_v50 = vadd.f32 %v5960_v23, %v14753_v37  ;;  %v5385_v17 = vpop.f32.mrb[1].mxu0  ;;  %v5554_v37 = vld [vmem:[%s13414_s11 + $0x50] sm:$0xff] }
 0x4bd   : > { %5953 = vmatprep.mubr.msk.f32.mxu1 %vm1784_vm0, %v4893_v12  ;;  %v4894_v47 = vsub.f32 %v4798_v21, %v4862_v49  ;;  %v5386_v30 = vadd.f32 %v5385_v17, %v14754_v0  ;;  %v5555_v12 = vld [vmem:[%s13414_s11 + $0x58] sm:$0xff] }
 0x4be   : > { %v5577_v8 = vadd.f32 %v5545_v4, %v5391_v50  ;;  %v14765_v50 = vld [vmem:[#allocation55_spill] sm:$0xff] }
 0x4bf   : > { %v5576_v46 = vadd.f32 %v5544_v53, %v5386_v30 }
 0x4c0   : > { %5954 = vmatmul.mubr.msk.f32.gmra.mrb[30].mxu1 %vm1784_vm0, %v4894_v47  ;;  %v5613_v13 = vadd.f32 %v14755_v5, %v5577_v8  ;;  %v14764_v47 = vld [vmem:[#allocation12_spill] sm:$0xff] }
 0x4c1   : > { %v5612_v35 = vadd.f32 %v14755_v5, %v5576_v46 }
 0x4c2   : > { %5645 = vst.msk [vmem:[%s13424_s14 + $0x8] sm:$0xff] %vm1784_vm0, %v5613_v13  ;;  %v5557_v13 = vld [vmem:[%s13414_s11 + $0x68] sm:$0xff] }
 0x4c3   : > { %5644 = vst.msk [vmem:[%s13424_s14] sm:$0xff] %vm1784_vm0, %v5612_v35  ;;  %v14766_v35 = vld [vmem:[#allocation15_spill] sm:$0xff] }
 0x4cb   : > { %v5963_v39 = vpop.f32.mrb[2].mxu0 }
 0x4cc   : > { %v5401_v2 = vadd.f32 %v5963_v39, %v14756_v9  ;;  %v5395_v1 = vpop.f32.mrb[3].mxu0  ;;  %v5556_v9 = vld [vmem:[%s13414_s11 + $0x60] sm:$0xff] }
 0x4cd   : > { %v5396_v14 = vadd.f32 %v5395_v1, %v14757_v43 }
 0x4ce   : > { %v5579_v42 = vadd.f32 %v5547_v62, %v5401_v2  ;;  %v14767_v2 = vld [vmem:[#allocation36_spill] sm:$0xff] }
 0x4cf   : > { %v5578_v54 = vadd.f32 %v5546_v16, %v5396_v14 }
 0x4d0   : > { %v5615_v25 = vadd.f32 %v14755_v5, %v5579_v42 }
 0x4d1   : > { %v5614_v63 = vadd.f32 %v14755_v5, %v5578_v54 }
 0x4d2   : > { %5647 = vst.msk [vmem:[%s13424_s14 + $0x18] sm:$0xff] %vm1784_vm0, %v5615_v25  ;;  %v5559_v25 = vld [vmem:[%s13414_s11 + $0x78] sm:$0xff] }
 0x4d3   : > { %5646 = vst.msk [vmem:[%s13424_s14 + $0x10] sm:$0xff] %vm1784_vm0, %v5614_v63  ;;  %v14768_v63 = vld [vmem:[#allocation13_spill] sm:$0xff] }
 0x4e1   : > { %v5966_v55 = vpop.f32.mrb[4].mxu0 }
 0x4e2   : > { %v5411_v7 = vadd.f32 %v5966_v55, %v14758_v38  ;;  %v5405_v52 = vpop.f32.mrb[5].mxu0  ;;  %v5558_v38 = vld [vmem:[%s13414_s11 + $0x70] sm:$0xff] }
 0x4e3   : > { %v5406_v15 = vadd.f32 %v5405_v52, %v14759_v57 }
 0x4e4   : > { %v5581_v48 = vadd.f32 %v5549_v45, %v5411_v7  ;;  %v14769_v7 = vld [vmem:[#allocation3_spill] sm:$0xff] }
 0x4e5   : > { %v5580_v40 = vadd.f32 %v5548_v34, %v5406_v15 }
 0x4e6   : > { %v5617_v24 = vadd.f32 %v14755_v5, %v5581_v48 }
 0x4e7   : > { %v5616_v59 = vadd.f32 %v14755_v5, %v5580_v40 }
 0x4e8   : > { %5649 = vst.msk [vmem:[%s13424_s14 + $0x28] sm:$0xff] %vm1784_vm0, %v5617_v24  ;;  %v5561_v24 = vld [vmem:[%s13414_s11 + $0x88] sm:$0xff] }
 0x4e9   : > { %5648 = vst.msk [vmem:[%s13424_s14 + $0x20] sm:$0xff] %vm1784_vm0, %v5616_v59  ;;  %v14770_v59 = vld [vmem:[#allocation5_spill] sm:$0xff] }
 0x4ef   : > { %v5969_v10 = vpop.f32.mrb[6].mxu0 }
 0x4f0   : > { %v5421_v26 = vadd.f32 %v5969_v10, %v14760_v6  ;;  %v5415_v29 = vpop.f32.mrb[7].mxu0  ;;  %v5560_v6 = vld [vmem:[%s13414_s11 + $0x80] sm:$0xff] }
 0x4f1   : > { %v5416_v28 = vadd.f32 %v5415_v29, %v14761_v20 }
 0x4f2   : > { %v5583_v51 = vadd.f32 %v5551_v61, %v5421_v26  ;;  %v14771_v26 = vld [vmem:[#allocation2_spill] sm:$0xff] }
 0x4f3   : > { %v5582_v27 = vadd.f32 %v5550_v56, %v5416_v28 }
 0x4f4   : > { %v5619_v22 = vadd.f32 %v14755_v5, %v5583_v51 }
 0x4f5   : > { %v5618_v3 = vadd.f32 %v14755_v5, %v5582_v27 }
 0x4f6   : > { %5651 = vst.msk [vmem:[%s13424_s14 + $0x38] sm:$0xff] %vm1784_vm0, %v5619_v22  ;;  %v5563_v22 = vld [vmem:[%s13414_s11 + $0x98] sm:$0xff] }
 0x4f7   : > { %5650 = vst.msk [vmem:[%s13424_s14 + $0x30] sm:$0xff] %vm1784_vm0, %v5618_v3  ;;  %v14772_v3 = vld [vmem:[#allocation64_spill] sm:$0xff] }
 0x506   : > { %v5972_v32 = vpop.f32.mrb[8].mxu0 }
 0x507   : > { %v5431_v33 = vadd.f32 %v5972_v32, %v14762_v18  ;;  %v5425_v58 = vpop.f32.mrb[9].mxu0  ;;  %v5562_v18 = vld [vmem:[%s13414_s11 + $0x90] sm:$0xff] }
 0x508   : > { %v5426_v60 = vadd.f32 %v5425_v58, %v14763_v41 }
 0x509   : > { %v5585_v44 = vadd.f32 %v5553_v19, %v5431_v33  ;;  %v14773_v33 = vld [vmem:[#allocation54_spill] sm:$0xff] }
 0x50a   : > { %v5584_v11 = vadd.f32 %v5552_v31, %v5426_v60 }
 0x50b   : > { %v5621_v36 = vadd.f32 %v14755_v5, %v5585_v44 }
 0x50c   : > { %v5620_v21 = vadd.f32 %v14755_v5, %v5584_v11 }
 0x50d   : > { %5653 = vst.msk [vmem:[%s13424_s14 + $0x48] sm:$0xff] %vm1784_vm0, %v5621_v36  ;;  %v5565_v36 = vld [vmem:[%s13414_s11 + $0xa8] sm:$0xff] }
 0x50e   : > { %5652 = vst.msk [vmem:[%s13424_s14 + $0x40] sm:$0xff] %vm1784_vm0, %v5620_v21  ;;  %v14774_v21 = vld [vmem:[#allocation63_spill] sm:$0xff] }
 0x514   : > { %v5975_v49 = vpop.f32.mrb[10].mxu0 }
 0x515   : > { %v5441_v23 = vadd.f32 %v5975_v49, %v14764_v47  ;;  %v5435_v4 = vpop.f32.mrb[11].mxu0  ;;  %v5564_v47 = vld [vmem:[%s13414_s11 + $0xa0] sm:$0xff] }
 0x516   : > { %v5436_v17 = vadd.f32 %v5435_v4, %v14765_v50 }
 0x517   : > { %v5587_v53 = vadd.f32 %v5555_v12, %v5441_v23  ;;  %v14775_v23 = vld [vmem:[#allocation66_spill] sm:$0xff] }
 0x518   : > { %v5586_v0 = vadd.f32 %v5554_v37, %v5436_v17 }
 0x519   : > { %v5623_v30 = vadd.f32 %v14755_v5, %v5587_v53 }
 0x51a   : > { %v5622_v8 = vadd.f32 %v14755_v5, %v5586_v0 }
 0x51b   : > { %5655 = vst.msk [vmem:[%s13424_s14 + $0x58] sm:$0xff] %vm1784_vm0, %v5623_v30 }
 0x51c   : > { %5654 = vst.msk [vmem:[%s13424_s14 + $0x50] sm:$0xff] %vm1784_vm0, %v5622_v8 }
 0x521   : > { %v5978_v46 = vpop.f32.mrb[12].mxu0 }
 0x522   : > { %v5451_v39 = vadd.f32 %v5978_v46, %v14766_v35  ;;  %v5445_v62 = vpop.f32.mrb[13].mxu0  ;;  %v5567_v46 = vld [vmem:[%s13414_s11 + $0xb8] sm:$0xff] }
 0x523   : > { %v5446_v1 = vadd.f32 %v5445_v62, %v14767_v2 }
 0x524   : > { %v5589_v16 = vadd.f32 %v5557_v13, %v5451_v39  ;;  %v5566_v39 = vld [vmem:[%s13414_s11 + $0xb0] sm:$0xff] }
 0x525   : > { %v5588_v43 = vadd.f32 %v5556_v9, %v5446_v1 }
 0x526   : > { %v5625_v14 = vadd.f32 %v14755_v5, %v5589_v16 }
 0x527   : > { %v5624_v42 = vadd.f32 %v14755_v5, %v5588_v43 }
 0x528   : > { %5657 = vst.msk [vmem:[%s13424_s14 + $0x68] sm:$0xff] %vm1784_vm0, %v5625_v14 }
 0x529   : > { %5656 = vst.msk [vmem:[%s13424_s14 + $0x60] sm:$0xff] %vm1784_vm0, %v5624_v42 }
 0x52c   : > { %v5981_v54 = vpop.f32.mrb[14].mxu0 }
 0x52d   : > { %v5461_v55 = vadd.f32 %v5981_v54, %v14768_v63  ;;  %v5455_v45 = vpop.f32.mrb[15].mxu0  ;;  %v5569_v63 = vld [vmem:[%s13414_s11 + $0xc8] sm:$0xff] }
 0x52e   : > { %v5456_v52 = vadd.f32 %v5455_v45, %v14769_v7 }
 0x52f   : > { %v5591_v34 = vadd.f32 %v5559_v25, %v5461_v55 }
 0x530   : > { %v5590_v57 = vadd.f32 %v5558_v38, %v5456_v52  ;;  %v5568_v38 = vld [vmem:[%s13414_s11 + $0xc0] sm:$0xff] }
 0x531   : > { %v5627_v15 = vadd.f32 %v14755_v5, %v5591_v34 }
 0x532   : > { %v5626_v48 = vadd.f32 %v14755_v5, %v5590_v57 }
 0x533   : > { %5659 = vst.msk [vmem:[%s13424_s14 + $0x78] sm:$0xff] %vm1784_vm0, %v5627_v15 }
 0x534   : > { %5658 = vst.msk [vmem:[%s13424_s14 + $0x70] sm:$0xff] %vm1784_vm0, %v5626_v48 }
 0x53a   : > { %v5984_v40 = vpop.f32.mrb[16].mxu0 }
 0x53b   : > { %v5471_v10 = vadd.f32 %v5984_v40, %v14770_v59  ;;  %v5465_v61 = vpop.f32.mrb[17].mxu0  ;;  %v5571_v59 = vld [vmem:[%s13414_s11 + $0xd8] sm:$0xff] }
 0x53c   : > { %v5466_v29 = vadd.f32 %v5465_v61, %v14771_v26 }
 0x53d   : > { %v5593_v56 = vadd.f32 %v5561_v24, %v5471_v10 }
 0x53e   : > { %v5592_v20 = vadd.f32 %v5560_v6, %v5466_v29  ;;  %v5570_v6 = vld [vmem:[%s13414_s11 + $0xd0] sm:$0xff] }
 0x53f   : > { %v5629_v28 = vadd.f32 %v14755_v5, %v5593_v56 }
 0x540   : > { %v5628_v51 = vadd.f32 %v14755_v5, %v5592_v20 }
 0x541   : > { %5661 = vst.msk [vmem:[%s13424_s14 + $0x88] sm:$0xff] %vm1784_vm0, %v5629_v28 }
 0x542   : > { %5660 = vst.msk [vmem:[%s13424_s14 + $0x80] sm:$0xff] %vm1784_vm0, %v5628_v51  ;;  %v5573_v51 = vld [vmem:[%s13414_s11 + $0xe8] sm:$0xff] }
 0x546   : > { %v5987_v27 = vpop.f32.mrb[18].mxu0 }
 0x547   : > { %v5481_v32 = vadd.f32 %v5987_v27, %v14772_v3  ;;  %v5475_v19 = vpop.f32.mrb[19].mxu0 }
 0x548   : > { %v5476_v58 = vadd.f32 %v5475_v19, %v14773_v33  ;;  %v5572_v19 = vld [vmem:[%s13414_s11 + $0xe0] sm:$0xff] }
 0x549   : > { %v5595_v31 = vadd.f32 %v5563_v22, %v5481_v32 }
 0x54a   : > { %v5594_v41 = vadd.f32 %v5562_v18, %v5476_v58 }
 0x54b   : > { %v5631_v60 = vadd.f32 %v14755_v5, %v5595_v31 }
 0x54c   : > { %v5630_v44 = vadd.f32 %v14755_v5, %v5594_v41 }
 0x54d   : > { %5663 = vst.msk [vmem:[%s13424_s14 + $0x98] sm:$0xff] %vm1784_vm0, %v5631_v60  ;;  %v5575_v60 = vld [vmem:[%s13414_s11 + $0xf8] sm:$0xff] }
 0x54e   : > { %5662 = vst.msk [vmem:[%s13424_s14 + $0x90] sm:$0xff] %vm1784_vm0, %v5630_v44 }
 0x553   : > { %v5990_v11 = vpop.f32.mrb[20].mxu0 }
 0x554   : > { %v5491_v49 = vadd.f32 %v5990_v11, %v14774_v21  ;;  %v5485_v12 = vpop.f32.mrb[21].mxu0  ;;  %v5574_v21 = vld [vmem:[%s13414_s11 + $0xf0] sm:$0xff] }
 0x555   : > { %v5486_v4 = vadd.f32 %v5485_v12, %v14775_v23 }
 0x556   : > { %v5597_v37 = vadd.f32 %v5565_v36, %v5491_v49 }
 0x557   : > { %v5596_v50 = vadd.f32 %v5564_v47, %v5486_v4 }
 0x558   : > { %v5633_v17 = vadd.f32 %v14755_v5, %v5597_v37 }
 0x559   : > { %v5632_v53 = vadd.f32 %v14755_v5, %v5596_v50 }
 0x55a   : > { %5665 = vst.msk [vmem:[%s13424_s14 + $0xa8] sm:$0xff] %vm1784_vm0, %v5633_v17 }
 0x55b   : > { %5664 = vst.msk [vmem:[%s13424_s14 + $0xa0] sm:$0xff] %vm1784_vm0, %v5632_v53 }
 0x55f   : > { %v5993_v0 = vpop.f32.mrb[22].mxu0 }
 0x560   : > { %v5495_v30 = vpop.f32.mrb[23].mxu0 }
 0x56d   : > { %v5943_v8 = vpop.f32.mrb[22].mxu1 }
 0x56e   : > { %v5501_v13 = vadd.f32 %v5993_v0, %v5943_v8  ;;  %v5172_v35 = vpop.f32.mrb[23].mxu1 }
 0x56f   : > { %v5496_v62 = vadd.f32 %v5495_v30, %v5172_v35 }
 0x570   : > { %v5599_v9 = vadd.f32 %v5567_v46, %v5501_v13 }
 0x571   : > { %v5598_v2 = vadd.f32 %v5566_v39, %v5496_v62 }
 0x572   : > { %v5635_v1 = vadd.f32 %v14755_v5, %v5599_v9 }
 0x573   : > { %v5634_v16 = vadd.f32 %v14755_v5, %v5598_v2 }
 0x574   : > { %5667 = vst.msk [vmem:[%s13424_s14 + $0xb8] sm:$0xff] %vm1784_vm0, %v5635_v1 }
 0x575   : > { %5666 = vst.msk [vmem:[%s13424_s14 + $0xb0] sm:$0xff] %vm1784_vm0, %v5634_v16 }
 0x579   : > { %v5996_v43 = vpop.f32.mrb[24].mxu0 }
 0x57a   : > { %v5505_v14 = vpop.f32.mrb[25].mxu0 }
 0x581   : > { %v5999_v42 = vpop.f32.mrb[26].mxu0 }
 0x582   : > { %v5515_v54 = vpop.f32.mrb[27].mxu0 }
 0x587   : > { %v5946_v25 = vpop.f32.mrb[24].mxu1 }
 0x588   : > { %v5511_v55 = vadd.f32 %v5996_v43, %v5946_v25  ;;  %v5182_v45 = vpop.f32.mrb[25].mxu1  ;;  %v6002_v34 = vpop.f32.mrb[28].mxu0 }
 0x589   : > { %v5506_v7 = vadd.f32 %v5505_v14, %v5182_v45  ;;  %v5525_v15 = vpop.f32.mrb[29].mxu0 }
 0x58a   : > { %v5601_v52 = vadd.f32 %v5569_v63, %v5511_v55 }
 0x58b   : > { %v5600_v57 = vadd.f32 %v5568_v38, %v5506_v7  ;;  %v5949_v24 = vpop.f32.mrb[26].mxu1 }
 0x58c   : > { %v5637_v48 = vadd.f32 %v14755_v5, %v5601_v52  ;;  %v5521_v10 = vadd.f32 %v5999_v42, %v5949_v24  ;;  %v5192_v61 = vpop.f32.mrb[27].mxu1 }
 0x58d   : > { %v5636_v40 = vadd.f32 %v14755_v5, %v5600_v57  ;;  %v5516_v26 = vadd.f32 %v5515_v54, %v5192_v61 }
 0x58e   : > { %5669 = vst.msk [vmem:[%s13424_s14 + $0xc8] sm:$0xff] %vm1784_vm0, %v5637_v48  ;;  %v5603_v29 = vadd.f32 %v5571_v59, %v5521_v10 }
 0x58f   : > { %5668 = vst.msk [vmem:[%s13424_s14 + $0xc0] sm:$0xff] %vm1784_vm0, %v5636_v40  ;;  %v6005_v56 = vpop.f32.mrb[30].mxu0  ;;  %v5602_v20 = vadd.f32 %v5570_v6, %v5516_v26  ;;  %v5952_v28 = vpop.f32.mrb[28].mxu1 }
 0x590   : > { %v5535_v27 = vpop.f32.mrb[31].mxu0  ;;  %v5639_v22 = vadd.f32 %v14755_v5, %v5603_v29  ;;  %v5531_v3 = vadd.f32 %v6002_v34, %v5952_v28  ;;  %v5202_v32 = vpop.f32.mrb[29].mxu1 }
 0x591   : > { %v5638_v18 = vadd.f32 %v14755_v5, %v5602_v20  ;;  %v5526_v33 = vadd.f32 %v5525_v15, %v5202_v32 }
 0x592   : > { %5671 = vst.msk [vmem:[%s13424_s14 + $0xd8] sm:$0xff] %vm1784_vm0, %v5639_v22  ;;  %v5605_v58 = vadd.f32 %v5573_v51, %v5531_v3 }
 0x593   : > { %5670 = vst.msk [vmem:[%s13424_s14 + $0xd0] sm:$0xff] %vm1784_vm0, %v5638_v18  ;;  %v5604_v31 = vadd.f32 %v5572_v19, %v5526_v33  ;;  %v5955_v41 = vpop.f32.mrb[30].mxu1 }
 0x594   : > { %v5641_v44 = vadd.f32 %v14755_v5, %v5605_v58  ;;  %v5541_v11 = vadd.f32 %v6005_v56, %v5955_v41  ;;  %v5212_v36 = vpop.f32.mrb[31].mxu1 }
 0x595   : > { %v5640_v49 = vadd.f32 %v14755_v5, %v5604_v31  ;;  %v5536_v12 = vadd.f32 %v5535_v27, %v5212_v36 }
 0x596   : > { %5673 = vst.msk [vmem:[%s13424_s14 + $0xe8] sm:$0xff] %vm1784_vm0, %v5641_v44  ;;  %v5607_v47 = vadd.f32 %v5575_v60, %v5541_v11 }
 0x597   : > { %5672 = vst.msk [vmem:[%s13424_s14 + $0xe0] sm:$0xff] %vm1784_vm0, %v5640_v49  ;;  %v5606_v23 = vadd.f32 %v5574_v21, %v5536_v12 }
 0x598   : > { %v5643_v4 = vadd.f32 %v14755_v5, %v5607_v47 }
 0x599   : > { %v5642_v37 = vadd.f32 %v14755_v5, %v5606_v23 }
 0x59a   : > { %5675 = vst.msk [vmem:[%s13424_s14 + $0xf8] sm:$0xff] %vm1784_vm0, %v5643_v4 }
 0x59b   : > { %5674 = vst.msk [vmem:[%s13424_s14 + $0xf0] sm:$0xff] %vm1784_vm0, %v5642_v37 }
 0x59c PF: > { %s15_s18 = sadd.s32 1, %s6459_s18  }
 0x59d   : > { %p12_p4 = scmp.ge.s32.totalorder %s15_s18, 4  }
 0x59f   :  { %14 = sbr.rel (!%p12_p4) target bundleno = 1 (0x1), region = 76 }

</bundles_post_ra>
